<compile_context>
chip_gen: v6e
topology: v6e:2x2x1
jax: 0.10.0
libtpu: 0.0.40
codegen_flags: <defaults>
</compile_context>

<pallas_src>
import numpy as np
import jax
import jax.numpy as jnp
from jax.experimental import pallas as pl
from jax.experimental.pallas import tpu as pltpu

# ---- static configuration (stand-in for parameters_spinchain) --------------
NSITE = 3                  # spin chain sites
DIM = 2 ** NSITE           # Hilbert-space dimension = 8
N_PAR = 2                  # batch of trajectories
N_STEPS = 4                # parameters_spinchain.max_episode_steps
N_SUBSTEPS = 2             # parameters_spinchain.n_substeps
DT = 0.05                  # parameters_spinchain.dt
GAMMA = 0.95               # parameters_spinchain.gamma
FORCE_MAG = 2.0            # parameters_spinchain.force_mag
J_COUPLING = 1.0           # parameters_spinchain.J

LS, LA, LC = 256, 64, 256
C1, C2, C3 = 0.00011, 4.1e-06, 3.6e-07

DIM2 = 2 * DIM             # 16: lane-stacked state width [x | y]
NCH = 14                   # 7 Hamiltonian generators applied to x and to y
CHW = NCH * DIM            # 112 lanes of per-chunk products
OUTW = DIM2 + 8            # 24-lane packed output rows
F32_HI = jax.lax.Precision.HIGHEST

# const-pack row offsets (all starts are multiples of 8)
_R_BIGH = 0                       # rows [  0, 16)  : BigH (DIM2, CHW)
_R_S2 = _R_BIGH + DIM2            # rows [ 16,128)  : S2   (CHW, DIM2)
_R_E = _R_S2 + CHW                # rows [128,135)  : E    (7, CHW)
_R_T = _R_E + 8                   # rows [136,152)  : T    (DIM2, 2)
_R_TOT = _R_T + DIM2              # 152


# ---- Hamiltonian construction (plain numpy glue, same math as the module) --
def _list_kron(ops):
    out = ops[0]
    for op in ops[1:]:
        out = np.kron(out, op)
    return out


def hamiltonian(nsite, J):
    si = np.eye(2, dtype=np.float32)
    sx = np.array([[0, 1], [1, 0]], dtype=np.float32)
    sz = np.array([[1, 0], [0, -1]], dtype=np.float32)
    sy = np.array([[0, -1], [1, 0]], dtype=np.float32)   # real "-i*sigma_y" as in ref
    sz_list, sx_list, sy_list = [], [], []
    for n in range(nsite):
        ops = [si] * nsite
        ops[n] = sz
        sz_list.append(_list_kron(ops))
        ops[n] = sx
        sx_list.append(_list_kron(ops))
        ops[n] = sy
        sy_list.append(_list_kron(ops))
    Hzz = np.zeros((2 ** nsite, 2 ** nsite), dtype=np.float32)
    for n in range(nsite - 1):
        Hzz += J * (sz_list[n] @ sz_list[n + 1])
    return Hzz, np.stack(sx_list), np.stack(sy_list)


# ---- the Pallas kernel ------------------------------------------------------
def pred_corr_kernel(xy_ref, c_ref, w1_ref, w2s_ref, w2a_ref, w1c_ref,
                     w2c_ref, b_ref, out_ref):
    relu = lambda t: jnp.maximum(t, 0.0)

    def mlp_dot(a, w):
        # bf16 x bf16 MXU matmul with f32 accumulation (VPU math stays f32).
        return jnp.dot(a.astype(jnp.bfloat16), w,
                       preferred_element_type=jnp.float32)

    def f32_dot(a, b):
        # physics-path matmul: explicit full-f32 MXU precision.
        return jnp.dot(a, b, precision=F32_HI,
                       preferred_element_type=jnp.float32)

    def apply_H(u, coeff):
        # u: (N_PAR, DIM2) = [x | y].  One matmul produces all 14 generator
        # applications as DIM-wide lane chunks; the per-trajectory coeff
        # (built once per step) weights them, and the constant chunk-sum /
        # routing matrix S2 reduces them back to [f_x | f_y] in one more
        # MXU push.  No lane/sublane shuffles anywhere on the Heun path.
        m = f32_dot(u, c_ref[_R_BIGH:_R_BIGH + DIM2, :])              # (N_PAR, CHW)
        return f32_dot(coeff * m, c_ref[_R_S2:_R_S2 + CHW, 0:DIM2])   # (N_PAR, DIM2)

    v = xy_ref[...]                                    # (N_PAR, DIM2) f32
    alpha = jnp.zeros((N_PAR, 2 * NSITE), jnp.float32)
    loss = jnp.zeros((N_PAR, 1), jnp.float32)
    fid = jnp.zeros((N_PAR, 1), jnp.float32)
    ones_col = jnp.ones((N_PAR, 1), jnp.float32)
    step_rows = []

    # N_STEPS is tiny -> fully unrolled episode loop inside one invocation.
    for j in range(N_STEPS):
        # ---- fused net_state/net_action layer 1 (block-diag weight; the
        #      1/force_mag input scale is folded into the action block).
        feat = jnp.concatenate([v, alpha], axis=1)                 # (N_PAR, 22)
        h = relu(mlp_dot(feat, w1_ref[...]) + b_ref[0:1, :])       # (N_PAR, LS+LA)
        # ---- separate layer-2 heads (each has its own ReLU in the reference)
        dalpha1 = relu(mlp_dot(h[:, :LS], w2s_ref[...]) + b_ref[1:2, 0:LC])
        dalpha2 = relu(mlp_dot(h[:, LS:], w2a_ref[...]) + b_ref[2:3, 0:LC])
        # ---- net_combine : Linear -> ReLU -> Linear
        h_c = relu(mlp_dot(dalpha1 + dalpha2, w1c_ref[...]) + b_ref[3:4, 0:LC])
        dalpha = mlp_dot(h_c, w2c_ref[...]) + b_ref[4:5, 0:2 * NSITE]

        # force_mag * softsign(dalpha); the reference's extra clamp is a
        # mathematical no-op (softsign already bounds |alpha| < force_mag).
        alpha = FORCE_MAG * dalpha / (1.0 + jnp.abs(dalpha))       # (N_PAR, 6)

        # Per-trajectory chunk coefficients (signs & f_x/f_y routing are baked
        # into the constant E / S2 matrices).  Built ONCE per step, reused by
        # all 4 apply_H calls below (alpha is constant across substeps).
        coeff = f32_dot(jnp.concatenate([ones_col, alpha], axis=1),
                        c_ref[_R_E:_R_E + 1 + 2 * NSITE, :])       # (N_PAR, CHW)

        # Heun predictor-corrector, full DT per substep (as in the reference).
        for _ in range(N_SUBSTEPS):
            f = apply_H(v, coeff)
            g = apply_H(v + f, coeff)
            v = v + 0.5 * (g + f)

        # fidelity (the reference uses the real target for both terms)
        tt = f32_dot(v, c_ref[_R_T:_R_T + DIM2, 0:2])              # (N_PAR, 2)
        fid = jnp.sum(tt * tt, axis=1, keepdims=True)

        abs_alpha = jnp.mean(alpha * alpha, axis=1, keepdims=True)
        loss = loss + (C1 * (GAMMA ** j)) * (1.0 - fid) + C2 * abs_alpha

        # accumulate per-step row [fid | alpha | pad]; stored once at the end
        step_rows.append(jnp.concatenate(
            [fid, alpha,
             jnp.zeros((N_PAR, OUTW - 1 - 2 * NSITE), jnp.float32)], axis=1))

    loss = loss + C3 * (1.0 - fid)                     # terminal bonus
    final_row = jnp.concatenate(
        [v, loss, jnp.zeros((N_PAR, OUTW - DIM2 - 1), jnp.float32)], axis=1)
    # one lane-padded store for the whole episode
    out_ref[...] = jnp.concatenate(step_rows + [final_row], axis=0)


# ---- wrapper ----------------------------------------------------------------
@jax.jit
def pred_corr_forward(psi_x, psi_y, params):
    consts, w1_blk, w2s, w2a, w1c, w2c, biases = params
    xy0 = jnp.concatenate([psi_x, psi_y], axis=1)                  # (N_PAR, 16)

    inputs = (xy0, consts, w1_blk, w2s, w2a, w1c, w2c, biases)
    vmem = pl.BlockSpec(memory_space=pltpu.MemorySpace.VMEM)

    packed = pl.pallas_call(
        pred_corr_kernel,
        out_shape=jax.ShapeDtypeStruct(((N_STEPS + 1) * N_PAR, OUTW),
                                       jnp.float32),
        in_specs=[vmem] * len(inputs),
        out_specs=vmem,
    )(*inputs)

    packed = packed.reshape(N_STEPS + 1, N_PAR, OUTW)
    fidelity_store = packed[:N_STEPS, :, 0]                        # (n_steps, n_par)
    alphax = packed[:N_STEPS, :, 1:1 + NSITE]
    alphay = packed[:N_STEPS, :, 1 + NSITE:1 + 2 * NSITE]
    last_action_store = jnp.stack([alphax, alphay], axis=0)        # (2, n_steps, n_par, nsite)
    v_fin = packed[N_STEPS]                                        # (n_par, OUTW)
    psi_x_out = v_fin[:, :DIM]
    psi_y_out = v_fin[:, DIM:DIM2]
    loss = jnp.mean(v_fin[:, DIM2])                                # mean over n_par
    return psi_x_out, psi_y_out, loss, fidelity_store, last_action_store


# ---- deterministic parameter construction -----------------------------------
def make_params():
    Hzz, Hx, Hy = hamiltonian(NSITE, J_COUPLING)
    gens = np.concatenate([(Hzz * DT)[None], Hx * DT, Hy * DT], axis=0)  # (7, DIM, DIM)

    # BigH: chunks 0..6 = x @ G_c^T, chunks 7..13 = y @ G_c^T (block diagonal).
    big_h = np.zeros((DIM2, CHW), np.float32)
    for c in range(7):
        big_h[0:DIM, c * DIM:(c + 1) * DIM] = gens[c].T
        big_h[DIM:DIM2, (7 + c) * DIM:(8 + c) * DIM] = gens[c].T

    # S2: routes each chunk's DIM lanes to f_x (lanes 0:8) or f_y (lanes 8:16).
    #   f_x =  H_Im x + H_Re y  <- chunks 4..6 (x,H2) and 7..10 (y,H0/H1)
    #   f_y = -H_Re x + H_Im y  <- chunks 0..3 (x,H0/H1) and 11..13 (y,H2)
    fx_chunks = {4, 5, 6, 7, 8, 9, 10}
    s2 = np.zeros((CHW, DIM2), np.float32)
    for c in range(NCH):
        off = 0 if c in fx_chunks else DIM
        for d in range(DIM):
            s2[c * DIM + d, off + d] = 1.0

    # E: expands avec = [1, ax0..2, ay0..2] into per-chunk coefficients w/ signs.
    e = np.zeros((1 + 2 * NSITE, CHW), np.float32)

    def put(k, c, val):
        e[k, c * DIM:(c + 1) * DIM] = val

    put(0, 0, -1.0); put(0, 7, 1.0)                        # H0 : -(on x), +(on y)
    for i in range(NSITE):
        put(1 + i, 1 + i, -1.0); put(1 + i, 8 + i, 1.0)    # alphax_i (H1_i)
        put(4 + i, 4 + i, 1.0);  put(4 + i, 11 + i, 1.0)   # alphay_i (H2_i)

    # GHZ target (|0..0> + |1..1>)/sqrt(2); forward only uses the real part.
    tgt = np.zeros(DIM, np.float32)
    tgt[0] = tgt[-1] = 1.0 / np.sqrt(2.0)
    t_mat = np.zeros((DIM2, 2), np.float32)
    t_mat[0:DIM, 0] = tgt
    t_mat[DIM:DIM2, 1] = tgt

    consts = np.zeros((_R_TOT, CHW), np.float32)
    consts[_R_BIGH:_R_BIGH + DIM2, :] = big_h
    consts[_R_S2:_R_S2 + CHW, 0:DIM2] = s2
    consts[_R_E:_R_E + 1 + 2 * NSITE, :] = e
    consts[_R_T:_R_T + DIM2, 0:2] = t_mat
    consts = jnp.asarray(consts)

    # ---- MLP parameters (nn.Linear-style init, deterministic) --------------
    def linear(key, fan_in, fan_out):
        kw, kb = jax.random.split(key)
        bound = 1.0 / np.sqrt(fan_in)
        w = jax.random.uniform(kw, (fan_in, fan_out), jnp.float32, -bound, bound)
        b = jax.random.uniform(kb, (fan_out,), jnp.float32, -bound, bound)
        return w, b

    keys = jax.random.split(jax.random.PRNGKey(0), 6)
    w1s, b1s = linear(keys[0], 2 * DIM, LS)
    w2s, b2s = linear(keys[1], LS, LC)
    w1a, b1a = linear(keys[2], 2 * NSITE, LA)
    w2a, b2a = linear(keys[3], LA, LC)
    w1c, b1c = linear(keys[4], LC, LC)
    w2c, b2c = linear(keys[5], LC, 2 * NSITE)

    # fused block-diagonal layer-1 weight; 1/force_mag folded into action block
    w1_blk = jnp.zeros((2 * DIM + 2 * NSITE, LS + LA), jnp.float32)
    w1_blk = w1_blk.at[:2 * DIM, :LS].set(w1s)
    w1_blk = w1_blk.at[2 * DIM:, LS:].set(w1a * (1.0 / FORCE_MAG))

    # all six biases packed into one (5, LS+LA) f32 array (one DMA descriptor)
    biases = jnp.zeros((5, LS + LA), jnp.float32)
    biases = biases.at[0, :LS].set(b1s).at[0, LS:].set(b1a)
    biases = biases.at[1, :LC].set(b2s)
    biases = biases.at[2, :LC].set(b2a)
    biases = biases.at[3, :LC].set(b1c)
    biases = biases.at[4, :2 * NSITE].set(b2c)

    bf16 = lambda w: w.astype(jnp.bfloat16)
    return (consts, bf16(w1_blk), bf16(w2s), bf16(w2a), bf16(w1c), bf16(w2c),
            biases)


if __name__ == "__main__":
    params = make_params()
    kx, ky = jax.random.split(jax.random.PRNGKey(0))
    psi_x = jax.random.normal(kx, (N_PAR, DIM), jnp.float32)
    psi_y = jax.random.normal(ky, (N_PAR, DIM), jnp.float32)
    norm = jnp.sqrt(jnp.sum(psi_x ** 2 + psi_y ** 2, axis=1, keepdims=True))
    psi_x = psi_x / norm
    psi_y = psi_y / norm

    out = pred_corr_forward(psi_x, psi_y, params)
    jax.block_until_ready(out)
    psi_x_out, psi_y_out, loss, fidelity_store, last_action_store = out
    assert psi_x_out.shape == (N_PAR, DIM)
    assert psi_y_out.shape == (N_PAR, DIM)
    assert fidelity_store.shape == (N_STEPS, N_PAR)
    assert last_action_store.shape == (2, N_STEPS, N_PAR, NSITE)
    assert bool(jnp.isfinite(loss))
    print("KERNEL_OK")
</pallas_src>

<mosaic_0001>
module attributes {stable_mosaic.version = 11 : i64} {
  func.func @pred_corr_kernel(%arg0: memref<2x16xf32, #tpu.memory_space<vmem>>, %arg1: memref<152x112xf32, #tpu.memory_space<vmem>>, %arg2: memref<22x320xbf16, #tpu.memory_space<vmem>>, %arg3: memref<256x256xbf16, #tpu.memory_space<vmem>>, %arg4: memref<64x256xbf16, #tpu.memory_space<vmem>>, %arg5: memref<256x256xbf16, #tpu.memory_space<vmem>>, %arg6: memref<256x6xbf16, #tpu.memory_space<vmem>>, %arg7: memref<5x320xf32, #tpu.memory_space<vmem>>, %arg8: memref<10x24xf32, #tpu.memory_space<vmem>>) attributes {dimension_semantics = [], scalar_prefetch = 0 : i64, scratch_operands = 0 : i64, tpu.core_type = #tpu.core_type<tc>} {
    %c0 = arith.constant 0 : index
    %c0_0 = arith.constant 0 : index
    %0 = vector.load %arg0[%c0, %c0_0] : memref<2x16xf32, #tpu.memory_space<vmem>>, vector<2x16xf32>
    %cst = arith.constant 0.000000e+00 : f32
    %1 = vector.broadcast %cst : f32 to vector<2x6xf32>
    %cst_1 = arith.constant 0.000000e+00 : f32
    %2 = vector.broadcast %cst_1 : f32 to vector<2x1xf32>
    %cst_2 = arith.constant 1.000000e+00 : f32
    %3 = vector.broadcast %cst_2 : f32 to vector<2x1xf32>
    %4 = tpu.concatenate %0, %1 in 1 : vector<2x16xf32>, vector<2x6xf32> -> vector<2x22xf32>
    %c0_3 = arith.constant 0 : index
    %c0_4 = arith.constant 0 : index
    %5 = vector.load %arg2[%c0_3, %c0_4] : memref<22x320xbf16, #tpu.memory_space<vmem>>, vector<22x320xbf16>
    %6 = arith.truncf %4 : vector<2x22xf32> to vector<2x22xbf16>
    %cst_5 = arith.constant dense<0.000000e+00> : vector<2x320xf32>
    %7 = tpu.matmul %6, %5, %cst_5 {dimension_numbers = #tpu.dot_dimension_numbers<[1], [0], [0], [1], [0, 0, 1, 1], [], []>} : vector<2x22xbf16>, vector<22x320xbf16>, vector<2x320xf32> -> vector<2x320xf32>
    %c0_6 = arith.constant 0 : index
    %c0_7 = arith.constant 0 : index
    %8 = vector.load %arg7[%c0_6, %c0_7] : memref<5x320xf32, #tpu.memory_space<vmem>>, vector<1x320xf32>
    %9 = vector.broadcast %8 : vector<1x320xf32> to vector<2x320xf32>
    %10 = arith.addf %7, %9 : vector<2x320xf32>
    %cst_8 = arith.constant 0.000000e+00 : f32
    %11 = vector.broadcast %cst_8 : f32 to vector<2x320xf32>
    %12 = arith.maximumf %10, %11 : vector<2x320xf32>
    %13 = vector.extract_strided_slice %12 {offsets = [0, 0], sizes = [2, 256], strides = [1, 1]} : vector<2x320xf32> to vector<2x256xf32>
    %c0_9 = arith.constant 0 : index
    %c0_10 = arith.constant 0 : index
    %14 = vector.load %arg3[%c0_9, %c0_10] : memref<256x256xbf16, #tpu.memory_space<vmem>>, vector<256x256xbf16>
    %15 = arith.truncf %13 : vector<2x256xf32> to vector<2x256xbf16>
    %cst_11 = arith.constant dense<0.000000e+00> : vector<2x256xf32>
    %16 = tpu.matmul %15, %14, %cst_11 {dimension_numbers = #tpu.dot_dimension_numbers<[1], [0], [0], [1], [0, 0, 1, 1], [], []>} : vector<2x256xbf16>, vector<256x256xbf16>, vector<2x256xf32> -> vector<2x256xf32>
    %c1 = arith.constant 1 : index
    %c0_12 = arith.constant 0 : index
    %17 = vector.load %arg7[%c1, %c0_12] : memref<5x320xf32, #tpu.memory_space<vmem>>, vector<1x256xf32>
    %18 = vector.broadcast %17 : vector<1x256xf32> to vector<2x256xf32>
    %19 = arith.addf %16, %18 : vector<2x256xf32>
    %cst_13 = arith.constant 0.000000e+00 : f32
    %20 = vector.broadcast %cst_13 : f32 to vector<2x256xf32>
    %21 = arith.maximumf %19, %20 : vector<2x256xf32>
    %22 = vector.extract_strided_slice %12 {offsets = [0, 256], sizes = [2, 64], strides = [1, 1]} : vector<2x320xf32> to vector<2x64xf32>
    %c0_14 = arith.constant 0 : index
    %c0_15 = arith.constant 0 : index
    %23 = vector.load %arg4[%c0_14, %c0_15] : memref<64x256xbf16, #tpu.memory_space<vmem>>, vector<64x256xbf16>
    %24 = arith.truncf %22 : vector<2x64xf32> to vector<2x64xbf16>
    %cst_16 = arith.constant dense<0.000000e+00> : vector<2x256xf32>
    %25 = tpu.matmul %24, %23, %cst_16 {dimension_numbers = #tpu.dot_dimension_numbers<[1], [0], [0], [1], [0, 0, 1, 1], [], []>} : vector<2x64xbf16>, vector<64x256xbf16>, vector<2x256xf32> -> vector<2x256xf32>
    %c2 = arith.constant 2 : index
    %c0_17 = arith.constant 0 : index
    %26 = vector.load %arg7[%c2, %c0_17] : memref<5x320xf32, #tpu.memory_space<vmem>>, vector<1x256xf32>
    %27 = vector.broadcast %26 : vector<1x256xf32> to vector<2x256xf32>
    %28 = arith.addf %25, %27 : vector<2x256xf32>
    %cst_18 = arith.constant 0.000000e+00 : f32
    %29 = vector.broadcast %cst_18 : f32 to vector<2x256xf32>
    %30 = arith.maximumf %28, %29 : vector<2x256xf32>
    %31 = arith.addf %21, %30 : vector<2x256xf32>
    %c0_19 = arith.constant 0 : index
    %c0_20 = arith.constant 0 : index
    %32 = vector.load %arg5[%c0_19, %c0_20] : memref<256x256xbf16, #tpu.memory_space<vmem>>, vector<256x256xbf16>
    %33 = arith.truncf %31 : vector<2x256xf32> to vector<2x256xbf16>
    %cst_21 = arith.constant dense<0.000000e+00> : vector<2x256xf32>
    %34 = tpu.matmul %33, %32, %cst_21 {dimension_numbers = #tpu.dot_dimension_numbers<[1], [0], [0], [1], [0, 0, 1, 1], [], []>} : vector<2x256xbf16>, vector<256x256xbf16>, vector<2x256xf32> -> vector<2x256xf32>
    %c3 = arith.constant 3 : index
    %c0_22 = arith.constant 0 : index
    %35 = vector.load %arg7[%c3, %c0_22] : memref<5x320xf32, #tpu.memory_space<vmem>>, vector<1x256xf32>
    %36 = vector.broadcast %35 : vector<1x256xf32> to vector<2x256xf32>
    %37 = arith.addf %34, %36 : vector<2x256xf32>
    %cst_23 = arith.constant 0.000000e+00 : f32
    %38 = vector.broadcast %cst_23 : f32 to vector<2x256xf32>
    %39 = arith.maximumf %37, %38 : vector<2x256xf32>
    %c0_24 = arith.constant 0 : index
    %c0_25 = arith.constant 0 : index
    %40 = vector.load %arg6[%c0_24, %c0_25] : memref<256x6xbf16, #tpu.memory_space<vmem>>, vector<256x6xbf16>
    %41 = arith.truncf %39 : vector<2x256xf32> to vector<2x256xbf16>
    %cst_26 = arith.constant dense<0.000000e+00> : vector<2x6xf32>
    %42 = tpu.matmul %41, %40, %cst_26 {dimension_numbers = #tpu.dot_dimension_numbers<[1], [0], [0], [1], [0, 0, 1, 1], [], []>} : vector<2x256xbf16>, vector<256x6xbf16>, vector<2x6xf32> -> vector<2x6xf32>
    %c4 = arith.constant 4 : index
    %c0_27 = arith.constant 0 : index
    %43 = vector.load %arg7[%c4, %c0_27] : memref<5x320xf32, #tpu.memory_space<vmem>>, vector<1x6xf32>
    %44 = vector.broadcast %43 : vector<1x6xf32> to vector<2x6xf32>
    %45 = arith.addf %42, %44 : vector<2x6xf32>
    %cst_28 = arith.constant 2.000000e+00 : f32
    %46 = vector.broadcast %cst_28 : f32 to vector<2x6xf32>
    %47 = arith.mulf %46, %45 : vector<2x6xf32>
    %48 = math.absf %45 : vector<2x6xf32>
    %cst_29 = arith.constant 1.000000e+00 : f32
    %49 = vector.broadcast %cst_29 : f32 to vector<2x6xf32>
    %50 = arith.addf %49, %48 : vector<2x6xf32>
    %51 = arith.divf %47, %50 : vector<2x6xf32>
    %52 = tpu.concatenate %3, %51 in 1 : vector<2x1xf32>, vector<2x6xf32> -> vector<2x7xf32>
    %c128 = arith.constant 128 : index
    %c0_30 = arith.constant 0 : index
    %53 = vector.load %arg1[%c128, %c0_30] : memref<152x112xf32, #tpu.memory_space<vmem>>, vector<7x112xf32>
    %cst_31 = arith.constant dense<0.000000e+00> : vector<2x112xf32>
    %54 = tpu.matmul %52, %53, %cst_31 {dimension_numbers = #tpu.dot_dimension_numbers<[1], [0], [0], [1], [0, 0, 1, 1], [], []>, precision = #tpu.contract_precision<fp32>} : vector<2x7xf32>, vector<7x112xf32>, vector<2x112xf32> -> vector<2x112xf32>
    %c0_32 = arith.constant 0 : index
    %c0_33 = arith.constant 0 : index
    %55 = vector.load %arg1[%c0_32, %c0_33] : memref<152x112xf32, #tpu.memory_space<vmem>>, vector<16x112xf32>
    %cst_34 = arith.constant dense<0.000000e+00> : vector<2x112xf32>
    %56 = tpu.matmul %0, %55, %cst_34 {dimension_numbers = #tpu.dot_dimension_numbers<[1], [0], [0], [1], [0, 0, 1, 1], [], []>, precision = #tpu.contract_precision<fp32>} : vector<2x16xf32>, vector<16x112xf32>, vector<2x112xf32> -> vector<2x112xf32>
    %57 = arith.mulf %54, %56 : vector<2x112xf32>
    %c16 = arith.constant 16 : index
    %c0_35 = arith.constant 0 : index
    %58 = vector.load %arg1[%c16, %c0_35] : memref<152x112xf32, #tpu.memory_space<vmem>>, vector<112x16xf32>
    %cst_36 = arith.constant dense<0.000000e+00> : vector<2x16xf32>
    %59 = tpu.matmul %57, %58, %cst_36 {dimension_numbers = #tpu.dot_dimension_numbers<[1], [0], [0], [1], [0, 0, 1, 1], [], []>, precision = #tpu.contract_precision<fp32>} : vector<2x112xf32>, vector<112x16xf32>, vector<2x16xf32> -> vector<2x16xf32>
    %60 = arith.addf %0, %59 : vector<2x16xf32>
    %c0_37 = arith.constant 0 : index
    %c0_38 = arith.constant 0 : index
    %61 = vector.load %arg1[%c0_37, %c0_38] : memref<152x112xf32, #tpu.memory_space<vmem>>, vector<16x112xf32>
    %cst_39 = arith.constant dense<0.000000e+00> : vector<2x112xf32>
    %62 = tpu.matmul %60, %61, %cst_39 {dimension_numbers = #tpu.dot_dimension_numbers<[1], [0], [0], [1], [0, 0, 1, 1], [], []>, precision = #tpu.contract_precision<fp32>} : vector<2x16xf32>, vector<16x112xf32>, vector<2x112xf32> -> vector<2x112xf32>
    %63 = arith.mulf %54, %62 : vector<2x112xf32>
    %c16_40 = arith.constant 16 : index
    %c0_41 = arith.constant 0 : index
    %64 = vector.load %arg1[%c16_40, %c0_41] : memref<152x112xf32, #tpu.memory_space<vmem>>, vector<112x16xf32>
    %cst_42 = arith.constant dense<0.000000e+00> : vector<2x16xf32>
    %65 = tpu.matmul %63, %64, %cst_42 {dimension_numbers = #tpu.dot_dimension_numbers<[1], [0], [0], [1], [0, 0, 1, 1], [], []>, precision = #tpu.contract_precision<fp32>} : vector<2x112xf32>, vector<112x16xf32>, vector<2x16xf32> -> vector<2x16xf32>
    %66 = arith.addf %65, %59 : vector<2x16xf32>
    %cst_43 = arith.constant 5.000000e-01 : f32
    %67 = vector.broadcast %cst_43 : f32 to vector<2x16xf32>
    %68 = arith.mulf %67, %66 : vector<2x16xf32>
    %69 = arith.addf %0, %68 : vector<2x16xf32>
    %c0_44 = arith.constant 0 : index
    %c0_45 = arith.constant 0 : index
    %70 = vector.load %arg1[%c0_44, %c0_45] : memref<152x112xf32, #tpu.memory_space<vmem>>, vector<16x112xf32>
    %cst_46 = arith.constant dense<0.000000e+00> : vector<2x112xf32>
    %71 = tpu.matmul %69, %70, %cst_46 {dimension_numbers = #tpu.dot_dimension_numbers<[1], [0], [0], [1], [0, 0, 1, 1], [], []>, precision = #tpu.contract_precision<fp32>} : vector<2x16xf32>, vector<16x112xf32>, vector<2x112xf32> -> vector<2x112xf32>
    %72 = arith.mulf %54, %71 : vector<2x112xf32>
    %c16_47 = arith.constant 16 : index
    %c0_48 = arith.constant 0 : index
    %73 = vector.load %arg1[%c16_47, %c0_48] : memref<152x112xf32, #tpu.memory_space<vmem>>, vector<112x16xf32>
    %cst_49 = arith.constant dense<0.000000e+00> : vector<2x16xf32>
    %74 = tpu.matmul %72, %73, %cst_49 {dimension_numbers = #tpu.dot_dimension_numbers<[1], [0], [0], [1], [0, 0, 1, 1], [], []>, precision = #tpu.contract_precision<fp32>} : vector<2x112xf32>, vector<112x16xf32>, vector<2x16xf32> -> vector<2x16xf32>
    %75 = arith.addf %69, %74 : vector<2x16xf32>
    %c0_50 = arith.constant 0 : index
    %c0_51 = arith.constant 0 : index
    %76 = vector.load %arg1[%c0_50, %c0_51] : memref<152x112xf32, #tpu.memory_space<vmem>>, vector<16x112xf32>
    %cst_52 = arith.constant dense<0.000000e+00> : vector<2x112xf32>
    %77 = tpu.matmul %75, %76, %cst_52 {dimension_numbers = #tpu.dot_dimension_numbers<[1], [0], [0], [1], [0, 0, 1, 1], [], []>, precision = #tpu.contract_precision<fp32>} : vector<2x16xf32>, vector<16x112xf32>, vector<2x112xf32> -> vector<2x112xf32>
    %78 = arith.mulf %54, %77 : vector<2x112xf32>
    %c16_53 = arith.constant 16 : index
    %c0_54 = arith.constant 0 : index
    %79 = vector.load %arg1[%c16_53, %c0_54] : memref<152x112xf32, #tpu.memory_space<vmem>>, vector<112x16xf32>
    %cst_55 = arith.constant dense<0.000000e+00> : vector<2x16xf32>
    %80 = tpu.matmul %78, %79, %cst_55 {dimension_numbers = #tpu.dot_dimension_numbers<[1], [0], [0], [1], [0, 0, 1, 1], [], []>, precision = #tpu.contract_precision<fp32>} : vector<2x112xf32>, vector<112x16xf32>, vector<2x16xf32> -> vector<2x16xf32>
    %81 = arith.addf %80, %74 : vector<2x16xf32>
    %cst_56 = arith.constant 5.000000e-01 : f32
    %82 = vector.broadcast %cst_56 : f32 to vector<2x16xf32>
    %83 = arith.mulf %82, %81 : vector<2x16xf32>
    %84 = arith.addf %69, %83 : vector<2x16xf32>
    %c136 = arith.constant 136 : index
    %c0_57 = arith.constant 0 : index
    %85 = vector.load %arg1[%c136, %c0_57] : memref<152x112xf32, #tpu.memory_space<vmem>>, vector<16x2xf32>
    %cst_58 = arith.constant dense<0.000000e+00> : vector<2x2xf32>
    %86 = tpu.matmul %84, %85, %cst_58 {dimension_numbers = #tpu.dot_dimension_numbers<[1], [0], [0], [1], [0, 0, 1, 1], [], []>, precision = #tpu.contract_precision<fp32>} : vector<2x16xf32>, vector<16x2xf32>, vector<2x2xf32> -> vector<2x2xf32>
    %87 = arith.mulf %86, %86 : vector<2x2xf32>
    %cst_59 = arith.constant dense<0.000000e+00> : vector<2xf32>
    %88 = vector.multi_reduction <add>, %87, %cst_59 [1] : vector<2x2xf32> to vector<2xf32>
    %89 = vector.shape_cast %88 : vector<2xf32> to vector<2x1xf32>
    %90 = arith.mulf %51, %51 : vector<2x6xf32>
    %cst_60 = arith.constant dense<0.000000e+00> : vector<2xf32>
    %91 = vector.multi_reduction <add>, %90, %cst_60 [1] : vector<2x6xf32> to vector<2xf32>
    %92 = vector.shape_cast %91 : vector<2xf32> to vector<2x1xf32>
    %cst_61 = arith.constant 6.000000e+00 : f32
    %93 = vector.broadcast %cst_61 : f32 to vector<2x1xf32>
    %94 = arith.divf %92, %93 : vector<2x1xf32>
    %cst_62 = arith.constant 1.000000e+00 : f32
    %95 = vector.broadcast %cst_62 : f32 to vector<2x1xf32>
    %96 = arith.subf %95, %89 : vector<2x1xf32>
    %cst_63 = arith.constant 1.100000e-04 : f32
    %97 = vector.broadcast %cst_63 : f32 to vector<2x1xf32>
    %98 = arith.mulf %97, %96 : vector<2x1xf32>
    %99 = arith.addf %2, %98 : vector<2x1xf32>
    %cst_64 = arith.constant 4.100000e-06 : f32
    %100 = vector.broadcast %cst_64 : f32 to vector<2x1xf32>
    %101 = arith.mulf %100, %94 : vector<2x1xf32>
    %102 = arith.addf %99, %101 : vector<2x1xf32>
    %cst_65 = arith.constant 0.000000e+00 : f32
    %103 = vector.broadcast %cst_65 : f32 to vector<2x17xf32>
    %104 = tpu.concatenate %89, %51, %103 in 1 : vector<2x1xf32>, vector<2x6xf32>, vector<2x17xf32> -> vector<2x24xf32>
    %105 = tpu.concatenate %84, %51 in 1 : vector<2x16xf32>, vector<2x6xf32> -> vector<2x22xf32>
    %c0_66 = arith.constant 0 : index
    %c0_67 = arith.constant 0 : index
    %106 = vector.load %arg2[%c0_66, %c0_67] : memref<22x320xbf16, #tpu.memory_space<vmem>>, vector<22x320xbf16>
    %107 = arith.truncf %105 : vector<2x22xf32> to vector<2x22xbf16>
    %cst_68 = arith.constant dense<0.000000e+00> : vector<2x320xf32>
    %108 = tpu.matmul %107, %106, %cst_68 {dimension_numbers = #tpu.dot_dimension_numbers<[1], [0], [0], [1], [0, 0, 1, 1], [], []>} : vector<2x22xbf16>, vector<22x320xbf16>, vector<2x320xf32> -> vector<2x320xf32>
    %c0_69 = arith.constant 0 : index
    %c0_70 = arith.constant 0 : index
    %109 = vector.load %arg7[%c0_69, %c0_70] : memref<5x320xf32, #tpu.memory_space<vmem>>, vector<1x320xf32>
    %110 = vector.broadcast %109 : vector<1x320xf32> to vector<2x320xf32>
    %111 = arith.addf %108, %110 : vector<2x320xf32>
    %cst_71 = arith.constant 0.000000e+00 : f32
    %112 = vector.broadcast %cst_71 : f32 to vector<2x320xf32>
    %113 = arith.maximumf %111, %112 : vector<2x320xf32>
    %114 = vector.extract_strided_slice %113 {offsets = [0, 0], sizes = [2, 256], strides = [1, 1]} : vector<2x320xf32> to vector<2x256xf32>
    %c0_72 = arith.constant 0 : index
    %c0_73 = arith.constant 0 : index
    %115 = vector.load %arg3[%c0_72, %c0_73] : memref<256x256xbf16, #tpu.memory_space<vmem>>, vector<256x256xbf16>
    %116 = arith.truncf %114 : vector<2x256xf32> to vector<2x256xbf16>
    %cst_74 = arith.constant dense<0.000000e+00> : vector<2x256xf32>
    %117 = tpu.matmul %116, %115, %cst_74 {dimension_numbers = #tpu.dot_dimension_numbers<[1], [0], [0], [1], [0, 0, 1, 1], [], []>} : vector<2x256xbf16>, vector<256x256xbf16>, vector<2x256xf32> -> vector<2x256xf32>
    %c1_75 = arith.constant 1 : index
    %c0_76 = arith.constant 0 : index
    %118 = vector.load %arg7[%c1_75, %c0_76] : memref<5x320xf32, #tpu.memory_space<vmem>>, vector<1x256xf32>
    %119 = vector.broadcast %118 : vector<1x256xf32> to vector<2x256xf32>
    %120 = arith.addf %117, %119 : vector<2x256xf32>
    %cst_77 = arith.constant 0.000000e+00 : f32
    %121 = vector.broadcast %cst_77 : f32 to vector<2x256xf32>
    %122 = arith.maximumf %120, %121 : vector<2x256xf32>
    %123 = vector.extract_strided_slice %113 {offsets = [0, 256], sizes = [2, 64], strides = [1, 1]} : vector<2x320xf32> to vector<2x64xf32>
    %c0_78 = arith.constant 0 : index
    %c0_79 = arith.constant 0 : index
    %124 = vector.load %arg4[%c0_78, %c0_79] : memref<64x256xbf16, #tpu.memory_space<vmem>>, vector<64x256xbf16>
    %125 = arith.truncf %123 : vector<2x64xf32> to vector<2x64xbf16>
    %cst_80 = arith.constant dense<0.000000e+00> : vector<2x256xf32>
    %126 = tpu.matmul %125, %124, %cst_80 {dimension_numbers = #tpu.dot_dimension_numbers<[1], [0], [0], [1], [0, 0, 1, 1], [], []>} : vector<2x64xbf16>, vector<64x256xbf16>, vector<2x256xf32> -> vector<2x256xf32>
    %c2_81 = arith.constant 2 : index
    %c0_82 = arith.constant 0 : index
    %127 = vector.load %arg7[%c2_81, %c0_82] : memref<5x320xf32, #tpu.memory_space<vmem>>, vector<1x256xf32>
    %128 = vector.broadcast %127 : vector<1x256xf32> to vector<2x256xf32>
    %129 = arith.addf %126, %128 : vector<2x256xf32>
    %cst_83 = arith.constant 0.000000e+00 : f32
    %130 = vector.broadcast %cst_83 : f32 to vector<2x256xf32>
    %131 = arith.maximumf %129, %130 : vector<2x256xf32>
    %132 = arith.addf %122, %131 : vector<2x256xf32>
    %c0_84 = arith.constant 0 : index
    %c0_85 = arith.constant 0 : index
    %133 = vector.load %arg5[%c0_84, %c0_85] : memref<256x256xbf16, #tpu.memory_space<vmem>>, vector<256x256xbf16>
    %134 = arith.truncf %132 : vector<2x256xf32> to vector<2x256xbf16>
    %cst_86 = arith.constant dense<0.000000e+00> : vector<2x256xf32>
    %135 = tpu.matmul %134, %133, %cst_86 {dimension_numbers = #tpu.dot_dimension_numbers<[1], [0], [0], [1], [0, 0, 1, 1], [], []>} : vector<2x256xbf16>, vector<256x256xbf16>, vector<2x256xf32> -> vector<2x256xf32>
    %c3_87 = arith.constant 3 : index
    %c0_88 = arith.constant 0 : index
    %136 = vector.load %arg7[%c3_87, %c0_88] : memref<5x320xf32, #tpu.memory_space<vmem>>, vector<1x256xf32>
    %137 = vector.broadcast %136 : vector<1x256xf32> to vector<2x256xf32>
    %138 = arith.addf %135, %137 : vector<2x256xf32>
    %cst_89 = arith.constant 0.000000e+00 : f32
    %139 = vector.broadcast %cst_89 : f32 to vector<2x256xf32>
    %140 = arith.maximumf %138, %139 : vector<2x256xf32>
    %c0_90 = arith.constant 0 : index
    %c0_91 = arith.constant 0 : index
    %141 = vector.load %arg6[%c0_90, %c0_91] : memref<256x6xbf16, #tpu.memory_space<vmem>>, vector<256x6xbf16>
    %142 = arith.truncf %140 : vector<2x256xf32> to vector<2x256xbf16>
    %cst_92 = arith.constant dense<0.000000e+00> : vector<2x6xf32>
    %143 = tpu.matmul %142, %141, %cst_92 {dimension_numbers = #tpu.dot_dimension_numbers<[1], [0], [0], [1], [0, 0, 1, 1], [], []>} : vector<2x256xbf16>, vector<256x6xbf16>, vector<2x6xf32> -> vector<2x6xf32>
    %c4_93 = arith.constant 4 : index
    %c0_94 = arith.constant 0 : index
    %144 = vector.load %arg7[%c4_93, %c0_94] : memref<5x320xf32, #tpu.memory_space<vmem>>, vector<1x6xf32>
    %145 = vector.broadcast %144 : vector<1x6xf32> to vector<2x6xf32>
    %146 = arith.addf %143, %145 : vector<2x6xf32>
    %cst_95 = arith.constant 2.000000e+00 : f32
    %147 = vector.broadcast %cst_95 : f32 to vector<2x6xf32>
    %148 = arith.mulf %147, %146 : vector<2x6xf32>
    %149 = math.absf %146 : vector<2x6xf32>
    %cst_96 = arith.constant 1.000000e+00 : f32
    %150 = vector.broadcast %cst_96 : f32 to vector<2x6xf32>
    %151 = arith.addf %150, %149 : vector<2x6xf32>
    %152 = arith.divf %148, %151 : vector<2x6xf32>
    %153 = tpu.concatenate %3, %152 in 1 : vector<2x1xf32>, vector<2x6xf32> -> vector<2x7xf32>
    %c128_97 = arith.constant 128 : index
    %c0_98 = arith.constant 0 : index
    %154 = vector.load %arg1[%c128_97, %c0_98] : memref<152x112xf32, #tpu.memory_space<vmem>>, vector<7x112xf32>
    %cst_99 = arith.constant dense<0.000000e+00> : vector<2x112xf32>
    %155 = tpu.matmul %153, %154, %cst_99 {dimension_numbers = #tpu.dot_dimension_numbers<[1], [0], [0], [1], [0, 0, 1, 1], [], []>, precision = #tpu.contract_precision<fp32>} : vector<2x7xf32>, vector<7x112xf32>, vector<2x112xf32> -> vector<2x112xf32>
    %c0_100 = arith.constant 0 : index
    %c0_101 = arith.constant 0 : index
    %156 = vector.load %arg1[%c0_100, %c0_101] : memref<152x112xf32, #tpu.memory_space<vmem>>, vector<16x112xf32>
    %cst_102 = arith.constant dense<0.000000e+00> : vector<2x112xf32>
    %157 = tpu.matmul %84, %156, %cst_102 {dimension_numbers = #tpu.dot_dimension_numbers<[1], [0], [0], [1], [0, 0, 1, 1], [], []>, precision = #tpu.contract_precision<fp32>} : vector<2x16xf32>, vector<16x112xf32>, vector<2x112xf32> -> vector<2x112xf32>
    %158 = arith.mulf %155, %157 : vector<2x112xf32>
    %c16_103 = arith.constant 16 : index
    %c0_104 = arith.constant 0 : index
    %159 = vector.load %arg1[%c16_103, %c0_104] : memref<152x112xf32, #tpu.memory_space<vmem>>, vector<112x16xf32>
    %cst_105 = arith.constant dense<0.000000e+00> : vector<2x16xf32>
    %160 = tpu.matmul %158, %159, %cst_105 {dimension_numbers = #tpu.dot_dimension_numbers<[1], [0], [0], [1], [0, 0, 1, 1], [], []>, precision = #tpu.contract_precision<fp32>} : vector<2x112xf32>, vector<112x16xf32>, vector<2x16xf32> -> vector<2x16xf32>
    %161 = arith.addf %84, %160 : vector<2x16xf32>
    %c0_106 = arith.constant 0 : index
    %c0_107 = arith.constant 0 : index
    %162 = vector.load %arg1[%c0_106, %c0_107] : memref<152x112xf32, #tpu.memory_space<vmem>>, vector<16x112xf32>
    %cst_108 = arith.constant dense<0.000000e+00> : vector<2x112xf32>
    %163 = tpu.matmul %161, %162, %cst_108 {dimension_numbers = #tpu.dot_dimension_numbers<[1], [0], [0], [1], [0, 0, 1, 1], [], []>, precision = #tpu.contract_precision<fp32>} : vector<2x16xf32>, vector<16x112xf32>, vector<2x112xf32> -> vector<2x112xf32>
    %164 = arith.mulf %155, %163 : vector<2x112xf32>
    %c16_109 = arith.constant 16 : index
    %c0_110 = arith.constant 0 : index
    %165 = vector.load %arg1[%c16_109, %c0_110] : memref<152x112xf32, #tpu.memory_space<vmem>>, vector<112x16xf32>
    %cst_111 = arith.constant dense<0.000000e+00> : vector<2x16xf32>
    %166 = tpu.matmul %164, %165, %cst_111 {dimension_numbers = #tpu.dot_dimension_numbers<[1], [0], [0], [1], [0, 0, 1, 1], [], []>, precision = #tpu.contract_precision<fp32>} : vector<2x112xf32>, vector<112x16xf32>, vector<2x16xf32> -> vector<2x16xf32>
    %167 = arith.addf %166, %160 : vector<2x16xf32>
    %cst_112 = arith.constant 5.000000e-01 : f32
    %168 = vector.broadcast %cst_112 : f32 to vector<2x16xf32>
    %169 = arith.mulf %168, %167 : vector<2x16xf32>
    %170 = arith.addf %84, %169 : vector<2x16xf32>
    %c0_113 = arith.constant 0 : index
    %c0_114 = arith.constant 0 : index
    %171 = vector.load %arg1[%c0_113, %c0_114] : memref<152x112xf32, #tpu.memory_space<vmem>>, vector<16x112xf32>
    %cst_115 = arith.constant dense<0.000000e+00> : vector<2x112xf32>
    %172 = tpu.matmul %170, %171, %cst_115 {dimension_numbers = #tpu.dot_dimension_numbers<[1], [0], [0], [1], [0, 0, 1, 1], [], []>, precision = #tpu.contract_precision<fp32>} : vector<2x16xf32>, vector<16x112xf32>, vector<2x112xf32> -> vector<2x112xf32>
    %173 = arith.mulf %155, %172 : vector<2x112xf32>
    %c16_116 = arith.constant 16 : index
    %c0_117 = arith.constant 0 : index
    %174 = vector.load %arg1[%c16_116, %c0_117] : memref<152x112xf32, #tpu.memory_space<vmem>>, vector<112x16xf32>
    %cst_118 = arith.constant dense<0.000000e+00> : vector<2x16xf32>
    %175 = tpu.matmul %173, %174, %cst_118 {dimension_numbers = #tpu.dot_dimension_numbers<[1], [0], [0], [1], [0, 0, 1, 1], [], []>, precision = #tpu.contract_precision<fp32>} : vector<2x112xf32>, vector<112x16xf32>, vector<2x16xf32> -> vector<2x16xf32>
    %176 = arith.addf %170, %175 : vector<2x16xf32>
    %c0_119 = arith.constant 0 : index
    %c0_120 = arith.constant 0 : index
    %177 = vector.load %arg1[%c0_119, %c0_120] : memref<152x112xf32, #tpu.memory_space<vmem>>, vector<16x112xf32>
    %cst_121 = arith.constant dense<0.000000e+00> : vector<2x112xf32>
    %178 = tpu.matmul %176, %177, %cst_121 {dimension_numbers = #tpu.dot_dimension_numbers<[1], [0], [0], [1], [0, 0, 1, 1], [], []>, precision = #tpu.contract_precision<fp32>} : vector<2x16xf32>, vector<16x112xf32>, vector<2x112xf32> -> vector<2x112xf32>
    %179 = arith.mulf %155, %178 : vector<2x112xf32>
    %c16_122 = arith.constant 16 : index
    %c0_123 = arith.constant 0 : index
    %180 = vector.load %arg1[%c16_122, %c0_123] : memref<152x112xf32, #tpu.memory_space<vmem>>, vector<112x16xf32>
    %cst_124 = arith.constant dense<0.000000e+00> : vector<2x16xf32>
    %181 = tpu.matmul %179, %180, %cst_124 {dimension_numbers = #tpu.dot_dimension_numbers<[1], [0], [0], [1], [0, 0, 1, 1], [], []>, precision = #tpu.contract_precision<fp32>} : vector<2x112xf32>, vector<112x16xf32>, vector<2x16xf32> -> vector<2x16xf32>
    %182 = arith.addf %181, %175 : vector<2x16xf32>
    %cst_125 = arith.constant 5.000000e-01 : f32
    %183 = vector.broadcast %cst_125 : f32 to vector<2x16xf32>
    %184 = arith.mulf %183, %182 : vector<2x16xf32>
    %185 = arith.addf %170, %184 : vector<2x16xf32>
    %c136_126 = arith.constant 136 : index
    %c0_127 = arith.constant 0 : index
    %186 = vector.load %arg1[%c136_126, %c0_127] : memref<152x112xf32, #tpu.memory_space<vmem>>, vector<16x2xf32>
    %cst_128 = arith.constant dense<0.000000e+00> : vector<2x2xf32>
    %187 = tpu.matmul %185, %186, %cst_128 {dimension_numbers = #tpu.dot_dimension_numbers<[1], [0], [0], [1], [0, 0, 1, 1], [], []>, precision = #tpu.contract_precision<fp32>} : vector<2x16xf32>, vector<16x2xf32>, vector<2x2xf32> -> vector<2x2xf32>
    %188 = arith.mulf %187, %187 : vector<2x2xf32>
    %cst_129 = arith.constant dense<0.000000e+00> : vector<2xf32>
    %189 = vector.multi_reduction <add>, %188, %cst_129 [1] : vector<2x2xf32> to vector<2xf32>
    %190 = vector.shape_cast %189 : vector<2xf32> to vector<2x1xf32>
    %191 = arith.mulf %152, %152 : vector<2x6xf32>
    %cst_130 = arith.constant dense<0.000000e+00> : vector<2xf32>
    %192 = vector.multi_reduction <add>, %191, %cst_130 [1] : vector<2x6xf32> to vector<2xf32>
    %193 = vector.shape_cast %192 : vector<2xf32> to vector<2x1xf32>
    %cst_131 = arith.constant 6.000000e+00 : f32
    %194 = vector.broadcast %cst_131 : f32 to vector<2x1xf32>
    %195 = arith.divf %193, %194 : vector<2x1xf32>
    %cst_132 = arith.constant 1.000000e+00 : f32
    %196 = vector.broadcast %cst_132 : f32 to vector<2x1xf32>
    %197 = arith.subf %196, %190 : vector<2x1xf32>
    %cst_133 = arith.constant 1.045000e-04 : f32
    %198 = vector.broadcast %cst_133 : f32 to vector<2x1xf32>
    %199 = arith.mulf %198, %197 : vector<2x1xf32>
    %200 = arith.addf %102, %199 : vector<2x1xf32>
    %cst_134 = arith.constant 4.100000e-06 : f32
    %201 = vector.broadcast %cst_134 : f32 to vector<2x1xf32>
    %202 = arith.mulf %201, %195 : vector<2x1xf32>
    %203 = arith.addf %200, %202 : vector<2x1xf32>
    %cst_135 = arith.constant 0.000000e+00 : f32
    %204 = vector.broadcast %cst_135 : f32 to vector<2x17xf32>
    %205 = tpu.concatenate %190, %152, %204 in 1 : vector<2x1xf32>, vector<2x6xf32>, vector<2x17xf32> -> vector<2x24xf32>
    %206 = tpu.concatenate %185, %152 in 1 : vector<2x16xf32>, vector<2x6xf32> -> vector<2x22xf32>
    %c0_136 = arith.constant 0 : index
    %c0_137 = arith.constant 0 : index
    %207 = vector.load %arg2[%c0_136, %c0_137] : memref<22x320xbf16, #tpu.memory_space<vmem>>, vector<22x320xbf16>
    %208 = arith.truncf %206 : vector<2x22xf32> to vector<2x22xbf16>
    %cst_138 = arith.constant dense<0.000000e+00> : vector<2x320xf32>
    %209 = tpu.matmul %208, %207, %cst_138 {dimension_numbers = #tpu.dot_dimension_numbers<[1], [0], [0], [1], [0, 0, 1, 1], [], []>} : vector<2x22xbf16>, vector<22x320xbf16>, vector<2x320xf32> -> vector<2x320xf32>
    %c0_139 = arith.constant 0 : index
    %c0_140 = arith.constant 0 : index
    %210 = vector.load %arg7[%c0_139, %c0_140] : memref<5x320xf32, #tpu.memory_space<vmem>>, vector<1x320xf32>
    %211 = vector.broadcast %210 : vector<1x320xf32> to vector<2x320xf32>
    %212 = arith.addf %209, %211 : vector<2x320xf32>
    %cst_141 = arith.constant 0.000000e+00 : f32
    %213 = vector.broadcast %cst_141 : f32 to vector<2x320xf32>
    %214 = arith.maximumf %212, %213 : vector<2x320xf32>
    %215 = vector.extract_strided_slice %214 {offsets = [0, 0], sizes = [2, 256], strides = [1, 1]} : vector<2x320xf32> to vector<2x256xf32>
    %c0_142 = arith.constant 0 : index
    %c0_143 = arith.constant 0 : index
    %216 = vector.load %arg3[%c0_142, %c0_143] : memref<256x256xbf16, #tpu.memory_space<vmem>>, vector<256x256xbf16>
    %217 = arith.truncf %215 : vector<2x256xf32> to vector<2x256xbf16>
    %cst_144 = arith.constant dense<0.000000e+00> : vector<2x256xf32>
    %218 = tpu.matmul %217, %216, %cst_144 {dimension_numbers = #tpu.dot_dimension_numbers<[1], [0], [0], [1], [0, 0, 1, 1], [], []>} : vector<2x256xbf16>, vector<256x256xbf16>, vector<2x256xf32> -> vector<2x256xf32>
    %c1_145 = arith.constant 1 : index
    %c0_146 = arith.constant 0 : index
    %219 = vector.load %arg7[%c1_145, %c0_146] : memref<5x320xf32, #tpu.memory_space<vmem>>, vector<1x256xf32>
    %220 = vector.broadcast %219 : vector<1x256xf32> to vector<2x256xf32>
    %221 = arith.addf %218, %220 : vector<2x256xf32>
    %cst_147 = arith.constant 0.000000e+00 : f32
    %222 = vector.broadcast %cst_147 : f32 to vector<2x256xf32>
    %223 = arith.maximumf %221, %222 : vector<2x256xf32>
    %224 = vector.extract_strided_slice %214 {offsets = [0, 256], sizes = [2, 64], strides = [1, 1]} : vector<2x320xf32> to vector<2x64xf32>
    %c0_148 = arith.constant 0 : index
    %c0_149 = arith.constant 0 : index
    %225 = vector.load %arg4[%c0_148, %c0_149] : memref<64x256xbf16, #tpu.memory_space<vmem>>, vector<64x256xbf16>
    %226 = arith.truncf %224 : vector<2x64xf32> to vector<2x64xbf16>
    %cst_150 = arith.constant dense<0.000000e+00> : vector<2x256xf32>
    %227 = tpu.matmul %226, %225, %cst_150 {dimension_numbers = #tpu.dot_dimension_numbers<[1], [0], [0], [1], [0, 0, 1, 1], [], []>} : vector<2x64xbf16>, vector<64x256xbf16>, vector<2x256xf32> -> vector<2x256xf32>
    %c2_151 = arith.constant 2 : index
    %c0_152 = arith.constant 0 : index
    %228 = vector.load %arg7[%c2_151, %c0_152] : memref<5x320xf32, #tpu.memory_space<vmem>>, vector<1x256xf32>
    %229 = vector.broadcast %228 : vector<1x256xf32> to vector<2x256xf32>
    %230 = arith.addf %227, %229 : vector<2x256xf32>
    %cst_153 = arith.constant 0.000000e+00 : f32
    %231 = vector.broadcast %cst_153 : f32 to vector<2x256xf32>
    %232 = arith.maximumf %230, %231 : vector<2x256xf32>
    %233 = arith.addf %223, %232 : vector<2x256xf32>
    %c0_154 = arith.constant 0 : index
    %c0_155 = arith.constant 0 : index
    %234 = vector.load %arg5[%c0_154, %c0_155] : memref<256x256xbf16, #tpu.memory_space<vmem>>, vector<256x256xbf16>
    %235 = arith.truncf %233 : vector<2x256xf32> to vector<2x256xbf16>
    %cst_156 = arith.constant dense<0.000000e+00> : vector<2x256xf32>
    %236 = tpu.matmul %235, %234, %cst_156 {dimension_numbers = #tpu.dot_dimension_numbers<[1], [0], [0], [1], [0, 0, 1, 1], [], []>} : vector<2x256xbf16>, vector<256x256xbf16>, vector<2x256xf32> -> vector<2x256xf32>
    %c3_157 = arith.constant 3 : index
    %c0_158 = arith.constant 0 : index
    %237 = vector.load %arg7[%c3_157, %c0_158] : memref<5x320xf32, #tpu.memory_space<vmem>>, vector<1x256xf32>
    %238 = vector.broadcast %237 : vector<1x256xf32> to vector<2x256xf32>
    %239 = arith.addf %236, %238 : vector<2x256xf32>
    %cst_159 = arith.constant 0.000000e+00 : f32
    %240 = vector.broadcast %cst_159 : f32 to vector<2x256xf32>
    %241 = arith.maximumf %239, %240 : vector<2x256xf32>
    %c0_160 = arith.constant 0 : index
    %c0_161 = arith.constant 0 : index
    %242 = vector.load %arg6[%c0_160, %c0_161] : memref<256x6xbf16, #tpu.memory_space<vmem>>, vector<256x6xbf16>
    %243 = arith.truncf %241 : vector<2x256xf32> to vector<2x256xbf16>
    %cst_162 = arith.constant dense<0.000000e+00> : vector<2x6xf32>
    %244 = tpu.matmul %243, %242, %cst_162 {dimension_numbers = #tpu.dot_dimension_numbers<[1], [0], [0], [1], [0, 0, 1, 1], [], []>} : vector<2x256xbf16>, vector<256x6xbf16>, vector<2x6xf32> -> vector<2x6xf32>
    %c4_163 = arith.constant 4 : index
    %c0_164 = arith.constant 0 : index
    %245 = vector.load %arg7[%c4_163, %c0_164] : memref<5x320xf32, #tpu.memory_space<vmem>>, vector<1x6xf32>
    %246 = vector.broadcast %245 : vector<1x6xf32> to vector<2x6xf32>
    %247 = arith.addf %244, %246 : vector<2x6xf32>
    %cst_165 = arith.constant 2.000000e+00 : f32
    %248 = vector.broadcast %cst_165 : f32 to vector<2x6xf32>
    %249 = arith.mulf %248, %247 : vector<2x6xf32>
    %250 = math.absf %247 : vector<2x6xf32>
    %cst_166 = arith.constant 1.000000e+00 : f32
    %251 = vector.broadcast %cst_166 : f32 to vector<2x6xf32>
    %252 = arith.addf %251, %250 : vector<2x6xf32>
    %253 = arith.divf %249, %252 : vector<2x6xf32>
    %254 = tpu.concatenate %3, %253 in 1 : vector<2x1xf32>, vector<2x6xf32> -> vector<2x7xf32>
    %c128_167 = arith.constant 128 : index
    %c0_168 = arith.constant 0 : index
    %255 = vector.load %arg1[%c128_167, %c0_168] : memref<152x112xf32, #tpu.memory_space<vmem>>, vector<7x112xf32>
    %cst_169 = arith.constant dense<0.000000e+00> : vector<2x112xf32>
    %256 = tpu.matmul %254, %255, %cst_169 {dimension_numbers = #tpu.dot_dimension_numbers<[1], [0], [0], [1], [0, 0, 1, 1], [], []>, precision = #tpu.contract_precision<fp32>} : vector<2x7xf32>, vector<7x112xf32>, vector<2x112xf32> -> vector<2x112xf32>
    %c0_170 = arith.constant 0 : index
    %c0_171 = arith.constant 0 : index
    %257 = vector.load %arg1[%c0_170, %c0_171] : memref<152x112xf32, #tpu.memory_space<vmem>>, vector<16x112xf32>
    %cst_172 = arith.constant dense<0.000000e+00> : vector<2x112xf32>
    %258 = tpu.matmul %185, %257, %cst_172 {dimension_numbers = #tpu.dot_dimension_numbers<[1], [0], [0], [1], [0, 0, 1, 1], [], []>, precision = #tpu.contract_precision<fp32>} : vector<2x16xf32>, vector<16x112xf32>, vector<2x112xf32> -> vector<2x112xf32>
    %259 = arith.mulf %256, %258 : vector<2x112xf32>
    %c16_173 = arith.constant 16 : index
    %c0_174 = arith.constant 0 : index
    %260 = vector.load %arg1[%c16_173, %c0_174] : memref<152x112xf32, #tpu.memory_space<vmem>>, vector<112x16xf32>
    %cst_175 = arith.constant dense<0.000000e+00> : vector<2x16xf32>
    %261 = tpu.matmul %259, %260, %cst_175 {dimension_numbers = #tpu.dot_dimension_numbers<[1], [0], [0], [1], [0, 0, 1, 1], [], []>, precision = #tpu.contract_precision<fp32>} : vector<2x112xf32>, vector<112x16xf32>, vector<2x16xf32> -> vector<2x16xf32>
    %262 = arith.addf %185, %261 : vector<2x16xf32>
    %c0_176 = arith.constant 0 : index
    %c0_177 = arith.constant 0 : index
    %263 = vector.load %arg1[%c0_176, %c0_177] : memref<152x112xf32, #tpu.memory_space<vmem>>, vector<16x112xf32>
    %cst_178 = arith.constant dense<0.000000e+00> : vector<2x112xf32>
    %264 = tpu.matmul %262, %263, %cst_178 {dimension_numbers = #tpu.dot_dimension_numbers<[1], [0], [0], [1], [0, 0, 1, 1], [], []>, precision = #tpu.contract_precision<fp32>} : vector<2x16xf32>, vector<16x112xf32>, vector<2x112xf32> -> vector<2x112xf32>
    %265 = arith.mulf %256, %264 : vector<2x112xf32>
    %c16_179 = arith.constant 16 : index
    %c0_180 = arith.constant 0 : index
    %266 = vector.load %arg1[%c16_179, %c0_180] : memref<152x112xf32, #tpu.memory_space<vmem>>, vector<112x16xf32>
    %cst_181 = arith.constant dense<0.000000e+00> : vector<2x16xf32>
    %267 = tpu.matmul %265, %266, %cst_181 {dimension_numbers = #tpu.dot_dimension_numbers<[1], [0], [0], [1], [0, 0, 1, 1], [], []>, precision = #tpu.contract_precision<fp32>} : vector<2x112xf32>, vector<112x16xf32>, vector<2x16xf32> -> vector<2x16xf32>
    %268 = arith.addf %267, %261 : vector<2x16xf32>
    %cst_182 = arith.constant 5.000000e-01 : f32
    %269 = vector.broadcast %cst_182 : f32 to vector<2x16xf32>
    %270 = arith.mulf %269, %268 : vector<2x16xf32>
    %271 = arith.addf %185, %270 : vector<2x16xf32>
    %c0_183 = arith.constant 0 : index
    %c0_184 = arith.constant 0 : index
    %272 = vector.load %arg1[%c0_183, %c0_184] : memref<152x112xf32, #tpu.memory_space<vmem>>, vector<16x112xf32>
    %cst_185 = arith.constant dense<0.000000e+00> : vector<2x112xf32>
    %273 = tpu.matmul %271, %272, %cst_185 {dimension_numbers = #tpu.dot_dimension_numbers<[1], [0], [0], [1], [0, 0, 1, 1], [], []>, precision = #tpu.contract_precision<fp32>} : vector<2x16xf32>, vector<16x112xf32>, vector<2x112xf32> -> vector<2x112xf32>
    %274 = arith.mulf %256, %273 : vector<2x112xf32>
    %c16_186 = arith.constant 16 : index
    %c0_187 = arith.constant 0 : index
    %275 = vector.load %arg1[%c16_186, %c0_187] : memref<152x112xf32, #tpu.memory_space<vmem>>, vector<112x16xf32>
    %cst_188 = arith.constant dense<0.000000e+00> : vector<2x16xf32>
    %276 = tpu.matmul %274, %275, %cst_188 {dimension_numbers = #tpu.dot_dimension_numbers<[1], [0], [0], [1], [0, 0, 1, 1], [], []>, precision = #tpu.contract_precision<fp32>} : vector<2x112xf32>, vector<112x16xf32>, vector<2x16xf32> -> vector<2x16xf32>
    %277 = arith.addf %271, %276 : vector<2x16xf32>
    %c0_189 = arith.constant 0 : index
    %c0_190 = arith.constant 0 : index
    %278 = vector.load %arg1[%c0_189, %c0_190] : memref<152x112xf32, #tpu.memory_space<vmem>>, vector<16x112xf32>
    %cst_191 = arith.constant dense<0.000000e+00> : vector<2x112xf32>
    %279 = tpu.matmul %277, %278, %cst_191 {dimension_numbers = #tpu.dot_dimension_numbers<[1], [0], [0], [1], [0, 0, 1, 1], [], []>, precision = #tpu.contract_precision<fp32>} : vector<2x16xf32>, vector<16x112xf32>, vector<2x112xf32> -> vector<2x112xf32>
    %280 = arith.mulf %256, %279 : vector<2x112xf32>
    %c16_192 = arith.constant 16 : index
    %c0_193 = arith.constant 0 : index
    %281 = vector.load %arg1[%c16_192, %c0_193] : memref<152x112xf32, #tpu.memory_space<vmem>>, vector<112x16xf32>
    %cst_194 = arith.constant dense<0.000000e+00> : vector<2x16xf32>
    %282 = tpu.matmul %280, %281, %cst_194 {dimension_numbers = #tpu.dot_dimension_numbers<[1], [0], [0], [1], [0, 0, 1, 1], [], []>, precision = #tpu.contract_precision<fp32>} : vector<2x112xf32>, vector<112x16xf32>, vector<2x16xf32> -> vector<2x16xf32>
    %283 = arith.addf %282, %276 : vector<2x16xf32>
    %cst_195 = arith.constant 5.000000e-01 : f32
    %284 = vector.broadcast %cst_195 : f32 to vector<2x16xf32>
    %285 = arith.mulf %284, %283 : vector<2x16xf32>
    %286 = arith.addf %271, %285 : vector<2x16xf32>
    %c136_196 = arith.constant 136 : index
    %c0_197 = arith.constant 0 : index
    %287 = vector.load %arg1[%c136_196, %c0_197] : memref<152x112xf32, #tpu.memory_space<vmem>>, vector<16x2xf32>
    %cst_198 = arith.constant dense<0.000000e+00> : vector<2x2xf32>
    %288 = tpu.matmul %286, %287, %cst_198 {dimension_numbers = #tpu.dot_dimension_numbers<[1], [0], [0], [1], [0, 0, 1, 1], [], []>, precision = #tpu.contract_precision<fp32>} : vector<2x16xf32>, vector<16x2xf32>, vector<2x2xf32> -> vector<2x2xf32>
    %289 = arith.mulf %288, %288 : vector<2x2xf32>
    %cst_199 = arith.constant dense<0.000000e+00> : vector<2xf32>
    %290 = vector.multi_reduction <add>, %289, %cst_199 [1] : vector<2x2xf32> to vector<2xf32>
    %291 = vector.shape_cast %290 : vector<2xf32> to vector<2x1xf32>
    %292 = arith.mulf %253, %253 : vector<2x6xf32>
    %cst_200 = arith.constant dense<0.000000e+00> : vector<2xf32>
    %293 = vector.multi_reduction <add>, %292, %cst_200 [1] : vector<2x6xf32> to vector<2xf32>
    %294 = vector.shape_cast %293 : vector<2xf32> to vector<2x1xf32>
    %cst_201 = arith.constant 6.000000e+00 : f32
    %295 = vector.broadcast %cst_201 : f32 to vector<2x1xf32>
    %296 = arith.divf %294, %295 : vector<2x1xf32>
    %cst_202 = arith.constant 1.000000e+00 : f32
    %297 = vector.broadcast %cst_202 : f32 to vector<2x1xf32>
    %298 = arith.subf %297, %291 : vector<2x1xf32>
    %cst_203 = arith.constant 9.927500e-05 : f32
    %299 = vector.broadcast %cst_203 : f32 to vector<2x1xf32>
    %300 = arith.mulf %299, %298 : vector<2x1xf32>
    %301 = arith.addf %203, %300 : vector<2x1xf32>
    %cst_204 = arith.constant 4.100000e-06 : f32
    %302 = vector.broadcast %cst_204 : f32 to vector<2x1xf32>
    %303 = arith.mulf %302, %296 : vector<2x1xf32>
    %304 = arith.addf %301, %303 : vector<2x1xf32>
    %cst_205 = arith.constant 0.000000e+00 : f32
    %305 = vector.broadcast %cst_205 : f32 to vector<2x17xf32>
    %306 = tpu.concatenate %291, %253, %305 in 1 : vector<2x1xf32>, vector<2x6xf32>, vector<2x17xf32> -> vector<2x24xf32>
    %307 = tpu.concatenate %286, %253 in 1 : vector<2x16xf32>, vector<2x6xf32> -> vector<2x22xf32>
    %c0_206 = arith.constant 0 : index
    %c0_207 = arith.constant 0 : index
    %308 = vector.load %arg2[%c0_206, %c0_207] : memref<22x320xbf16, #tpu.memory_space<vmem>>, vector<22x320xbf16>
    %309 = arith.truncf %307 : vector<2x22xf32> to vector<2x22xbf16>
    %cst_208 = arith.constant dense<0.000000e+00> : vector<2x320xf32>
    %310 = tpu.matmul %309, %308, %cst_208 {dimension_numbers = #tpu.dot_dimension_numbers<[1], [0], [0], [1], [0, 0, 1, 1], [], []>} : vector<2x22xbf16>, vector<22x320xbf16>, vector<2x320xf32> -> vector<2x320xf32>
    %c0_209 = arith.constant 0 : index
    %c0_210 = arith.constant 0 : index
    %311 = vector.load %arg7[%c0_209, %c0_210] : memref<5x320xf32, #tpu.memory_space<vmem>>, vector<1x320xf32>
    %312 = vector.broadcast %311 : vector<1x320xf32> to vector<2x320xf32>
    %313 = arith.addf %310, %312 : vector<2x320xf32>
    %cst_211 = arith.constant 0.000000e+00 : f32
    %314 = vector.broadcast %cst_211 : f32 to vector<2x320xf32>
    %315 = arith.maximumf %313, %314 : vector<2x320xf32>
    %316 = vector.extract_strided_slice %315 {offsets = [0, 0], sizes = [2, 256], strides = [1, 1]} : vector<2x320xf32> to vector<2x256xf32>
    %c0_212 = arith.constant 0 : index
    %c0_213 = arith.constant 0 : index
    %317 = vector.load %arg3[%c0_212, %c0_213] : memref<256x256xbf16, #tpu.memory_space<vmem>>, vector<256x256xbf16>
    %318 = arith.truncf %316 : vector<2x256xf32> to vector<2x256xbf16>
    %cst_214 = arith.constant dense<0.000000e+00> : vector<2x256xf32>
    %319 = tpu.matmul %318, %317, %cst_214 {dimension_numbers = #tpu.dot_dimension_numbers<[1], [0], [0], [1], [0, 0, 1, 1], [], []>} : vector<2x256xbf16>, vector<256x256xbf16>, vector<2x256xf32> -> vector<2x256xf32>
    %c1_215 = arith.constant 1 : index
    %c0_216 = arith.constant 0 : index
    %320 = vector.load %arg7[%c1_215, %c0_216] : memref<5x320xf32, #tpu.memory_space<vmem>>, vector<1x256xf32>
    %321 = vector.broadcast %320 : vector<1x256xf32> to vector<2x256xf32>
    %322 = arith.addf %319, %321 : vector<2x256xf32>
    %cst_217 = arith.constant 0.000000e+00 : f32
    %323 = vector.broadcast %cst_217 : f32 to vector<2x256xf32>
    %324 = arith.maximumf %322, %323 : vector<2x256xf32>
    %325 = vector.extract_strided_slice %315 {offsets = [0, 256], sizes = [2, 64], strides = [1, 1]} : vector<2x320xf32> to vector<2x64xf32>
    %c0_218 = arith.constant 0 : index
    %c0_219 = arith.constant 0 : index
    %326 = vector.load %arg4[%c0_218, %c0_219] : memref<64x256xbf16, #tpu.memory_space<vmem>>, vector<64x256xbf16>
    %327 = arith.truncf %325 : vector<2x64xf32> to vector<2x64xbf16>
    %cst_220 = arith.constant dense<0.000000e+00> : vector<2x256xf32>
    %328 = tpu.matmul %327, %326, %cst_220 {dimension_numbers = #tpu.dot_dimension_numbers<[1], [0], [0], [1], [0, 0, 1, 1], [], []>} : vector<2x64xbf16>, vector<64x256xbf16>, vector<2x256xf32> -> vector<2x256xf32>
    %c2_221 = arith.constant 2 : index
    %c0_222 = arith.constant 0 : index
    %329 = vector.load %arg7[%c2_221, %c0_222] : memref<5x320xf32, #tpu.memory_space<vmem>>, vector<1x256xf32>
    %330 = vector.broadcast %329 : vector<1x256xf32> to vector<2x256xf32>
    %331 = arith.addf %328, %330 : vector<2x256xf32>
    %cst_223 = arith.constant 0.000000e+00 : f32
    %332 = vector.broadcast %cst_223 : f32 to vector<2x256xf32>
    %333 = arith.maximumf %331, %332 : vector<2x256xf32>
    %334 = arith.addf %324, %333 : vector<2x256xf32>
    %c0_224 = arith.constant 0 : index
    %c0_225 = arith.constant 0 : index
    %335 = vector.load %arg5[%c0_224, %c0_225] : memref<256x256xbf16, #tpu.memory_space<vmem>>, vector<256x256xbf16>
    %336 = arith.truncf %334 : vector<2x256xf32> to vector<2x256xbf16>
    %cst_226 = arith.constant dense<0.000000e+00> : vector<2x256xf32>
    %337 = tpu.matmul %336, %335, %cst_226 {dimension_numbers = #tpu.dot_dimension_numbers<[1], [0], [0], [1], [0, 0, 1, 1], [], []>} : vector<2x256xbf16>, vector<256x256xbf16>, vector<2x256xf32> -> vector<2x256xf32>
    %c3_227 = arith.constant 3 : index
    %c0_228 = arith.constant 0 : index
    %338 = vector.load %arg7[%c3_227, %c0_228] : memref<5x320xf32, #tpu.memory_space<vmem>>, vector<1x256xf32>
    %339 = vector.broadcast %338 : vector<1x256xf32> to vector<2x256xf32>
    %340 = arith.addf %337, %339 : vector<2x256xf32>
    %cst_229 = arith.constant 0.000000e+00 : f32
    %341 = vector.broadcast %cst_229 : f32 to vector<2x256xf32>
    %342 = arith.maximumf %340, %341 : vector<2x256xf32>
    %c0_230 = arith.constant 0 : index
    %c0_231 = arith.constant 0 : index
    %343 = vector.load %arg6[%c0_230, %c0_231] : memref<256x6xbf16, #tpu.memory_space<vmem>>, vector<256x6xbf16>
    %344 = arith.truncf %342 : vector<2x256xf32> to vector<2x256xbf16>
    %cst_232 = arith.constant dense<0.000000e+00> : vector<2x6xf32>
    %345 = tpu.matmul %344, %343, %cst_232 {dimension_numbers = #tpu.dot_dimension_numbers<[1], [0], [0], [1], [0, 0, 1, 1], [], []>} : vector<2x256xbf16>, vector<256x6xbf16>, vector<2x6xf32> -> vector<2x6xf32>
    %c4_233 = arith.constant 4 : index
    %c0_234 = arith.constant 0 : index
    %346 = vector.load %arg7[%c4_233, %c0_234] : memref<5x320xf32, #tpu.memory_space<vmem>>, vector<1x6xf32>
    %347 = vector.broadcast %346 : vector<1x6xf32> to vector<2x6xf32>
    %348 = arith.addf %345, %347 : vector<2x6xf32>
    %cst_235 = arith.constant 2.000000e+00 : f32
    %349 = vector.broadcast %cst_235 : f32 to vector<2x6xf32>
    %350 = arith.mulf %349, %348 : vector<2x6xf32>
    %351 = math.absf %348 : vector<2x6xf32>
    %cst_236 = arith.constant 1.000000e+00 : f32
    %352 = vector.broadcast %cst_236 : f32 to vector<2x6xf32>
    %353 = arith.addf %352, %351 : vector<2x6xf32>
    %354 = arith.divf %350, %353 : vector<2x6xf32>
    %355 = tpu.concatenate %3, %354 in 1 : vector<2x1xf32>, vector<2x6xf32> -> vector<2x7xf32>
    %c128_237 = arith.constant 128 : index
    %c0_238 = arith.constant 0 : index
    %356 = vector.load %arg1[%c128_237, %c0_238] : memref<152x112xf32, #tpu.memory_space<vmem>>, vector<7x112xf32>
    %cst_239 = arith.constant dense<0.000000e+00> : vector<2x112xf32>
    %357 = tpu.matmul %355, %356, %cst_239 {dimension_numbers = #tpu.dot_dimension_numbers<[1], [0], [0], [1], [0, 0, 1, 1], [], []>, precision = #tpu.contract_precision<fp32>} : vector<2x7xf32>, vector<7x112xf32>, vector<2x112xf32> -> vector<2x112xf32>
    %c0_240 = arith.constant 0 : index
    %c0_241 = arith.constant 0 : index
    %358 = vector.load %arg1[%c0_240, %c0_241] : memref<152x112xf32, #tpu.memory_space<vmem>>, vector<16x112xf32>
    %cst_242 = arith.constant dense<0.000000e+00> : vector<2x112xf32>
    %359 = tpu.matmul %286, %358, %cst_242 {dimension_numbers = #tpu.dot_dimension_numbers<[1], [0], [0], [1], [0, 0, 1, 1], [], []>, precision = #tpu.contract_precision<fp32>} : vector<2x16xf32>, vector<16x112xf32>, vector<2x112xf32> -> vector<2x112xf32>
    %360 = arith.mulf %357, %359 : vector<2x112xf32>
    %c16_243 = arith.constant 16 : index
    %c0_244 = arith.constant 0 : index
    %361 = vector.load %arg1[%c16_243, %c0_244] : memref<152x112xf32, #tpu.memory_space<vmem>>, vector<112x16xf32>
    %cst_245 = arith.constant dense<0.000000e+00> : vector<2x16xf32>
    %362 = tpu.matmul %360, %361, %cst_245 {dimension_numbers = #tpu.dot_dimension_numbers<[1], [0], [0], [1], [0, 0, 1, 1], [], []>, precision = #tpu.contract_precision<fp32>} : vector<2x112xf32>, vector<112x16xf32>, vector<2x16xf32> -> vector<2x16xf32>
    %363 = arith.addf %286, %362 : vector<2x16xf32>
    %c0_246 = arith.constant 0 : index
    %c0_247 = arith.constant 0 : index
    %364 = vector.load %arg1[%c0_246, %c0_247] : memref<152x112xf32, #tpu.memory_space<vmem>>, vector<16x112xf32>
    %cst_248 = arith.constant dense<0.000000e+00> : vector<2x112xf32>
    %365 = tpu.matmul %363, %364, %cst_248 {dimension_numbers = #tpu.dot_dimension_numbers<[1], [0], [0], [1], [0, 0, 1, 1], [], []>, precision = #tpu.contract_precision<fp32>} : vector<2x16xf32>, vector<16x112xf32>, vector<2x112xf32> -> vector<2x112xf32>
    %366 = arith.mulf %357, %365 : vector<2x112xf32>
    %c16_249 = arith.constant 16 : index
    %c0_250 = arith.constant 0 : index
    %367 = vector.load %arg1[%c16_249, %c0_250] : memref<152x112xf32, #tpu.memory_space<vmem>>, vector<112x16xf32>
    %cst_251 = arith.constant dense<0.000000e+00> : vector<2x16xf32>
    %368 = tpu.matmul %366, %367, %cst_251 {dimension_numbers = #tpu.dot_dimension_numbers<[1], [0], [0], [1], [0, 0, 1, 1], [], []>, precision = #tpu.contract_precision<fp32>} : vector<2x112xf32>, vector<112x16xf32>, vector<2x16xf32> -> vector<2x16xf32>
    %369 = arith.addf %368, %362 : vector<2x16xf32>
    %cst_252 = arith.constant 5.000000e-01 : f32
    %370 = vector.broadcast %cst_252 : f32 to vector<2x16xf32>
    %371 = arith.mulf %370, %369 : vector<2x16xf32>
    %372 = arith.addf %286, %371 : vector<2x16xf32>
    %c0_253 = arith.constant 0 : index
    %c0_254 = arith.constant 0 : index
    %373 = vector.load %arg1[%c0_253, %c0_254] : memref<152x112xf32, #tpu.memory_space<vmem>>, vector<16x112xf32>
    %cst_255 = arith.constant dense<0.000000e+00> : vector<2x112xf32>
    %374 = tpu.matmul %372, %373, %cst_255 {dimension_numbers = #tpu.dot_dimension_numbers<[1], [0], [0], [1], [0, 0, 1, 1], [], []>, precision = #tpu.contract_precision<fp32>} : vector<2x16xf32>, vector<16x112xf32>, vector<2x112xf32> -> vector<2x112xf32>
    %375 = arith.mulf %357, %374 : vector<2x112xf32>
    %c16_256 = arith.constant 16 : index
    %c0_257 = arith.constant 0 : index
    %376 = vector.load %arg1[%c16_256, %c0_257] : memref<152x112xf32, #tpu.memory_space<vmem>>, vector<112x16xf32>
    %cst_258 = arith.constant dense<0.000000e+00> : vector<2x16xf32>
    %377 = tpu.matmul %375, %376, %cst_258 {dimension_numbers = #tpu.dot_dimension_numbers<[1], [0], [0], [1], [0, 0, 1, 1], [], []>, precision = #tpu.contract_precision<fp32>} : vector<2x112xf32>, vector<112x16xf32>, vector<2x16xf32> -> vector<2x16xf32>
    %378 = arith.addf %372, %377 : vector<2x16xf32>
    %c0_259 = arith.constant 0 : index
    %c0_260 = arith.constant 0 : index
    %379 = vector.load %arg1[%c0_259, %c0_260] : memref<152x112xf32, #tpu.memory_space<vmem>>, vector<16x112xf32>
    %cst_261 = arith.constant dense<0.000000e+00> : vector<2x112xf32>
    %380 = tpu.matmul %378, %379, %cst_261 {dimension_numbers = #tpu.dot_dimension_numbers<[1], [0], [0], [1], [0, 0, 1, 1], [], []>, precision = #tpu.contract_precision<fp32>} : vector<2x16xf32>, vector<16x112xf32>, vector<2x112xf32> -> vector<2x112xf32>
    %381 = arith.mulf %357, %380 : vector<2x112xf32>
    %c16_262 = arith.constant 16 : index
    %c0_263 = arith.constant 0 : index
    %382 = vector.load %arg1[%c16_262, %c0_263] : memref<152x112xf32, #tpu.memory_space<vmem>>, vector<112x16xf32>
    %cst_264 = arith.constant dense<0.000000e+00> : vector<2x16xf32>
    %383 = tpu.matmul %381, %382, %cst_264 {dimension_numbers = #tpu.dot_dimension_numbers<[1], [0], [0], [1], [0, 0, 1, 1], [], []>, precision = #tpu.contract_precision<fp32>} : vector<2x112xf32>, vector<112x16xf32>, vector<2x16xf32> -> vector<2x16xf32>
    %384 = arith.addf %383, %377 : vector<2x16xf32>
    %cst_265 = arith.constant 5.000000e-01 : f32
    %385 = vector.broadcast %cst_265 : f32 to vector<2x16xf32>
    %386 = arith.mulf %385, %384 : vector<2x16xf32>
    %387 = arith.addf %372, %386 : vector<2x16xf32>
    %c136_266 = arith.constant 136 : index
    %c0_267 = arith.constant 0 : index
    %388 = vector.load %arg1[%c136_266, %c0_267] : memref<152x112xf32, #tpu.memory_space<vmem>>, vector<16x2xf32>
    %cst_268 = arith.constant dense<0.000000e+00> : vector<2x2xf32>
    %389 = tpu.matmul %387, %388, %cst_268 {dimension_numbers = #tpu.dot_dimension_numbers<[1], [0], [0], [1], [0, 0, 1, 1], [], []>, precision = #tpu.contract_precision<fp32>} : vector<2x16xf32>, vector<16x2xf32>, vector<2x2xf32> -> vector<2x2xf32>
    %390 = arith.mulf %389, %389 : vector<2x2xf32>
    %cst_269 = arith.constant dense<0.000000e+00> : vector<2xf32>
    %391 = vector.multi_reduction <add>, %390, %cst_269 [1] : vector<2x2xf32> to vector<2xf32>
    %392 = vector.shape_cast %391 : vector<2xf32> to vector<2x1xf32>
    %393 = arith.mulf %354, %354 : vector<2x6xf32>
    %cst_270 = arith.constant dense<0.000000e+00> : vector<2xf32>
    %394 = vector.multi_reduction <add>, %393, %cst_270 [1] : vector<2x6xf32> to vector<2xf32>
    %395 = vector.shape_cast %394 : vector<2xf32> to vector<2x1xf32>
    %cst_271 = arith.constant 6.000000e+00 : f32
    %396 = vector.broadcast %cst_271 : f32 to vector<2x1xf32>
    %397 = arith.divf %395, %396 : vector<2x1xf32>
    %cst_272 = arith.constant 1.000000e+00 : f32
    %398 = vector.broadcast %cst_272 : f32 to vector<2x1xf32>
    %399 = arith.subf %398, %392 : vector<2x1xf32>
    %cst_273 = arith.constant 9.43112536E-5 : f32
    %400 = vector.broadcast %cst_273 : f32 to vector<2x1xf32>
    %401 = arith.mulf %400, %399 : vector<2x1xf32>
    %402 = arith.addf %304, %401 : vector<2x1xf32>
    %cst_274 = arith.constant 4.100000e-06 : f32
    %403 = vector.broadcast %cst_274 : f32 to vector<2x1xf32>
    %404 = arith.mulf %403, %397 : vector<2x1xf32>
    %405 = arith.addf %402, %404 : vector<2x1xf32>
    %cst_275 = arith.constant 0.000000e+00 : f32
    %406 = vector.broadcast %cst_275 : f32 to vector<2x17xf32>
    %407 = tpu.concatenate %392, %354, %406 in 1 : vector<2x1xf32>, vector<2x6xf32>, vector<2x17xf32> -> vector<2x24xf32>
    %cst_276 = arith.constant 1.000000e+00 : f32
    %408 = vector.broadcast %cst_276 : f32 to vector<2x1xf32>
    %409 = arith.subf %408, %392 : vector<2x1xf32>
    %cst_277 = arith.constant 3.600000e-07 : f32
    %410 = vector.broadcast %cst_277 : f32 to vector<2x1xf32>
    %411 = arith.mulf %410, %409 : vector<2x1xf32>
    %412 = arith.addf %405, %411 : vector<2x1xf32>
    %cst_278 = arith.constant 0.000000e+00 : f32
    %413 = vector.broadcast %cst_278 : f32 to vector<2x7xf32>
    %414 = tpu.concatenate %387, %412, %413 in 1 : vector<2x16xf32>, vector<2x1xf32>, vector<2x7xf32> -> vector<2x24xf32>
    %415 = tpu.concatenate %104, %205, %306, %407, %414 in 0 : vector<2x24xf32>, vector<2x24xf32>, vector<2x24xf32>, vector<2x24xf32>, vector<2x24xf32> -> vector<10x24xf32>
    %c0_279 = arith.constant 0 : index
    %c0_280 = arith.constant 0 : index
    %416 = vector.load %arg8[%c0_279, %c0_280] : memref<10x24xf32, #tpu.memory_space<vmem>>, vector<10x24xf32>
    tpu.vector_store %arg8[%c0_279, %c0_280], %415 {strides = array<i32>} : memref<10x24xf32, #tpu.memory_space<vmem>>, vector<10x24xf32>,
    return
  }
}

</mosaic_0001>

<bundles_post_ra>
// kernel: pred_corr_forward.1
= control target key start
LH: loop header
LB: loop body
LE: loop exit
PB: predicated region body
PF: predicated region fallthrough
CT: control target
= control target key end

     0   :  { %13 = vsyncpa [#allocation3], 0  ;;  %s34416_s0 = inlined_call_operand.vmem [shape: f32[2,16], index: 0, kind: input, shape index: {}]   ;;  %s34417_s1 = inlined_call_operand.hbm [shape: f32[152,112], index: 1, kind: input, shape index: {}]   ;;  %s34418_s2 = inlined_call_operand.vmem [shape: bf16[22,320], index: 2, kind: input, shape index: {}]   ;;  %s34419_s3 = inlined_call_operand.hbm [shape: bf16[256,256], index: 3, kind: input, shape index: {}]   ;;  %s34420_s4 = inlined_call_operand.vmem [shape: bf16[64,256], index: 4, kind: input, shape index: {}]   ;;  %s34421_s5 = inlined_call_operand.hbm [shape: bf16[256,256], index: 5, kind: input, shape index: {}]   ;;  %s34422_s6 = inlined_call_operand.vmem [shape: bf16[256,6], index: 6, kind: input, shape index: {}]   ;;  %s34423_s7 = inlined_call_operand.vmem [shape: f32[5,320], index: 7, kind: input, shape index: {}]   ;;  %s34424_s8 = inlined_call_operand.vmem [shape: f32[10,24], index: 8, kind: output, shape index: {}]  }
   0x1   :  { %14 = vsyncpa [#allocation5], 0  ;;  %s29458_s27 = smov [#allocation4]   ;;  %s29459_s29 = smov [#allocation2]  }
   0x2   :  { %s36_s28 = sshll.u32 %s29458_s27, 4  ;;  %s22_s30 = sshll.u32 %s29459_s29, 4  ;;  %s37_s28 = int_to_ptr.vmem [resolvable:$true] %s36_s28  ;;  %s23_s30 = int_to_ptr.vmem [resolvable:$true] %s22_s30 }
   0x3   :  { %s29402_s9 = scalar_lea.vmem %s37_s28, 4096  ;;  %p29407_p1 = scmp.lt.s32.totalorder %s37_s28, %s37_s28 }
   0x4   :  { %p29403_p0 = scmp.ne.s32.totalorder %s37_s28, %s29402_s9  ;;  %p29408_p2 = scmp.lt.s32.totalorder %s29402_s9, %s29402_s9 }
   0x6   :  { %p29409_p3 = por %p29408_p2, %p29407_p1 }
   0x8   :  { %p29410_p4 = pnand %p29409_p3, %p29403_p0 }
   0xa   :  { %29413 = shalt.err (!%p29410_p4)
}
   0xb   :  { %s29460_s10 = smov 128   ;;  %s29461_s11 = smov 8  }
   0xc   :  { %42 = dma.hbm_to_vmem [thread:$0]  %s34419_s3, 4096, %s37_s28, [#allocation5], %s29460_s10, %s29460_s10, %s29461_s11  }
   0xd   :  { %s29422_s14 = scalar_lea.vmem %s23_s30, 2432  ;;  %p29427_p6 = scmp.lt.s32.totalorder %s23_s30, %s23_s30 }
   0xe   :  { %p29423_p5 = scmp.ne.s32.totalorder %s23_s30, %s29422_s14  ;;  %p29428_p7 = scmp.lt.s32.totalorder %s29422_s14, %s29422_s14 }
  0x10   :  { %p29429_p8 = por %p29428_p7, %p29427_p6 }
  0x12   :  { %p29430_p9 = pnand %p29429_p8, %p29423_p5 }
  0x14   :  { %29433 = shalt.err (!%p29430_p9)
}
  0x15   :  { %28 = dma.hbm_to_vmem [thread:$0]  %s34417_s1, 2432, %s23_s30, [#allocation3], %s29460_s10, %s29460_s10, %s29461_s11  }
  0x16   :  { %s29462_s17 = smov [#allocation6]  }
  0x17   :  { %s50_s18 = sshll.u32 %s29462_s17, 4  ;;  %s51_s18 = int_to_ptr.vmem [resolvable:$true] %s50_s18 }
  0x18   :  { %s29442_s19 = scalar_lea.vmem %s51_s18, 4096  ;;  %p29447_p11 = scmp.lt.s32.totalorder %s51_s18, %s51_s18 }
  0x19   :  { %p29443_p10 = scmp.ne.s32.totalorder %s51_s18, %s29442_s19  ;;  %p29448_p12 = scmp.lt.s32.totalorder %s29442_s19, %s29442_s19 }
  0x1b   :  { %p29449_p13 = por %p29448_p12, %p29447_p11 }
  0x1d   :  { %p29450_p0 = pnand %p29449_p13, %p29443_p10 }
  0x1f   :  { %29453 = shalt.err (!%p29450_p0)
}
  0x20   :  { %56 = dma.hbm_to_vmem [thread:$0]  %s34421_s5, 4096, %s51_s18, [#allocation5], %s29460_s10, %s29460_s10, %s29461_s11  }
  0x21   :  { %29454 = dma.done.wait [#allocation3], 2432  }
  0x22   :  { %29455 = vsyncadd [#allocation3], 4294964864 }
  0x23   :  { %29456 = dma.done.wait [#allocation5], 8192  }
  0x24   :  { %29457 = vsyncadd [#allocation5], 4294959104  ;;  %v34501_v0 = vmov 0.0   ;;  %v34425_v1 = vmov 0   ;;  %vm29465_vm0 = vmmov 0   ;;  %vm126_vm1 = vcmask 1042432  }
  0x25   :  { %25000 = vmatprep.subr.bf16.mxu1 %v34501_v0  ;;  %168 = vmatprep.mubr.bf16.mxu0 %v34425_v1  ;;  %v78_v2 = vld [vmem:[%s34418_s2 + $0x18] sm:$0x77]  ;;  %vm72_vm2 = vcmask 130048   ;;  %v28980_v5 = vld [vmem:[%s34418_s2 + $0x20] ss:$0 sps:$4 sm:$0x77]   ;;  %v83_v55 = vlaneseq }
  0x26   :  { %25004 = vmatprep.mubr.msk.bf16.mxu1 %vm29465_vm0, %v34501_v0  ;;  %v29529_v3 = vcombine.high %v78_v2, %v78_v2  ;;  %v22942_v4 = vcombine.low %v78_v2, %v78_v2  ;;  %v28981_v6 = vld [vmem:[%s34418_s2 + $0x4] ss:$12 sps:$4 sm:$0xff]   ;;  %v29543_v8 = vsel %vm126_vm1, %v28980_v5, 0  ;;  %v28983_v9 = vld [vmem:[%s34418_s2] ss:$12 sps:$4 sm:$0xff]   ;;  %vm122_vm3 = vcmask 179200  }
  0x27   :  { %34595 = vst [vmem:[#allocation11_spill] sm:$0xff] %v29543_v8  ;;  %v29551_v10 = vld [vmem:[%s34416_s0] sm:$0x3]  ;;  %25001 = vmatpush3.bf16.msra.mxu1 %v29543_v8  ;;  %v28984_v11 = vld [vmem:[%s34418_s2 + $0x8] ss:$12 sps:$4 sm:$0xff]   ;;  %v84_v56 = vshrl.u32 %v83_v55, 7 }
  0x28   :  { %34593 = vst [vmem:[#allocation9_spill] sm:$0xff] %v29529_v3  ;;  %22945 = vmatprep.subr.msk.bf16.mxu0 %vm126_vm1, %v29529_v3  ;;  %v29540_v7 = vsel %vm126_vm1, %v22942_v4, 0  ;;  %v73_v12 = vsel %vm72_vm2, %v29551_v10, 0.0  ;;  %25002 = vmatprep.subr.bf16.mxu1 %v34501_v0  ;;  %v28985_v13 = vld [vmem:[#allocation4 + $0x74] ss:$8 sps:$4 sm:$0xff]   ;;  %vm532_vm4 = vcmask 523264  }
  0x29   :  { %34594 = vst [vmem:[#allocation10_spill] sm:$0xff] %v29540_v7  ;;  %149 = vmatpush1.bf16.msra.mxu0 %v29540_v7  ;;  %v80_v14 = vpack.c.bf16 %v73_v12, %v73_v12  ;;  %v28987_v15 = vld [vmem:[#allocation4 + $0x70] ss:$8 sps:$4 sm:$0xff]   ;;  %v28988_v16 = vld [vmem:[#allocation4 + $0x64] ss:$8 sps:$4 sm:$0xff]   ;;  %v29588_v57 = vsub.s32 0, %v84_v56 }
  0x2a   :  { %150 = vmatprep.subr.bf16.mxu0 %v28981_v6  ;;  %v28990_v17 = vld [vmem:[#allocation4 + $0x60] ss:$8 sps:$4 sm:$0xff]   ;;  %v28991_v18 = vld [vmem:[#allocation4 + $0x54] ss:$8 sps:$4 sm:$0xff]   ;;  %v28993_v19 = vld [vmem:[#allocation4 + $0x50] ss:$8 sps:$4 sm:$0xff]  }
  0x2b   :  { %25003 = vmatpush3.bf16.msra.mxu1 %v28984_v11  ;;  %v28994_v20 = vld [vmem:[#allocation4 + $0x44] ss:$8 sps:$4 sm:$0xff]   ;;  %v28996_v21 = vld [vmem:[#allocation4 + $0x40] ss:$8 sps:$4 sm:$0xff]   ;;  %v28997_v22 = vld [vmem:[#allocation4 + $0x34] ss:$8 sps:$4 sm:$0xff]  }
  0x2c   :  { %v29021_v23 = vld [vmem:[%s34420_s4 + $0x34] ss:$8 sps:$4 sm:$0xff]   ;;  %v29023_v24 = vld [vmem:[%s34420_s4 + $0x30] ss:$8 sps:$4 sm:$0xff]   ;;  %v29027_v25 = vld [vmem:[%s34420_s4 + $0x24] ss:$8 sps:$4 sm:$0xff]  }
  0x2d   :  { %151 = vmatpush1.bf16.msra.mxu0 %v28983_v9  ;;  %544 = vmatprep.subr.bf16.mxu1 %v29021_v23  ;;  %v29029_v26 = vld [vmem:[%s34420_s4 + $0x20] ss:$8 sps:$4 sm:$0xff]   ;;  %v29000_v28 = vld [vmem:[#allocation4 + $0x24] ss:$8 sps:$4 sm:$0xff]   ;;  %v29003_v31 = vld [vmem:[#allocation4 + $0x14] ss:$8 sps:$4 sm:$0xff]  }
  0x2e   :  { %427 = vmatprep.subr.bf16.mxu0 %v28985_v13  ;;  %25005 = vmatmul.mubr.msk.bf16.vlgmr.msra.gmra.mxu1 %vm122_vm3, %v80_v14  ;;  %v28999_v27 = vld [vmem:[#allocation4 + $0x30] ss:$8 sps:$4 sm:$0xff]   ;;  %v29002_v29 = vld [vmem:[#allocation4 + $0x20] ss:$8 sps:$4 sm:$0xff]   ;;  %v29033_v30 = vld [vmem:[%s34420_s4 + $0x14] ss:$8 sps:$4 sm:$0xff]  }
  0x2f   :  { %568 = vmatprep.mubr.bf16.mxu1 %v34425_v1  ;;  %545 = vmatpush1.bf16.msra.mxu1 %v29023_v24  ;;  %v29005_v32 = vld [vmem:[#allocation4 + $0x10] ss:$8 sps:$4 sm:$0xff]   ;;  %v29006_v33 = vld [vmem:[#allocation4 + $0x4] ss:$8 sps:$4 sm:$0xff]   ;;  %v29008_v34 = vld [vmem:[#allocation4] ss:$8 sps:$4 sm:$0xff]  }
  0x30   :  { %22946 = vmatmul.mubr.msk.bf16.vlgmr.msra.gmra.mxu0 %vm122_vm3, %v80_v14  ;;  %546 = vmatprep.subr.bf16.mxu1 %v29027_v25  ;;  %v29009_v35 = vld [vmem:[#allocation4 + $0xf4] ss:$8 sps:$4 sm:$0xff]   ;;  %v29011_v36 = vld [vmem:[#allocation4 + $0xf0] ss:$8 sps:$4 sm:$0xff]   ;;  %v29012_v37 = vld [vmem:[#allocation4 + $0xe4] ss:$8 sps:$4 sm:$0xff]  }
  0x31   :  { %428 = vmatpush1.bf16.msra.mxu0 %v28987_v15  ;;  %v29014_v38 = vld [vmem:[#allocation4 + $0xe0] ss:$8 sps:$4 sm:$0xff]   ;;  %v29015_v39 = vld [vmem:[#allocation4 + $0xd4] ss:$8 sps:$4 sm:$0xff]   ;;  %v29017_v40 = vld [vmem:[#allocation4 + $0xd0] ss:$8 sps:$4 sm:$0xff]  }
  0x32   :  { %429 = vmatprep.subr.bf16.mxu0 %v28988_v16  ;;  %v29018_v41 = vld [vmem:[#allocation4 + $0xc4] ss:$8 sps:$4 sm:$0xff]   ;;  %v29020_v42 = vld [vmem:[#allocation4 + $0xc0] ss:$8 sps:$4 sm:$0xff]   ;;  %v29024_v43 = vld [vmem:[#allocation4 + $0xb4] ss:$8 sps:$4 sm:$0xff]  }
  0x33   :  { %547 = vmatpush1.bf16.msra.mxu1 %v29029_v26  ;;  %v29026_v44 = vld [vmem:[#allocation4 + $0xb0] ss:$8 sps:$4 sm:$0xff]   ;;  %v29030_v45 = vld [vmem:[#allocation4 + $0xa4] ss:$8 sps:$4 sm:$0xff]   ;;  %v29032_v46 = vld [vmem:[#allocation4 + $0xa0] ss:$8 sps:$4 sm:$0xff]  }
  0x34   :  { %548 = vmatprep.subr.bf16.mxu1 %v29033_v30  ;;  %v29035_v47 = vld [vmem:[%s34420_s4 + $0x10] ss:$8 sps:$4 sm:$0xff]   ;;  %v29036_v48 = vld [vmem:[#allocation4 + $0x94] ss:$8 sps:$4 sm:$0xff]   ;;  %v29041_v51 = vld [vmem:[%s34420_s4] ss:$8 sps:$4 sm:$0xff]  }
  0x35   :  { %430 = vmatpush1.bf16.msra.mxu0 %v28990_v17  ;;  %v29039_v49 = vld [vmem:[%s34420_s4 + $0x4] ss:$8 sps:$4 sm:$0xff]   ;;  %v29038_v50 = vld [vmem:[#allocation4 + $0x90] ss:$8 sps:$4 sm:$0xff]   ;;  %v29044_v53 = vld [vmem:[#allocation4 + $0x80] ss:$8 sps:$4 sm:$0xff]  }
  0x36   :  { %431 = vmatprep.subr.bf16.mxu0 %v28991_v18  ;;  %v29042_v52 = vld [vmem:[#allocation4 + $0x84] ss:$8 sps:$4 sm:$0xff]   ;;  %v29045_v54 = vld [vmem:[#allocation6 + $0x74] ss:$8 sps:$4 sm:$0xff]   ;;  %v93_v58 = vsub.s32 2, %v84_v56  ;;  %v29593_v60 = vsub.s32 1, %v84_v56 }
  0x37   :  { %549 = vmatpush1.bf16.msra.mxu1 %v29035_v47  ;;  %v81_v59 = vld [vmem:[%s34423_s7] ss:$8 sm:$0x7]  ;;  %v29051_v26 = vld [vmem:[#allocation6 + $0x54] ss:$8 sps:$4 sm:$0xff]   ;;  %v29094_v55 = vld [vmem:[%s34422_s6 + $0x38] sm:$0xff]  }
  0x38   :  { %550 = vmatprep.subr.bf16.mxu1 %v29039_v49  ;;  %v29596_v61 = vrot.slane %v81_v59, %v29588_v57  ;;  %v29598_v62 = vrot.slane %v81_v59, %v93_v58  ;;  %v29601_v63 = vrot.slane %v81_v59, %v29593_v60  ;;  %v29047_v17 = vld [vmem:[#allocation6 + $0x70] ss:$8 sps:$4 sm:$0xff]   ;;  %v29050_v25 = vld [vmem:[#allocation6 + $0x60] ss:$8 sps:$4 sm:$0xff]   ;;  %v29057_v30 = vld [vmem:[#allocation6 + $0x34] ss:$8 sps:$4 sm:$0xff]  }
  0x39   :  { %432 = vmatpush1.bf16.msra.mxu0 %v28993_v19  ;;  %v29083_v47 = vld [vmem:[#allocation6 + $0xb0] ss:$8 sps:$4 sm:$0xff]   ;;  %v29086_v49 = vld [vmem:[#allocation6 + $0xa0] ss:$8 sps:$4 sm:$0xff]   ;;  %vm1018_vm5 = vcmask 1046528   ;;  %s29466_s17 = smov 1  }
  0x3a   :  { %433 = vmatprep.subr.bf16.mxu0 %v28994_v20  ;;  %34596 = vst [vmem:[#allocation12_spill] sm:$0xff] %v29596_v61  ;;  %34597 = vst [vmem:[#allocation13_spill] sm:$0xff] %v29598_v62  ;;  %v29048_v20 = vld [vmem:[#allocation6 + $0x64] ss:$8 sps:$4 sm:$0xff]   ;;  %v29095_v56 = vld [vmem:[%s34422_s6 + $0x70] sm:$0xff]   ;;  %s29467_s18 = smov 16  }
  0x3b   :  { %551 = vmatpush1.bf16.msra.mxu1 %v29041_v51  ;;  %34598 = vst [vmem:[#allocation14_spill] sm:$0xff] %v29601_v63  ;;  %v29089_v51 = vld [vmem:[#allocation6 + $0x90] ss:$8 sps:$4 sm:$0xff]   ;;  %vm1011_vm6 = vcmask 7168   ;;  %vm1014_vm7 = vcmask 56320   ;;  %vm1947_vm8 = vcmask 916480  }
  0x3c   :  { %788 = vmatprep.subr.bf16.mxu1 %v29045_v54  ;;  %v29093_v54 = vld [vmem:[%s34422_s6 + $0x78] sm:$0xff]   ;;  %v29096_v58 = vld [vmem:[%s34422_s6 + $0x30] sm:$0xff]   ;;  %v29097_v59 = vld [vmem:[%s34422_s6 + $0x68] sm:$0xff]   ;;  %vm6280_vm9 = vcmask 9216   ;;  %vm6285_vm10 = vcmask 41984   ;;  %vm22923_vm11 = vcmask 1041408  }
  0x3d   :  { %434 = vmatpush1.bf16.msra.mxu0 %v28996_v21  ;;  %vm22925_vm12 = vcmask 1043456   ;;  %vm22927_vm13 = vcmask 1045504   ;;  %vm22929_vm14 = vcmask 195584   ;;  %vm22912_vm15 = vcmask 138240  }
  0x3e   :  { %435 = vmatprep.subr.bf16.mxu0 %v28997_v22 }
  0x41   :  { %436 = vmatpush1.bf16.msra.mxu0 %v28999_v27  ;;  %v29053_v27 = vld [vmem:[#allocation6 + $0x50] ss:$8 sps:$4 sm:$0xff]  }
  0x42   :  { %437 = vmatprep.subr.bf16.mxu0 %v29000_v28  ;;  %v29054_v28 = vld [vmem:[#allocation6 + $0x44] ss:$8 sps:$4 sm:$0xff]  }
  0x45   :  { %438 = vmatpush1.bf16.msra.mxu0 %v29002_v29  ;;  %v29056_v29 = vld [vmem:[#allocation6 + $0x40] ss:$8 sps:$4 sm:$0xff]  }
  0x46   :  { %439 = vmatprep.subr.bf16.mxu0 %v29003_v31  ;;  %v29059_v31 = vld [vmem:[#allocation6 + $0x30] ss:$8 sps:$4 sm:$0xff]  }
  0x49   :  { %440 = vmatpush1.bf16.msra.mxu0 %v29005_v32  ;;  %v29060_v32 = vld [vmem:[#allocation6 + $0x24] ss:$8 sps:$4 sm:$0xff]  }
  0x4a   :  { %441 = vmatprep.subr.bf16.mxu0 %v29006_v33  ;;  %v29062_v33 = vld [vmem:[#allocation6 + $0x20] ss:$8 sps:$4 sm:$0xff]  }
  0x4d   :  { %442 = vmatpush1.bf16.msra.mxu0 %v29008_v34  ;;  %v29063_v34 = vld [vmem:[#allocation6 + $0x14] ss:$8 sps:$4 sm:$0xff]  }
  0x4e   :  { %443 = vmatprep.subr.bf16.mxu0 %v29009_v35  ;;  %v29065_v35 = vld [vmem:[#allocation6 + $0x10] ss:$8 sps:$4 sm:$0xff]  }
  0x51   :  { %444 = vmatpush2.bf16.msra.mxu0 %v29011_v36  ;;  %v29066_v36 = vld [vmem:[#allocation6 + $0x4] ss:$8 sps:$4 sm:$0xff]  }
  0x52   :  { %445 = vmatprep.subr.bf16.mxu0 %v29012_v37  ;;  %v29068_v37 = vld [vmem:[#allocation6] ss:$8 sps:$4 sm:$0xff]  }
  0x55   :  { %446 = vmatpush2.bf16.msra.mxu0 %v29014_v38  ;;  %v29069_v38 = vld [vmem:[#allocation6 + $0xf4] ss:$8 sps:$4 sm:$0xff]  }
  0x56   :  { %447 = vmatprep.subr.bf16.mxu0 %v29015_v39  ;;  %v29071_v39 = vld [vmem:[#allocation6 + $0xf0] ss:$8 sps:$4 sm:$0xff]  }
  0x59   :  { %448 = vmatpush2.bf16.msra.mxu0 %v29017_v40  ;;  %v29072_v40 = vld [vmem:[#allocation6 + $0xe4] ss:$8 sps:$4 sm:$0xff]  }
  0x5a   :  { %449 = vmatprep.subr.bf16.mxu0 %v29018_v41  ;;  %v29074_v41 = vld [vmem:[#allocation6 + $0xe0] ss:$8 sps:$4 sm:$0xff]  }
  0x5d   :  { %450 = vmatpush2.bf16.msra.mxu0 %v29020_v42  ;;  %v29075_v42 = vld [vmem:[#allocation6 + $0xd4] ss:$8 sps:$4 sm:$0xff]  }
  0x5e   :  { %451 = vmatprep.subr.bf16.mxu0 %v29024_v43  ;;  %v29077_v43 = vld [vmem:[#allocation6 + $0xd0] ss:$8 sps:$4 sm:$0xff]  }
  0x61   :  { %452 = vmatpush2.bf16.msra.mxu0 %v29026_v44  ;;  %v29078_v44 = vld [vmem:[#allocation6 + $0xc4] ss:$8 sps:$4 sm:$0xff]  }
  0x62   :  { %453 = vmatprep.subr.bf16.mxu0 %v29030_v45  ;;  %v29080_v45 = vld [vmem:[#allocation6 + $0xc0] ss:$8 sps:$4 sm:$0xff]  }
  0x65   :  { %454 = vmatpush2.bf16.msra.mxu0 %v29032_v46  ;;  %v29081_v46 = vld [vmem:[#allocation6 + $0xb4] ss:$8 sps:$4 sm:$0xff]  }
  0x66   :  { %455 = vmatprep.subr.bf16.mxu0 %v29036_v48  ;;  %v29084_v48 = vld [vmem:[#allocation6 + $0xa4] ss:$8 sps:$4 sm:$0xff]  }
  0x69   :  { %456 = vmatpush2.bf16.msra.mxu0 %v29038_v50  ;;  %v29087_v50 = vld [vmem:[#allocation6 + $0x94] ss:$8 sps:$4 sm:$0xff]  }
  0x6a   :  { %457 = vmatprep.subr.bf16.mxu0 %v29042_v52  ;;  %v29090_v52 = vld [vmem:[#allocation6 + $0x84] ss:$8 sps:$4 sm:$0xff]  }
  0x6d   :  { %458 = vmatpush2.bf16.msra.mxu0 %v29044_v53  ;;  %v29092_v53 = vld [vmem:[#allocation6 + $0x80] ss:$8 sps:$4 sm:$0xff]  }
  0x6e   :  { %23055 = vmatprep.subr.bf16.mxu0 %v29093_v54 }
  0xee   :  { %v211_v4 = vpop.f32.mrf.mxu1 }
  0xef   :  { %v212_v6 = vadd.f32 %v211_v4, %v29598_v62  ;;  %v29099_v4 = vld [vmem:[%s34422_s6 + $0x60] sm:$0xff]  }
  0xf0   :  { %v170_v2 = vpop.f32.mrf.mxu0  ;;  %v25006_v11 = vpop.f32.mrf.mxu1 }
  0xf1   :  { %v171_v5 = vadd.f32 %v170_v2, %v29596_v61  ;;  %v219_v12 = vmax.f32 %v212_v6, 0.0  ;;  %v29098_v2 = vld [vmem:[%s34422_s6 + $0x28] sm:$0xff]   ;;  %v29101_v6 = vld [vmem:[%s34422_s6 + $0x58] sm:$0xff]   ;;  %v29103_v11 = vld [vmem:[%s34422_s6 + $0x50] sm:$0xff]  }
  0xf2   :  { %v172_v9 = vpop.f32.mrf.mxu0  ;;  %v214_v16 = vpop.f32.mrf.mxu1 }
  0xf3   :  { %v173_v13 = vadd.f32 %v172_v9, %v29601_v63  ;;  %v217_v14 = vmax.f32 %v171_v5, 0.0  ;;  %v478_v18 = vpack.c.bf16 %v219_v12, %v219_v12  ;;  %v29100_v5 = vld [vmem:[%s34422_s6 + $0x20] sm:$0xff]   ;;  %v29102_v9 = vld [vmem:[%s34422_s6 + $0x18] sm:$0xff]   ;;  %v29104_v12 = vld [vmem:[%s34422_s6 + $0x10] sm:$0xff]  }
  0xf4   :  { %v174_v15 = vpop.f32.mrf.mxu0  ;;  %v25007_v22 = vpop.f32.mrf.mxu1  ;;  %v1933_v63 = vld [vmem:[#allocation2 + $0x10] sm:$0xff] }
  0xf5   :  { %v218_v19 = vmax.f32 %v173_v13, 0.0  ;;  %22990 = vmatmul.mubr.msk.bf16.vlgmr.msra.gmra.mxu1 %vm532_vm4, %v478_v18  ;;  %v252_v24 = vpack.c.bf16 %v217_v14, %v217_v14  ;;  %v22981_v13 = vld [vmem:[%s34423_s7 + $0x2] ss:$8 sm:$0x3]  ;;  %v30001_v62 = vand.u32 4294901760, %v1933_v63 }
  0xf6   :  { %v175_v21 = vpop.f32.mrf.mxu0  ;;  %789 = vmatpush1.bf16.msra.mxu1 %v29047_v17  ;;  %v29648_v14 = vrot.slane %v22981_v13, %v29588_v57  ;;  %v22948_v15 = vld [vmem:[%s34423_s7 + $0x1] ss:$8 sm:$0x3]  ;;  %v29654_v17 = vrot.slane %v22981_v13, %v29593_v60 }
  0xf7   :  { %v253_v23 = vpack.c.bf16 %v218_v19, %v218_v19  ;;  %790 = vmatprep.subr.bf16.mxu1 %v29048_v20  ;;  %v29657_v18 = vrot.slane %v22948_v15, %v29588_v57  ;;  %v29661_v21 = vrot.slane %v22948_v15, %v29593_v60 }
  0xf8   :  { %34599 = vst [vmem:[#allocation15_spill] sm:$0xff] %v29648_v14  ;;  %34600 = vst [vmem:[#allocation16_spill] sm:$0xff] %v29654_v17 }
  0xf9   :  { %459 = vmatprep.mubr.bf16.mxu0 %v253_v23  ;;  %34601 = vst [vmem:[#allocation17_spill] sm:$0xff] %v29657_v18  ;;  %34602 = vst [vmem:[#allocation18_spill] sm:$0xff] %v29661_v21 }
  0xfa   :  { %460 = vmatmul.mubr.bf16.vlgmr.msra.gmra.mxu0 %v252_v24  ;;  %791 = vmatpush1.bf16.msra.mxu1 %v29050_v25 }
  0xfb   :  { %792 = vmatprep.subr.bf16.mxu1 %v29051_v26  ;;  %23056 = vmatpush3.bf16.msra.mxu0 %v29094_v55 }
  0xfc   :  { %23057 = vmatprep.subr.bf16.mxu0 %v29095_v56 }
  0xfe   :  { %793 = vmatpush1.bf16.msra.mxu1 %v29053_v27 }
  0xff   :  { %794 = vmatprep.subr.bf16.mxu1 %v29054_v28  ;;  %23058 = vmatpush3.bf16.msra.mxu0 %v29096_v58 }
 0x100   :  { %23059 = vmatprep.subr.bf16.mxu0 %v29097_v59 }
 0x102   :  { %795 = vmatpush1.bf16.msra.mxu1 %v29056_v29 }
 0x103   :  { %796 = vmatprep.subr.bf16.mxu1 %v29057_v30  ;;  %23060 = vmatpush3.bf16.msra.mxu0 %v29098_v2 }
 0x104   :  { %23061 = vmatprep.subr.bf16.mxu0 %v29099_v4 }
 0x106   :  { %797 = vmatpush1.bf16.msra.mxu1 %v29059_v31 }
 0x107   :  { %798 = vmatprep.subr.bf16.mxu1 %v29060_v32  ;;  %23062 = vmatpush3.bf16.msra.mxu0 %v29100_v5 }
 0x108   :  { %23063 = vmatprep.subr.bf16.mxu0 %v29101_v6 }
 0x10a   :  { %799 = vmatpush1.bf16.msra.mxu1 %v29062_v33 }
 0x10b   :  { %800 = vmatprep.subr.bf16.mxu1 %v29063_v34  ;;  %23064 = vmatpush3.bf16.msra.mxu0 %v29102_v9  ;;  %v1013_v9 = vld [vmem:[#allocation2 + $0x80] sm:$0x7f] }
 0x10c   :  { %23065 = vmatprep.subr.bf16.mxu0 %v29103_v11  ;;  %v1020_v11 = vsel %vm1018_vm5, %v1013_v9, 0  ;;  %v1942_v9 = vld [vmem:[#allocation2 + $0x58] sm:$0xff] }
 0x10e   :  { %801 = vmatpush1.bf16.msra.mxu1 %v29065_v35 }
 0x10f   :  { %802 = vmatprep.subr.bf16.mxu1 %v29066_v36  ;;  %23066 = vmatpush3.bf16.msra.mxu0 %v29104_v12  ;;  %v29697_v12 = vand.u32 4294901760, %v1020_v11 }
 0x111   :  { %34605 = vst [vmem:[#allocation21_spill] sm:$0xff] %v29697_v12  ;;  %v29700_v13 = vsub.f32 %v1020_v11, %v29697_v12 }
 0x112   :  { %803 = vmatpush1.bf16.msra.mxu1 %v29068_v37 }
 0x113   :  { %804 = vmatprep.subr.bf16.mxu1 %v29069_v38  ;;  %34606 = vst [vmem:[#allocation22_spill] sm:$0xff] %v29700_v13  ;;  %v29705_v15 = vand.u32 4294901760, %v29700_v13 }
 0x115   :  { %34607 = vst [vmem:[#allocation23_spill] sm:$0xff] %v29705_v15 }
 0x116   :  { %805 = vmatpush2.bf16.msra.mxu1 %v29071_v39  ;;  %v29105_v39 = vld [vmem:[%s34422_s6 + $0x48] sm:$0xff]  }
 0x117   :  { %806 = vmatprep.subr.bf16.mxu1 %v29072_v40  ;;  %v29106_v40 = vld [vmem:[%s34422_s6 + $0x8] sm:$0xff]   ;;  %23067 = vmatprep.subr.bf16.mxu0 %v29105_v39 }
 0x118   :  { %23068 = vmatpush3.bf16.msra.mxu0 %v29106_v40 }
 0x11a   :  { %807 = vmatpush2.bf16.msra.mxu1 %v29074_v41  ;;  %v29107_v41 = vld [vmem:[%s34422_s6 + $0x40] sm:$0xff]  }
 0x11b   :  { %808 = vmatprep.subr.bf16.mxu1 %v29075_v42  ;;  %v29108_v42 = vld [vmem:[%s34422_s6] sm:$0xff]   ;;  %23069 = vmatprep.subr.bf16.mxu0 %v29107_v41 }
 0x11c   :  { %23070 = vmatpush3.bf16.msra.mxu0 %v29108_v42 }
 0x11d   :  { %25028 = vmatprep.subr.mxu0 %v34501_v0 }
 0x11e   :  { %809 = vmatpush2.bf16.msra.mxu1 %v29077_v43  ;;  %v22991_v43 = vld [vmem:[%s34423_s7 + $0x3] ss:$8 sm:$0x3] }
 0x11f   :  { %810 = vmatprep.subr.bf16.mxu1 %v29078_v44  ;;  %v29685_v44 = vrot.slane %v22991_v43, %v29588_v57 }
 0x121   :  { %34603 = vst [vmem:[#allocation19_spill] sm:$0xff] %v29685_v44 }
 0x122   :  { %811 = vmatpush2.bf16.msra.mxu1 %v29080_v45  ;;  %v29688_v45 = vrot.slane %v22991_v43, %v29593_v60  ;;  %v865_v60 = vld [vmem:[%s34423_s7 + $0x4] ss:$0 sm:$0xff] }
 0x123   :  { %812 = vmatprep.subr.bf16.mxu1 %v29081_v46 }
 0x124   :  { %34604 = vst [vmem:[#allocation20_spill] sm:$0xff] %v29688_v45 }
 0x126   :  { %813 = vmatpush2.bf16.msra.mxu1 %v29083_v47 }
 0x127   :  { %814 = vmatprep.subr.bf16.mxu1 %v29084_v48 }
 0x12a   :  { %815 = vmatpush2.bf16.msra.mxu1 %v29086_v49 }
 0x12b   :  { %816 = vmatprep.subr.bf16.mxu1 %v29087_v50 }
 0x12e   :  { %817 = vmatpush2.bf16.msra.mxu1 %v29089_v51 }
 0x12f   :  { %818 = vmatprep.subr.bf16.mxu1 %v29090_v52 }
 0x132   :  { %819 = vmatpush2.bf16.msra.mxu1 %v29092_v53 }
 0x133   :  { %25008 = vmatprep.subr.mxu1 %v34501_v0 }
 0x1b5   :  { %v570_v16 = vpop.f32.mrf.mxu1 }
 0x1b6   :  { %v571_v19 = vadd.f32 %v570_v16, %v29648_v14 }
 0x1b7   :  { %v572_v20 = vpop.f32.mrf.mxu1 }
 0x1b8   :  { %v573_v23 = vadd.f32 %v572_v20, %v29654_v17  ;;  %v577_v26 = vmax.f32 %v571_v19, 0.0 }
 0x1b9   :  { %v574_v25 = vpop.f32.mrf.mxu1 }
 0x1ba   :  { %v461_v22 = vpop.f32.mrf.mxu0  ;;  %v578_v32 = vmax.f32 %v573_v23, 0.0 }
 0x1bb   :  { %v462_v24 = vadd.f32 %v461_v22, %v29657_v18  ;;  %v575_v30 = vpop.f32.mrf.mxu1  ;;  %v1471_v22 = vsel %vm72_vm2, %v29551_v10, 0 }
 0x1bc   :  { %v463_v27 = vpop.f32.mrf.mxu0  ;;  %v29717_v23 = vand.u32 4294901760, %v1471_v22 }
 0x1bd   :  { %v468_v28 = vmax.f32 %v462_v24, 0.0  ;;  %v464_v29 = vadd.f32 %v463_v27, %v29661_v21  ;;  %v1934_v21 = vld [vmem:[#allocation2 + $0x18] sm:$0xff] }
 0x1be   :  { %v465_v31 = vpop.f32.mrf.mxu0  ;;  %v29720_v24 = vsub.f32 %v1471_v22, %v29717_v23  ;;  %v29985_v17 = vand.u32 4294901760, %v1934_v21 }
 0x1bf   :  { %v469_v33 = vmax.f32 %v464_v29, 0.0  ;;  %v579_v34 = vadd.f32 %v577_v26, %v468_v28  ;;  %v1469_v28 = vld [vmem:[#allocation2 + $0x8] sm:$0xff]  ;;  %v1468_v31 = vld [vmem:[#allocation2] sm:$0xff] }
 0x1c0   :  { %v466_v35 = vpop.f32.mrf.mxu0  ;;  %v1542_v25 = vand.u32 4294901760, %v29720_v24  ;;  %v29999_v61 = vsub.f32 %v1934_v21, %v29985_v17 }
 0x1c1   :  { %v580_v36 = vadd.f32 %v578_v32, %v469_v33  ;;  %v613_v38 = vpack.c.bf16 %v579_v34, %v579_v34  ;;  %v29731_v32 = vand.u32 4294901760, %v1469_v28  ;;  %v1132_v35 = vsub.f32 %v29700_v13, %v29705_v15 }
 0x1c2   :  { %v1543_v29 = vsub.f32 %v29720_v24, %v1542_v25  ;;  %v30014_v21 = vand.u32 4294901760, %v29999_v61 }
 0x1c3   :  { %v614_v37 = vpack.c.bf16 %v580_v36, %v580_v36  ;;  %34610 = vst [vmem:[#allocation26_spill] sm:$0xff] %v29731_v32  ;;  %v29736_v36 = vand.u32 4294901760, %v1468_v31  ;;  %v29746_v40 = vand.u32 4294901760, %v1132_v35 }
 0x1c4   :  { %v1544_v34 = vand.u32 4294901760, %v1543_v29  ;;  %34636 = vst [vmem:[#allocation52_spill] sm:$0xff] %v30014_v21 }
 0x1c5   :  { %820 = vmatprep.mubr.bf16.mxu1 %v614_v37  ;;  %34611 = vst [vmem:[#allocation27_spill] sm:$0xff] %v29736_v36  ;;  %34613 = vst [vmem:[#allocation29_spill] sm:$0xff] %v29746_v40  ;;  %v29750_v41 = vsub.f32 %v1468_v31, %v29736_v36 }
 0x1c6   :  { %821 = vmatmul.mubr.bf16.vlgmr.msra.gmra.mxu1 %v613_v38  ;;  %v29743_v38 = vsub.f32 %v1469_v28, %v29731_v32 }
 0x1c7   :  { %25010 = vmatprep.mubr.msk.f32.mxu1 %vm29465_vm0, %v34501_v0  ;;  %25009 = vmatpush3.msra.mxu1 %v29697_v12  ;;  %34614 = vst [vmem:[#allocation30_spill] sm:$0xff] %v29750_v41 }
 0x1c8   :  { %25013 = vmatprep.subr.mxu1 %v34501_v0  ;;  %34612 = vst [vmem:[#allocation28_spill] sm:$0xff] %v29743_v38  ;;  %v29761_v43 = vand.u32 4294901760, %v29743_v38 }
 0x1ca   :  { %34615 = vst [vmem:[#allocation31_spill] sm:$0xff] %v29761_v43 }
 0x286   :  { %v822_v46 = vpop.f32.mrf.mxu1 }
 0x287   :  { %v823_v47 = vadd.f32 %v822_v46, %v29685_v44  ;;  %v29769_v46 = vand.u32 4294901760, %v29750_v41 }
 0x288   :  { %v824_v48 = vpop.f32.mrf.mxu1 }
 0x289   :  { %v825_v49 = vadd.f32 %v824_v48, %v29688_v45  ;;  %v829_v50 = vmax.f32 %v823_v47, 0.0  ;;  %34616 = vst [vmem:[#allocation32_spill] sm:$0xff] %v29769_v46  ;;  %v1582_v47 = vsub.f32 %v29743_v38, %v29761_v43  ;;  %v1589_v48 = vsub.f32 %v29750_v41, %v29769_v46 }
 0x28a   :  { %v826_v51 = vpop.f32.mrf.mxu1 }
 0x28b   :  { %v830_v52 = vmax.f32 %v825_v49, 0.0  ;;  %v863_v55 = vpack.c.bf16 %v829_v50, %v829_v50  ;;  %v29792_v49 = vand.u32 4294901760, %v1582_v47  ;;  %v29795_v50 = vand.u32 4294901760, %v1589_v48  ;;  %v1946_v51 = vld [vmem:[#allocation2 + $0x78] sm:$0xff] }
 0x28c   :  { %v827_v53 = vpop.f32.mrf.mxu1 }
 0x28d   :  { %v864_v54 = vpack.c.bf16 %v830_v52, %v830_v52  ;;  %34617 = vst [vmem:[#allocation33_spill] sm:$0xff] %v29792_v49  ;;  %34618 = vst [vmem:[#allocation34_spill] sm:$0xff] %v29795_v50  ;;  %v29821_v52 = vand.u32 4294901760, %v1946_v51  ;;  %v1945_v53 = vld [vmem:[#allocation2 + $0x70] sm:$0xff] }
 0x28f   :  { %994 = vmatprep.mubr.bf16.mxu0 %v864_v54  ;;  %v29824_v54 = vsub.f32 %v1946_v51, %v29821_v52 }
 0x290   :  { %995 = vmatmul.mubr.bf16.vlgmr.msra.gmra.mxu0 %v863_v55  ;;  %v29826_v55 = vand.u32 4294901760, %v1945_v53 }
 0x291   :  { %25030 = vmatprep.mubr.msk.f32.mxu0 %vm29465_vm0, %v34501_v0  ;;  %25029 = vmatpush3.msra.mxu0 %v29705_v15  ;;  %v1935_v15 = vld [vmem:[#allocation2 + $0x20] sm:$0xff] }
 0x292   :  { %25038 = vmatprep.subr.mxu0 %v34501_v0 }
 0x350   :  { %v23071_v57 = vpop.f32.mrf.mxu0 }
 0x352   :  { %v23072_v56 = vpop.f32.mrf.mxu0 }
 0x353   :  { %v23073_v58 = vadd.f32 %v23072_v56, %v23071_v57  ;;  %v1944_v57 = vld [vmem:[#allocation2 + $0x68] sm:$0xff]  ;;  %v29834_v56 = vsub.f32 %v1945_v53, %v29826_v55 }
 0x354   :  { %v23074_v59 = vpop.f32.mrf.mxu0 }
 0x355   :  { %v997_v2 = vadd.f32 %v23073_v58, %v865_v60  ;;  %v29831_v60 = vand.u32 4294901760, %v29824_v54  ;;  %v29836_v58 = vand.u32 4294901760, %v1944_v57  ;;  %v1943_v59 = vld [vmem:[#allocation2 + $0x60] sm:$0xff] }
 0x356   :  { %v23075_v4 = vpop.f32.mrf.mxu0 }
 0x357   :  { %v1003_v5 = vand.u32 2147483647, %v997_v2  ;;  %v1002_v16 = vmul.f32 2.0, %v997_v2  ;;  %v2048_v2 = vsub.f32 %v29824_v54, %v29831_v60  ;;  %v29843_v4 = vand.u32 4294901760, %v29834_v56 }
 0x359   :  { %v1004_v6 = vadd.f32 1.0, %v1003_v5  ;;  %v29846_v5 = vsub.f32 %v1944_v57, %v29836_v58  ;;  %v29852_v11 = vand.u32 4294901760, %v2048_v2  ;;  %v1938_v57 = vld [vmem:[#allocation2 + $0x38] sm:$0xff] }
 0x35b   :  { %29109 = vrcp.f32 %v1004_v6  ;;  %v29848_v6 = vand.u32 4294901760, %v1943_v59  ;;  %34619 = vst [vmem:[#allocation35_spill] sm:$0xff] %v29852_v11 }
 0x35d   :  { %v29860_v22 = vsub.f32 %v1943_v59, %v29848_v6 }
 0x35f   :  { %v29872_v28 = vand.u32 4294901760, %v29860_v22 }
 0x368   :  { %v29110_v19 = vpop.eup %29109 }
 0x369   :  { %v29709_v20 = vmul.f32 %v29110_v19, %v1002_v16  ;;  %v2055_v16 = vsub.f32 %v29834_v56, %v29843_v4  ;;  %v29857_v19 = vand.u32 4294901760, %v29846_v5 }
 0x36b   :  { %34608 = vst [vmem:[#allocation24_spill] sm:$0xff] %v29709_v20  ;;  %1008 = vrot.lane.b32.xlu0 %v29709_v20, %s29466_s17 }
 0x36f   :  { %6298 = vrot.lane.b32.xlu0 %v29709_v20, %s29467_s18 }
 0x3dd   :  { %v29723_v26 = vpop.permute.xlu0 %1008 }
 0x3de   :  { %34609 = vst [vmem:[#allocation25_spill] sm:$0xff] %v29723_v26  ;;  %v1012_v27 = vsel %vm1011_vm6, 1.0, %v29723_v26  ;;  %v1936_v26 = vld [vmem:[#allocation2 + $0x28] sm:$0xff] }
 0x3df   :  { %v1016_v10 = vsel %vm1014_vm7, %v1012_v27, 0  ;;  %v2062_v27 = vsub.f32 %v29846_v5, %v29857_v19 }
 0x3e0   :  { %v1088_v30 = vand.u32 4294901760, %v1016_v10 }
 0x3e1   :  { %v29882_v31 = vand.u32 4294901760, %v2062_v27  ;;  %v1937_v27 = vld [vmem:[#allocation2 + $0x30] sm:$0xff] }
 0x3e2   :  { %v1089_v33 = vsub.f32 %v1016_v10, %v1088_v30  ;;  %25031 = vmatmul.mubr.f32.vlgmr.msra.gmra.mxu0 %v1088_v30 }
 0x3e3   :  { %25039 = vmatpush3.msra.mxu0 %v29731_v32  ;;  %25042 = vmatprep.mubr.msk.f32.mxu0 %vm29465_vm0, %v34501_v0  ;;  %34621 = vst [vmem:[#allocation37_spill] sm:$0xff] %v29882_v31 }
 0x3e4   :  { %v1090_v37 = vand.u32 4294901760, %v1089_v33  ;;  %25040 = vmatprep.subr.mxu0 %v34501_v0 }
 0x3e5   :  { %25041 = vmatpush3.msra.mxu0 %v29736_v36 }
 0x3e6   :  { %v1091_v39 = vsub.f32 %v1089_v33, %v1090_v37  ;;  %25043 = vmatmul.mubr.f32.vlgmr.msra.gmra.mxu0 %v1544_v34  ;;  %25052 = vmatprep.subr.mxu0 %v34501_v0 }
 0x3e7   :  { %25053 = vmatpush3.msra.mxu0 %v29743_v38  ;;  %25056 = vmatprep.mubr.msk.f32.mxu0 %vm29465_vm0, %v34501_v0 }
 0x3e8   :  { %v1092_v42 = vand.u32 4294901760, %v1091_v39  ;;  %25054 = vmatprep.subr.mxu0 %v34501_v0  ;;  %v1939_v39 = vld [vmem:[#allocation2 + $0x40] sm:$0xff] }
 0x3e9   :  { %25055 = vmatpush3.msra.mxu0 %v29750_v41  ;;  %v29906_v51 = vand.u32 4294901760, %v1939_v39 }
 0x3ea   :  { %25011 = vmatmul.mubr.f32.vlgmr.msra.gmra.mxu1 %v1092_v42  ;;  %25057 = vmatmul.mubr.f32.vlgmr.msra.gmra.mxu0 %v29720_v24  ;;  %v1941_v24 = vld [vmem:[#allocation2 + $0x50] sm:$0xff] }
 0x3eb   :  { %25014 = vmatpush3.msra.mxu1 %v29746_v40  ;;  %25015 = vmatprep.mubr.msk.f32.mxu1 %vm29465_vm0, %v34501_v0  ;;  %v29874_v29 = vand.u32 4294901760, %v1941_v24 }
 0x3ec   :  { %25018 = vmatprep.subr.mxu1 %v34501_v0  ;;  %25066 = vmatprep.subr.mxu0 %v34501_v0 }
 0x3ed   :  { %25067 = vmatpush3.msra.mxu0 %v29761_v43  ;;  %25070 = vmatprep.mubr.msk.f32.mxu0 %vm29465_vm0, %v34501_v0  ;;  %v29887_v34 = vsub.f32 %v1941_v24, %v29874_v29 }
 0x3ee   :  { %25016 = vmatmul.mubr.f32.vlgmr.msra.gmra.mxu1 %v1088_v30  ;;  %25068 = vmatprep.subr.mxu0 %v34501_v0 }
 0x3ef   :  { %25019 = vmatpush3.msra.mxu1 %v29700_v13  ;;  %25020 = vmatprep.mubr.msk.f32.mxu1 %vm29465_vm0, %v34501_v0  ;;  %v29901_v47 = vand.u32 4294901760, %v29887_v34 }
 0x3f0   :  { %25023 = vmatprep.subr.mxu1 %v34501_v0  ;;  %25069 = vmatpush3.msra.mxu0 %v29769_v46 }
 0x3f1   :  { %25071 = vmatmul.mubr.f32.vlgmr.msra.gmra.mxu0 %v29717_v23  ;;  %25080 = vmatprep.subr.mxu0 %v34501_v0  ;;  %v2083_v59 = vsub.f32 %v29887_v34, %v29901_v47 }
 0x3f2   :  { %25021 = vmatmul.mubr.f32.vlgmr.msra.gmra.mxu1 %v1089_v33  ;;  %25108 = vmatprep.mubr.msk.f32.mxu0 %vm29465_vm0, %v34501_v0  ;;  %v2069_v33 = vsub.f32 %v29860_v22, %v29872_v28 }
 0x3f3   :  { %25024 = vmatpush3.msra.mxu1 %v29697_v12  ;;  %25025 = vmatprep.mubr.msk.f32.mxu1 %vm29465_vm0, %v34501_v0 }
 0x3f4   :  { %25033 = vmatprep.subr.mxu1 %v34501_v0  ;;  %25081 = vmatpush3.msra.mxu0 %v29821_v52  ;;  %v29898_v42 = vand.u32 4294901760, %v2069_v33 }
 0x3f5   :  { %25082 = vmatprep.subr.mxu0 %v34501_v0 }
 0x3f6   :  { %25026 = vmatmul.mubr.f32.vlgmr.msra.gmra.mxu1 %v1090_v37  ;;  %25083 = vmatpush3.msra.mxu0 %v29826_v55  ;;  %34622 = vst [vmem:[#allocation38_spill] sm:$0xff] %v29898_v42 }
 0x3f7   :  { %25034 = vmatpush3.msra.mxu1 %v29697_v12  ;;  %25035 = vmatprep.mubr.msk.f32.mxu1 %vm29465_vm0, %v34501_v0  ;;  %v29968_v12 = vand.u32 4294901760, %v1935_v15 }
 0x3f8   :  { %25045 = vmatprep.subr.mxu1 %v34501_v0  ;;  %25084 = vmatprep.subr.mxu0 %v34501_v0 }
 0x3f9   :  { %25085 = vmatpush3.msra.mxu0 %v29836_v58 }
 0x3fa   :  { %25036 = vmatmul.mubr.f32.vlgmr.msra.gmra.mxu1 %v1088_v30  ;;  %25086 = vmatprep.subr.mxu0 %v34501_v0  ;;  %v1940_v30 = vld [vmem:[#allocation2 + $0x48] sm:$0xff] }
 0x3fb   :  { %25046 = vmatpush3.msra.mxu1 %v29792_v49  ;;  %25049 = vmatprep.mubr.msk.f32.mxu1 %vm29465_vm0, %v34501_v0  ;;  %v29889_v35 = vand.u32 4294901760, %v1940_v30 }
 0x3fc   :  { %25047 = vmatprep.subr.mxu1 %v34501_v0  ;;  %25087 = vmatpush3.msra.mxu0 %v29848_v6 }
 0x3fd   :  { %25048 = vmatpush3.msra.mxu1 %v29795_v50  ;;  %25088 = vmatprep.subr.mxu0 %v34501_v0  ;;  %v29904_v48 = vsub.f32 %v1940_v30, %v29889_v35  ;;  %v29929_v30 = vand.u32 4294901760, %v2083_v59 }
 0x3fe   :  { %25059 = vmatprep.subr.mxu1 %v34501_v0  ;;  %25050 = vmatmul.mubr.f32.vlgmr.msra.gmra.mxu1 %v29717_v23 }
 0x3ff   :  { %25060 = vmatpush3.msra.mxu1 %v29731_v32  ;;  %25063 = vmatprep.mubr.msk.f32.mxu1 %vm29465_vm0, %v34501_v0  ;;  %v29917_v2 = vand.u32 4294901760, %v29904_v48  ;;  %34625 = vst [vmem:[#allocation41_spill] sm:$0xff] %v29929_v30 }
 0x400   :  { %25061 = vmatprep.subr.mxu1 %v34501_v0 }
 0x401   :  { %25062 = vmatpush3.msra.mxu1 %v29736_v36  ;;  %34623 = vst [vmem:[#allocation39_spill] sm:$0xff] %v29917_v2  ;;  %v2090_v33 = vsub.f32 %v29904_v48, %v29917_v2 }
 0x402   :  { %25073 = vmatprep.subr.mxu1 %v34501_v0  ;;  %25064 = vmatmul.mubr.f32.vlgmr.msra.gmra.mxu1 %v1542_v25  ;;  %v29867_v25 = vand.u32 4294901760, %v2055_v16  ;;  %v29922_v16 = vand.u32 4294901760, %v1938_v57 }
 0x403   :  { %25074 = vmatpush3.msra.mxu1 %v29731_v32  ;;  %25077 = vmatprep.mubr.msk.f32.mxu1 %vm29465_vm0, %v34501_v0  ;;  %v29945_v59 = vand.u32 4294901760, %v2090_v33 }
 0x404   :  { %25075 = vmatprep.subr.mxu1 %v34501_v0  ;;  %34620 = vst [vmem:[#allocation36_spill] sm:$0xff] %v29867_v25 }
 0x405   :  { %25076 = vmatpush3.msra.mxu1 %v29736_v36  ;;  %34627 = vst [vmem:[#allocation43_spill] sm:$0xff] %v29945_v59 }
 0x406   :  { %25078 = vmatmul.mubr.f32.vlgmr.msra.gmra.mxu1 %v29717_v23  ;;  %25111 = vmatprep.subr.mxu1 %v34501_v0  ;;  %v29863_v23 = vand.u32 4294901760, %v1942_v9 }
 0x407   :  { %25139 = vmatprep.mubr.msk.f32.mxu1 %vm29465_vm0, %v34501_v0  ;;  %25112 = vmatpush3.msra.mxu1 %v29852_v11 }
 0x408   :  { %25113 = vmatprep.subr.mxu1 %v34501_v0  ;;  %v29878_v10 = vsub.f32 %v1942_v9, %v29863_v23  ;;  %25089 = vmatpush3.msra.mxu0 %v29863_v23  ;;  %v29920_v9 = vsub.f32 %v1939_v39, %v29906_v51  ;;  %v29937_v39 = vsub.f32 %v1938_v57, %v29922_v16  ;;  %v29952_v57 = vand.u32 4294901760, %v1936_v26 }
 0x409   :  { %25114 = vmatpush3.msra.mxu1 %v29867_v25  ;;  %25090 = vmatprep.subr.mxu0 %v34501_v0 }
 0x40a   :  { %25115 = vmatprep.subr.mxu1 %v34501_v0  ;;  %v29894_v37 = vand.u32 4294901760, %v29878_v10  ;;  %25091 = vmatpush3.msra.mxu0 %v29874_v29  ;;  %v29934_v1 = vand.u32 4294901760, %v29920_v9  ;;  %v29950_v13 = vand.u32 4294901760, %v29937_v39  ;;  %v29966_v44 = vsub.f32 %v1936_v26, %v29952_v57 }
 0x40b   :  { %25116 = vmatpush3.msra.mxu1 %v29882_v31  ;;  %25092 = vmatprep.subr.mxu0 %v34501_v0  ;;  %v29983_v26 = vsub.f32 %v1935_v15, %v29968_v12 }
 0x40c   :  { %25117 = vmatprep.subr.mxu1 %v34501_v0  ;;  %v2076_v53 = vsub.f32 %v29878_v10, %v29894_v37  ;;  %25093 = vmatpush3.msra.mxu0 %v29889_v35  ;;  %34626 = vst [vmem:[#allocation42_spill] sm:$0xff] %v29934_v1  ;;  %v2097_v20 = vsub.f32 %v29920_v9, %v29934_v1  ;;  %34628 = vst [vmem:[#allocation44_spill] sm:$0xff] %v29950_v13  ;;  %v29980_v18 = vand.u32 4294901760, %v29966_v44 }
 0x40d   :  { %25118 = vmatpush3.msra.mxu1 %v29898_v42  ;;  %25094 = vmatprep.subr.mxu0 %v34501_v0  ;;  %v2104_v45 = vsub.f32 %v29937_v39, %v29950_v13  ;;  %v29996_v15 = vand.u32 4294901760, %v29983_v26 }
 0x40e   :  { %25119 = vmatprep.subr.mxu1 %v34501_v0  ;;  %v29926_v24 = vand.u32 4294901760, %v2076_v53  ;;  %25095 = vmatpush3.msra.mxu0 %v29906_v51  ;;  %v29941_v53 = vand.u32 4294901760, %v1937_v27  ;;  %v29961_v33 = vand.u32 4294901760, %v2097_v20  ;;  %34632 = vst [vmem:[#allocation48_spill] sm:$0xff] %v29980_v18 }
 0x40f   :  { %25096 = vmatprep.subr.mxu0 %v34501_v0  ;;  %v29977_v20 = vand.u32 4294901760, %v2104_v45  ;;  %v2118_v45 = vsub.f32 %v29966_v44, %v29980_v18  ;;  %34633 = vst [vmem:[#allocation49_spill] sm:$0xff] %v29996_v15  ;;  %v2125_v8 = vsub.f32 %v29983_v26, %v29996_v15 }
 0x410   :  { %34624 = vst [vmem:[#allocation40_spill] sm:$0xff] %v29926_v24  ;;  %25120 = vmatpush3.msra.mxu1 %v29926_v24  ;;  %25097 = vmatpush3.msra.mxu0 %v29922_v16  ;;  %v29957_v40 = vsub.f32 %v1937_v27, %v29941_v53  ;;  %34629 = vst [vmem:[#allocation45_spill] sm:$0xff] %v29961_v33 }
 0x411   :  { %25121 = vmatprep.subr.mxu1 %v34501_v0  ;;  %25098 = vmatprep.subr.mxu0 %v34501_v0  ;;  %34631 = vst [vmem:[#allocation47_spill] sm:$0xff] %v29977_v20  ;;  %v30009_v3 = vand.u32 4294901760, %v2118_v45  ;;  %v2132_v45 = vsub.f32 %v29999_v61, %v30014_v21 }
 0x412   :  { %25122 = vmatpush3.msra.mxu1 %v29929_v30  ;;  %25099 = vmatpush3.msra.mxu0 %v29941_v53  ;;  %v29973_v27 = vand.u32 4294901760, %v29957_v40 }
 0x413   :  { %25123 = vmatprep.subr.mxu1 %v34501_v0  ;;  %25100 = vmatprep.subr.mxu0 %v34501_v0  ;;  %34635 = vst [vmem:[#allocation51_spill] sm:$0xff] %v30009_v3 }
 0x414   :  { %25124 = vmatpush3.msra.mxu1 %v29945_v59  ;;  %34630 = vst [vmem:[#allocation46_spill] sm:$0xff] %v29973_v27  ;;  %25101 = vmatpush3.msra.mxu0 %v29952_v57  ;;  %v2111_v14 = vsub.f32 %v29957_v40, %v29973_v27 }
 0x415   :  { %25125 = vmatprep.subr.mxu1 %v34501_v0  ;;  %25102 = vmatprep.subr.mxu0 %v34501_v0 }
 0x416   :  { %25126 = vmatpush3.msra.mxu1 %v29961_v33  ;;  %25103 = vmatpush3.msra.mxu0 %v29968_v12  ;;  %v30005_v7 = vand.u32 4294901760, %v2111_v14  ;;  %v30017_v33 = vsub.f32 %v1933_v63, %v30001_v62  ;;  %v30023_v14 = vand.u32 4294901760, %v2125_v8  ;;  %v30033_v63 = vand.u32 4294901760, %v2132_v45 }
 0x417   :  { %25127 = vmatprep.subr.mxu1 %v34501_v0  ;;  %25104 = vmatprep.subr.mxu0 %v34501_v0 }
 0x418   :  { %25128 = vmatpush3.msra.mxu1 %v29977_v20  ;;  %34634 = vst [vmem:[#allocation50_spill] sm:$0xff] %v30005_v7  ;;  %25105 = vmatpush3.msra.mxu0 %v29985_v17  ;;  %34637 = vst [vmem:[#allocation53_spill] sm:$0xff] %v30023_v14  ;;  %v30028_v20 = vand.u32 4294901760, %v30017_v33 }
 0x419   :  { %25129 = vmatprep.subr.mxu1 %v34501_v0  ;;  %25106 = vmatprep.subr.mxu0 %v34501_v0  ;;  %34639 = vst [vmem:[#allocation55_spill] sm:$0xff] %v30033_v63 }
 0x41a   :  { %25130 = vmatpush3.msra.mxu1 %v30005_v7  ;;  %25107 = vmatpush3.msra.mxu0 %v30001_v62  ;;  %34638 = vst [vmem:[#allocation54_spill] sm:$0xff] %v30028_v20  ;;  %v2139_v7 = vsub.f32 %v30017_v33, %v30028_v20 }
 0x41b   :  { %25131 = vmatprep.subr.mxu1 %v34501_v0  ;;  %25142 = vmatprep.subr.mxu0 %v34501_v0 }
 0x41c   :  { %25132 = vmatpush3.msra.mxu1 %v30009_v3  ;;  %v30039_v8 = vand.u32 4294901760, %v2139_v7 }
 0x41d   :  { %25133 = vmatprep.subr.mxu1 %v34501_v0 }
 0x41e   :  { %25134 = vmatpush3.msra.mxu1 %v30023_v14  ;;  %34640 = vst [vmem:[#allocation56_spill] sm:$0xff] %v30039_v8 }
 0x41f   :  { %25135 = vmatprep.subr.mxu1 %v34501_v0 }
 0x420   :  { %25136 = vmatpush3.msra.mxu1 %v30033_v63 }
 0x421   :  { %25137 = vmatprep.subr.mxu1 %v34501_v0 }
 0x422   :  { %25138 = vmatpush3.msra.mxu1 %v30039_v8 }
 0x423   :  { %25173 = vmatprep.subr.mxu1 %v34501_v0 }
 0x4a2   :  { %v1392_v3 = vpop.f32.mrf.mxu0 }
 0x4a4   :  { %v25032_v45 = vpop.f32.mrf.mxu0 }
 0x4a6   :  { %v1546_v59 = vpop.f32.mrf.mxu0 }
 0x4a8   :  { %v25044_v30 = vpop.f32.mrf.mxu0 }
 0x4aa   :  { %v1094_v24 = vpop.f32.mrf.mxu1  ;;  %v1703_v42 = vpop.f32.mrf.mxu0 }
 0x4ac   :  { %v25012_v31 = vpop.f32.mrf.mxu1  ;;  %v25058_v14 = vpop.f32.mrf.mxu0 }
 0x4ae   :  { %v1170_v25 = vpop.f32.mrf.mxu1 }
 0x4af   :  { %v1171_v8 = vadd.f32 %v1170_v25, %v1094_v24  ;;  %v34645_v24 = vld [vmem:[#allocation33_spill] sm:$0xff] }
 0x4b0   :  { %v25017_v46 = vpop.f32.mrf.mxu1 }
 0x4b1   :  { %v1855_v7 = vpop.f32.mrf.mxu0 }
 0x4b2   :  { %v1244_v43 = vpop.f32.mrf.mxu1 }
 0x4b3   :  { %v25072_v11 = vpop.f32.mrf.mxu0  ;;  %v1245_v0 = vadd.f32 %v1244_v43, %v1171_v8 }
 0x4b4   :  { %v25022_v63 = vpop.f32.mrf.mxu1 }
 0x4b5   :  { %v34650_v63 = vld [vmem:[#allocation27_spill] sm:$0xff] }
 0x4b6   :  { %v1318_v41 = vpop.f32.mrf.mxu1 }
 0x4b7   :  { %v1319_v45 = vadd.f32 %v1318_v41, %v1245_v0 }
 0x4b8   :  { %v25027_v38 = vpop.f32.mrf.mxu1 }
 0x4b9   :  { %v1393_v31 = vadd.f32 %v1392_v3, %v1319_v45  ;;  %v34641_v3 = vmov 0.0  }
 0x4ba   :  { %v1464_v36 = vpop.f32.mrf.mxu1 }
 0x4bb   :  { %v30045_v27 = vadd.f32 %v1464_v36, %v1393_v31 }
 0x4bc   :  { %v25037_v32 = vpop.f32.mrf.mxu1 }
 0x4be   :  { %v1627_v20 = vpop.f32.mrf.mxu1 }
 0x4bf   :  { %v1628_v50 = vadd.f32 %v1627_v20, %v1546_v59  ;;  %v34646_v59 = vld [vmem:[#allocation52_spill] sm:$0xff]  ;;  %v34647_v20 = vld [vmem:[#allocation34_spill] sm:$0xff] }
 0x4c0   :  { %v25051_v30 = vpop.f32.mrf.mxu1 }
 0x4c1   :  { %v1704_v21 = vadd.f32 %v1703_v42, %v1628_v50  ;;  %v34643_v50 = vld [vmem:[#allocation48_spill] sm:$0xff]  ;;  %v34644_v42 = vld [vmem:[#allocation49_spill] sm:$0xff] }
 0x4c2   :  { %v1778_v49 = vpop.f32.mrf.mxu1 }
 0x4c3   :  { %v1779_v14 = vadd.f32 %v1778_v49, %v1704_v21  ;;  %v34642_v49 = vld [vmem:[#allocation46_spill] sm:$0xff] }
 0x4c4   :  { %v25065_v15 = vpop.f32.mrf.mxu1  ;;  %v34649_v21 = vld [vmem:[#allocation26_spill] sm:$0xff] }
 0x4c5   :  { %v1856_v46 = vadd.f32 %v1855_v7, %v1779_v14  ;;  %v34648_v15 = vld [vmem:[#allocation54_spill] sm:$0xff] }
 0x4c6   :  { %v1928_v18 = vpop.f32.mrf.mxu1 }
 0x4c7   :  { %v1929_v11 = vadd.f32 %v1928_v18, %v1856_v46 }
 0x4c8   :  { %v25079_v38 = vpop.f32.mrf.mxu1 }
 0x4c9   :  { %v1932_v25 = vmul.f32 %v1929_v11, %v30045_v27 }
 0x4cb   :  { %v1949_v32 = vsel %vm1947_vm8, %v1932_v25, 0 }
 0x4cc   :  { %v30049_v43 = vand.u32 4294901760, %v1949_v32 }
 0x4ce   :  { %v30052_v0 = vsub.f32 %v1949_v32, %v30049_v43  ;;  %25140 = vmatmul.mubr.f32.vlgmr.msra.gmra.mxu1 %v30049_v43 }
 0x4cf   :  { %25174 = vmatpush3.msra.mxu1 %v29821_v52  ;;  %25201 = vmatprep.mubr.msk.f32.mxu1 %vm29465_vm0, %v34641_v3 }
 0x4d0   :  { %25175 = vmatprep.subr.mxu1 %v34641_v3  ;;  %v2032_v18 = vand.u32 4294901760, %v30052_v0 }
 0x4d1   :  { %25176 = vmatpush3.msra.mxu1 %v29826_v55 }
 0x4d2   :  { %25177 = vmatprep.subr.mxu1 %v34641_v3  ;;  %v2033_v36 = vsub.f32 %v30052_v0, %v2032_v18 }
 0x4d3   :  { %25178 = vmatpush3.msra.mxu1 %v29836_v58 }
 0x4d4   :  { %25179 = vmatprep.subr.mxu1 %v34641_v3  ;;  %v2034_v41 = vand.u32 4294901760, %v2033_v36 }
 0x4d5   :  { %25180 = vmatpush3.msra.mxu1 %v29848_v6 }
 0x4d6   :  { %25181 = vmatprep.subr.mxu1 %v34641_v3  ;;  %25109 = vmatmul.mubr.f32.vlgmr.msra.gmra.mxu0 %v2034_v41 }
 0x4d7   :  { %25143 = vmatpush3.msra.mxu0 %v29824_v54  ;;  %25182 = vmatpush3.msra.mxu1 %v29863_v23 }
 0x4d8   :  { %25144 = vmatprep.subr.mxu0 %v34641_v3  ;;  %25183 = vmatprep.subr.mxu1 %v34641_v3 }
 0x4d9   :  { %25145 = vmatpush3.msra.mxu0 %v29834_v56  ;;  %25184 = vmatpush3.msra.mxu1 %v29874_v29 }
 0x4da   :  { %25146 = vmatprep.subr.mxu0 %v34641_v3  ;;  %25185 = vmatprep.subr.mxu1 %v34641_v3 }
 0x4db   :  { %25147 = vmatpush3.msra.mxu0 %v29846_v5  ;;  %25186 = vmatpush3.msra.mxu1 %v29889_v35 }
 0x4dc   :  { %25148 = vmatprep.subr.mxu0 %v34641_v3  ;;  %25187 = vmatprep.subr.mxu1 %v34641_v3 }
 0x4dd   :  { %25149 = vmatpush3.msra.mxu0 %v29860_v22  ;;  %25188 = vmatpush3.msra.mxu1 %v29906_v51 }
 0x4de   :  { %25150 = vmatprep.subr.mxu0 %v34641_v3  ;;  %25189 = vmatprep.subr.mxu1 %v34641_v3 }
 0x4df   :  { %25151 = vmatpush3.msra.mxu0 %v29878_v10  ;;  %25190 = vmatpush3.msra.mxu1 %v29922_v16 }
 0x4e0   :  { %25152 = vmatprep.subr.mxu0 %v34641_v3  ;;  %25191 = vmatprep.subr.mxu1 %v34641_v3 }
 0x4e1   :  { %25153 = vmatpush3.msra.mxu0 %v29887_v34  ;;  %25192 = vmatpush3.msra.mxu1 %v29941_v53 }
 0x4e2   :  { %25154 = vmatprep.subr.mxu0 %v34641_v3  ;;  %25193 = vmatprep.subr.mxu1 %v34641_v3 }
 0x4e3   :  { %25155 = vmatpush3.msra.mxu0 %v29904_v48  ;;  %25194 = vmatpush3.msra.mxu1 %v29952_v57 }
 0x4e4   :  { %25156 = vmatprep.subr.mxu0 %v34641_v3  ;;  %25195 = vmatprep.subr.mxu1 %v34641_v3 }
 0x4e5   :  { %25157 = vmatpush3.msra.mxu0 %v29920_v9  ;;  %25196 = vmatpush3.msra.mxu1 %v29968_v12 }
 0x4e6   :  { %25158 = vmatprep.subr.mxu0 %v34641_v3  ;;  %25197 = vmatprep.subr.mxu1 %v34641_v3 }
 0x4e7   :  { %25159 = vmatpush3.msra.mxu0 %v29937_v39  ;;  %25198 = vmatpush3.msra.mxu1 %v29985_v17 }
 0x4e8   :  { %25160 = vmatprep.subr.mxu0 %v34641_v3  ;;  %25199 = vmatprep.subr.mxu1 %v34641_v3 }
 0x4e9   :  { %25161 = vmatpush3.msra.mxu0 %v29957_v40  ;;  %25200 = vmatpush3.msra.mxu1 %v30001_v62 }
 0x4ea   :  { %25162 = vmatprep.subr.mxu0 %v34641_v3  ;;  %25202 = vmatmul.mubr.f32.vlgmr.msra.gmra.mxu1 %v2032_v18 }
 0x4eb   :  { %25235 = vmatprep.subr.mxu1 %v34641_v3  ;;  %25163 = vmatpush3.msra.mxu0 %v29966_v44 }
 0x4ec   :  { %25236 = vmatpush3.msra.mxu1 %v29821_v52  ;;  %25164 = vmatprep.subr.mxu0 %v34641_v3 }
 0x4ed   :  { %25237 = vmatprep.subr.mxu1 %v34641_v3  ;;  %25165 = vmatpush3.msra.mxu0 %v29983_v26 }
 0x4ee   :  { %25238 = vmatpush3.msra.mxu1 %v29826_v55  ;;  %25166 = vmatprep.subr.mxu0 %v34641_v3 }
 0x4ef   :  { %25239 = vmatprep.subr.mxu1 %v34641_v3  ;;  %25167 = vmatpush3.msra.mxu0 %v29999_v61 }
 0x4f0   :  { %25240 = vmatpush3.msra.mxu1 %v29836_v58  ;;  %25168 = vmatprep.subr.mxu0 %v34641_v3 }
 0x4f1   :  { %25241 = vmatprep.subr.mxu1 %v34641_v3  ;;  %25169 = vmatpush3.msra.mxu0 %v30017_v33 }
 0x4f2   :  { %25170 = vmatprep.mubr.msk.f32.mxu0 %vm29465_vm0, %v34641_v3  ;;  %25242 = vmatpush3.msra.mxu1 %v29848_v6 }
 0x4f3   :  { %25171 = vmatmul.mubr.f32.vlgmr.msra.gmra.mxu0 %v30052_v0  ;;  %25204 = vmatprep.subr.mxu0 %v34641_v3 }
 0x4f4   :  { %25243 = vmatprep.subr.mxu1 %v34641_v3  ;;  %25205 = vmatpush3.msra.mxu0 %v29831_v60 }
 0x4f5   :  { %25244 = vmatpush3.msra.mxu1 %v29863_v23  ;;  %25206 = vmatprep.subr.mxu0 %v34641_v3 }
 0x4f6   :  { %25245 = vmatprep.subr.mxu1 %v34641_v3  ;;  %25207 = vmatpush3.msra.mxu0 %v29843_v4 }
 0x4f7   :  { %25246 = vmatpush3.msra.mxu1 %v29874_v29  ;;  %25208 = vmatprep.subr.mxu0 %v34641_v3 }
 0x4f8   :  { %25247 = vmatprep.subr.mxu1 %v34641_v3  ;;  %25209 = vmatpush3.msra.mxu0 %v29857_v19 }
 0x4f9   :  { %25248 = vmatpush3.msra.mxu1 %v29889_v35  ;;  %25210 = vmatprep.subr.mxu0 %v34641_v3 }
 0x4fa   :  { %25249 = vmatprep.subr.mxu1 %v34641_v3  ;;  %25211 = vmatpush3.msra.mxu0 %v29872_v28 }
 0x4fb   :  { %25250 = vmatpush3.msra.mxu1 %v29906_v51  ;;  %25212 = vmatprep.subr.mxu0 %v34641_v3 }
 0x4fc   :  { %25251 = vmatprep.subr.mxu1 %v34641_v3  ;;  %25213 = vmatpush3.msra.mxu0 %v29894_v37 }
 0x4fd   :  { %25252 = vmatpush3.msra.mxu1 %v29922_v16  ;;  %25214 = vmatprep.subr.mxu0 %v34641_v3 }
 0x4fe   :  { %25253 = vmatprep.subr.mxu1 %v34641_v3  ;;  %25215 = vmatpush3.msra.mxu0 %v29901_v47 }
 0x4ff   :  { %25254 = vmatpush3.msra.mxu1 %v29941_v53  ;;  %25216 = vmatprep.subr.mxu0 %v34641_v3 }
 0x500   :  { %25255 = vmatprep.subr.mxu1 %v34641_v3  ;;  %25217 = vmatpush3.msra.mxu0 %v29917_v2 }
 0x501   :  { %25256 = vmatpush3.msra.mxu1 %v29952_v57  ;;  %25218 = vmatprep.subr.mxu0 %v34641_v3 }
 0x502   :  { %25257 = vmatprep.subr.mxu1 %v34641_v3  ;;  %25219 = vmatpush3.msra.mxu0 %v29934_v1 }
 0x503   :  { %25258 = vmatpush3.msra.mxu1 %v29968_v12  ;;  %25220 = vmatprep.subr.mxu0 %v34641_v3 }
 0x504   :  { %25259 = vmatprep.subr.mxu1 %v34641_v3  ;;  %25221 = vmatpush3.msra.mxu0 %v29950_v13 }
 0x505   :  { %25260 = vmatpush3.msra.mxu1 %v29985_v17  ;;  %25222 = vmatprep.subr.mxu0 %v34641_v3 }
 0x506   :  { %25261 = vmatprep.subr.mxu1 %v34641_v3  ;;  %25223 = vmatpush3.msra.mxu0 %v34642_v49 }
 0x507   :  { %25262 = vmatpush3.msra.mxu1 %v30001_v62  ;;  %25263 = vmatprep.mubr.msk.f32.mxu1 %vm29465_vm0, %v34641_v3 }
 0x508   :  { %25224 = vmatprep.subr.mxu0 %v34641_v3  ;;  %25264 = vmatmul.mubr.f32.vlgmr.msra.gmra.mxu1 %v30049_v43 }
 0x509   :  { %25225 = vmatpush3.msra.mxu0 %v34643_v50  ;;  %25232 = vmatprep.mubr.msk.f32.mxu0 %vm29465_vm0, %v34641_v3 }
 0x50a   :  { %25226 = vmatprep.subr.mxu0 %v34641_v3  ;;  %25273 = vmatprep.subr.mxu1 %v34641_v3 }
 0x50b   :  { %25227 = vmatpush3.msra.mxu0 %v34644_v42  ;;  %25274 = vmatpush3.msra.mxu1 %v34645_v24 }
 0x50c   :  { %25228 = vmatprep.subr.mxu0 %v34641_v3  ;;  %25275 = vmatprep.subr.mxu1 %v34641_v3 }
 0x50d   :  { %25229 = vmatpush3.msra.mxu0 %v34646_v59  ;;  %25276 = vmatpush3.msra.mxu1 %v34647_v20 }
 0x50e   :  { %25230 = vmatprep.subr.mxu0 %v34641_v3  ;;  %25277 = vmatprep.mubr.msk.f32.mxu1 %vm29465_vm0, %v34641_v3 }
 0x50f   :  { %25231 = vmatpush3.msra.mxu0 %v34648_v15  ;;  %25287 = vmatprep.subr.mxu1 %v34641_v3 }
 0x510   :  { %25233 = vmatmul.mubr.f32.vlgmr.msra.gmra.mxu0 %v30049_v43  ;;  %25266 = vmatprep.subr.mxu0 %v34641_v3 }
 0x511   :  { %25267 = vmatpush3.msra.mxu0 %v34649_v21  ;;  %25270 = vmatprep.mubr.msk.f32.mxu0 %vm29465_vm0, %v34641_v3 }
 0x512   :  { %25268 = vmatprep.subr.mxu0 %v34641_v3 }
 0x513   :  { %25269 = vmatpush3.msra.mxu0 %v34650_v63 }
 0x514   :  { %25280 = vmatprep.subr.mxu0 %v34641_v3 }
 0x58e   :  { %v2177_v8 = vpop.f32.mrf.mxu1 }
 0x590   :  { %v25141_v7 = vpop.f32.mrf.mxu1 }
 0x591   :  { %v30197_v7 = vld [vmem:[%s34416_s0] sm:$0x3] }
 0x592   :  { %34652 = vst [vmem:[#allocation58_spill] sm:$0xff] %v30197_v7 }
 0x596   :  { %v2036_v45 = vpop.f32.mrf.mxu0 }
 0x597   :  { %v2178_v25 = vadd.f32 %v2177_v8, %v2036_v45 }
 0x598   :  { %v25110_v30 = vpop.f32.mrf.mxu0 }
 0x5aa   :  { %v2364_v31 = vpop.f32.mrf.mxu1 }
 0x5ac   :  { %v25203_v14 = vpop.f32.mrf.mxu1 }
 0x5b3   :  { %v2277_v46 = vpop.f32.mrf.mxu0 }
 0x5b4   :  { %v2278_v43 = vadd.f32 %v2277_v46, %v2178_v25  ;;  %v34654_v25 = vld [vmem:[#allocation30_spill] sm:$0xff] }
 0x5b5   :  { %v25172_v11 = vpop.f32.mrf.mxu0 }
 0x5b6   :  { %v2365_v0 = vadd.f32 %v2364_v31, %v2278_v43  ;;  %v34656_v43 = vld [vmem:[#allocation31_spill] sm:$0xff] }
 0x5c8   :  { %v2562_v38 = vpop.f32.mrf.mxu1 }
 0x5ca   :  { %v25265_v32 = vpop.f32.mrf.mxu1 }
 0x5cb   :  { %v34655_v32 = vld [vmem:[#allocation35_spill] sm:$0xff] }
 0x5d0   :  { %v2477_v18 = vpop.f32.mrf.mxu0 }
 0x5d1   :  { %v2478_v36 = vadd.f32 %v2477_v18, %v2365_v0  ;;  %v34657_v0 = vld [vmem:[#allocation32_spill] sm:$0xff] }
 0x5d2   :  { %v25234_v41 = vpop.f32.mrf.mxu0  ;;  %v34658_v18 = vld [vmem:[#allocation36_spill] sm:$0xff] }
 0x5d3   :  { %v30192_v15 = vadd.f32 %v2562_v38, %v2478_v36  ;;  %v34653_v38 = vld [vmem:[#allocation28_spill] sm:$0xff]  ;;  %v34659_v36 = vld [vmem:[#allocation37_spill] sm:$0xff]  ;;  %v34660_v41 = vld [vmem:[#allocation38_spill] sm:$0xff] }
 0x5d5   :  { %34651 = vst [vmem:[#allocation57_spill] sm:$0xff] %v30192_v15  ;;  %v2566_v30 = vadd.f32 %v30197_v7, %v30192_v15 }
 0x5d7   :  { %v2568_v14 = vsel %vm72_vm2, %v2566_v30, 0  ;;  %v34661_v30 = vld [vmem:[#allocation40_spill] sm:$0xff] }
 0x5d8   :  { %v2637_v11 = vand.u32 4294901760, %v2568_v14 }
 0x5da   :  { %v2638_v8 = vsub.f32 %v2568_v14, %v2637_v11  ;;  %25278 = vmatmul.mubr.f32.vlgmr.msra.gmra.mxu1 %v2637_v11  ;;  %v34662_v14 = vld [vmem:[#allocation41_spill] sm:$0xff] }
 0x5db   :  { %25288 = vmatpush3.msra.mxu1 %v34649_v21  ;;  %25291 = vmatprep.mubr.msk.f32.mxu1 %vm29465_vm0, %v34641_v3 }
 0x5dc   :  { %25289 = vmatprep.subr.mxu1 %v34641_v3  ;;  %v2639_v45 = vand.u32 4294901760, %v2638_v8 }
 0x5dd   :  { %25290 = vmatpush3.msra.mxu1 %v34650_v63 }
 0x5de   :  { %25292 = vmatmul.mubr.f32.vlgmr.msra.gmra.mxu1 %v2639_v45  ;;  %25301 = vmatprep.subr.mxu1 %v34641_v3  ;;  %v2640_v31 = vsub.f32 %v2638_v8, %v2639_v45  ;;  %v34665_v45 = vld [vmem:[#allocation47_spill] sm:$0xff] }
 0x5df   :  { %25302 = vmatpush3.msra.mxu1 %v34649_v21  ;;  %25305 = vmatprep.mubr.msk.f32.mxu1 %vm29465_vm0, %v34641_v3 }
 0x5e0   :  { %25303 = vmatprep.subr.mxu1 %v34641_v3  ;;  %v2641_v46 = vand.u32 4294901760, %v2640_v31  ;;  %v34666_v31 = vld [vmem:[#allocation50_spill] sm:$0xff] }
 0x5e1   :  { %25304 = vmatpush3.msra.mxu1 %v34650_v63 }
 0x5e2   :  { %25271 = vmatmul.mubr.f32.vlgmr.msra.gmra.mxu0 %v2641_v46  ;;  %25306 = vmatmul.mubr.f32.vlgmr.msra.gmra.mxu1 %v2637_v11  ;;  %v34667_v46 = vld [vmem:[#allocation51_spill] sm:$0xff] }
 0x5e3   :  { %25281 = vmatpush3.msra.mxu0 %v34653_v38  ;;  %25284 = vmatprep.mubr.msk.f32.mxu0 %vm29465_vm0, %v34641_v3 }
 0x5e4   :  { %25282 = vmatprep.subr.mxu0 %v34641_v3  ;;  %25339 = vmatprep.subr.mxu1 %v34641_v3 }
 0x5e5   :  { %25283 = vmatpush3.msra.mxu0 %v34654_v25  ;;  %25340 = vmatpush3.msra.mxu1 %v34655_v32 }
 0x5e6   :  { %25294 = vmatprep.subr.mxu0 %v34641_v3  ;;  %25285 = vmatmul.mubr.f32.vlgmr.msra.gmra.mxu0 %v2638_v8  ;;  %v34664_v8 = vld [vmem:[#allocation45_spill] sm:$0xff] }
 0x5e7   :  { %25295 = vmatpush3.msra.mxu0 %v34656_v43  ;;  %25298 = vmatprep.mubr.msk.f32.mxu0 %vm29465_vm0, %v34641_v3 }
 0x5e8   :  { %25296 = vmatprep.subr.mxu0 %v34641_v3  ;;  %25341 = vmatprep.subr.mxu1 %v34641_v3 }
 0x5e9   :  { %25297 = vmatpush3.msra.mxu0 %v34657_v0  ;;  %25342 = vmatpush3.msra.mxu1 %v34658_v18 }
 0x5ea   :  { %25299 = vmatmul.mubr.f32.vlgmr.msra.gmra.mxu0 %v2637_v11  ;;  %25343 = vmatprep.subr.mxu1 %v34641_v3  ;;  %v34663_v11 = vld [vmem:[#allocation43_spill] sm:$0xff] }
 0x5eb   :  { %25344 = vmatpush3.msra.mxu1 %v34659_v36  ;;  %25308 = vmatprep.subr.mxu0 %v34641_v3 }
 0x5ec   :  { %25345 = vmatprep.subr.mxu1 %v34641_v3  ;;  %25309 = vmatpush3.msra.mxu0 %v29821_v52 }
 0x5ed   :  { %25346 = vmatpush3.msra.mxu1 %v34660_v41  ;;  %25310 = vmatprep.subr.mxu0 %v34641_v3 }
 0x5ee   :  { %25347 = vmatprep.subr.mxu1 %v34641_v3  ;;  %25311 = vmatpush3.msra.mxu0 %v29826_v55 }
 0x5ef   :  { %25348 = vmatpush3.msra.mxu1 %v34661_v30  ;;  %25312 = vmatprep.subr.mxu0 %v34641_v3 }
 0x5f0   :  { %25349 = vmatprep.subr.mxu1 %v34641_v3  ;;  %25313 = vmatpush3.msra.mxu0 %v29836_v58 }
 0x5f1   :  { %25350 = vmatpush3.msra.mxu1 %v34662_v14  ;;  %25314 = vmatprep.subr.mxu0 %v34641_v3 }
 0x5f2   :  { %25351 = vmatprep.subr.mxu1 %v34641_v3  ;;  %25315 = vmatpush3.msra.mxu0 %v29848_v6 }
 0x5f3   :  { %25352 = vmatpush3.msra.mxu1 %v34663_v11  ;;  %25316 = vmatprep.subr.mxu0 %v34641_v3 }
 0x5f4   :  { %25353 = vmatprep.subr.mxu1 %v34641_v3  ;;  %25317 = vmatpush3.msra.mxu0 %v29863_v23 }
 0x5f5   :  { %25354 = vmatpush3.msra.mxu1 %v34664_v8  ;;  %25318 = vmatprep.subr.mxu0 %v34641_v3 }
 0x5f6   :  { %25355 = vmatprep.subr.mxu1 %v34641_v3  ;;  %25319 = vmatpush3.msra.mxu0 %v29874_v29 }
 0x5f7   :  { %25356 = vmatpush3.msra.mxu1 %v34665_v45  ;;  %25320 = vmatprep.subr.mxu0 %v34641_v3  ;;  %v34668_v45 = vld [vmem:[#allocation53_spill] sm:$0xff] }
 0x5f8   :  { %25357 = vmatprep.subr.mxu1 %v34641_v3  ;;  %25321 = vmatpush3.msra.mxu0 %v29889_v35 }
 0x5f9   :  { %25358 = vmatpush3.msra.mxu1 %v34666_v31  ;;  %25322 = vmatprep.subr.mxu0 %v34641_v3  ;;  %v34669_v31 = vld [vmem:[#allocation55_spill] sm:$0xff] }
 0x5fa   :  { %25359 = vmatprep.subr.mxu1 %v34641_v3  ;;  %25323 = vmatpush3.msra.mxu0 %v29906_v51 }
 0x5fb   :  { %25360 = vmatpush3.msra.mxu1 %v34667_v46  ;;  %25324 = vmatprep.subr.mxu0 %v34641_v3  ;;  %v34670_v46 = vld [vmem:[#allocation56_spill] sm:$0xff] }
 0x5fc   :  { %25361 = vmatprep.subr.mxu1 %v34641_v3  ;;  %25325 = vmatpush3.msra.mxu0 %v29922_v16 }
 0x5fd   :  { %25362 = vmatpush3.msra.mxu1 %v34668_v45  ;;  %25326 = vmatprep.subr.mxu0 %v34641_v3 }
 0x5fe   :  { %25363 = vmatprep.subr.mxu1 %v34641_v3  ;;  %25327 = vmatpush3.msra.mxu0 %v29941_v53 }
 0x5ff   :  { %25364 = vmatpush3.msra.mxu1 %v34669_v31  ;;  %25328 = vmatprep.subr.mxu0 %v34641_v3 }
 0x600   :  { %25365 = vmatprep.subr.mxu1 %v34641_v3  ;;  %25367 = vmatprep.mubr.msk.f32.mxu1 %vm29465_vm0, %v34641_v3 }
 0x601   :  { %25366 = vmatpush3.msra.mxu1 %v34670_v46  ;;  %25329 = vmatpush3.msra.mxu0 %v29952_v57 }
 0x602   :  { %25401 = vmatprep.subr.mxu1 %v34641_v3  ;;  %25330 = vmatprep.subr.mxu0 %v34641_v3 }
 0x603   :  { %25331 = vmatpush3.msra.mxu0 %v29968_v12  ;;  %25336 = vmatprep.mubr.msk.f32.mxu0 %vm29465_vm0, %v34641_v3 }
 0x604   :  { %25332 = vmatprep.subr.mxu0 %v34641_v3 }
 0x605   :  { %25333 = vmatpush3.msra.mxu0 %v29985_v17 }
 0x606   :  { %25334 = vmatprep.subr.mxu0 %v34641_v3 }
 0x607   :  { %25335 = vmatpush3.msra.mxu0 %v30001_v62 }
 0x608   :  { %25370 = vmatprep.subr.mxu0 %v34641_v3 }
 0x69a   :  { %v2724_v46 = vpop.f32.mrf.mxu1 }
 0x69c   :  { %v25279_v31 = vpop.f32.mrf.mxu1 }
 0x69e   :  { %v2875_v45 = vpop.f32.mrf.mxu1 }
 0x6a0   :  { %v25293_v8 = vpop.f32.mrf.mxu1 }
 0x6a2   :  { %v2643_v11 = vpop.f32.mrf.mxu0  ;;  %v3025_v14 = vpop.f32.mrf.mxu1 }
 0x6a3   :  { %v2725_v36 = vadd.f32 %v2724_v46, %v2643_v11  ;;  %v34674_v11 = vld [vmem:[#allocation57_spill] sm:$0xff] }
 0x6a4   :  { %v25272_v30 = vpop.f32.mrf.mxu0  ;;  %v25307_v41 = vpop.f32.mrf.mxu1 }
 0x6a6   :  { %v2800_v18 = vpop.f32.mrf.mxu0 }
 0x6a7   :  { %v2801_v0 = vadd.f32 %v2800_v18, %v2725_v36 }
 0x6a8   :  { %v25286_v43 = vpop.f32.mrf.mxu0 }
 0x6a9   :  { %v2876_v32 = vadd.f32 %v2875_v45, %v2801_v0 }
 0x6aa   :  { %v2952_v25 = vpop.f32.mrf.mxu0 }
 0x6ab   :  { %v2953_v38 = vadd.f32 %v2952_v25, %v2876_v32  ;;  %v34673_v25 = vld [vmem:[#allocation27_spill] sm:$0xff] }
 0x6ac   :  { %v25300_v7 = vpop.f32.mrf.mxu0 }
 0x6ad   :  { %v3026_v15 = vadd.f32 %v3025_v14, %v2953_v38  ;;  %v34672_v38 = vld [vmem:[#allocation26_spill] sm:$0xff] }
 0x6af   :  { %v3029_v63 = vmul.f32 %v3026_v15, %v30045_v27 }
 0x6b1   :  { %v3031_v21 = vsel %vm1947_vm8, %v3029_v63, 0  ;;  %v34671_v63 = vld [vmem:[#allocation54_spill] sm:$0xff] }
 0x6b2   :  { %v30288_v31 = vand.u32 4294901760, %v3031_v21 }
 0x6b4   :  { %v30291_v8 = vsub.f32 %v3031_v21, %v30288_v31  ;;  %25368 = vmatmul.mubr.f32.vlgmr.msra.gmra.mxu1 %v30288_v31 }
 0x6b5   :  { %25402 = vmatpush3.msra.mxu1 %v29821_v52  ;;  %25429 = vmatprep.mubr.msk.f32.mxu1 %vm29465_vm0, %v34641_v3 }
 0x6b6   :  { %25403 = vmatprep.subr.mxu1 %v34641_v3  ;;  %v3114_v7 = vand.u32 4294901760, %v30291_v8 }
 0x6b7   :  { %25404 = vmatpush3.msra.mxu1 %v29826_v55 }
 0x6b8   :  { %25405 = vmatprep.subr.mxu1 %v34641_v3  ;;  %v3115_v15 = vsub.f32 %v30291_v8, %v3114_v7 }
 0x6b9   :  { %25406 = vmatpush3.msra.mxu1 %v29836_v58 }
 0x6ba   :  { %25407 = vmatprep.subr.mxu1 %v34641_v3  ;;  %v3116_v21 = vand.u32 4294901760, %v3115_v15 }
 0x6bb   :  { %25408 = vmatpush3.msra.mxu1 %v29848_v6 }
 0x6bc   :  { %25409 = vmatprep.subr.mxu1 %v34641_v3  ;;  %25337 = vmatmul.mubr.f32.vlgmr.msra.gmra.mxu0 %v3116_v21 }
 0x6bd   :  { %25371 = vmatpush3.msra.mxu0 %v29824_v54  ;;  %25410 = vmatpush3.msra.mxu1 %v29863_v23 }
 0x6be   :  { %25372 = vmatprep.subr.mxu0 %v34641_v3  ;;  %25411 = vmatprep.subr.mxu1 %v34641_v3 }
 0x6bf   :  { %25373 = vmatpush3.msra.mxu0 %v29834_v56  ;;  %25412 = vmatpush3.msra.mxu1 %v29874_v29 }
 0x6c0   :  { %25374 = vmatprep.subr.mxu0 %v34641_v3  ;;  %25413 = vmatprep.subr.mxu1 %v34641_v3 }
 0x6c1   :  { %25375 = vmatpush3.msra.mxu0 %v29846_v5  ;;  %25414 = vmatpush3.msra.mxu1 %v29889_v35 }
 0x6c2   :  { %25376 = vmatprep.subr.mxu0 %v34641_v3  ;;  %25415 = vmatprep.subr.mxu1 %v34641_v3 }
 0x6c3   :  { %25377 = vmatpush3.msra.mxu0 %v29860_v22  ;;  %25416 = vmatpush3.msra.mxu1 %v29906_v51 }
 0x6c4   :  { %25378 = vmatprep.subr.mxu0 %v34641_v3  ;;  %25417 = vmatprep.subr.mxu1 %v34641_v3 }
 0x6c5   :  { %25379 = vmatpush3.msra.mxu0 %v29878_v10  ;;  %25418 = vmatpush3.msra.mxu1 %v29922_v16 }
 0x6c6   :  { %25380 = vmatprep.subr.mxu0 %v34641_v3  ;;  %25419 = vmatprep.subr.mxu1 %v34641_v3 }
 0x6c7   :  { %25381 = vmatpush3.msra.mxu0 %v29887_v34  ;;  %25420 = vmatpush3.msra.mxu1 %v29941_v53 }
 0x6c8   :  { %25382 = vmatprep.subr.mxu0 %v34641_v3  ;;  %25421 = vmatprep.subr.mxu1 %v34641_v3 }
 0x6c9   :  { %25383 = vmatpush3.msra.mxu0 %v29904_v48  ;;  %25422 = vmatpush3.msra.mxu1 %v29952_v57 }
 0x6ca   :  { %25384 = vmatprep.subr.mxu0 %v34641_v3  ;;  %25423 = vmatprep.subr.mxu1 %v34641_v3 }
 0x6cb   :  { %25385 = vmatpush3.msra.mxu0 %v29920_v9  ;;  %25424 = vmatpush3.msra.mxu1 %v29968_v12 }
 0x6cc   :  { %25386 = vmatprep.subr.mxu0 %v34641_v3  ;;  %25425 = vmatprep.subr.mxu1 %v34641_v3 }
 0x6cd   :  { %25387 = vmatpush3.msra.mxu0 %v29937_v39  ;;  %25426 = vmatpush3.msra.mxu1 %v29985_v17 }
 0x6ce   :  { %25388 = vmatprep.subr.mxu0 %v34641_v3  ;;  %25427 = vmatprep.subr.mxu1 %v34641_v3 }
 0x6cf   :  { %25389 = vmatpush3.msra.mxu0 %v29957_v40  ;;  %25428 = vmatpush3.msra.mxu1 %v30001_v62 }
 0x6d0   :  { %25390 = vmatprep.subr.mxu0 %v34641_v3  ;;  %25430 = vmatmul.mubr.f32.vlgmr.msra.gmra.mxu1 %v3114_v7 }
 0x6d1   :  { %25463 = vmatprep.subr.mxu1 %v34641_v3  ;;  %25391 = vmatpush3.msra.mxu0 %v29966_v44 }
 0x6d2   :  { %25464 = vmatpush3.msra.mxu1 %v29821_v52  ;;  %25392 = vmatprep.subr.mxu0 %v34641_v3 }
 0x6d3   :  { %25465 = vmatprep.subr.mxu1 %v34641_v3  ;;  %25393 = vmatpush3.msra.mxu0 %v29983_v26 }
 0x6d4   :  { %25466 = vmatpush3.msra.mxu1 %v29826_v55  ;;  %25394 = vmatprep.subr.mxu0 %v34641_v3 }
 0x6d5   :  { %25467 = vmatprep.subr.mxu1 %v34641_v3  ;;  %25395 = vmatpush3.msra.mxu0 %v29999_v61 }
 0x6d6   :  { %25468 = vmatpush3.msra.mxu1 %v29836_v58  ;;  %25396 = vmatprep.subr.mxu0 %v34641_v3 }
 0x6d7   :  { %25469 = vmatprep.subr.mxu1 %v34641_v3  ;;  %25397 = vmatpush3.msra.mxu0 %v30017_v33 }
 0x6d8   :  { %25398 = vmatprep.mubr.msk.f32.mxu0 %vm29465_vm0, %v34641_v3  ;;  %25470 = vmatpush3.msra.mxu1 %v29848_v6 }
 0x6d9   :  { %25399 = vmatmul.mubr.f32.vlgmr.msra.gmra.mxu0 %v30291_v8  ;;  %25432 = vmatprep.subr.mxu0 %v34641_v3 }
 0x6da   :  { %25471 = vmatprep.subr.mxu1 %v34641_v3  ;;  %25433 = vmatpush3.msra.mxu0 %v29831_v60 }
 0x6db   :  { %25472 = vmatpush3.msra.mxu1 %v29863_v23  ;;  %25434 = vmatprep.subr.mxu0 %v34641_v3 }
 0x6dc   :  { %25473 = vmatprep.subr.mxu1 %v34641_v3  ;;  %25435 = vmatpush3.msra.mxu0 %v29843_v4 }
 0x6dd   :  { %25474 = vmatpush3.msra.mxu1 %v29874_v29  ;;  %25436 = vmatprep.subr.mxu0 %v34641_v3 }
 0x6de   :  { %25475 = vmatprep.subr.mxu1 %v34641_v3  ;;  %25437 = vmatpush3.msra.mxu0 %v29857_v19 }
 0x6df   :  { %25476 = vmatpush3.msra.mxu1 %v29889_v35  ;;  %25438 = vmatprep.subr.mxu0 %v34641_v3 }
 0x6e0   :  { %25477 = vmatprep.subr.mxu1 %v34641_v3  ;;  %25439 = vmatpush3.msra.mxu0 %v29872_v28 }
 0x6e1   :  { %25478 = vmatpush3.msra.mxu1 %v29906_v51  ;;  %25440 = vmatprep.subr.mxu0 %v34641_v3 }
 0x6e2   :  { %25479 = vmatprep.subr.mxu1 %v34641_v3  ;;  %25441 = vmatpush3.msra.mxu0 %v29894_v37 }
 0x6e3   :  { %25480 = vmatpush3.msra.mxu1 %v29922_v16  ;;  %25442 = vmatprep.subr.mxu0 %v34641_v3 }
 0x6e4   :  { %25481 = vmatprep.subr.mxu1 %v34641_v3  ;;  %25443 = vmatpush3.msra.mxu0 %v29901_v47 }
 0x6e5   :  { %25482 = vmatpush3.msra.mxu1 %v29941_v53  ;;  %25444 = vmatprep.subr.mxu0 %v34641_v3 }
 0x6e6   :  { %25483 = vmatprep.subr.mxu1 %v34641_v3  ;;  %25445 = vmatpush3.msra.mxu0 %v29917_v2 }
 0x6e7   :  { %25484 = vmatpush3.msra.mxu1 %v29952_v57  ;;  %25446 = vmatprep.subr.mxu0 %v34641_v3 }
 0x6e8   :  { %25485 = vmatprep.subr.mxu1 %v34641_v3  ;;  %25447 = vmatpush3.msra.mxu0 %v29934_v1 }
 0x6e9   :  { %25486 = vmatpush3.msra.mxu1 %v29968_v12  ;;  %25448 = vmatprep.subr.mxu0 %v34641_v3 }
 0x6ea   :  { %25487 = vmatprep.subr.mxu1 %v34641_v3  ;;  %25449 = vmatpush3.msra.mxu0 %v29950_v13 }
 0x6eb   :  { %25488 = vmatpush3.msra.mxu1 %v29985_v17  ;;  %25450 = vmatprep.subr.mxu0 %v34641_v3 }
 0x6ec   :  { %25489 = vmatprep.subr.mxu1 %v34641_v3  ;;  %25451 = vmatpush3.msra.mxu0 %v34642_v49 }
 0x6ed   :  { %25490 = vmatpush3.msra.mxu1 %v30001_v62  ;;  %25491 = vmatprep.mubr.msk.f32.mxu1 %vm29465_vm0, %v34641_v3 }
 0x6ee   :  { %25452 = vmatprep.subr.mxu0 %v34641_v3  ;;  %25492 = vmatmul.mubr.f32.vlgmr.msra.gmra.mxu1 %v30288_v31 }
 0x6ef   :  { %25453 = vmatpush3.msra.mxu0 %v34643_v50  ;;  %25460 = vmatprep.mubr.msk.f32.mxu0 %vm29465_vm0, %v34641_v3 }
 0x6f0   :  { %25454 = vmatprep.subr.mxu0 %v34641_v3  ;;  %25501 = vmatprep.subr.mxu1 %v34641_v3 }
 0x6f1   :  { %25455 = vmatpush3.msra.mxu0 %v34644_v42  ;;  %25502 = vmatpush3.msra.mxu1 %v34645_v24  ;;  %v34675_v42 = vld [vmem:[#allocation58_spill] sm:$0xff] }
 0x6f2   :  { %25456 = vmatprep.subr.mxu0 %v34641_v3  ;;  %25503 = vmatprep.subr.mxu1 %v34641_v3 }
 0x6f3   :  { %25457 = vmatpush3.msra.mxu0 %v34646_v59  ;;  %25504 = vmatpush3.msra.mxu1 %v34647_v20 }
 0x6f4   :  { %25458 = vmatprep.subr.mxu0 %v34641_v3  ;;  %25505 = vmatprep.mubr.msk.f32.mxu1 %vm29465_vm0, %v34641_v3 }
 0x6f5   :  { %25459 = vmatpush3.msra.mxu0 %v34671_v63  ;;  %25515 = vmatprep.subr.mxu1 %v34641_v3 }
 0x6f6   :  { %25461 = vmatmul.mubr.f32.vlgmr.msra.gmra.mxu0 %v30288_v31  ;;  %25494 = vmatprep.subr.mxu0 %v34641_v3 }
 0x6f7   :  { %25495 = vmatpush3.msra.mxu0 %v34672_v38  ;;  %25498 = vmatprep.mubr.msk.f32.mxu0 %vm29465_vm0, %v34641_v3 }
 0x6f8   :  { %25496 = vmatprep.subr.mxu0 %v34641_v3 }
 0x6f9   :  { %25497 = vmatpush3.msra.mxu0 %v34673_v25 }
 0x6fa   :  { %25508 = vmatprep.subr.mxu0 %v34641_v3 }
 0x774   :  { %v3259_v32 = vpop.f32.mrf.mxu1 }
 0x776   :  { %v25369_v43 = vpop.f32.mrf.mxu1 }
 0x77c   :  { %v3118_v0 = vpop.f32.mrf.mxu0 }
 0x77d   :  { %v3119_v45 = vadd.f32 %v3118_v0, %v34674_v11  ;;  %v34679_v0 = vld [vmem:[#allocation31_spill] sm:$0xff]  ;;  %v34682_v11 = vld [vmem:[#allocation37_spill] sm:$0xff] }
 0x77e   :  { %v25338_v18 = vpop.f32.mrf.mxu0 }
 0x77f   :  { %v3260_v31 = vadd.f32 %v3259_v32, %v3119_v45  ;;  %v34683_v45 = vld [vmem:[#allocation38_spill] sm:$0xff] }
 0x790   :  { %v3446_v36 = vpop.f32.mrf.mxu1 }
 0x792   :  { %v25431_v41 = vpop.f32.mrf.mxu1 }
 0x799   :  { %v3359_v30 = vpop.f32.mrf.mxu0 }
 0x79a   :  { %v3360_v7 = vadd.f32 %v3359_v30, %v3260_v31  ;;  %v34681_v30 = vld [vmem:[#allocation36_spill] sm:$0xff]  ;;  %v34685_v31 = vld [vmem:[#allocation41_spill] sm:$0xff] }
 0x79b   :  { %v25400_v14 = vpop.f32.mrf.mxu0 }
 0x79c   :  { %v3447_v15 = vadd.f32 %v3446_v36, %v3360_v7  ;;  %v34680_v36 = vld [vmem:[#allocation32_spill] sm:$0xff]  ;;  %v34687_v7 = vld [vmem:[#allocation45_spill] sm:$0xff] }
 0x7ae   :  { %v3644_v46 = vpop.f32.mrf.mxu1 }
 0x7b0   :  { %v25493_v8 = vpop.f32.mrf.mxu1 }
 0x7b1   :  { %v34686_v8 = vld [vmem:[#allocation43_spill] sm:$0xff] }
 0x7b6   :  { %v3559_v21 = vpop.f32.mrf.mxu0 }
 0x7b7   :  { %v3560_v63 = vadd.f32 %v3559_v21, %v3447_v15  ;;  %v34688_v15 = vld [vmem:[#allocation47_spill] sm:$0xff]  ;;  %v34689_v21 = vld [vmem:[#allocation50_spill] sm:$0xff] }
 0x7b8   :  { %v25462_v20 = vpop.f32.mrf.mxu0 }
 0x7b9   :  { %v3645_v59 = vadd.f32 %v3644_v46, %v3560_v63  ;;  %v34677_v20 = vld [vmem:[#allocation30_spill] sm:$0xff]  ;;  %v34678_v63 = vld [vmem:[#allocation35_spill] sm:$0xff]  ;;  %v34684_v46 = vld [vmem:[#allocation40_spill] sm:$0xff] }
 0x7bb   :  { %v3648_v24 = vmul.f32 0.5, %v3645_v59  ;;  %v34676_v59 = vld [vmem:[#allocation28_spill] sm:$0xff] }
 0x7bd   :  { %v30433_v43 = vadd.f32 %v34675_v42, %v3648_v24 }
 0x7bf   :  { %v3651_v18 = vsel %vm72_vm2, %v30433_v43, 0 }
 0x7c0   :  { %v3720_v41 = vand.u32 4294901760, %v3651_v18 }
 0x7c2   :  { %v3721_v14 = vsub.f32 %v3651_v18, %v3720_v41  ;;  %25506 = vmatmul.mubr.f32.vlgmr.msra.gmra.mxu1 %v3720_v41  ;;  %v34690_v18 = vld [vmem:[#allocation51_spill] sm:$0xff] }
 0x7c3   :  { %25516 = vmatpush3.msra.mxu1 %v34672_v38  ;;  %25519 = vmatprep.mubr.msk.f32.mxu1 %vm29465_vm0, %v34641_v3 }
 0x7c4   :  { %25517 = vmatprep.subr.mxu1 %v34641_v3  ;;  %v3722_v32 = vand.u32 4294901760, %v3721_v14 }
 0x7c5   :  { %25518 = vmatpush3.msra.mxu1 %v34673_v25 }
 0x7c6   :  { %25520 = vmatmul.mubr.f32.vlgmr.msra.gmra.mxu1 %v3722_v32  ;;  %25529 = vmatprep.subr.mxu1 %v34641_v3  ;;  %v3723_v42 = vsub.f32 %v3721_v14, %v3722_v32  ;;  %v34693_v32 = vld [vmem:[#allocation56_spill] sm:$0xff] }
 0x7c7   :  { %25530 = vmatpush3.msra.mxu1 %v34672_v38  ;;  %25533 = vmatprep.mubr.msk.f32.mxu1 %vm29465_vm0, %v34641_v3 }
 0x7c8   :  { %25531 = vmatprep.subr.mxu1 %v34641_v3  ;;  %v3724_v24 = vand.u32 4294901760, %v3723_v42 }
 0x7c9   :  { %25532 = vmatpush3.msra.mxu1 %v34673_v25 }
 0x7ca   :  { %25499 = vmatmul.mubr.f32.vlgmr.msra.gmra.mxu0 %v3724_v24  ;;  %25534 = vmatmul.mubr.f32.vlgmr.msra.gmra.mxu1 %v3720_v41 }
 0x7cb   :  { %25509 = vmatpush3.msra.mxu0 %v34676_v59  ;;  %25512 = vmatprep.mubr.msk.f32.mxu0 %vm29465_vm0, %v34641_v3 }
 0x7cc   :  { %25510 = vmatprep.subr.mxu0 %v34641_v3  ;;  %25567 = vmatprep.subr.mxu1 %v34641_v3 }
 0x7cd   :  { %25511 = vmatpush3.msra.mxu0 %v34677_v20  ;;  %25568 = vmatpush3.msra.mxu1 %v34678_v63 }
 0x7ce   :  { %25522 = vmatprep.subr.mxu0 %v34641_v3  ;;  %25513 = vmatmul.mubr.f32.vlgmr.msra.gmra.mxu0 %v3721_v14  ;;  %v34692_v14 = vld [vmem:[#allocation55_spill] sm:$0xff] }
 0x7cf   :  { %25523 = vmatpush3.msra.mxu0 %v34679_v0  ;;  %25526 = vmatprep.mubr.msk.f32.mxu0 %vm29465_vm0, %v34641_v3 }
 0x7d0   :  { %25524 = vmatprep.subr.mxu0 %v34641_v3  ;;  %25569 = vmatprep.subr.mxu1 %v34641_v3 }
 0x7d1   :  { %25525 = vmatpush3.msra.mxu0 %v34680_v36  ;;  %25570 = vmatpush3.msra.mxu1 %v34681_v30 }
 0x7d2   :  { %25527 = vmatmul.mubr.f32.vlgmr.msra.gmra.mxu0 %v3720_v41  ;;  %25571 = vmatprep.subr.mxu1 %v34641_v3  ;;  %v34691_v41 = vld [vmem:[#allocation53_spill] sm:$0xff] }
 0x7d3   :  { %25572 = vmatpush3.msra.mxu1 %v34682_v11  ;;  %25536 = vmatprep.subr.mxu0 %v34641_v3 }
 0x7d4   :  { %25573 = vmatprep.subr.mxu1 %v34641_v3  ;;  %25537 = vmatpush3.msra.mxu0 %v29821_v52 }
 0x7d5   :  { %25574 = vmatpush3.msra.mxu1 %v34683_v45  ;;  %25538 = vmatprep.subr.mxu0 %v34641_v3 }
 0x7d6   :  { %25575 = vmatprep.subr.mxu1 %v34641_v3  ;;  %25539 = vmatpush3.msra.mxu0 %v29826_v55 }
 0x7d7   :  { %25576 = vmatpush3.msra.mxu1 %v34684_v46  ;;  %25540 = vmatprep.subr.mxu0 %v34641_v3 }
 0x7d8   :  { %25577 = vmatprep.subr.mxu1 %v34641_v3  ;;  %25541 = vmatpush3.msra.mxu0 %v29836_v58 }
 0x7d9   :  { %25578 = vmatpush3.msra.mxu1 %v34685_v31  ;;  %25542 = vmatprep.subr.mxu0 %v34641_v3 }
 0x7da   :  { %25579 = vmatprep.subr.mxu1 %v34641_v3  ;;  %25543 = vmatpush3.msra.mxu0 %v29848_v6 }
 0x7db   :  { %25580 = vmatpush3.msra.mxu1 %v34686_v8  ;;  %25544 = vmatprep.subr.mxu0 %v34641_v3 }
 0x7dc   :  { %25581 = vmatprep.subr.mxu1 %v34641_v3  ;;  %25545 = vmatpush3.msra.mxu0 %v29863_v23 }
 0x7dd   :  { %25582 = vmatpush3.msra.mxu1 %v34687_v7  ;;  %25546 = vmatprep.subr.mxu0 %v34641_v3 }
 0x7de   :  { %25583 = vmatprep.subr.mxu1 %v34641_v3  ;;  %25547 = vmatpush3.msra.mxu0 %v29874_v29 }
 0x7df   :  { %25584 = vmatpush3.msra.mxu1 %v34688_v15  ;;  %25548 = vmatprep.subr.mxu0 %v34641_v3 }
 0x7e0   :  { %25585 = vmatprep.subr.mxu1 %v34641_v3  ;;  %25549 = vmatpush3.msra.mxu0 %v29889_v35 }
 0x7e1   :  { %25586 = vmatpush3.msra.mxu1 %v34689_v21  ;;  %25550 = vmatprep.subr.mxu0 %v34641_v3 }
 0x7e2   :  { %25587 = vmatprep.subr.mxu1 %v34641_v3  ;;  %25551 = vmatpush3.msra.mxu0 %v29906_v51 }
 0x7e3   :  { %25588 = vmatpush3.msra.mxu1 %v34690_v18  ;;  %25552 = vmatprep.subr.mxu0 %v34641_v3 }
 0x7e4   :  { %25589 = vmatprep.subr.mxu1 %v34641_v3  ;;  %25553 = vmatpush3.msra.mxu0 %v29922_v16 }
 0x7e5   :  { %25590 = vmatpush3.msra.mxu1 %v34691_v41  ;;  %25554 = vmatprep.subr.mxu0 %v34641_v3 }
 0x7e6   :  { %25591 = vmatprep.subr.mxu1 %v34641_v3  ;;  %25555 = vmatpush3.msra.mxu0 %v29941_v53 }
 0x7e7   :  { %25592 = vmatpush3.msra.mxu1 %v34692_v14  ;;  %25556 = vmatprep.subr.mxu0 %v34641_v3 }
 0x7e8   :  { %25593 = vmatprep.subr.mxu1 %v34641_v3  ;;  %25595 = vmatprep.mubr.msk.f32.mxu1 %vm29465_vm0, %v34641_v3 }
 0x7e9   :  { %25594 = vmatpush3.msra.mxu1 %v34693_v32  ;;  %25557 = vmatpush3.msra.mxu0 %v29952_v57 }
 0x7ea   :  { %25629 = vmatprep.subr.mxu1 %v34641_v3  ;;  %25558 = vmatprep.subr.mxu0 %v34641_v3 }
 0x7eb   :  { %25559 = vmatpush3.msra.mxu0 %v29968_v12  ;;  %25564 = vmatprep.mubr.msk.f32.mxu0 %vm29465_vm0, %v34641_v3 }
 0x7ec   :  { %25560 = vmatprep.subr.mxu0 %v34641_v3 }
 0x7ed   :  { %25561 = vmatpush3.msra.mxu0 %v29985_v17 }
 0x7ee   :  { %25562 = vmatprep.subr.mxu0 %v34641_v3 }
 0x7ef   :  { %25563 = vmatpush3.msra.mxu0 %v30001_v62 }
 0x7f0   :  { %25598 = vmatprep.subr.mxu0 %v34641_v3 }
 0x882   :  { %v3807_v42 = vpop.f32.mrf.mxu1 }
 0x884   :  { %v25507_v24 = vpop.f32.mrf.mxu1 }
 0x886   :  { %v3958_v32 = vpop.f32.mrf.mxu1 }
 0x888   :  { %v25521_v14 = vpop.f32.mrf.mxu1 }
 0x88a   :  { %v3726_v41 = vpop.f32.mrf.mxu0  ;;  %v4108_v18 = vpop.f32.mrf.mxu1 }
 0x88b   :  { %v3808_v7 = vadd.f32 %v3807_v42, %v3726_v41 }
 0x88c   :  { %v25500_v21 = vpop.f32.mrf.mxu0  ;;  %v25535_v15 = vpop.f32.mrf.mxu1 }
 0x88e   :  { %v3883_v8 = vpop.f32.mrf.mxu0 }
 0x88f   :  { %v3884_v31 = vadd.f32 %v3883_v8, %v3808_v7 }
 0x890   :  { %v25514_v46 = vpop.f32.mrf.mxu0 }
 0x891   :  { %v3959_v45 = vadd.f32 %v3958_v32, %v3884_v31  ;;  %v34698_v46 = vld [vmem:[#allocation54_spill] sm:$0xff] }
 0x892   :  { %v4035_v11 = vpop.f32.mrf.mxu0 }
 0x893   :  { %v4036_v30 = vadd.f32 %v4035_v11, %v3959_v45  ;;  %v34696_v11 = vld [vmem:[#allocation52_spill] sm:$0xff]  ;;  %v34697_v45 = vld [vmem:[#allocation34_spill] sm:$0xff] }
 0x894   :  { %v25528_v36 = vpop.f32.mrf.mxu0 }
 0x895   :  { %v4109_v0 = vadd.f32 %v4108_v18, %v4036_v30  ;;  %v34695_v30 = vld [vmem:[#allocation33_spill] sm:$0xff] }
 0x897   :  { %v4112_v63 = vmul.f32 %v4109_v0, %v30045_v27  ;;  %v34694_v0 = vld [vmem:[#allocation49_spill] sm:$0xff] }
 0x899   :  { %v4114_v20 = vsel %vm1947_vm8, %v4112_v63, 0 }
 0x89a   :  { %v30523_v24 = vand.u32 4294901760, %v4114_v20 }
 0x89c   :  { %v30526_v14 = vsub.f32 %v4114_v20, %v30523_v24  ;;  %25596 = vmatmul.mubr.f32.vlgmr.msra.gmra.mxu1 %v30523_v24 }
 0x89d   :  { %25630 = vmatpush3.msra.mxu1 %v29821_v52  ;;  %25657 = vmatprep.mubr.msk.f32.mxu1 %vm29465_vm0, %v34641_v3 }
 0x89e   :  { %25631 = vmatprep.subr.mxu1 %v34641_v3  ;;  %v4197_v36 = vand.u32 4294901760, %v30526_v14 }
 0x89f   :  { %25632 = vmatpush3.msra.mxu1 %v29826_v55 }
 0x8a0   :  { %25633 = vmatprep.subr.mxu1 %v34641_v3  ;;  %v4198_v63 = vsub.f32 %v30526_v14, %v4197_v36 }
 0x8a1   :  { %25634 = vmatpush3.msra.mxu1 %v29836_v58 }
 0x8a2   :  { %25635 = vmatprep.subr.mxu1 %v34641_v3  ;;  %v4199_v20 = vand.u32 4294901760, %v4198_v63 }
 0x8a3   :  { %25636 = vmatpush3.msra.mxu1 %v29848_v6 }
 0x8a4   :  { %25637 = vmatprep.subr.mxu1 %v34641_v3  ;;  %25565 = vmatmul.mubr.f32.vlgmr.msra.gmra.mxu0 %v4199_v20 }
 0x8a5   :  { %25599 = vmatpush3.msra.mxu0 %v29824_v54  ;;  %25638 = vmatpush3.msra.mxu1 %v29863_v23 }
 0x8a6   :  { %25600 = vmatprep.subr.mxu0 %v34641_v3  ;;  %25639 = vmatprep.subr.mxu1 %v34641_v3 }
 0x8a7   :  { %25601 = vmatpush3.msra.mxu0 %v29834_v56  ;;  %25640 = vmatpush3.msra.mxu1 %v29874_v29 }
 0x8a8   :  { %25602 = vmatprep.subr.mxu0 %v34641_v3  ;;  %25641 = vmatprep.subr.mxu1 %v34641_v3 }
 0x8a9   :  { %25603 = vmatpush3.msra.mxu0 %v29846_v5  ;;  %25642 = vmatpush3.msra.mxu1 %v29889_v35 }
 0x8aa   :  { %25604 = vmatprep.subr.mxu0 %v34641_v3  ;;  %25643 = vmatprep.subr.mxu1 %v34641_v3 }
 0x8ab   :  { %25605 = vmatpush3.msra.mxu0 %v29860_v22  ;;  %25644 = vmatpush3.msra.mxu1 %v29906_v51 }
 0x8ac   :  { %25606 = vmatprep.subr.mxu0 %v34641_v3  ;;  %25645 = vmatprep.subr.mxu1 %v34641_v3 }
 0x8ad   :  { %25607 = vmatpush3.msra.mxu0 %v29878_v10  ;;  %25646 = vmatpush3.msra.mxu1 %v29922_v16 }
 0x8ae   :  { %25608 = vmatprep.subr.mxu0 %v34641_v3  ;;  %25647 = vmatprep.subr.mxu1 %v34641_v3 }
 0x8af   :  { %25609 = vmatpush3.msra.mxu0 %v29887_v34  ;;  %25648 = vmatpush3.msra.mxu1 %v29941_v53 }
 0x8b0   :  { %25610 = vmatprep.subr.mxu0 %v34641_v3  ;;  %25649 = vmatprep.subr.mxu1 %v34641_v3 }
 0x8b1   :  { %25611 = vmatpush3.msra.mxu0 %v29904_v48  ;;  %25650 = vmatpush3.msra.mxu1 %v29952_v57 }
 0x8b2   :  { %25612 = vmatprep.subr.mxu0 %v34641_v3  ;;  %25651 = vmatprep.subr.mxu1 %v34641_v3 }
 0x8b3   :  { %25613 = vmatpush3.msra.mxu0 %v29920_v9  ;;  %25652 = vmatpush3.msra.mxu1 %v29968_v12 }
 0x8b4   :  { %25614 = vmatprep.subr.mxu0 %v34641_v3  ;;  %25653 = vmatprep.subr.mxu1 %v34641_v3 }
 0x8b5   :  { %25615 = vmatpush3.msra.mxu0 %v29937_v39  ;;  %25654 = vmatpush3.msra.mxu1 %v29985_v17 }
 0x8b6   :  { %25616 = vmatprep.subr.mxu0 %v34641_v3  ;;  %25655 = vmatprep.subr.mxu1 %v34641_v3 }
 0x8b7   :  { %25617 = vmatpush3.msra.mxu0 %v29957_v40  ;;  %25656 = vmatpush3.msra.mxu1 %v30001_v62 }
 0x8b8   :  { %25618 = vmatprep.subr.mxu0 %v34641_v3  ;;  %25658 = vmatmul.mubr.f32.vlgmr.msra.gmra.mxu1 %v4197_v36 }
 0x8b9   :  { %25691 = vmatprep.subr.mxu1 %v34641_v3  ;;  %25619 = vmatpush3.msra.mxu0 %v29966_v44 }
 0x8ba   :  { %25692 = vmatpush3.msra.mxu1 %v29821_v52  ;;  %25620 = vmatprep.subr.mxu0 %v34641_v3 }
 0x8bb   :  { %25693 = vmatprep.subr.mxu1 %v34641_v3  ;;  %25621 = vmatpush3.msra.mxu0 %v29983_v26 }
 0x8bc   :  { %25694 = vmatpush3.msra.mxu1 %v29826_v55  ;;  %25622 = vmatprep.subr.mxu0 %v34641_v3 }
 0x8bd   :  { %25695 = vmatprep.subr.mxu1 %v34641_v3  ;;  %25623 = vmatpush3.msra.mxu0 %v29999_v61 }
 0x8be   :  { %25696 = vmatpush3.msra.mxu1 %v29836_v58  ;;  %25624 = vmatprep.subr.mxu0 %v34641_v3 }
 0x8bf   :  { %25697 = vmatprep.subr.mxu1 %v34641_v3  ;;  %25625 = vmatpush3.msra.mxu0 %v30017_v33 }
 0x8c0   :  { %25626 = vmatprep.mubr.msk.f32.mxu0 %vm29465_vm0, %v34641_v3  ;;  %25698 = vmatpush3.msra.mxu1 %v29848_v6 }
 0x8c1   :  { %25627 = vmatmul.mubr.f32.vlgmr.msra.gmra.mxu0 %v30526_v14  ;;  %25660 = vmatprep.subr.mxu0 %v34641_v3 }
 0x8c2   :  { %25699 = vmatprep.subr.mxu1 %v34641_v3  ;;  %25661 = vmatpush3.msra.mxu0 %v29831_v60 }
 0x8c3   :  { %25700 = vmatpush3.msra.mxu1 %v29863_v23  ;;  %25662 = vmatprep.subr.mxu0 %v34641_v3 }
 0x8c4   :  { %25701 = vmatprep.subr.mxu1 %v34641_v3  ;;  %25663 = vmatpush3.msra.mxu0 %v29843_v4 }
 0x8c5   :  { %25702 = vmatpush3.msra.mxu1 %v29874_v29  ;;  %25664 = vmatprep.subr.mxu0 %v34641_v3 }
 0x8c6   :  { %25703 = vmatprep.subr.mxu1 %v34641_v3  ;;  %25665 = vmatpush3.msra.mxu0 %v29857_v19 }
 0x8c7   :  { %25704 = vmatpush3.msra.mxu1 %v29889_v35  ;;  %25666 = vmatprep.subr.mxu0 %v34641_v3 }
 0x8c8   :  { %25705 = vmatprep.subr.mxu1 %v34641_v3  ;;  %25667 = vmatpush3.msra.mxu0 %v29872_v28 }
 0x8c9   :  { %25706 = vmatpush3.msra.mxu1 %v29906_v51  ;;  %25668 = vmatprep.subr.mxu0 %v34641_v3 }
 0x8ca   :  { %25707 = vmatprep.subr.mxu1 %v34641_v3  ;;  %25669 = vmatpush3.msra.mxu0 %v29894_v37 }
 0x8cb   :  { %25708 = vmatpush3.msra.mxu1 %v29922_v16  ;;  %25670 = vmatprep.subr.mxu0 %v34641_v3 }
 0x8cc   :  { %25709 = vmatprep.subr.mxu1 %v34641_v3  ;;  %25671 = vmatpush3.msra.mxu0 %v29901_v47 }
 0x8cd   :  { %25710 = vmatpush3.msra.mxu1 %v29941_v53  ;;  %25672 = vmatprep.subr.mxu0 %v34641_v3 }
 0x8ce   :  { %25711 = vmatprep.subr.mxu1 %v34641_v3  ;;  %25673 = vmatpush3.msra.mxu0 %v29917_v2 }
 0x8cf   :  { %25712 = vmatpush3.msra.mxu1 %v29952_v57  ;;  %25674 = vmatprep.subr.mxu0 %v34641_v3 }
 0x8d0   :  { %25713 = vmatprep.subr.mxu1 %v34641_v3  ;;  %25675 = vmatpush3.msra.mxu0 %v29934_v1 }
 0x8d1   :  { %25714 = vmatpush3.msra.mxu1 %v29968_v12  ;;  %25676 = vmatprep.subr.mxu0 %v34641_v3 }
 0x8d2   :  { %25715 = vmatprep.subr.mxu1 %v34641_v3  ;;  %25677 = vmatpush3.msra.mxu0 %v29950_v13 }
 0x8d3   :  { %25716 = vmatpush3.msra.mxu1 %v29985_v17  ;;  %25678 = vmatprep.subr.mxu0 %v34641_v3 }
 0x8d4   :  { %25717 = vmatprep.subr.mxu1 %v34641_v3  ;;  %25679 = vmatpush3.msra.mxu0 %v34642_v49 }
 0x8d5   :  { %25718 = vmatpush3.msra.mxu1 %v30001_v62  ;;  %25719 = vmatprep.mubr.msk.f32.mxu1 %vm29465_vm0, %v34641_v3 }
 0x8d6   :  { %25680 = vmatprep.subr.mxu0 %v34641_v3  ;;  %25720 = vmatmul.mubr.f32.vlgmr.msra.gmra.mxu1 %v30523_v24 }
 0x8d7   :  { %25681 = vmatpush3.msra.mxu0 %v34643_v50  ;;  %25688 = vmatprep.mubr.msk.f32.mxu0 %vm29465_vm0, %v34641_v3 }
 0x8d8   :  { %25682 = vmatprep.subr.mxu0 %v34641_v3  ;;  %25729 = vmatprep.subr.mxu1 %v34641_v3 }
 0x8d9   :  { %25683 = vmatpush3.msra.mxu0 %v34694_v0  ;;  %25730 = vmatpush3.msra.mxu1 %v34695_v30 }
 0x8da   :  { %25684 = vmatprep.subr.mxu0 %v34641_v3  ;;  %25731 = vmatprep.subr.mxu1 %v34641_v3 }
 0x8db   :  { %25685 = vmatpush3.msra.mxu0 %v34696_v11  ;;  %25732 = vmatpush3.msra.mxu1 %v34697_v45 }
 0x8dc   :  { %25686 = vmatprep.subr.mxu0 %v34641_v3  ;;  %25733 = vmatprep.mubr.msk.f32.mxu1 %vm29465_vm0, %v34641_v3 }
 0x8dd   :  { %25687 = vmatpush3.msra.mxu0 %v34698_v46  ;;  %25743 = vmatprep.subr.mxu1 %v34641_v3 }
 0x8de   :  { %25689 = vmatmul.mubr.f32.vlgmr.msra.gmra.mxu0 %v30523_v24  ;;  %25722 = vmatprep.subr.mxu0 %v34641_v3 }
 0x8df   :  { %25723 = vmatpush3.msra.mxu0 %v34672_v38  ;;  %25726 = vmatprep.mubr.msk.f32.mxu0 %vm29465_vm0, %v34641_v3 }
 0x8e0   :  { %25724 = vmatprep.subr.mxu0 %v34641_v3 }
 0x8e1   :  { %25725 = vmatpush3.msra.mxu0 %v34673_v25 }
 0x8e2   :  { %25736 = vmatprep.subr.mxu0 %v34641_v3 }
 0x95c   :  { %v4342_v31 = vpop.f32.mrf.mxu1 }
 0x95e   :  { %v25597_v8 = vpop.f32.mrf.mxu1 }
 0x964   :  { %v4201_v7 = vpop.f32.mrf.mxu0 }
 0x965   :  { %v4343_v24 = vadd.f32 %v4342_v31, %v4201_v7  ;;  %v34700_v7 = vld [vmem:[#allocation35_spill] sm:$0xff] }
 0x966   :  { %v25566_v15 = vpop.f32.mrf.mxu0 }
 0x978   :  { %v4529_v21 = vpop.f32.mrf.mxu1 }
 0x97a   :  { %v25659_v18 = vpop.f32.mrf.mxu1 }
 0x97b   :  { %v34702_v18 = vld [vmem:[#allocation32_spill] sm:$0xff] }
 0x981   :  { %v4442_v41 = vpop.f32.mrf.mxu0 }
 0x982   :  { %v4443_v36 = vadd.f32 %v4442_v41, %v4343_v24  ;;  %v34703_v41 = vld [vmem:[#allocation36_spill] sm:$0xff]  ;;  %v34707_v24 = vld [vmem:[#allocation41_spill] sm:$0xff] }
 0x983   :  { %v25628_v32 = vpop.f32.mrf.mxu0 }
 0x984   :  { %v4530_v63 = vadd.f32 %v4529_v21, %v4443_v36  ;;  %v34701_v21 = vld [vmem:[#allocation31_spill] sm:$0xff]  ;;  %v34704_v32 = vld [vmem:[#allocation37_spill] sm:$0xff] }
 0x985   :  { %v34709_v36 = vld [vmem:[#allocation45_spill] sm:$0xff] }
 0x996   :  { %v4727_v42 = vpop.f32.mrf.mxu1 }
 0x998   :  { %v25721_v14 = vpop.f32.mrf.mxu1 }
 0x999   :  { %v34708_v14 = vld [vmem:[#allocation43_spill] sm:$0xff] }
 0x99e   :  { %v4642_v20 = vpop.f32.mrf.mxu0 }
 0x99f   :  { %v4643_v45 = vadd.f32 %v4642_v20, %v4530_v63  ;;  %v34710_v63 = vld [vmem:[#allocation47_spill] sm:$0xff]  ;;  %v34711_v20 = vld [vmem:[#allocation50_spill] sm:$0xff] }
 0x9a0   :  { %v25690_v30 = vpop.f32.mrf.mxu0 }
 0x9a1   :  { %v30666_v46 = vadd.f32 %v4727_v42, %v4643_v45  ;;  %v34699_v45 = vld [vmem:[#allocation30_spill] sm:$0xff]  ;;  %v34706_v42 = vld [vmem:[#allocation40_spill] sm:$0xff] }
 0x9a3   :  { %v4731_v11 = vadd.f32 %v30666_v46, %v30433_v43 }
 0x9a5   :  { %v4733_v8 = vsel %vm72_vm2, %v4731_v11, 0 }
 0x9a6   :  { %v4802_v15 = vand.u32 4294901760, %v4733_v8 }
 0x9a8   :  { %v4803_v0 = vsub.f32 %v4733_v8, %v4802_v15  ;;  %25734 = vmatmul.mubr.f32.vlgmr.msra.gmra.mxu1 %v4802_v15  ;;  %v34712_v8 = vld [vmem:[#allocation51_spill] sm:$0xff] }
 0x9a9   :  { %25744 = vmatpush3.msra.mxu1 %v34672_v38  ;;  %25747 = vmatprep.mubr.msk.f32.mxu1 %vm29465_vm0, %v34641_v3 }
 0x9aa   :  { %25745 = vmatprep.subr.mxu1 %v34641_v3  ;;  %v4804_v31 = vand.u32 4294901760, %v4803_v0 }
 0x9ab   :  { %25746 = vmatpush3.msra.mxu1 %v34673_v25 }
 0x9ac   :  { %25748 = vmatmul.mubr.f32.vlgmr.msra.gmra.mxu1 %v4804_v31  ;;  %25757 = vmatprep.subr.mxu1 %v34641_v3  ;;  %v4805_v30 = vsub.f32 %v4803_v0, %v4804_v31  ;;  %v34714_v31 = vld [vmem:[#allocation55_spill] sm:$0xff] }
 0x9ad   :  { %25758 = vmatpush3.msra.mxu1 %v34672_v38  ;;  %25761 = vmatprep.mubr.msk.f32.mxu1 %vm29465_vm0, %v34641_v3 }
 0x9ae   :  { %25759 = vmatprep.subr.mxu1 %v34641_v3  ;;  %v4806_v11 = vand.u32 4294901760, %v4805_v30  ;;  %v34715_v30 = vld [vmem:[#allocation56_spill] sm:$0xff] }
 0x9af   :  { %25760 = vmatpush3.msra.mxu1 %v34673_v25 }
 0x9b0   :  { %25727 = vmatmul.mubr.f32.vlgmr.msra.gmra.mxu0 %v4806_v11  ;;  %25762 = vmatmul.mubr.f32.vlgmr.msra.gmra.mxu1 %v4802_v15 }
 0x9b1   :  { %25737 = vmatpush3.msra.mxu0 %v34676_v59  ;;  %25740 = vmatprep.mubr.msk.f32.mxu0 %vm29465_vm0, %v34641_v3 }
 0x9b2   :  { %25738 = vmatprep.subr.mxu0 %v34641_v3  ;;  %25795 = vmatprep.subr.mxu1 %v34641_v3 }
 0x9b3   :  { %25739 = vmatpush3.msra.mxu0 %v34699_v45  ;;  %25796 = vmatpush3.msra.mxu1 %v34700_v7 }
 0x9b4   :  { %25750 = vmatprep.subr.mxu0 %v34641_v3  ;;  %25741 = vmatmul.mubr.f32.vlgmr.msra.gmra.mxu0 %v4803_v0  ;;  %v34705_v0 = vld [vmem:[#allocation38_spill] sm:$0xff] }
 0x9b5   :  { %25751 = vmatpush3.msra.mxu0 %v34701_v21  ;;  %25754 = vmatprep.mubr.msk.f32.mxu0 %vm29465_vm0, %v34641_v3 }
 0x9b6   :  { %25752 = vmatprep.subr.mxu0 %v34641_v3  ;;  %25797 = vmatprep.subr.mxu1 %v34641_v3 }
 0x9b7   :  { %25753 = vmatpush3.msra.mxu0 %v34702_v18  ;;  %25798 = vmatpush3.msra.mxu1 %v34703_v41 }
 0x9b8   :  { %25755 = vmatmul.mubr.f32.vlgmr.msra.gmra.mxu0 %v4802_v15  ;;  %25799 = vmatprep.subr.mxu1 %v34641_v3  ;;  %v34713_v15 = vld [vmem:[#allocation53_spill] sm:$0xff] }
 0x9b9   :  { %25800 = vmatpush3.msra.mxu1 %v34704_v32  ;;  %25764 = vmatprep.subr.mxu0 %v34641_v3 }
 0x9ba   :  { %25801 = vmatprep.subr.mxu1 %v34641_v3  ;;  %25765 = vmatpush3.msra.mxu0 %v29821_v52 }
 0x9bb   :  { %25802 = vmatpush3.msra.mxu1 %v34705_v0  ;;  %25766 = vmatprep.subr.mxu0 %v34641_v3 }
 0x9bc   :  { %25803 = vmatprep.subr.mxu1 %v34641_v3  ;;  %25767 = vmatpush3.msra.mxu0 %v29826_v55 }
 0x9bd   :  { %25804 = vmatpush3.msra.mxu1 %v34706_v42  ;;  %25768 = vmatprep.subr.mxu0 %v34641_v3 }
 0x9be   :  { %25805 = vmatprep.subr.mxu1 %v34641_v3  ;;  %25769 = vmatpush3.msra.mxu0 %v29836_v58 }
 0x9bf   :  { %25806 = vmatpush3.msra.mxu1 %v34707_v24  ;;  %25770 = vmatprep.subr.mxu0 %v34641_v3 }
 0x9c0   :  { %25807 = vmatprep.subr.mxu1 %v34641_v3  ;;  %25771 = vmatpush3.msra.mxu0 %v29848_v6 }
 0x9c1   :  { %25808 = vmatpush3.msra.mxu1 %v34708_v14  ;;  %25772 = vmatprep.subr.mxu0 %v34641_v3 }
 0x9c2   :  { %25809 = vmatprep.subr.mxu1 %v34641_v3  ;;  %25773 = vmatpush3.msra.mxu0 %v29863_v23 }
 0x9c3   :  { %25810 = vmatpush3.msra.mxu1 %v34709_v36  ;;  %25774 = vmatprep.subr.mxu0 %v34641_v3 }
 0x9c4   :  { %25811 = vmatprep.subr.mxu1 %v34641_v3  ;;  %25775 = vmatpush3.msra.mxu0 %v29874_v29 }
 0x9c5   :  { %25812 = vmatpush3.msra.mxu1 %v34710_v63  ;;  %25776 = vmatprep.subr.mxu0 %v34641_v3 }
 0x9c6   :  { %25813 = vmatprep.subr.mxu1 %v34641_v3  ;;  %25777 = vmatpush3.msra.mxu0 %v29889_v35 }
 0x9c7   :  { %25814 = vmatpush3.msra.mxu1 %v34711_v20  ;;  %25778 = vmatprep.subr.mxu0 %v34641_v3 }
 0x9c8   :  { %25815 = vmatprep.subr.mxu1 %v34641_v3  ;;  %25779 = vmatpush3.msra.mxu0 %v29906_v51 }
 0x9c9   :  { %25816 = vmatpush3.msra.mxu1 %v34712_v8  ;;  %25780 = vmatprep.subr.mxu0 %v34641_v3 }
 0x9ca   :  { %25817 = vmatprep.subr.mxu1 %v34641_v3  ;;  %25781 = vmatpush3.msra.mxu0 %v29922_v16 }
 0x9cb   :  { %25818 = vmatpush3.msra.mxu1 %v34713_v15  ;;  %25782 = vmatprep.subr.mxu0 %v34641_v3 }
 0x9cc   :  { %25819 = vmatprep.subr.mxu1 %v34641_v3  ;;  %25783 = vmatpush3.msra.mxu0 %v29941_v53 }
 0x9cd   :  { %25820 = vmatpush3.msra.mxu1 %v34714_v31  ;;  %25784 = vmatprep.subr.mxu0 %v34641_v3 }
 0x9ce   :  { %25821 = vmatprep.subr.mxu1 %v34641_v3  ;;  %25823 = vmatprep.mubr.msk.f32.mxu1 %vm29465_vm0, %v34641_v3 }
 0x9cf   :  { %25822 = vmatpush3.msra.mxu1 %v34715_v30  ;;  %25785 = vmatpush3.msra.mxu0 %v29952_v57 }
 0x9d0   :  { %25857 = vmatprep.subr.mxu1 %v34641_v3  ;;  %25786 = vmatprep.subr.mxu0 %v34641_v3 }
 0x9d1   :  { %25787 = vmatpush3.msra.mxu0 %v29968_v12  ;;  %25792 = vmatprep.mubr.msk.f32.mxu0 %vm29465_vm0, %v34641_v3 }
 0x9d2   :  { %25788 = vmatprep.subr.mxu0 %v34641_v3 }
 0x9d3   :  { %25789 = vmatpush3.msra.mxu0 %v29985_v17 }
 0x9d4   :  { %25790 = vmatprep.subr.mxu0 %v34641_v3 }
 0x9d5   :  { %25791 = vmatpush3.msra.mxu0 %v30001_v62 }
 0x9d6   :  { %25826 = vmatprep.subr.mxu0 %v34641_v3 }
 0xa68   :  { %v4889_v11 = vpop.f32.mrf.mxu1 }
 0xa6a   :  { %v25735_v30 = vpop.f32.mrf.mxu1 }
 0xa6c   :  { %v5040_v31 = vpop.f32.mrf.mxu1 }
 0xa6e   :  { %v25749_v15 = vpop.f32.mrf.mxu1 }
 0xa70   :  { %v4808_v8 = vpop.f32.mrf.mxu0  ;;  %v5190_v20 = vpop.f32.mrf.mxu1 }
 0xa71   :  { %v4890_v14 = vadd.f32 %v4889_v11, %v4808_v8 }
 0xa72   :  { %v25728_v63 = vpop.f32.mrf.mxu0  ;;  %v25763_v36 = vpop.f32.mrf.mxu1 }
 0xa74   :  { %v4965_v24 = vpop.f32.mrf.mxu0 }
 0xa75   :  { %v4966_v42 = vadd.f32 %v4965_v24, %v4890_v14 }
 0xa76   :  { %v25742_v0 = vpop.f32.mrf.mxu0 }
 0xa77   :  { %v5041_v32 = vadd.f32 %v5040_v31, %v4966_v42  ;;  %v5815_v0 = vld [vmem:[#allocation2 + $0x88] sm:$0xff] }
 0xa78   :  { %v5117_v41 = vpop.f32.mrf.mxu0  ;;  %v30897_v24 = vand.u32 4294901760, %v5815_v0 }
 0xa79   :  { %v5118_v7 = vadd.f32 %v5117_v41, %v5041_v32  ;;  %v5816_v41 = vld [vmem:[#allocation2 + $0x90] sm:$0xff] }
 0xa7a   :  { %v25756_v18 = vpop.f32.mrf.mxu0  ;;  %v30892_v32 = vand.u32 4294901760, %v5816_v41  ;;  %34721 = vst [vmem:[#allocation59_spill] sm:$0xff] %v30897_v24  ;;  %v30905_v36 = vsub.f32 %v5815_v0, %v30897_v24 }
 0xa7b   :  { %v5191_v21 = vadd.f32 %v5190_v20, %v5118_v7  ;;  %v34718_v18 = vld [vmem:[#allocation54_spill] sm:$0xff] }
 0xa7c   :  { %34719 = vst [vmem:[#allocation57_spill] sm:$0xff] %v30892_v32  ;;  %v30895_v42 = vsub.f32 %v5816_v41, %v30892_v32  ;;  %34723 = vst [vmem:[#allocation61_spill] sm:$0xff] %v30905_v36  ;;  %v30912_v20 = vand.u32 4294901760, %v30905_v36 }
 0xa7d   :  { %v5194_v45 = vmul.f32 %v5191_v21, %v30045_v27  ;;  %v34717_v21 = vld [vmem:[#allocation52_spill] sm:$0xff] }
 0xa7e   :  { %34720 = vst [vmem:[#allocation58_spill] sm:$0xff] %v30895_v42  ;;  %v30902_v14 = vand.u32 4294901760, %v30895_v42  ;;  %34724 = vst [vmem:[#allocation62_spill] sm:$0xff] %v30912_v20  ;;  %v5936_v31 = vsub.f32 %v30905_v36, %v30912_v20 }
 0xa7f   :  { %v5196_v59 = vsel %vm1947_vm8, %v5194_v45, 0  ;;  %v34716_v45 = vld [vmem:[#allocation49_spill] sm:$0xff] }
 0xa80   :  { %v30757_v30 = vand.u32 4294901760, %v5196_v59  ;;  %34722 = vst [vmem:[#allocation60_spill] sm:$0xff] %v30902_v14  ;;  %v5929_v63 = vsub.f32 %v30895_v42, %v30902_v14  ;;  %v30919_v11 = vand.u32 4294901760, %v5936_v31 }
 0xa82   :  { %v30760_v15 = vsub.f32 %v5196_v59, %v30757_v30  ;;  %25824 = vmatmul.mubr.f32.vlgmr.msra.gmra.mxu1 %v30757_v30  ;;  %v30914_v8 = vand.u32 4294901760, %v5929_v63  ;;  %34726 = vst [vmem:[#allocation64_spill] sm:$0xff] %v30919_v11 }
 0xa83   :  { %25858 = vmatpush3.msra.mxu1 %v29821_v52  ;;  %25885 = vmatprep.mubr.msk.f32.mxu1 %vm29465_vm0, %v34641_v3 }
 0xa84   :  { %25859 = vmatprep.subr.mxu1 %v34641_v3  ;;  %v5279_v7 = vand.u32 4294901760, %v30760_v15  ;;  %34725 = vst [vmem:[#allocation63_spill] sm:$0xff] %v30914_v8 }
 0xa85   :  { %25860 = vmatpush3.msra.mxu1 %v29826_v55 }
 0xa86   :  { %25861 = vmatprep.subr.mxu1 %v34641_v3  ;;  %v5280_v27 = vsub.f32 %v30760_v15, %v5279_v7 }
 0xa87   :  { %25862 = vmatpush3.msra.mxu1 %v29836_v58 }
 0xa88   :  { %25863 = vmatprep.subr.mxu1 %v34641_v3  ;;  %v5281_v59 = vand.u32 4294901760, %v5280_v27 }
 0xa89   :  { %25864 = vmatpush3.msra.mxu1 %v29848_v6 }
 0xa8a   :  { %25865 = vmatprep.subr.mxu1 %v34641_v3  ;;  %25793 = vmatmul.mubr.f32.vlgmr.msra.gmra.mxu0 %v5281_v59 }
 0xa8b   :  { %25827 = vmatpush3.msra.mxu0 %v29824_v54  ;;  %25866 = vmatpush3.msra.mxu1 %v29863_v23 }
 0xa8c   :  { %25828 = vmatprep.subr.mxu0 %v34641_v3  ;;  %25867 = vmatprep.subr.mxu1 %v34641_v3 }
 0xa8d   :  { %25829 = vmatpush3.msra.mxu0 %v29834_v56  ;;  %25868 = vmatpush3.msra.mxu1 %v29874_v29 }
 0xa8e   :  { %25830 = vmatprep.subr.mxu0 %v34641_v3  ;;  %25869 = vmatprep.subr.mxu1 %v34641_v3 }
 0xa8f   :  { %25831 = vmatpush3.msra.mxu0 %v29846_v5  ;;  %25870 = vmatpush3.msra.mxu1 %v29889_v35 }
 0xa90   :  { %25832 = vmatprep.subr.mxu0 %v34641_v3  ;;  %25871 = vmatprep.subr.mxu1 %v34641_v3 }
 0xa91   :  { %25833 = vmatpush3.msra.mxu0 %v29860_v22  ;;  %25872 = vmatpush3.msra.mxu1 %v29906_v51 }
 0xa92   :  { %25834 = vmatprep.subr.mxu0 %v34641_v3  ;;  %25873 = vmatprep.subr.mxu1 %v34641_v3 }
 0xa93   :  { %25835 = vmatpush3.msra.mxu0 %v29878_v10  ;;  %25874 = vmatpush3.msra.mxu1 %v29922_v16 }
 0xa94   :  { %25836 = vmatprep.subr.mxu0 %v34641_v3  ;;  %25875 = vmatprep.subr.mxu1 %v34641_v3 }
 0xa95   :  { %25837 = vmatpush3.msra.mxu0 %v29887_v34  ;;  %25876 = vmatpush3.msra.mxu1 %v29941_v53 }
 0xa96   :  { %25838 = vmatprep.subr.mxu0 %v34641_v3  ;;  %25877 = vmatprep.subr.mxu1 %v34641_v3 }
 0xa97   :  { %25839 = vmatpush3.msra.mxu0 %v29904_v48  ;;  %25878 = vmatpush3.msra.mxu1 %v29952_v57 }
 0xa98   :  { %25840 = vmatprep.subr.mxu0 %v34641_v3  ;;  %25879 = vmatprep.subr.mxu1 %v34641_v3 }
 0xa99   :  { %25841 = vmatpush3.msra.mxu0 %v29920_v9  ;;  %25880 = vmatpush3.msra.mxu1 %v29968_v12 }
 0xa9a   :  { %25842 = vmatprep.subr.mxu0 %v34641_v3  ;;  %25881 = vmatprep.subr.mxu1 %v34641_v3 }
 0xa9b   :  { %25843 = vmatpush3.msra.mxu0 %v29937_v39  ;;  %25882 = vmatpush3.msra.mxu1 %v29985_v17 }
 0xa9c   :  { %25844 = vmatprep.subr.mxu0 %v34641_v3  ;;  %25883 = vmatprep.subr.mxu1 %v34641_v3 }
 0xa9d   :  { %25845 = vmatpush3.msra.mxu0 %v29957_v40  ;;  %25884 = vmatpush3.msra.mxu1 %v30001_v62 }
 0xa9e   :  { %25846 = vmatprep.subr.mxu0 %v34641_v3  ;;  %25886 = vmatmul.mubr.f32.vlgmr.msra.gmra.mxu1 %v5279_v7 }
 0xa9f   :  { %25919 = vmatprep.subr.mxu1 %v34641_v3  ;;  %25847 = vmatpush3.msra.mxu0 %v29966_v44 }
 0xaa0   :  { %25920 = vmatpush3.msra.mxu1 %v29821_v52  ;;  %25848 = vmatprep.subr.mxu0 %v34641_v3 }
 0xaa1   :  { %25921 = vmatprep.subr.mxu1 %v34641_v3  ;;  %25849 = vmatpush3.msra.mxu0 %v29983_v26 }
 0xaa2   :  { %25922 = vmatpush3.msra.mxu1 %v29826_v55  ;;  %25850 = vmatprep.subr.mxu0 %v34641_v3 }
 0xaa3   :  { %25923 = vmatprep.subr.mxu1 %v34641_v3  ;;  %25851 = vmatpush3.msra.mxu0 %v29999_v61 }
 0xaa4   :  { %25924 = vmatpush3.msra.mxu1 %v29836_v58  ;;  %25852 = vmatprep.subr.mxu0 %v34641_v3 }
 0xaa5   :  { %25925 = vmatprep.subr.mxu1 %v34641_v3  ;;  %25853 = vmatpush3.msra.mxu0 %v30017_v33 }
 0xaa6   :  { %25854 = vmatprep.mubr.msk.f32.mxu0 %vm29465_vm0, %v34641_v3  ;;  %25926 = vmatpush3.msra.mxu1 %v29848_v6 }
 0xaa7   :  { %25855 = vmatmul.mubr.f32.vlgmr.msra.gmra.mxu0 %v30760_v15  ;;  %25888 = vmatprep.subr.mxu0 %v34641_v3 }
 0xaa8   :  { %25927 = vmatprep.subr.mxu1 %v34641_v3  ;;  %25889 = vmatpush3.msra.mxu0 %v29831_v60 }
 0xaa9   :  { %25928 = vmatpush3.msra.mxu1 %v29863_v23  ;;  %25890 = vmatprep.subr.mxu0 %v34641_v3 }
 0xaaa   :  { %25929 = vmatprep.subr.mxu1 %v34641_v3  ;;  %25891 = vmatpush3.msra.mxu0 %v29843_v4 }
 0xaab   :  { %25930 = vmatpush3.msra.mxu1 %v29874_v29  ;;  %25892 = vmatprep.subr.mxu0 %v34641_v3 }
 0xaac   :  { %25931 = vmatprep.subr.mxu1 %v34641_v3  ;;  %25893 = vmatpush3.msra.mxu0 %v29857_v19 }
 0xaad   :  { %25932 = vmatpush3.msra.mxu1 %v29889_v35  ;;  %25894 = vmatprep.subr.mxu0 %v34641_v3 }
 0xaae   :  { %25933 = vmatprep.subr.mxu1 %v34641_v3  ;;  %25895 = vmatpush3.msra.mxu0 %v29872_v28 }
 0xaaf   :  { %25934 = vmatpush3.msra.mxu1 %v29906_v51  ;;  %25896 = vmatprep.subr.mxu0 %v34641_v3 }
 0xab0   :  { %25935 = vmatprep.subr.mxu1 %v34641_v3  ;;  %25897 = vmatpush3.msra.mxu0 %v29894_v37 }
 0xab1   :  { %25936 = vmatpush3.msra.mxu1 %v29922_v16  ;;  %25898 = vmatprep.subr.mxu0 %v34641_v3 }
 0xab2   :  { %25937 = vmatprep.subr.mxu1 %v34641_v3  ;;  %25899 = vmatpush3.msra.mxu0 %v29901_v47 }
 0xab3   :  { %25938 = vmatpush3.msra.mxu1 %v29941_v53  ;;  %25900 = vmatprep.subr.mxu0 %v34641_v3 }
 0xab4   :  { %25939 = vmatprep.subr.mxu1 %v34641_v3  ;;  %25901 = vmatpush3.msra.mxu0 %v29917_v2 }
 0xab5   :  { %25940 = vmatpush3.msra.mxu1 %v29952_v57  ;;  %25902 = vmatprep.subr.mxu0 %v34641_v3 }
 0xab6   :  { %25941 = vmatprep.subr.mxu1 %v34641_v3  ;;  %25903 = vmatpush3.msra.mxu0 %v29934_v1 }
 0xab7   :  { %25942 = vmatpush3.msra.mxu1 %v29968_v12  ;;  %25904 = vmatprep.subr.mxu0 %v34641_v3 }
 0xab8   :  { %25943 = vmatprep.subr.mxu1 %v34641_v3  ;;  %25905 = vmatpush3.msra.mxu0 %v29950_v13 }
 0xab9   :  { %25944 = vmatpush3.msra.mxu1 %v29985_v17  ;;  %25906 = vmatprep.subr.mxu0 %v34641_v3 }
 0xaba   :  { %25945 = vmatprep.subr.mxu1 %v34641_v3  ;;  %25907 = vmatpush3.msra.mxu0 %v34642_v49 }
 0xabb   :  { %25946 = vmatpush3.msra.mxu1 %v30001_v62  ;;  %25947 = vmatprep.mubr.msk.f32.mxu1 %vm29465_vm0, %v34641_v3 }
 0xabc   :  { %25908 = vmatprep.subr.mxu0 %v34641_v3  ;;  %25948 = vmatmul.mubr.f32.vlgmr.msra.gmra.mxu1 %v30757_v30 }
 0xabd   :  { %25909 = vmatpush3.msra.mxu0 %v34643_v50  ;;  %25916 = vmatprep.mubr.msk.f32.mxu0 %vm29465_vm0, %v34641_v3 }
 0xabe   :  { %25910 = vmatprep.subr.mxu0 %v34641_v3  ;;  %25957 = vmatprep.subr.mxu1 %v34641_v3 }
 0xabf   :  { %25911 = vmatpush3.msra.mxu0 %v34716_v45  ;;  %25961 = vmatprep.mubr.msk.f32.mxu1 %vm29465_vm0, %v34641_v3 }
 0xac0   :  { %25912 = vmatprep.subr.mxu0 %v34641_v3  ;;  %25958 = vmatpush3.msra.mxu1 %v30914_v8 }
 0xac1   :  { %25913 = vmatpush3.msra.mxu0 %v34717_v21  ;;  %25959 = vmatprep.subr.mxu1 %v34641_v3 }
 0xac2   :  { %25914 = vmatprep.subr.mxu0 %v34641_v3  ;;  %25960 = vmatpush3.msra.mxu1 %v30919_v11 }
 0xac3   :  { %25915 = vmatpush3.msra.mxu0 %v34718_v18  ;;  %25971 = vmatprep.subr.mxu1 %v34641_v3 }
 0xac4   :  { %25917 = vmatmul.mubr.f32.vlgmr.msra.gmra.mxu0 %v30757_v30  ;;  %25950 = vmatprep.subr.mxu0 %v34641_v3 }
 0xac5   :  { %25954 = vmatprep.mubr.msk.f32.mxu0 %vm29465_vm0, %v34641_v3  ;;  %25951 = vmatpush3.msra.mxu0 %v30892_v32 }
 0xac6   :  { %25952 = vmatprep.subr.mxu0 %v34641_v3 }
 0xac7   :  { %25953 = vmatpush3.msra.mxu0 %v30897_v24 }
 0xac8   :  { %25964 = vmatprep.subr.mxu0 %v34641_v3 }
 0xb42   :  { %v5424_v30 = vpop.f32.mrf.mxu1 }
 0xb44   :  { %v25825_v15 = vpop.f32.mrf.mxu1 }
 0xb4a   :  { %v5283_v7 = vpop.f32.mrf.mxu0 }
 0xb4b   :  { %v5284_v18 = vadd.f32 %v5283_v7, %v30666_v46  ;;  %v34731_v7 = vmov 0  }
 0xb4c   :  { %v25794_v27 = vpop.f32.mrf.mxu0 }
 0xb4d   :  { %v5425_v8 = vadd.f32 %v5424_v30, %v5284_v18  ;;  %v29119_v18 = vld [vmem:[%s34420_s4 + $0x34] ss:$8 sps:$4 sm:$0xff]   ;;  %v34730_v30 = vld [vmem:[#allocation10_spill] sm:$0xff] }
 0xb5e   :  { %v5611_v59 = vpop.f32.mrf.mxu1 }
 0xb60   :  { %v25887_v41 = vpop.f32.mrf.mxu1 }
 0xb67   :  { %v5524_v0 = vpop.f32.mrf.mxu0 }
 0xb68   :  { %v5525_v45 = vadd.f32 %v5524_v0, %v5425_v8  ;;  %v34729_v8 = vld [vmem:[#allocation9_spill] sm:$0xff]  ;;  %v29122_v0 = vld [vmem:[%s34420_s4 + $0x24] ss:$8 sps:$4 sm:$0xff]  }
 0xb69   :  { %v25856_v63 = vpop.f32.mrf.mxu0 }
 0xb6a   :  { %v5612_v50 = vadd.f32 %v5611_v59, %v5525_v45  ;;  %v29118_v45 = vld [vmem:[%s34418_s2 + $0x8] ss:$12 sps:$4 sm:$0xff]   ;;  %v29121_v59 = vld [vmem:[%s34418_s2 + $0x4] ss:$12 sps:$4 sm:$0xff]  }
 0xb6b   :  { %v29123_v63 = vld [vmem:[%s34420_s4 + $0x20] ss:$8 sps:$4 sm:$0xff]  }
 0xb7c   :  { %v5809_v21 = vpop.f32.mrf.mxu1 }
 0xb7e   :  { %v25949_v31 = vpop.f32.mrf.mxu1 }
 0xb7f   :  { %v29124_v31 = vld [vmem:[%s34418_s2] ss:$12 sps:$4 sm:$0xff]  }
 0xb84   :  { %v5724_v49 = vpop.f32.mrf.mxu0 }
 0xb85   :  { %v5725_v13 = vadd.f32 %v5724_v49, %v5612_v50  ;;  %v34728_v49 = vld [vmem:[#allocation11_spill] sm:$0xff]  ;;  %v6299_v50 = vpop.permute.xlu0 %6298 }
 0xb86   :  { %v25918_v11 = vpop.f32.mrf.mxu0 }
 0xb87   :  { %v5810_v1 = vadd.f32 %v5809_v21, %v5725_v13  ;;  %v29120_v11 = vld [vmem:[%s34420_s4 + $0x30] ss:$8 sps:$4 sm:$0xff]  }
 0xb89   :  { %v5813_v2 = vmul.f32 0.5, %v5810_v1 }
 0xb8b   :  { %v30926_v15 = vadd.f32 %v5813_v2, %v30433_v43 }
 0xb8d   :  { %34727 = vst [vmem:[#allocation65_spill] sm:$0xff] %v30926_v15  ;;  %v5818_v27 = vsel %vm72_vm2, %v30926_v15, 0  ;;  %v6301_v43 = vsel %vm72_vm2, %v30926_v15, %v6299_v50  ;;  %v29127_v50 = vld [vmem:[%s34420_s4 + $0x10] ss:$8 sps:$4 sm:$0xff]  }
 0xb8e   :  { %v30930_v41 = vand.u32 4294901760, %v5818_v27  ;;  %v6302_v21 = vpack.c.bf16 %v6301_v43, %v6301_v43  ;;  %v29128_v43 = vld [vmem:[#allocation4 + $0x70] ss:$8 sps:$4 sm:$0xff]  }
 0xb90   :  { %v30933_v46 = vsub.f32 %v5818_v27, %v30930_v41  ;;  %25962 = vmatmul.mubr.f32.vlgmr.msra.gmra.mxu1 %v30930_v41  ;;  %v29125_v27 = vld [vmem:[%s34420_s4 + $0x14] ss:$8 sps:$4 sm:$0xff]  }
 0xb91   :  { %25972 = vmatpush3.msra.mxu1 %v30892_v32  ;;  %25975 = vmatprep.mubr.msk.f32.mxu1 %vm29465_vm0, %v34641_v3 }
 0xb92   :  { %25973 = vmatprep.subr.mxu1 %v34641_v3  ;;  %v30941_v1 = vand.u32 4294901760, %v30933_v46 }
 0xb93   :  { %25974 = vmatpush3.msra.mxu1 %v30897_v24 }
 0xb94   :  { %25985 = vmatprep.subr.mxu1 %v34641_v3  ;;  %25976 = vmatmul.mubr.f32.vlgmr.msra.gmra.mxu1 %v30941_v1  ;;  %v5890_v13 = vsub.f32 %v30933_v46, %v30941_v1 }
 0xb95   :  { %25986 = vmatpush3.msra.mxu1 %v30892_v32  ;;  %25989 = vmatprep.mubr.msk.f32.mxu1 %vm29465_vm0, %v34641_v3 }
 0xb96   :  { %25987 = vmatprep.subr.mxu1 %v34641_v3  ;;  %v30952_v2 = vand.u32 4294901760, %v5890_v13  ;;  %v29126_v13 = vld [vmem:[#allocation4 + $0x74] ss:$8 sps:$4 sm:$0xff]  }
 0xb97   :  { %25988 = vmatpush3.msra.mxu1 %v30897_v24 }
 0xb98   :  { %25992 = vmatprep.subr.bf16.mxu1 %v34641_v3  ;;  %25955 = vmatmul.mubr.f32.vlgmr.msra.gmra.mxu0 %v30952_v2 }
 0xb99   :  { %25965 = vmatpush3.msra.mxu0 %v30895_v42  ;;  %25990 = vmatmul.mubr.f32.vlgmr.msra.gmra.mxu1 %v30930_v41 }
 0xb9a   :  { %25993 = vmatpush3.bf16.msra.mxu1 %v34728_v49  ;;  %25966 = vmatprep.subr.mxu0 %v34641_v3 }
 0xb9b   :  { %25967 = vmatpush3.msra.mxu0 %v30905_v36  ;;  %25968 = vmatprep.mubr.msk.f32.mxu0 %vm29465_vm0, %v34641_v3 }
 0xb9c   :  { %25978 = vmatprep.subr.mxu0 %v34641_v3  ;;  %25994 = vmatprep.subr.bf16.mxu1 %v34641_v3 }
 0xb9d   :  { %25969 = vmatmul.mubr.f32.vlgmr.msra.gmra.mxu0 %v30933_v46  ;;  %25996 = vmatprep.mubr.msk.bf16.mxu1 %vm29465_vm0, %v34641_v3 }
 0xb9e   :  { %25979 = vmatpush3.msra.mxu0 %v30902_v14  ;;  %25995 = vmatpush3.bf16.msra.mxu1 %v29118_v45  ;;  %v29129_v45 = vld [vmem:[%s34420_s4 + $0x4] ss:$8 sps:$4 sm:$0xff]  }
 0xb9f   :  { %25980 = vmatprep.subr.mxu0 %v34641_v3  ;;  %25982 = vmatprep.mubr.msk.f32.mxu0 %vm29465_vm0, %v34641_v3 }
 0xba0   :  { %25981 = vmatpush3.msra.mxu0 %v30912_v20  ;;  %6447 = vmatprep.subr.bf16.mxu1 %v29119_v18  ;;  %v29130_v18 = vld [vmem:[#allocation4 + $0x64] ss:$8 sps:$4 sm:$0xff]  }
 0xba1   :  { %23040 = vmatprep.subr.msk.bf16.mxu0 %vm126_vm1, %v34729_v8  ;;  %25997 = vmatmul.mubr.msk.bf16.vlgmr.msra.gmra.mxu1 %vm122_vm3, %v6302_v21 }
 0xba2   :  { %25983 = vmatmul.mubr.f32.vlgmr.msra.gmra.mxu0 %v30930_v41  ;;  %6448 = vmatpush1.bf16.msra.mxu1 %v29120_v11  ;;  %v29131_v11 = vld [vmem:[%s34420_s4] ss:$8 sps:$4 sm:$0xff]  }
 0xba3   :  { %6319 = vmatpush1.bf16.msra.mxu0 %v34730_v30  ;;  %6338 = vmatprep.mubr.bf16.mxu0 %v34731_v7 }
 0xba4   :  { %6320 = vmatprep.subr.bf16.mxu0 %v29121_v59  ;;  %6449 = vmatprep.subr.bf16.mxu1 %v29122_v0  ;;  %v29133_v59 = vld [vmem:[#allocation6 + $0x74] ss:$8 sps:$4 sm:$0xff]  }
 0xba5   :  { %6471 = vmatprep.mubr.bf16.mxu1 %v34731_v7  ;;  %v29134_v0 = vld [vmem:[#allocation4 + $0x54] ss:$8 sps:$4 sm:$0xff]  }
 0xba6   :  { %6450 = vmatpush1.bf16.msra.mxu1 %v29123_v63  ;;  %v29135_v63 = vld [vmem:[#allocation4 + $0x50] ss:$8 sps:$4 sm:$0xff]  }
 0xba7   :  { %6321 = vmatpush1.bf16.msra.mxu0 %v29124_v31  ;;  %6451 = vmatprep.subr.bf16.mxu1 %v29125_v27  ;;  %v29136_v31 = vld [vmem:[#allocation4 + $0x44] ss:$8 sps:$4 sm:$0xff]   ;;  %v29137_v27 = vld [vmem:[#allocation4 + $0x40] ss:$8 sps:$4 sm:$0xff]  }
 0xba8   :  { %6392 = vmatprep.subr.bf16.mxu0 %v29126_v13  ;;  %v29138_v13 = vld [vmem:[#allocation4 + $0x34] ss:$8 sps:$4 sm:$0xff]  }
 0xbaa   :  { %23041 = vmatmul.mubr.msk.bf16.vlgmr.msra.gmra.mxu0 %vm122_vm3, %v6302_v21  ;;  %6452 = vmatpush1.bf16.msra.mxu1 %v29127_v50  ;;  %v29132_v21 = vld [vmem:[#allocation4 + $0x60] ss:$8 sps:$4 sm:$0xff]   ;;  %v29139_v50 = vld [vmem:[#allocation4 + $0x30] ss:$8 sps:$4 sm:$0xff]  }
 0xbab   :  { %6393 = vmatpush1.bf16.msra.mxu0 %v29128_v43  ;;  %6453 = vmatprep.subr.bf16.mxu1 %v29129_v45  ;;  %v29140_v43 = vld [vmem:[#allocation4 + $0x24] ss:$8 sps:$4 sm:$0xff]   ;;  %v29141_v45 = vld [vmem:[#allocation4 + $0x20] ss:$8 sps:$4 sm:$0xff]  }
 0xbac   :  { %6394 = vmatprep.subr.bf16.mxu0 %v29130_v18  ;;  %v29142_v18 = vld [vmem:[#allocation4 + $0x14] ss:$8 sps:$4 sm:$0xff]  }
 0xbae   :  { %6454 = vmatpush1.bf16.msra.mxu1 %v29131_v11  ;;  %v29143_v11 = vld [vmem:[#allocation4 + $0x10] ss:$8 sps:$4 sm:$0xff]  }
 0xbaf   :  { %6395 = vmatpush1.bf16.msra.mxu0 %v29132_v21  ;;  %6486 = vmatprep.subr.bf16.mxu1 %v29133_v59  ;;  %v29144_v21 = vld [vmem:[#allocation4 + $0x4] ss:$8 sps:$4 sm:$0xff]   ;;  %v29145_v59 = vld [vmem:[#allocation4] ss:$8 sps:$4 sm:$0xff]  }
 0xbb0   :  { %6396 = vmatprep.subr.bf16.mxu0 %v29134_v0  ;;  %v29146_v0 = vld [vmem:[#allocation4 + $0xf4] ss:$8 sps:$4 sm:$0xff]  }
 0xbb3   :  { %6397 = vmatpush1.bf16.msra.mxu0 %v29135_v63  ;;  %v29147_v63 = vld [vmem:[#allocation4 + $0xf0] ss:$8 sps:$4 sm:$0xff]  }
 0xbb4   :  { %6398 = vmatprep.subr.bf16.mxu0 %v29136_v31  ;;  %v29148_v31 = vld [vmem:[#allocation4 + $0xe4] ss:$8 sps:$4 sm:$0xff]  }
 0xbb7   :  { %6399 = vmatpush1.bf16.msra.mxu0 %v29137_v27  ;;  %v29149_v27 = vld [vmem:[#allocation4 + $0xe0] ss:$8 sps:$4 sm:$0xff]  }
 0xbb8   :  { %6400 = vmatprep.subr.bf16.mxu0 %v29138_v13  ;;  %v29150_v13 = vld [vmem:[#allocation4 + $0xd4] ss:$8 sps:$4 sm:$0xff]  }
 0xbbb   :  { %6401 = vmatpush1.bf16.msra.mxu0 %v29139_v50  ;;  %v29151_v50 = vld [vmem:[#allocation4 + $0xd0] ss:$8 sps:$4 sm:$0xff]  }
 0xbbc   :  { %6402 = vmatprep.subr.bf16.mxu0 %v29140_v43  ;;  %v29152_v43 = vld [vmem:[#allocation4 + $0xc4] ss:$8 sps:$4 sm:$0xff]  }
 0xbbf   :  { %6403 = vmatpush1.bf16.msra.mxu0 %v29141_v45  ;;  %v29153_v45 = vld [vmem:[#allocation4 + $0xc0] ss:$8 sps:$4 sm:$0xff]  }
 0xbc0   :  { %6404 = vmatprep.subr.bf16.mxu0 %v29142_v18  ;;  %v29154_v18 = vld [vmem:[#allocation4 + $0xb4] ss:$8 sps:$4 sm:$0xff]  }
 0xbc3   :  { %6405 = vmatpush1.bf16.msra.mxu0 %v29143_v11  ;;  %v29155_v11 = vld [vmem:[#allocation4 + $0xb0] ss:$8 sps:$4 sm:$0xff]  }
 0xbc4   :  { %6406 = vmatprep.subr.bf16.mxu0 %v29144_v21  ;;  %v29156_v21 = vld [vmem:[#allocation4 + $0xa4] ss:$8 sps:$4 sm:$0xff]  }
 0xbc7   :  { %6407 = vmatpush1.bf16.msra.mxu0 %v29145_v59  ;;  %v29157_v59 = vld [vmem:[#allocation4 + $0xa0] ss:$8 sps:$4 sm:$0xff]  }
 0xbc8   :  { %6408 = vmatprep.subr.bf16.mxu0 %v29146_v0  ;;  %v29158_v0 = vld [vmem:[#allocation4 + $0x94] ss:$8 sps:$4 sm:$0xff]  }
 0xbcb   :  { %6409 = vmatpush2.bf16.msra.mxu0 %v29147_v63  ;;  %v29159_v63 = vld [vmem:[#allocation4 + $0x90] ss:$8 sps:$4 sm:$0xff]  }
 0xbcc   :  { %6410 = vmatprep.subr.bf16.mxu0 %v29148_v31  ;;  %v29160_v31 = vld [vmem:[#allocation4 + $0x84] ss:$8 sps:$4 sm:$0xff]  }
 0xbcf   :  { %6411 = vmatpush2.bf16.msra.mxu0 %v29149_v27  ;;  %v29161_v27 = vld [vmem:[#allocation4 + $0x80] ss:$8 sps:$4 sm:$0xff]  }
 0xbd0   :  { %6412 = vmatprep.subr.bf16.mxu0 %v29150_v13  ;;  %v29162_v13 = vld [vmem:[%s34422_s6 + $0x78] sm:$0xff]  }
 0xbd3   :  { %6413 = vmatpush2.bf16.msra.mxu0 %v29151_v50 }
 0xbd4   :  { %6414 = vmatprep.subr.bf16.mxu0 %v29152_v43 }
 0xbd7   :  { %6415 = vmatpush2.bf16.msra.mxu0 %v29153_v45 }
 0xbd8   :  { %6416 = vmatprep.subr.bf16.mxu0 %v29154_v18 }
 0xbdb   :  { %6417 = vmatpush2.bf16.msra.mxu0 %v29155_v11 }
 0xbdc   :  { %6418 = vmatprep.subr.bf16.mxu0 %v29156_v21 }
 0xbdf   :  { %6419 = vmatpush2.bf16.msra.mxu0 %v29157_v59 }
 0xbe0   :  { %6420 = vmatprep.subr.bf16.mxu0 %v29158_v0 }
 0xbe3   :  { %6421 = vmatpush2.bf16.msra.mxu0 %v29159_v63 }
 0xbe4   :  { %6422 = vmatprep.subr.bf16.mxu0 %v29160_v31 }
 0xbe7   :  { %6423 = vmatpush2.bf16.msra.mxu0 %v29161_v27  ;;  %v34732_v27 = vld [vmem:[#allocation13_spill] sm:$0xff] }
 0xbe8   :  { %23542 = vmatprep.subr.bf16.mxu0 %v29162_v13 }
 0xc50   :  { %v5974_v50 = vpop.f32.mrf.mxu1 }
 0xc52   :  { %v25963_v43 = vpop.f32.mrf.mxu1 }
 0xc54   :  { %v6125_v45 = vpop.f32.mrf.mxu1 }
 0xc56   :  { %v25977_v18 = vpop.f32.mrf.mxu1 }
 0xc58   :  { %v5893_v11 = vpop.f32.mrf.mxu0 }
 0xc59   :  { %v5975_v21 = vadd.f32 %v5974_v50, %v5893_v11  ;;  %v6275_v59 = vpop.f32.mrf.mxu1 }
 0xc5a   :  { %v25956_v7 = vpop.f32.mrf.mxu0 }
 0xc5b   :  { %v25991_v0 = vpop.f32.mrf.mxu1  ;;  %v29163_v7 = vld [vmem:[#allocation6 + $0x70] ss:$8 sps:$4 sm:$0xff]  }
 0xc5d   :  { %v6050_v30 = vpop.f32.mrf.mxu0 }
 0xc5e   :  { %v6051_v63 = vadd.f32 %v6050_v30, %v5975_v21  ;;  %v34735_v21 = vld [vmem:[#allocation14_spill] sm:$0xff] }
 0xc5f   :  { %v25970_v8 = vpop.f32.mrf.mxu0 }
 0xc60   :  { %v6126_v31 = vadd.f32 %v6125_v45, %v6051_v63  ;;  %v29164_v8 = vld [vmem:[#allocation6 + $0x64] ss:$8 sps:$4 sm:$0xff]   ;;  %v34734_v45 = vld [vmem:[#allocation12_spill] sm:$0xff] }
 0xc61   :  { %v6381_v20 = vpop.f32.mrf.mxu1 }
 0xc62   :  { %v6382_v14 = vadd.f32 %v6381_v20, %v34732_v27  ;;  %v6202_v36 = vpop.f32.mrf.mxu0 }
 0xc63   :  { %v6203_v49 = vadd.f32 %v6202_v36, %v6126_v31  ;;  %v25998_v42 = vpop.f32.mrf.mxu1 }
 0xc64   :  { %v6389_v13 = vmax.f32 %v6382_v14, 0.0  ;;  %v25984_v24 = vpop.f32.mrf.mxu0  ;;  %v29165_v42 = vld [vmem:[#allocation6 + $0x60] ss:$8 sps:$4 sm:$0xff]  }
 0xc65   :  { %v31021_v43 = vadd.f32 %v6275_v59, %v6203_v49  ;;  %v6384_v18 = vpop.f32.mrf.mxu1  ;;  %v29166_v49 = vld [vmem:[#allocation6 + $0x54] ss:$8 sps:$4 sm:$0xff]  }
 0xc66   :  { %v6435_v32 = vpack.c.bf16 %v6389_v13, %v6389_v13  ;;  %v29168_v13 = vld [vmem:[#allocation6 + $0x44] ss:$8 sps:$4 sm:$0xff]   ;;  %v29169_v18 = vld [vmem:[#allocation6 + $0x40] ss:$8 sps:$4 sm:$0xff]  }
 0xc67   :  { %34733 = vst [vmem:[#allocation66_spill] sm:$0xff] %v31021_v43  ;;  %v25999_v50 = vpop.f32.mrf.mxu1 }
 0xc68   :  { %23043 = vmatmul.mubr.msk.bf16.vlgmr.msra.gmra.mxu1 %vm532_vm4, %v6435_v32  ;;  %v29167_v32 = vld [vmem:[#allocation6 + $0x50] ss:$8 sps:$4 sm:$0xff]   ;;  %v29170_v50 = vld [vmem:[%s34422_s6 + $0x38] sm:$0xff]  }
 0xc69   :  { %6487 = vmatpush1.bf16.msra.mxu1 %v29163_v7  ;;  %v29171_v7 = vld [vmem:[#allocation6 + $0x34] ss:$8 sps:$4 sm:$0xff]  }
 0xc6a   :  { %v6340_v30 = vpop.f32.mrf.mxu0  ;;  %6488 = vmatprep.subr.bf16.mxu1 %v29164_v8  ;;  %v29173_v8 = vld [vmem:[#allocation6 + $0x30] ss:$8 sps:$4 sm:$0xff]  }
 0xc6b   :  { %v6341_v11 = vadd.f32 %v6340_v30, %v34734_v45  ;;  %v29172_v30 = vld [vmem:[%s34422_s6 + $0x70] sm:$0xff]  }
 0xc6c   :  { %v6342_v20 = vpop.f32.mrf.mxu0 }
 0xc6d   :  { %v6343_v36 = vadd.f32 %v6342_v20, %v34735_v21  ;;  %6489 = vmatpush1.bf16.msra.mxu1 %v29165_v42  ;;  %v6387_v24 = vmax.f32 %v6341_v11, 0.0  ;;  %v29174_v11 = vld [vmem:[%s34422_s6 + $0x30] sm:$0xff]   ;;  %v29175_v20 = vld [vmem:[#allocation6 + $0x24] ss:$8 sps:$4 sm:$0xff]   ;;  %v29177_v42 = vld [vmem:[#allocation6 + $0x20] ss:$8 sps:$4 sm:$0xff]  }
 0xc6e   :  { %v6344_v14 = vpop.f32.mrf.mxu0  ;;  %6490 = vmatprep.subr.bf16.mxu1 %v29166_v49  ;;  %v29180_v49 = vld [vmem:[%s34422_s6 + $0x60] sm:$0xff]  }
 0xc6f   :  { %v6388_v59 = vmax.f32 %v6343_v36, 0.0  ;;  %v6390_v31 = vpack.c.bf16 %v6387_v24, %v6387_v24  ;;  %v29176_v36 = vld [vmem:[%s34422_s6 + $0x68] sm:$0xff]  }
 0xc70   :  { %v6345_v0 = vpop.f32.mrf.mxu0  ;;  %v29178_v24 = vld [vmem:[%s34422_s6 + $0x28] sm:$0xff]  }
 0xc71   :  { %v6391_v63 = vpack.c.bf16 %v6388_v59, %v6388_v59  ;;  %6491 = vmatpush1.bf16.msra.mxu1 %v29167_v32  ;;  %v29179_v14 = vld [vmem:[#allocation6 + $0x14] ss:$8 sps:$4 sm:$0xff]   ;;  %v29181_v59 = vld [vmem:[#allocation6 + $0x10] ss:$8 sps:$4 sm:$0xff]   ;;  %v29182_v0 = vld [vmem:[%s34422_s6 + $0x20] sm:$0xff]  }
 0xc72   :  { %6492 = vmatprep.subr.bf16.mxu1 %v29168_v13  ;;  %v29184_v32 = vld [vmem:[%s34422_s6 + $0x58] sm:$0xff]  }
 0xc73   :  { %6424 = vmatprep.mubr.bf16.mxu0 %v6391_v63  ;;  %v29183_v63 = vld [vmem:[#allocation6 + $0x4] ss:$8 sps:$4 sm:$0xff]  }
 0xc74   :  { %6425 = vmatmul.mubr.bf16.vlgmr.msra.gmra.mxu0 %v6390_v31  ;;  %v29185_v31 = vld [vmem:[#allocation6] ss:$8 sps:$4 sm:$0xff]  }
 0xc75   :  { %6493 = vmatpush1.bf16.msra.mxu1 %v29169_v18  ;;  %23543 = vmatpush3.bf16.msra.mxu0 %v29170_v50  ;;  %v29186_v13 = vld [vmem:[%s34422_s6 + $0x18] sm:$0xff]   ;;  %v29187_v18 = vld [vmem:[#allocation6 + $0xf4] ss:$8 sps:$4 sm:$0xff]  }
 0xc76   :  { %6494 = vmatprep.subr.bf16.mxu1 %v29171_v7  ;;  %23544 = vmatprep.subr.bf16.mxu0 %v29172_v30  ;;  %v29188_v50 = vld [vmem:[%s34422_s6 + $0x50] sm:$0xff]  }
 0xc77   :  { %v29189_v7 = vld [vmem:[#allocation6 + $0xf0] ss:$8 sps:$4 sm:$0xff]  }
 0xc78   :  { %v29190_v30 = vld [vmem:[%s34422_s6 + $0x10] sm:$0xff]  }
 0xc79   :  { %6495 = vmatpush1.bf16.msra.mxu1 %v29173_v8  ;;  %23545 = vmatpush3.bf16.msra.mxu0 %v29174_v11  ;;  %v29191_v8 = vld [vmem:[#allocation6 + $0xe4] ss:$8 sps:$4 sm:$0xff]   ;;  %v29192_v11 = vld [vmem:[%s34422_s6 + $0x48] sm:$0xff]  }
 0xc7a   :  { %6496 = vmatprep.subr.bf16.mxu1 %v29175_v20  ;;  %23546 = vmatprep.subr.bf16.mxu0 %v29176_v36  ;;  %v29193_v20 = vld [vmem:[#allocation6 + $0xe0] ss:$8 sps:$4 sm:$0xff]   ;;  %v29194_v36 = vld [vmem:[%s34422_s6 + $0x8] sm:$0xff]  }
 0xc7d   :  { %6497 = vmatpush1.bf16.msra.mxu1 %v29177_v42  ;;  %23547 = vmatpush3.bf16.msra.mxu0 %v29178_v24  ;;  %v29195_v42 = vld [vmem:[#allocation6 + $0xd4] ss:$8 sps:$4 sm:$0xff]   ;;  %v29196_v24 = vld [vmem:[%s34422_s6 + $0x40] sm:$0xff]  }
 0xc7e   :  { %6498 = vmatprep.subr.bf16.mxu1 %v29179_v14  ;;  %23548 = vmatprep.subr.bf16.mxu0 %v29180_v49  ;;  %v29197_v14 = vld [vmem:[#allocation6 + $0xd0] ss:$8 sps:$4 sm:$0xff]   ;;  %v29198_v49 = vld [vmem:[%s34422_s6] sm:$0xff]  }
 0xc81   :  { %6499 = vmatpush1.bf16.msra.mxu1 %v29181_v59  ;;  %23549 = vmatpush3.bf16.msra.mxu0 %v29182_v0  ;;  %v29199_v59 = vld [vmem:[#allocation6 + $0xc4] ss:$8 sps:$4 sm:$0xff]   ;;  %v29200_v0 = vld [vmem:[#allocation6 + $0xc0] ss:$8 sps:$4 sm:$0xff]  }
 0xc82   :  { %6500 = vmatprep.subr.bf16.mxu1 %v29183_v63  ;;  %23550 = vmatprep.subr.bf16.mxu0 %v29184_v32  ;;  %v29201_v63 = vld [vmem:[#allocation6 + $0xb4] ss:$8 sps:$4 sm:$0xff]   ;;  %v29202_v32 = vld [vmem:[#allocation6 + $0xb0] ss:$8 sps:$4 sm:$0xff]  }
 0xc85   :  { %6501 = vmatpush1.bf16.msra.mxu1 %v29185_v31  ;;  %23551 = vmatpush3.bf16.msra.mxu0 %v29186_v13  ;;  %v29203_v31 = vld [vmem:[#allocation6 + $0xa4] ss:$8 sps:$4 sm:$0xff]   ;;  %v29204_v13 = vld [vmem:[#allocation6 + $0xa0] ss:$8 sps:$4 sm:$0xff]  }
 0xc86   :  { %6502 = vmatprep.subr.bf16.mxu1 %v29187_v18  ;;  %23552 = vmatprep.subr.bf16.mxu0 %v29188_v50  ;;  %v29205_v18 = vld [vmem:[#allocation6 + $0x94] ss:$8 sps:$4 sm:$0xff]   ;;  %v29206_v50 = vld [vmem:[#allocation6 + $0x90] ss:$8 sps:$4 sm:$0xff]  }
 0xc89   :  { %6503 = vmatpush2.bf16.msra.mxu1 %v29189_v7  ;;  %23553 = vmatpush3.bf16.msra.mxu0 %v29190_v30  ;;  %v29207_v7 = vld [vmem:[#allocation6 + $0x84] ss:$8 sps:$4 sm:$0xff]   ;;  %v29208_v30 = vld [vmem:[#allocation6 + $0x80] ss:$8 sps:$4 sm:$0xff]  }
 0xc8a   :  { %6504 = vmatprep.subr.bf16.mxu1 %v29191_v8  ;;  %23554 = vmatprep.subr.bf16.mxu0 %v29192_v11 }
 0xc8d   :  { %6505 = vmatpush2.bf16.msra.mxu1 %v29193_v20  ;;  %23555 = vmatpush3.bf16.msra.mxu0 %v29194_v36 }
 0xc8e   :  { %6506 = vmatprep.subr.bf16.mxu1 %v29195_v42  ;;  %23556 = vmatprep.subr.bf16.mxu0 %v29196_v24  ;;  %v34736_v42 = vld [vmem:[#allocation15_spill] sm:$0xff] }
 0xc91   :  { %6507 = vmatpush2.bf16.msra.mxu1 %v29197_v14  ;;  %23557 = vmatpush3.bf16.msra.mxu0 %v29198_v49  ;;  %v34737_v49 = vld [vmem:[#allocation16_spill] sm:$0xff] }
 0xc92   :  { %6508 = vmatprep.subr.bf16.mxu1 %v29199_v59  ;;  %26020 = vmatprep.subr.mxu0 %v34641_v3 }
 0xc95   :  { %6509 = vmatpush2.bf16.msra.mxu1 %v29200_v0  ;;  %v34738_v0 = vld [vmem:[#allocation17_spill] sm:$0xff] }
 0xc96   :  { %6510 = vmatprep.subr.bf16.mxu1 %v29201_v63 }
 0xc99   :  { %6511 = vmatpush2.bf16.msra.mxu1 %v29202_v32 }
 0xc9a   :  { %6512 = vmatprep.subr.bf16.mxu1 %v29203_v31 }
 0xc9d   :  { %6513 = vmatpush2.bf16.msra.mxu1 %v29204_v13  ;;  %v34739_v13 = vld [vmem:[#allocation18_spill] sm:$0xff] }
 0xc9e   :  { %6514 = vmatprep.subr.bf16.mxu1 %v29205_v18 }
 0xca1   :  { %6515 = vmatpush2.bf16.msra.mxu1 %v29206_v50 }
 0xca2   :  { %6516 = vmatprep.subr.bf16.mxu1 %v29207_v7 }
 0xca5   :  { %6517 = vmatpush2.bf16.msra.mxu1 %v29208_v30 }
 0xca6   :  { %26000 = vmatprep.subr.mxu1 %v34641_v3 }
 0xd28   :  { %v6473_v8 = vpop.f32.mrf.mxu1 }
 0xd29   :  { %v6474_v24 = vadd.f32 %v6473_v8, %v34736_v42  ;;  %v34740_v8 = vld [vmem:[#allocation21_spill] sm:$0xff] }
 0xd2a   :  { %v6475_v11 = vpop.f32.mrf.mxu1 }
 0xd2b   :  { %v6476_v59 = vadd.f32 %v6475_v11, %v34737_v49  ;;  %v6480_v50 = vmax.f32 %v6474_v24, 0.0 }
 0xd2c   :  { %v6477_v20 = vpop.f32.mrf.mxu1 }
 0xd2d   :  { %v6481_v30 = vmax.f32 %v6476_v59, 0.0  ;;  %v34742_v59 = vld [vmem:[#allocation20_spill] sm:$0xff] }
 0xd2e   :  { %v6478_v36 = vpop.f32.mrf.mxu1 }
 0xd34   :  { %v6426_v14 = vpop.f32.mrf.mxu0 }
 0xd35   :  { %v6427_v63 = vadd.f32 %v6426_v14, %v34738_v0  ;;  %v34741_v14 = vld [vmem:[#allocation19_spill] sm:$0xff] }
 0xd36   :  { %v6428_v32 = vpop.f32.mrf.mxu0 }
 0xd37   :  { %v6433_v31 = vmax.f32 %v6427_v63, 0.0  ;;  %v6429_v18 = vadd.f32 %v6428_v32, %v34739_v13 }
 0xd38   :  { %v6430_v7 = vpop.f32.mrf.mxu0 }
 0xd39   :  { %v6434_v43 = vmax.f32 %v6429_v18, 0.0  ;;  %v6482_v21 = vadd.f32 %v6480_v50, %v6433_v31  ;;  %v34743_v50 = vld [vmem:[#allocation23_spill] sm:$0xff] }
 0xd3a   :  { %v6431_v45 = vpop.f32.mrf.mxu0 }
 0xd3b   :  { %v6483_v27 = vadd.f32 %v6481_v30, %v6434_v43  ;;  %v6484_v36 = vpack.c.bf16 %v6482_v21, %v6482_v21 }
 0xd3d   :  { %v6485_v20 = vpack.c.bf16 %v6483_v27, %v6483_v27 }
 0xd3f   :  { %6518 = vmatprep.mubr.bf16.mxu1 %v6485_v20 }
 0xd40   :  { %6519 = vmatmul.mubr.bf16.vlgmr.msra.gmra.mxu1 %v6484_v36 }
 0xd41   :  { %26001 = vmatpush3.msra.mxu1 %v34740_v8  ;;  %26002 = vmatprep.mubr.msk.f32.mxu1 %vm29465_vm0, %v34641_v3 }
 0xd42   :  { %26005 = vmatprep.subr.mxu1 %v34641_v3 }
 0xe00   :  { %v6520_v11 = vpop.f32.mrf.mxu1 }
 0xe01   :  { %v6521_v24 = vadd.f32 %v6520_v11, %v34741_v14  ;;  %v29209_v11 = vld [vmem:[%s34423_s7 + $0x4] ss:$0 sm:$0xff] }
 0xe02   :  { %v6522_v63 = vpop.f32.mrf.mxu1 }
 0xe03   :  { %v6523_v32 = vadd.f32 %v6522_v63, %v34742_v59  ;;  %v6527_v31 = vmax.f32 %v6521_v24, 0.0  ;;  %v34767_v59 = vld [vmem:[#allocation56_spill] sm:$0xff] }
 0xe04   :  { %v6524_v45 = vpop.f32.mrf.mxu1 }
 0xe05   :  { %v6528_v43 = vmax.f32 %v6523_v32, 0.0  ;;  %v6529_v18 = vpack.c.bf16 %v6527_v31, %v6527_v31 }
 0xe06   :  { %v6525_v27 = vpop.f32.mrf.mxu1 }
 0xe07   :  { %v6530_v21 = vpack.c.bf16 %v6528_v43, %v6528_v43 }
 0xe09   :  { %6563 = vmatprep.mubr.bf16.mxu0 %v6530_v21 }
 0xe0a   :  { %6564 = vmatmul.mubr.bf16.vlgmr.msra.gmra.mxu0 %v6529_v18 }
 0xe0b   :  { %26021 = vmatpush3.msra.mxu0 %v34743_v50  ;;  %26022 = vmatprep.mubr.msk.f32.mxu0 %vm29465_vm0, %v34641_v3  ;;  %v34766_v50 = vld [vmem:[#allocation55_spill] sm:$0xff] }
 0xe0c   :  { %26030 = vmatprep.subr.mxu0 %v34641_v3 }
 0xeca   :  { %v23558_v7 = vpop.f32.mrf.mxu0 }
 0xecc   :  { %v23559_v30 = vpop.f32.mrf.mxu0 }
 0xecd   :  { %v23560_v20 = vadd.f32 %v23559_v30, %v23558_v7 }
 0xece   :  { %v23561_v36 = vpop.f32.mrf.mxu0 }
 0xecf   :  { %v6566_v24 = vadd.f32 %v29209_v11, %v23560_v20 }
 0xed0   :  { %v23562_v63 = vpop.f32.mrf.mxu0 }
 0xed1   :  { %v6572_v32 = vand.u32 2147483647, %v6566_v24  ;;  %v6571_v45 = vmul.f32 2.0, %v6566_v24  ;;  %v34746_v24 = vld [vmem:[#allocation28_spill] sm:$0xff] }
 0xed3   :  { %v6573_v31 = vadd.f32 1.0, %v6572_v32  ;;  %v34747_v32 = vld [vmem:[#allocation30_spill] sm:$0xff] }
 0xed5   :  { %29111 = vrcp.f32 %v6573_v31  ;;  %v34748_v31 = vld [vmem:[#allocation29_spill] sm:$0xff] }
 0xee2   :  { %v29112_v43 = vpop.eup %29111 }
 0xee3   :  { %v31090_v27 = vmul.f32 %v29112_v43, %v6571_v45  ;;  %v34750_v45 = vld [vmem:[#allocation32_spill] sm:$0xff]  ;;  %v34752_v43 = vld [vmem:[#allocation33_spill] sm:$0xff] }
 0xee5   :  { %34744 = vst [vmem:[#allocation67_spill] sm:$0xff] %v31090_v27  ;;  %6577 = vrot.lane.b32.xlu1 %v31090_v27, %s29466_s17 }
 0xee9   :  { %11835 = vrot.lane.b32.xlu1 %v31090_v27, %s29467_s18  ;;  %v34765_v27 = vld [vmem:[#allocation53_spill] sm:$0xff] }
 0xf57   :  { %v31096_v21 = vpop.permute.xlu1 %6577 }
 0xf58   :  { %34745 = vst [vmem:[#allocation68_spill] sm:$0xff] %v31096_v21  ;;  %v6580_v18 = vsel %vm1011_vm6, 1.0, %v31096_v21  ;;  %v34762_v21 = vld [vmem:[#allocation47_spill] sm:$0xff] }
 0xf59   :  { %v6582_v7 = vsel %vm1014_vm7, %v6580_v18, 0  ;;  %v34753_v18 = vld [vmem:[#allocation34_spill] sm:$0xff] }
 0xf5a   :  { %v6650_v30 = vand.u32 4294901760, %v6582_v7 }
 0xf5c   :  { %v6651_v20 = vsub.f32 %v6582_v7, %v6650_v30  ;;  %26023 = vmatmul.mubr.f32.vlgmr.msra.gmra.mxu0 %v6650_v30  ;;  %v34754_v7 = vld [vmem:[#allocation35_spill] sm:$0xff] }
 0xf5d   :  { %26031 = vmatpush3.msra.mxu0 %v34672_v38  ;;  %26034 = vmatprep.mubr.msk.f32.mxu0 %vm29465_vm0, %v34641_v3 }
 0xf5e   :  { %v6652_v36 = vand.u32 4294901760, %v6651_v20  ;;  %26032 = vmatprep.subr.mxu0 %v34641_v3 }
 0xf5f   :  { %26033 = vmatpush3.msra.mxu0 %v34673_v25 }
 0xf60   :  { %26035 = vmatmul.mubr.f32.vlgmr.msra.gmra.mxu0 %v30952_v2  ;;  %26044 = vmatprep.subr.mxu0 %v34641_v3  ;;  %v6653_v11 = vsub.f32 %v6651_v20, %v6652_v36  ;;  %v34749_v2 = vld [vmem:[#allocation31_spill] sm:$0xff] }
 0xf61   :  { %26045 = vmatpush3.msra.mxu0 %v34746_v24  ;;  %26048 = vmatprep.mubr.msk.f32.mxu0 %vm29465_vm0, %v34641_v3 }
 0xf62   :  { %26046 = vmatprep.subr.mxu0 %v34641_v3  ;;  %v6654_v63 = vand.u32 4294901760, %v6653_v11  ;;  %v34760_v11 = vld [vmem:[#allocation43_spill] sm:$0xff] }
 0xf63   :  { %26047 = vmatpush3.msra.mxu0 %v34747_v32 }
 0xf64   :  { %26003 = vmatmul.mubr.f32.vlgmr.msra.gmra.mxu1 %v6654_v63  ;;  %26049 = vmatmul.mubr.f32.vlgmr.msra.gmra.mxu0 %v30933_v46  ;;  %v34751_v46 = vld [vmem:[#allocation22_spill] sm:$0xff]  ;;  %v34761_v63 = vld [vmem:[#allocation45_spill] sm:$0xff] }
 0xf65   :  { %26006 = vmatpush3.msra.mxu1 %v34748_v31  ;;  %26058 = vmatprep.subr.mxu0 %v34641_v3  ;;  %v34764_v31 = vld [vmem:[#allocation51_spill] sm:$0xff] }
 0xf66   :  { %26059 = vmatpush3.msra.mxu0 %v34749_v2  ;;  %26007 = vmatprep.mubr.msk.f32.mxu1 %vm29465_vm0, %v34641_v3 }
 0xf67   :  { %26060 = vmatprep.subr.mxu0 %v34641_v3  ;;  %26010 = vmatprep.subr.mxu1 %v34641_v3 }
 0xf68   :  { %26061 = vmatpush3.msra.mxu0 %v34750_v45  ;;  %26062 = vmatprep.mubr.msk.f32.mxu0 %vm29465_vm0, %v34641_v3 }
 0xf69   :  { %26008 = vmatmul.mubr.f32.vlgmr.msra.gmra.mxu1 %v6650_v30  ;;  %26063 = vmatmul.mubr.f32.vlgmr.msra.gmra.mxu0 %v30930_v41 }
 0xf6a   :  { %26011 = vmatpush3.msra.mxu1 %v34751_v46  ;;  %26012 = vmatprep.mubr.msk.f32.mxu1 %vm29465_vm0, %v34641_v3  ;;  %v34763_v46 = vld [vmem:[#allocation50_spill] sm:$0xff] }
 0xf6b   :  { %26015 = vmatprep.subr.mxu1 %v34641_v3  ;;  %26072 = vmatprep.subr.mxu0 %v34641_v3 }
 0xf6c   :  { %26073 = vmatpush3.msra.mxu0 %v29821_v52  ;;  %26100 = vmatprep.mubr.msk.f32.mxu0 %vm29465_vm0, %v34641_v3 }
 0xf6d   :  { %26013 = vmatmul.mubr.f32.vlgmr.msra.gmra.mxu1 %v6651_v20  ;;  %26074 = vmatprep.subr.mxu0 %v34641_v3  ;;  %v34758_v20 = vld [vmem:[#allocation40_spill] sm:$0xff] }
 0xf6e   :  { %26016 = vmatpush3.msra.mxu1 %v34740_v8  ;;  %26017 = vmatprep.mubr.msk.f32.mxu1 %vm29465_vm0, %v34641_v3 }
 0xf6f   :  { %26025 = vmatprep.subr.mxu1 %v34641_v3  ;;  %26075 = vmatpush3.msra.mxu0 %v29826_v55 }
 0xf70   :  { %26076 = vmatprep.subr.mxu0 %v34641_v3 }
 0xf71   :  { %26018 = vmatmul.mubr.f32.vlgmr.msra.gmra.mxu1 %v6652_v36  ;;  %26077 = vmatpush3.msra.mxu0 %v29836_v58  ;;  %v34759_v36 = vld [vmem:[#allocation41_spill] sm:$0xff] }
 0xf72   :  { %26026 = vmatpush3.msra.mxu1 %v34740_v8  ;;  %26027 = vmatprep.mubr.msk.f32.mxu1 %vm29465_vm0, %v34641_v3 }
 0xf73   :  { %26037 = vmatprep.subr.mxu1 %v34641_v3  ;;  %26078 = vmatprep.subr.mxu0 %v34641_v3 }
 0xf74   :  { %26079 = vmatpush3.msra.mxu0 %v29848_v6 }
 0xf75   :  { %26028 = vmatmul.mubr.f32.vlgmr.msra.gmra.mxu1 %v6650_v30  ;;  %26080 = vmatprep.subr.mxu0 %v34641_v3  ;;  %v34756_v30 = vld [vmem:[#allocation37_spill] sm:$0xff] }
 0xf76   :  { %26038 = vmatpush3.msra.mxu1 %v34752_v43  ;;  %26041 = vmatprep.mubr.msk.f32.mxu1 %vm29465_vm0, %v34641_v3 }
 0xf77   :  { %26039 = vmatprep.subr.mxu1 %v34641_v3  ;;  %26081 = vmatpush3.msra.mxu0 %v29863_v23 }
 0xf78   :  { %26040 = vmatpush3.msra.mxu1 %v34753_v18  ;;  %26082 = vmatprep.subr.mxu0 %v34641_v3 }
 0xf79   :  { %26051 = vmatprep.subr.mxu1 %v34641_v3  ;;  %26042 = vmatmul.mubr.f32.vlgmr.msra.gmra.mxu1 %v30930_v41 }
 0xf7a   :  { %26052 = vmatpush3.msra.mxu1 %v34672_v38  ;;  %26055 = vmatprep.mubr.msk.f32.mxu1 %vm29465_vm0, %v34641_v3 }
 0xf7b   :  { %26053 = vmatprep.subr.mxu1 %v34641_v3  ;;  %26083 = vmatpush3.msra.mxu0 %v29874_v29 }
 0xf7c   :  { %26054 = vmatpush3.msra.mxu1 %v34673_v25  ;;  %26084 = vmatprep.subr.mxu0 %v34641_v3 }
 0xf7d   :  { %26065 = vmatprep.subr.mxu1 %v34641_v3  ;;  %26056 = vmatmul.mubr.f32.vlgmr.msra.gmra.mxu1 %v30941_v1  ;;  %v34755_v1 = vld [vmem:[#allocation36_spill] sm:$0xff] }
 0xf7e   :  { %26066 = vmatpush3.msra.mxu1 %v34672_v38  ;;  %26069 = vmatprep.mubr.msk.f32.mxu1 %vm29465_vm0, %v34641_v3 }
 0xf7f   :  { %26067 = vmatprep.subr.mxu1 %v34641_v3  ;;  %26085 = vmatpush3.msra.mxu0 %v29889_v35 }
 0xf80   :  { %26068 = vmatpush3.msra.mxu1 %v34673_v25  ;;  %26086 = vmatprep.subr.mxu0 %v34641_v3 }
 0xf81   :  { %26070 = vmatmul.mubr.f32.vlgmr.msra.gmra.mxu1 %v30930_v41  ;;  %26103 = vmatprep.subr.mxu1 %v34641_v3  ;;  %v34757_v41 = vld [vmem:[#allocation38_spill] sm:$0xff] }
 0xf82   :  { %26104 = vmatpush3.msra.mxu1 %v34754_v7  ;;  %26087 = vmatpush3.msra.mxu0 %v29906_v51 }
 0xf83   :  { %26105 = vmatprep.subr.mxu1 %v34641_v3  ;;  %26088 = vmatprep.subr.mxu0 %v34641_v3 }
 0xf84   :  { %26106 = vmatpush3.msra.mxu1 %v34755_v1  ;;  %26089 = vmatpush3.msra.mxu0 %v29922_v16 }
 0xf85   :  { %26107 = vmatprep.subr.mxu1 %v34641_v3  ;;  %26090 = vmatprep.subr.mxu0 %v34641_v3 }
 0xf86   :  { %26108 = vmatpush3.msra.mxu1 %v34756_v30  ;;  %26091 = vmatpush3.msra.mxu0 %v29941_v53 }
 0xf87   :  { %26109 = vmatprep.subr.mxu1 %v34641_v3  ;;  %26092 = vmatprep.subr.mxu0 %v34641_v3 }
 0xf88   :  { %26110 = vmatpush3.msra.mxu1 %v34757_v41  ;;  %26131 = vmatprep.mubr.msk.f32.mxu1 %vm29465_vm0, %v34641_v3 }
 0xf89   :  { %26111 = vmatprep.subr.mxu1 %v34641_v3  ;;  %26093 = vmatpush3.msra.mxu0 %v29952_v57 }
 0xf8a   :  { %26112 = vmatpush3.msra.mxu1 %v34758_v20  ;;  %26094 = vmatprep.subr.mxu0 %v34641_v3 }
 0xf8b   :  { %26113 = vmatprep.subr.mxu1 %v34641_v3  ;;  %26095 = vmatpush3.msra.mxu0 %v29968_v12 }
 0xf8c   :  { %26114 = vmatpush3.msra.mxu1 %v34759_v36  ;;  %26096 = vmatprep.subr.mxu0 %v34641_v3 }
 0xf8d   :  { %26115 = vmatprep.subr.mxu1 %v34641_v3  ;;  %26097 = vmatpush3.msra.mxu0 %v29985_v17 }
 0xf8e   :  { %26116 = vmatpush3.msra.mxu1 %v34760_v11  ;;  %26098 = vmatprep.subr.mxu0 %v34641_v3 }
 0xf8f   :  { %26117 = vmatprep.subr.mxu1 %v34641_v3  ;;  %26099 = vmatpush3.msra.mxu0 %v30001_v62 }
 0xf90   :  { %26118 = vmatpush3.msra.mxu1 %v34761_v63  ;;  %26134 = vmatprep.subr.mxu0 %v34641_v3 }
 0xf91   :  { %26119 = vmatprep.subr.mxu1 %v34641_v3 }
 0xf92   :  { %26120 = vmatpush3.msra.mxu1 %v34762_v21 }
 0xf93   :  { %26121 = vmatprep.subr.mxu1 %v34641_v3 }
 0xf94   :  { %26122 = vmatpush3.msra.mxu1 %v34763_v46 }
 0xf95   :  { %26123 = vmatprep.subr.mxu1 %v34641_v3 }
 0xf96   :  { %26124 = vmatpush3.msra.mxu1 %v34764_v31 }
 0xf97   :  { %26125 = vmatprep.subr.mxu1 %v34641_v3 }
 0xf98   :  { %26126 = vmatpush3.msra.mxu1 %v34765_v27 }
 0xf99   :  { %26127 = vmatprep.subr.mxu1 %v34641_v3 }
 0xf9a   :  { %26128 = vmatpush3.msra.mxu1 %v34766_v50 }
 0xf9b   :  { %26129 = vmatprep.subr.mxu1 %v34641_v3 }
 0xf9c   :  { %26130 = vmatpush3.msra.mxu1 %v34767_v59 }
 0xf9d   :  { %26165 = vmatprep.subr.mxu1 %v34641_v3 }
0x101c   :  { %v6954_v14 = vpop.f32.mrf.mxu0 }
0x101e   :  { %v26024_v8 = vpop.f32.mrf.mxu0 }
0x1020   :  { %v7103_v13 = vpop.f32.mrf.mxu0 }
0x1022   :  { %v26036_v0 = vpop.f32.mrf.mxu0 }
0x1024   :  { %v6656_v49 = vpop.f32.mrf.mxu1  ;;  %v7260_v42 = vpop.f32.mrf.mxu0 }
0x1026   :  { %v26004_v31 = vpop.f32.mrf.mxu1  ;;  %v26050_v46 = vpop.f32.mrf.mxu0 }
0x1029   :  { %v6732_v21 = vpop.f32.mrf.mxu1  ;;  %v7412_v27 = vpop.f32.mrf.mxu0 }
0x102a   :  { %v6733_v59 = vadd.f32 %v6732_v21, %v6656_v49  ;;  %v34771_v21 = vld [vmem:[#allocation46_spill] sm:$0xff] }
0x102b   :  { %v26009_v63 = vpop.f32.mrf.mxu1  ;;  %v26064_v11 = vpop.f32.mrf.mxu0 }
0x102d   :  { %v6806_v36 = vpop.f32.mrf.mxu1 }
0x102e   :  { %v6807_v45 = vadd.f32 %v6806_v36, %v6733_v59 }
0x102f   :  { %v26014_v50 = vpop.f32.mrf.mxu1 }
0x1031   :  { %v6880_v20 = vpop.f32.mrf.mxu1 }
0x1032   :  { %v6881_v8 = vadd.f32 %v6880_v20, %v6807_v45  ;;  %v34775_v45 = vld [vmem:[#allocation54_spill] sm:$0xff] }
0x1033   :  { %v26019_v41 = vpop.f32.mrf.mxu1 }
0x1034   :  { %v6955_v31 = vadd.f32 %v6954_v14, %v6881_v8  ;;  %v34769_v14 = vld [vmem:[#allocation42_spill] sm:$0xff] }
0x1035   :  { %v7026_v30 = vpop.f32.mrf.mxu1 }
0x1036   :  { %v31219_v11 = vadd.f32 %v7026_v30, %v6955_v31 }
0x1037   :  { %v26029_v1 = vpop.f32.mrf.mxu1 }
0x1038   :  { %v34777_v1 = vld [vmem:[#allocation27_spill] sm:$0xff] }
0x1039   :  { %v7184_v2 = vpop.f32.mrf.mxu1 }
0x103a   :  { %v7185_v7 = vadd.f32 %v7184_v2, %v7103_v13  ;;  %v34774_v2 = vld [vmem:[#allocation52_spill] sm:$0xff] }
0x103b   :  { %v26043_v0 = vpop.f32.mrf.mxu1 }
0x103c   :  { %v7261_v32 = vadd.f32 %v7260_v42, %v7185_v7  ;;  %v34768_v42 = vld [vmem:[#allocation39_spill] sm:$0xff]  ;;  %v34776_v7 = vld [vmem:[#allocation26_spill] sm:$0xff] }
0x103d   :  { %v7335_v24 = vpop.f32.mrf.mxu1 }
0x103e   :  { %v7336_v46 = vadd.f32 %v7335_v24, %v7261_v32  ;;  %v34772_v24 = vld [vmem:[#allocation48_spill] sm:$0xff]  ;;  %v34773_v32 = vld [vmem:[#allocation49_spill] sm:$0xff] }
0x103f   :  { %v26057_v15 = vpop.f32.mrf.mxu1 }
0x1040   :  { %v7413_v25 = vadd.f32 %v7412_v27, %v7336_v46  ;;  %v34770_v27 = vld [vmem:[#allocation44_spill] sm:$0xff] }
0x1041   :  { %v7485_v63 = vpop.f32.mrf.mxu1 }
0x1042   :  { %v7486_v50 = vadd.f32 %v7485_v63, %v7413_v25 }
0x1043   :  { %v26071_v38 = vpop.f32.mrf.mxu1 }
0x1044   :  { %v7489_v41 = vmul.f32 %v7486_v50, %v31219_v11 }
0x1046   :  { %v7491_v49 = vsel %vm1947_vm8, %v7489_v41, 0 }
0x1047   :  { %v31223_v59 = vand.u32 4294901760, %v7491_v49 }
0x1049   :  { %v31226_v13 = vsub.f32 %v7491_v49, %v31223_v59  ;;  %26132 = vmatmul.mubr.f32.vlgmr.msra.gmra.mxu1 %v31223_v59 }
0x104a   :  { %26166 = vmatpush3.msra.mxu1 %v29821_v52  ;;  %26193 = vmatprep.mubr.msk.f32.mxu1 %vm29465_vm0, %v34641_v3 }
0x104b   :  { %26167 = vmatprep.subr.mxu1 %v34641_v3  ;;  %v7574_v38 = vand.u32 4294901760, %v31226_v13 }
0x104c   :  { %26168 = vmatpush3.msra.mxu1 %v29826_v55 }
0x104d   :  { %26169 = vmatprep.subr.mxu1 %v34641_v3  ;;  %v7575_v25 = vsub.f32 %v31226_v13, %v7574_v38 }
0x104e   :  { %26170 = vmatpush3.msra.mxu1 %v29836_v58 }
0x104f   :  { %26171 = vmatprep.subr.mxu1 %v34641_v3  ;;  %v7576_v15 = vand.u32 4294901760, %v7575_v25 }
0x1050   :  { %26172 = vmatpush3.msra.mxu1 %v29848_v6 }
0x1051   :  { %26173 = vmatprep.subr.mxu1 %v34641_v3  ;;  %26101 = vmatmul.mubr.f32.vlgmr.msra.gmra.mxu0 %v7576_v15 }
0x1052   :  { %26135 = vmatpush3.msra.mxu0 %v29824_v54  ;;  %26174 = vmatpush3.msra.mxu1 %v29863_v23 }
0x1053   :  { %26136 = vmatprep.subr.mxu0 %v34641_v3  ;;  %26175 = vmatprep.subr.mxu1 %v34641_v3 }
0x1054   :  { %26137 = vmatpush3.msra.mxu0 %v29834_v56  ;;  %26176 = vmatpush3.msra.mxu1 %v29874_v29 }
0x1055   :  { %26138 = vmatprep.subr.mxu0 %v34641_v3  ;;  %26177 = vmatprep.subr.mxu1 %v34641_v3 }
0x1056   :  { %26139 = vmatpush3.msra.mxu0 %v29846_v5  ;;  %26178 = vmatpush3.msra.mxu1 %v29889_v35 }
0x1057   :  { %26140 = vmatprep.subr.mxu0 %v34641_v3  ;;  %26179 = vmatprep.subr.mxu1 %v34641_v3 }
0x1058   :  { %26141 = vmatpush3.msra.mxu0 %v29860_v22  ;;  %26180 = vmatpush3.msra.mxu1 %v29906_v51 }
0x1059   :  { %26142 = vmatprep.subr.mxu0 %v34641_v3  ;;  %26181 = vmatprep.subr.mxu1 %v34641_v3 }
0x105a   :  { %26143 = vmatpush3.msra.mxu0 %v29878_v10  ;;  %26182 = vmatpush3.msra.mxu1 %v29922_v16 }
0x105b   :  { %26144 = vmatprep.subr.mxu0 %v34641_v3  ;;  %26183 = vmatprep.subr.mxu1 %v34641_v3 }
0x105c   :  { %26145 = vmatpush3.msra.mxu0 %v29887_v34  ;;  %26184 = vmatpush3.msra.mxu1 %v29941_v53 }
0x105d   :  { %26146 = vmatprep.subr.mxu0 %v34641_v3  ;;  %26185 = vmatprep.subr.mxu1 %v34641_v3 }
0x105e   :  { %26147 = vmatpush3.msra.mxu0 %v29904_v48  ;;  %26186 = vmatpush3.msra.mxu1 %v29952_v57 }
0x105f   :  { %26148 = vmatprep.subr.mxu0 %v34641_v3  ;;  %26187 = vmatprep.subr.mxu1 %v34641_v3 }
0x1060   :  { %26149 = vmatpush3.msra.mxu0 %v29920_v9  ;;  %26188 = vmatpush3.msra.mxu1 %v29968_v12 }
0x1061   :  { %26150 = vmatprep.subr.mxu0 %v34641_v3  ;;  %26189 = vmatprep.subr.mxu1 %v34641_v3 }
0x1062   :  { %26151 = vmatpush3.msra.mxu0 %v29937_v39  ;;  %26190 = vmatpush3.msra.mxu1 %v29985_v17 }
0x1063   :  { %26152 = vmatprep.subr.mxu0 %v34641_v3  ;;  %26191 = vmatprep.subr.mxu1 %v34641_v3 }
0x1064   :  { %26153 = vmatpush3.msra.mxu0 %v29957_v40  ;;  %26192 = vmatpush3.msra.mxu1 %v30001_v62 }
0x1065   :  { %26154 = vmatprep.subr.mxu0 %v34641_v3  ;;  %26194 = vmatmul.mubr.f32.vlgmr.msra.gmra.mxu1 %v7574_v38 }
0x1066   :  { %26227 = vmatprep.subr.mxu1 %v34641_v3  ;;  %26155 = vmatpush3.msra.mxu0 %v29966_v44 }
0x1067   :  { %26228 = vmatpush3.msra.mxu1 %v29821_v52  ;;  %26156 = vmatprep.subr.mxu0 %v34641_v3 }
0x1068   :  { %26229 = vmatprep.subr.mxu1 %v34641_v3  ;;  %26157 = vmatpush3.msra.mxu0 %v29983_v26 }
0x1069   :  { %26230 = vmatpush3.msra.mxu1 %v29826_v55  ;;  %26158 = vmatprep.subr.mxu0 %v34641_v3 }
0x106a   :  { %26231 = vmatprep.subr.mxu1 %v34641_v3  ;;  %26159 = vmatpush3.msra.mxu0 %v29999_v61 }
0x106b   :  { %26232 = vmatpush3.msra.mxu1 %v29836_v58  ;;  %26160 = vmatprep.subr.mxu0 %v34641_v3 }
0x106c   :  { %26233 = vmatprep.subr.mxu1 %v34641_v3  ;;  %26161 = vmatpush3.msra.mxu0 %v30017_v33 }
0x106d   :  { %26162 = vmatprep.mubr.msk.f32.mxu0 %vm29465_vm0, %v34641_v3  ;;  %26234 = vmatpush3.msra.mxu1 %v29848_v6 }
0x106e   :  { %26163 = vmatmul.mubr.f32.vlgmr.msra.gmra.mxu0 %v31226_v13  ;;  %26196 = vmatprep.subr.mxu0 %v34641_v3 }
0x106f   :  { %26235 = vmatprep.subr.mxu1 %v34641_v3  ;;  %26197 = vmatpush3.msra.mxu0 %v29831_v60 }
0x1070   :  { %26236 = vmatpush3.msra.mxu1 %v29863_v23  ;;  %26198 = vmatprep.subr.mxu0 %v34641_v3 }
0x1071   :  { %26237 = vmatprep.subr.mxu1 %v34641_v3  ;;  %26199 = vmatpush3.msra.mxu0 %v29843_v4 }
0x1072   :  { %26238 = vmatpush3.msra.mxu1 %v29874_v29  ;;  %26200 = vmatprep.subr.mxu0 %v34641_v3 }
0x1073   :  { %26239 = vmatprep.subr.mxu1 %v34641_v3  ;;  %26201 = vmatpush3.msra.mxu0 %v29857_v19 }
0x1074   :  { %26240 = vmatpush3.msra.mxu1 %v29889_v35  ;;  %26202 = vmatprep.subr.mxu0 %v34641_v3 }
0x1075   :  { %26241 = vmatprep.subr.mxu1 %v34641_v3  ;;  %26203 = vmatpush3.msra.mxu0 %v29872_v28 }
0x1076   :  { %26242 = vmatpush3.msra.mxu1 %v29906_v51  ;;  %26204 = vmatprep.subr.mxu0 %v34641_v3 }
0x1077   :  { %26243 = vmatprep.subr.mxu1 %v34641_v3  ;;  %26205 = vmatpush3.msra.mxu0 %v29894_v37 }
0x1078   :  { %26244 = vmatpush3.msra.mxu1 %v29922_v16  ;;  %26206 = vmatprep.subr.mxu0 %v34641_v3 }
0x1079   :  { %26245 = vmatprep.subr.mxu1 %v34641_v3  ;;  %26207 = vmatpush3.msra.mxu0 %v29901_v47 }
0x107a   :  { %26246 = vmatpush3.msra.mxu1 %v29941_v53  ;;  %26208 = vmatprep.subr.mxu0 %v34641_v3 }
0x107b   :  { %26247 = vmatprep.subr.mxu1 %v34641_v3  ;;  %26209 = vmatpush3.msra.mxu0 %v34768_v42 }
0x107c   :  { %26248 = vmatpush3.msra.mxu1 %v29952_v57  ;;  %26210 = vmatprep.subr.mxu0 %v34641_v3 }
0x107d   :  { %26249 = vmatprep.subr.mxu1 %v34641_v3  ;;  %26211 = vmatpush3.msra.mxu0 %v34769_v14 }
0x107e   :  { %26250 = vmatpush3.msra.mxu1 %v29968_v12  ;;  %26212 = vmatprep.subr.mxu0 %v34641_v3 }
0x107f   :  { %26251 = vmatprep.subr.mxu1 %v34641_v3  ;;  %26213 = vmatpush3.msra.mxu0 %v34770_v27 }
0x1080   :  { %26252 = vmatpush3.msra.mxu1 %v29985_v17  ;;  %26214 = vmatprep.subr.mxu0 %v34641_v3 }
0x1081   :  { %26253 = vmatprep.subr.mxu1 %v34641_v3  ;;  %26215 = vmatpush3.msra.mxu0 %v34771_v21 }
0x1082   :  { %26254 = vmatpush3.msra.mxu1 %v30001_v62  ;;  %26255 = vmatprep.mubr.msk.f32.mxu1 %vm29465_vm0, %v34641_v3 }
0x1083   :  { %26216 = vmatprep.subr.mxu0 %v34641_v3  ;;  %26256 = vmatmul.mubr.f32.vlgmr.msra.gmra.mxu1 %v31223_v59 }
0x1084   :  { %26217 = vmatpush3.msra.mxu0 %v34772_v24  ;;  %26224 = vmatprep.mubr.msk.f32.mxu0 %vm29465_vm0, %v34641_v3 }
0x1085   :  { %26218 = vmatprep.subr.mxu0 %v34641_v3  ;;  %26265 = vmatprep.subr.mxu1 %v34641_v3 }
0x1086   :  { %26219 = vmatpush3.msra.mxu0 %v34773_v32  ;;  %26266 = vmatpush3.msra.mxu1 %v34752_v43 }
0x1087   :  { %26220 = vmatprep.subr.mxu0 %v34641_v3  ;;  %26267 = vmatprep.subr.mxu1 %v34641_v3 }
0x1088   :  { %26221 = vmatpush3.msra.mxu0 %v34774_v2  ;;  %26268 = vmatpush3.msra.mxu1 %v34753_v18  ;;  %v34778_v18 = vld [vmem:[#allocation65_spill] sm:$0xff] }
0x1089   :  { %26222 = vmatprep.subr.mxu0 %v34641_v3  ;;  %26269 = vmatprep.mubr.msk.f32.mxu1 %vm29465_vm0, %v34641_v3 }
0x108a   :  { %26223 = vmatpush3.msra.mxu0 %v34775_v45  ;;  %26279 = vmatprep.subr.mxu1 %v34641_v3 }
0x108b   :  { %26225 = vmatmul.mubr.f32.vlgmr.msra.gmra.mxu0 %v31223_v59  ;;  %26258 = vmatprep.subr.mxu0 %v34641_v3 }
0x108c   :  { %26259 = vmatpush3.msra.mxu0 %v34776_v7  ;;  %26262 = vmatprep.mubr.msk.f32.mxu0 %vm29465_vm0, %v34641_v3 }
0x108d   :  { %26260 = vmatprep.subr.mxu0 %v34641_v3 }
0x108e   :  { %26261 = vmatpush3.msra.mxu0 %v34777_v1 }
0x108f   :  { %26272 = vmatprep.subr.mxu0 %v34641_v3 }
0x1109   :  { %v7719_v30 = vpop.f32.mrf.mxu1 }
0x110b   :  { %v26133_v20 = vpop.f32.mrf.mxu1 }
0x1111   :  { %v7578_v36 = vpop.f32.mrf.mxu0 }
0x1112   :  { %v7720_v41 = vadd.f32 %v7719_v30, %v7578_v36 }
0x1113   :  { %v26102_v8 = vpop.f32.mrf.mxu0 }
0x1125   :  { %v7906_v0 = vpop.f32.mrf.mxu1 }
0x1127   :  { %v26195_v31 = vpop.f32.mrf.mxu1 }
0x1128   :  { %v34780_v31 = vld [vmem:[#allocation30_spill] sm:$0xff] }
0x112e   :  { %v7819_v46 = vpop.f32.mrf.mxu0 }
0x112f   :  { %v7820_v59 = vadd.f32 %v7819_v46, %v7720_v41  ;;  %v34781_v46 = vld [vmem:[#allocation35_spill] sm:$0xff]  ;;  %v34784_v41 = vld [vmem:[#allocation36_spill] sm:$0xff] }
0x1130   :  { %v26164_v63 = vpop.f32.mrf.mxu0 }
0x1131   :  { %v7907_v13 = vadd.f32 %v7906_v0, %v7820_v59  ;;  %v34779_v0 = vld [vmem:[#allocation28_spill] sm:$0xff]  ;;  %v34782_v63 = vld [vmem:[#allocation31_spill] sm:$0xff] }
0x1132   :  { %v34787_v59 = vld [vmem:[#allocation40_spill] sm:$0xff] }
0x1143   :  { %v8104_v50 = vpop.f32.mrf.mxu1 }
0x1145   :  { %v26257_v49 = vpop.f32.mrf.mxu1 }
0x1146   :  { %v34785_v49 = vld [vmem:[#allocation37_spill] sm:$0xff] }
0x114b   :  { %v8019_v38 = vpop.f32.mrf.mxu0 }
0x114c   :  { %v8020_v25 = vadd.f32 %v8019_v38, %v7907_v13  ;;  %v34788_v13 = vld [vmem:[#allocation41_spill] sm:$0xff]  ;;  %v34789_v38 = vld [vmem:[#allocation43_spill] sm:$0xff] }
0x114d   :  { %v26226_v15 = vpop.f32.mrf.mxu0 }
0x114e   :  { %v31366_v45 = vadd.f32 %v8104_v50, %v8020_v25  ;;  %v34783_v50 = vld [vmem:[#allocation32_spill] sm:$0xff]  ;;  %v34790_v25 = vld [vmem:[#allocation45_spill] sm:$0xff]  ;;  %v34791_v15 = vld [vmem:[#allocation47_spill] sm:$0xff] }
0x1150   :  { %v8108_v2 = vadd.f32 %v31366_v45, %v34778_v18 }
0x1152   :  { %v8110_v20 = vsel %vm72_vm2, %v8108_v2, 0 }
0x1153   :  { %v8179_v8 = vand.u32 4294901760, %v8110_v20 }
0x1155   :  { %v8180_v43 = vsub.f32 %v8110_v20, %v8179_v8  ;;  %26270 = vmatmul.mubr.f32.vlgmr.msra.gmra.mxu1 %v8179_v8  ;;  %v34792_v20 = vld [vmem:[#allocation50_spill] sm:$0xff] }
0x1156   :  { %26280 = vmatpush3.msra.mxu1 %v34776_v7  ;;  %26283 = vmatprep.mubr.msk.f32.mxu1 %vm29465_vm0, %v34641_v3 }
0x1157   :  { %26281 = vmatprep.subr.mxu1 %v34641_v3  ;;  %v8181_v30 = vand.u32 4294901760, %v8180_v43 }
0x1158   :  { %26282 = vmatpush3.msra.mxu1 %v34777_v1 }
0x1159   :  { %26284 = vmatmul.mubr.f32.vlgmr.msra.gmra.mxu1 %v8181_v30  ;;  %26293 = vmatprep.subr.mxu1 %v34641_v3  ;;  %v8182_v36 = vsub.f32 %v8180_v43, %v8181_v30  ;;  %v34794_v30 = vld [vmem:[#allocation53_spill] sm:$0xff] }
0x115a   :  { %26294 = vmatpush3.msra.mxu1 %v34776_v7  ;;  %26297 = vmatprep.mubr.msk.f32.mxu1 %vm29465_vm0, %v34641_v3 }
0x115b   :  { %26295 = vmatprep.subr.mxu1 %v34641_v3  ;;  %v8183_v2 = vand.u32 4294901760, %v8182_v36  ;;  %v34795_v36 = vld [vmem:[#allocation55_spill] sm:$0xff] }
0x115c   :  { %26296 = vmatpush3.msra.mxu1 %v34777_v1 }
0x115d   :  { %26263 = vmatmul.mubr.f32.vlgmr.msra.gmra.mxu0 %v8183_v2  ;;  %26298 = vmatmul.mubr.f32.vlgmr.msra.gmra.mxu1 %v8179_v8  ;;  %v34796_v2 = vld [vmem:[#allocation56_spill] sm:$0xff] }
0x115e   :  { %26273 = vmatpush3.msra.mxu0 %v34779_v0  ;;  %26276 = vmatprep.mubr.msk.f32.mxu0 %vm29465_vm0, %v34641_v3 }
0x115f   :  { %26274 = vmatprep.subr.mxu0 %v34641_v3  ;;  %26331 = vmatprep.subr.mxu1 %v34641_v3 }
0x1160   :  { %26275 = vmatpush3.msra.mxu0 %v34780_v31  ;;  %26332 = vmatpush3.msra.mxu1 %v34781_v46 }
0x1161   :  { %26286 = vmatprep.subr.mxu0 %v34641_v3  ;;  %26277 = vmatmul.mubr.f32.vlgmr.msra.gmra.mxu0 %v8180_v43  ;;  %v34786_v43 = vld [vmem:[#allocation38_spill] sm:$0xff] }
0x1162   :  { %26287 = vmatpush3.msra.mxu0 %v34782_v63  ;;  %26290 = vmatprep.mubr.msk.f32.mxu0 %vm29465_vm0, %v34641_v3 }
0x1163   :  { %26288 = vmatprep.subr.mxu0 %v34641_v3  ;;  %26333 = vmatprep.subr.mxu1 %v34641_v3 }
0x1164   :  { %26289 = vmatpush3.msra.mxu0 %v34783_v50  ;;  %26334 = vmatpush3.msra.mxu1 %v34784_v41 }
0x1165   :  { %26291 = vmatmul.mubr.f32.vlgmr.msra.gmra.mxu0 %v8179_v8  ;;  %26335 = vmatprep.subr.mxu1 %v34641_v3  ;;  %v34793_v8 = vld [vmem:[#allocation51_spill] sm:$0xff] }
0x1166   :  { %26336 = vmatpush3.msra.mxu1 %v34785_v49  ;;  %26300 = vmatprep.subr.mxu0 %v34641_v3 }
0x1167   :  { %26337 = vmatprep.subr.mxu1 %v34641_v3  ;;  %26301 = vmatpush3.msra.mxu0 %v29821_v52 }
0x1168   :  { %26338 = vmatpush3.msra.mxu1 %v34786_v43  ;;  %26302 = vmatprep.subr.mxu0 %v34641_v3 }
0x1169   :  { %26339 = vmatprep.subr.mxu1 %v34641_v3  ;;  %26303 = vmatpush3.msra.mxu0 %v29826_v55 }
0x116a   :  { %26340 = vmatpush3.msra.mxu1 %v34787_v59  ;;  %26304 = vmatprep.subr.mxu0 %v34641_v3 }
0x116b   :  { %26341 = vmatprep.subr.mxu1 %v34641_v3  ;;  %26305 = vmatpush3.msra.mxu0 %v29836_v58 }
0x116c   :  { %26342 = vmatpush3.msra.mxu1 %v34788_v13  ;;  %26306 = vmatprep.subr.mxu0 %v34641_v3 }
0x116d   :  { %26343 = vmatprep.subr.mxu1 %v34641_v3  ;;  %26307 = vmatpush3.msra.mxu0 %v29848_v6 }
0x116e   :  { %26344 = vmatpush3.msra.mxu1 %v34789_v38  ;;  %26308 = vmatprep.subr.mxu0 %v34641_v3 }
0x116f   :  { %26345 = vmatprep.subr.mxu1 %v34641_v3  ;;  %26309 = vmatpush3.msra.mxu0 %v29863_v23 }
0x1170   :  { %26346 = vmatpush3.msra.mxu1 %v34790_v25  ;;  %26310 = vmatprep.subr.mxu0 %v34641_v3 }
0x1171   :  { %26347 = vmatprep.subr.mxu1 %v34641_v3  ;;  %26311 = vmatpush3.msra.mxu0 %v29874_v29 }
0x1172   :  { %26348 = vmatpush3.msra.mxu1 %v34791_v15  ;;  %26312 = vmatprep.subr.mxu0 %v34641_v3 }
0x1173   :  { %26349 = vmatprep.subr.mxu1 %v34641_v3  ;;  %26313 = vmatpush3.msra.mxu0 %v29889_v35 }
0x1174   :  { %26350 = vmatpush3.msra.mxu1 %v34792_v20  ;;  %26314 = vmatprep.subr.mxu0 %v34641_v3 }
0x1175   :  { %26351 = vmatprep.subr.mxu1 %v34641_v3  ;;  %26315 = vmatpush3.msra.mxu0 %v29906_v51 }
0x1176   :  { %26352 = vmatpush3.msra.mxu1 %v34793_v8  ;;  %26316 = vmatprep.subr.mxu0 %v34641_v3 }
0x1177   :  { %26353 = vmatprep.subr.mxu1 %v34641_v3  ;;  %26317 = vmatpush3.msra.mxu0 %v29922_v16 }
0x1178   :  { %26354 = vmatpush3.msra.mxu1 %v34794_v30  ;;  %26318 = vmatprep.subr.mxu0 %v34641_v3 }
0x1179   :  { %26355 = vmatprep.subr.mxu1 %v34641_v3  ;;  %26319 = vmatpush3.msra.mxu0 %v29941_v53 }
0x117a   :  { %26356 = vmatpush3.msra.mxu1 %v34795_v36  ;;  %26320 = vmatprep.subr.mxu0 %v34641_v3 }
0x117b   :  { %26357 = vmatprep.subr.mxu1 %v34641_v3  ;;  %26359 = vmatprep.mubr.msk.f32.mxu1 %vm29465_vm0, %v34641_v3 }
0x117c   :  { %26358 = vmatpush3.msra.mxu1 %v34796_v2  ;;  %26321 = vmatpush3.msra.mxu0 %v29952_v57 }
0x117d   :  { %26393 = vmatprep.subr.mxu1 %v34641_v3  ;;  %26322 = vmatprep.subr.mxu0 %v34641_v3 }
0x117e   :  { %26323 = vmatpush3.msra.mxu0 %v29968_v12  ;;  %26328 = vmatprep.mubr.msk.f32.mxu0 %vm29465_vm0, %v34641_v3 }
0x117f   :  { %26324 = vmatprep.subr.mxu0 %v34641_v3 }
0x1180   :  { %26325 = vmatpush3.msra.mxu0 %v29985_v17 }
0x1181   :  { %26326 = vmatprep.subr.mxu0 %v34641_v3 }
0x1182   :  { %26327 = vmatpush3.msra.mxu0 %v30001_v62 }
0x1183   :  { %26362 = vmatprep.subr.mxu0 %v34641_v3 }
0x1215   :  { %v8266_v2 = vpop.f32.mrf.mxu1 }
0x1217   :  { %v26271_v36 = vpop.f32.mrf.mxu1 }
0x1219   :  { %v8417_v30 = vpop.f32.mrf.mxu1 }
0x121b   :  { %v26285_v8 = vpop.f32.mrf.mxu1 }
0x121d   :  { %v8185_v20 = vpop.f32.mrf.mxu0  ;;  %v8567_v15 = vpop.f32.mrf.mxu1 }
0x121e   :  { %v8267_v13 = vadd.f32 %v8266_v2, %v8185_v20 }
0x121f   :  { %v26264_v25 = vpop.f32.mrf.mxu0  ;;  %v26299_v38 = vpop.f32.mrf.mxu1 }
0x1221   :  { %v8342_v59 = vpop.f32.mrf.mxu0 }
0x1222   :  { %v8343_v43 = vadd.f32 %v8342_v59, %v8267_v13 }
0x1223   :  { %v26278_v49 = vpop.f32.mrf.mxu0 }
0x1224   :  { %v8418_v41 = vadd.f32 %v8417_v30, %v8343_v43 }
0x1225   :  { %v8494_v50 = vpop.f32.mrf.mxu0 }
0x1226   :  { %v8495_v63 = vadd.f32 %v8494_v50, %v8418_v41  ;;  %v34799_v50 = vld [vmem:[#allocation34_spill] sm:$0xff] }
0x1227   :  { %v26292_v46 = vpop.f32.mrf.mxu0  ;;  %v34800_v41 = vld [vmem:[#allocation54_spill] sm:$0xff] }
0x1228   :  { %v8568_v31 = vadd.f32 %v8567_v15, %v8495_v63  ;;  %v34798_v63 = vld [vmem:[#allocation52_spill] sm:$0xff] }
0x122a   :  { %v8571_v0 = vmul.f32 %v8568_v31, %v31219_v11  ;;  %v34797_v31 = vld [vmem:[#allocation33_spill] sm:$0xff] }
0x122c   :  { %v8573_v18 = vsel %vm1947_vm8, %v8571_v0, 0 }
0x122d   :  { %v31457_v36 = vand.u32 4294901760, %v8573_v18 }
0x122f   :  { %v31460_v8 = vsub.f32 %v8573_v18, %v31457_v36  ;;  %26360 = vmatmul.mubr.f32.vlgmr.msra.gmra.mxu1 %v31457_v36 }
0x1230   :  { %26394 = vmatpush3.msra.mxu1 %v29821_v52  ;;  %26421 = vmatprep.mubr.msk.f32.mxu1 %vm29465_vm0, %v34641_v3 }
0x1231   :  { %26395 = vmatprep.subr.mxu1 %v34641_v3  ;;  %v8656_v46 = vand.u32 4294901760, %v31460_v8 }
0x1232   :  { %26396 = vmatpush3.msra.mxu1 %v29826_v55 }
0x1233   :  { %26397 = vmatprep.subr.mxu1 %v34641_v3  ;;  %v8657_v0 = vsub.f32 %v31460_v8, %v8656_v46 }
0x1234   :  { %26398 = vmatpush3.msra.mxu1 %v29836_v58 }
0x1235   :  { %26399 = vmatprep.subr.mxu1 %v34641_v3  ;;  %v8658_v18 = vand.u32 4294901760, %v8657_v0 }
0x1236   :  { %26400 = vmatpush3.msra.mxu1 %v29848_v6 }
0x1237   :  { %26401 = vmatprep.subr.mxu1 %v34641_v3  ;;  %26329 = vmatmul.mubr.f32.vlgmr.msra.gmra.mxu0 %v8658_v18 }
0x1238   :  { %26363 = vmatpush3.msra.mxu0 %v29824_v54  ;;  %26402 = vmatpush3.msra.mxu1 %v29863_v23 }
0x1239   :  { %26364 = vmatprep.subr.mxu0 %v34641_v3  ;;  %26403 = vmatprep.subr.mxu1 %v34641_v3 }
0x123a   :  { %26365 = vmatpush3.msra.mxu0 %v29834_v56  ;;  %26404 = vmatpush3.msra.mxu1 %v29874_v29 }
0x123b   :  { %26366 = vmatprep.subr.mxu0 %v34641_v3  ;;  %26405 = vmatprep.subr.mxu1 %v34641_v3 }
0x123c   :  { %26367 = vmatpush3.msra.mxu0 %v29846_v5  ;;  %26406 = vmatpush3.msra.mxu1 %v29889_v35 }
0x123d   :  { %26368 = vmatprep.subr.mxu0 %v34641_v3  ;;  %26407 = vmatprep.subr.mxu1 %v34641_v3 }
0x123e   :  { %26369 = vmatpush3.msra.mxu0 %v29860_v22  ;;  %26408 = vmatpush3.msra.mxu1 %v29906_v51 }
0x123f   :  { %26370 = vmatprep.subr.mxu0 %v34641_v3  ;;  %26409 = vmatprep.subr.mxu1 %v34641_v3 }
0x1240   :  { %26371 = vmatpush3.msra.mxu0 %v29878_v10  ;;  %26410 = vmatpush3.msra.mxu1 %v29922_v16 }
0x1241   :  { %26372 = vmatprep.subr.mxu0 %v34641_v3  ;;  %26411 = vmatprep.subr.mxu1 %v34641_v3 }
0x1242   :  { %26373 = vmatpush3.msra.mxu0 %v29887_v34  ;;  %26412 = vmatpush3.msra.mxu1 %v29941_v53 }
0x1243   :  { %26374 = vmatprep.subr.mxu0 %v34641_v3  ;;  %26413 = vmatprep.subr.mxu1 %v34641_v3 }
0x1244   :  { %26375 = vmatpush3.msra.mxu0 %v29904_v48  ;;  %26414 = vmatpush3.msra.mxu1 %v29952_v57 }
0x1245   :  { %26376 = vmatprep.subr.mxu0 %v34641_v3  ;;  %26415 = vmatprep.subr.mxu1 %v34641_v3 }
0x1246   :  { %26377 = vmatpush3.msra.mxu0 %v29920_v9  ;;  %26416 = vmatpush3.msra.mxu1 %v29968_v12 }
0x1247   :  { %26378 = vmatprep.subr.mxu0 %v34641_v3  ;;  %26417 = vmatprep.subr.mxu1 %v34641_v3 }
0x1248   :  { %26379 = vmatpush3.msra.mxu0 %v29937_v39  ;;  %26418 = vmatpush3.msra.mxu1 %v29985_v17 }
0x1249   :  { %26380 = vmatprep.subr.mxu0 %v34641_v3  ;;  %26419 = vmatprep.subr.mxu1 %v34641_v3 }
0x124a   :  { %26381 = vmatpush3.msra.mxu0 %v29957_v40  ;;  %26420 = vmatpush3.msra.mxu1 %v30001_v62 }
0x124b   :  { %26382 = vmatprep.subr.mxu0 %v34641_v3  ;;  %26422 = vmatmul.mubr.f32.vlgmr.msra.gmra.mxu1 %v8656_v46 }
0x124c   :  { %26455 = vmatprep.subr.mxu1 %v34641_v3  ;;  %26383 = vmatpush3.msra.mxu0 %v29966_v44 }
0x124d   :  { %26456 = vmatpush3.msra.mxu1 %v29821_v52  ;;  %26384 = vmatprep.subr.mxu0 %v34641_v3 }
0x124e   :  { %26457 = vmatprep.subr.mxu1 %v34641_v3  ;;  %26385 = vmatpush3.msra.mxu0 %v29983_v26 }
0x124f   :  { %26458 = vmatpush3.msra.mxu1 %v29826_v55  ;;  %26386 = vmatprep.subr.mxu0 %v34641_v3 }
0x1250   :  { %26459 = vmatprep.subr.mxu1 %v34641_v3  ;;  %26387 = vmatpush3.msra.mxu0 %v29999_v61 }
0x1251   :  { %26460 = vmatpush3.msra.mxu1 %v29836_v58  ;;  %26388 = vmatprep.subr.mxu0 %v34641_v3 }
0x1252   :  { %26461 = vmatprep.subr.mxu1 %v34641_v3  ;;  %26389 = vmatpush3.msra.mxu0 %v30017_v33 }
0x1253   :  { %26390 = vmatprep.mubr.msk.f32.mxu0 %vm29465_vm0, %v34641_v3  ;;  %26462 = vmatpush3.msra.mxu1 %v29848_v6 }
0x1254   :  { %26391 = vmatmul.mubr.f32.vlgmr.msra.gmra.mxu0 %v31460_v8  ;;  %26424 = vmatprep.subr.mxu0 %v34641_v3 }
0x1255   :  { %26463 = vmatprep.subr.mxu1 %v34641_v3  ;;  %26425 = vmatpush3.msra.mxu0 %v29831_v60 }
0x1256   :  { %26464 = vmatpush3.msra.mxu1 %v29863_v23  ;;  %26426 = vmatprep.subr.mxu0 %v34641_v3 }
0x1257   :  { %26465 = vmatprep.subr.mxu1 %v34641_v3  ;;  %26427 = vmatpush3.msra.mxu0 %v29843_v4 }
0x1258   :  { %26466 = vmatpush3.msra.mxu1 %v29874_v29  ;;  %26428 = vmatprep.subr.mxu0 %v34641_v3 }
0x1259   :  { %26467 = vmatprep.subr.mxu1 %v34641_v3  ;;  %26429 = vmatpush3.msra.mxu0 %v29857_v19 }
0x125a   :  { %26468 = vmatpush3.msra.mxu1 %v29889_v35  ;;  %26430 = vmatprep.subr.mxu0 %v34641_v3 }
0x125b   :  { %26469 = vmatprep.subr.mxu1 %v34641_v3  ;;  %26431 = vmatpush3.msra.mxu0 %v29872_v28 }
0x125c   :  { %26470 = vmatpush3.msra.mxu1 %v29906_v51  ;;  %26432 = vmatprep.subr.mxu0 %v34641_v3 }
0x125d   :  { %26471 = vmatprep.subr.mxu1 %v34641_v3  ;;  %26433 = vmatpush3.msra.mxu0 %v29894_v37 }
0x125e   :  { %26472 = vmatpush3.msra.mxu1 %v29922_v16  ;;  %26434 = vmatprep.subr.mxu0 %v34641_v3 }
0x125f   :  { %26473 = vmatprep.subr.mxu1 %v34641_v3  ;;  %26435 = vmatpush3.msra.mxu0 %v29901_v47 }
0x1260   :  { %26474 = vmatpush3.msra.mxu1 %v29941_v53  ;;  %26436 = vmatprep.subr.mxu0 %v34641_v3 }
0x1261   :  { %26475 = vmatprep.subr.mxu1 %v34641_v3  ;;  %26437 = vmatpush3.msra.mxu0 %v34768_v42 }
0x1262   :  { %26476 = vmatpush3.msra.mxu1 %v29952_v57  ;;  %26438 = vmatprep.subr.mxu0 %v34641_v3 }
0x1263   :  { %26477 = vmatprep.subr.mxu1 %v34641_v3  ;;  %26439 = vmatpush3.msra.mxu0 %v34769_v14 }
0x1264   :  { %26478 = vmatpush3.msra.mxu1 %v29968_v12  ;;  %26440 = vmatprep.subr.mxu0 %v34641_v3 }
0x1265   :  { %26479 = vmatprep.subr.mxu1 %v34641_v3  ;;  %26441 = vmatpush3.msra.mxu0 %v34770_v27 }
0x1266   :  { %26480 = vmatpush3.msra.mxu1 %v29985_v17  ;;  %26442 = vmatprep.subr.mxu0 %v34641_v3 }
0x1267   :  { %26481 = vmatprep.subr.mxu1 %v34641_v3  ;;  %26443 = vmatpush3.msra.mxu0 %v34771_v21 }
0x1268   :  { %26482 = vmatpush3.msra.mxu1 %v30001_v62  ;;  %26483 = vmatprep.mubr.msk.f32.mxu1 %vm29465_vm0, %v34641_v3 }
0x1269   :  { %26444 = vmatprep.subr.mxu0 %v34641_v3  ;;  %26484 = vmatmul.mubr.f32.vlgmr.msra.gmra.mxu1 %v31457_v36 }
0x126a   :  { %26445 = vmatpush3.msra.mxu0 %v34772_v24  ;;  %26452 = vmatprep.mubr.msk.f32.mxu0 %vm29465_vm0, %v34641_v3 }
0x126b   :  { %26446 = vmatprep.subr.mxu0 %v34641_v3  ;;  %26493 = vmatprep.subr.mxu1 %v34641_v3 }
0x126c   :  { %26447 = vmatpush3.msra.mxu0 %v34773_v32  ;;  %26494 = vmatpush3.msra.mxu1 %v34797_v31  ;;  %v34801_v32 = vld [vmem:[#allocation65_spill] sm:$0xff] }
0x126d   :  { %26448 = vmatprep.subr.mxu0 %v34641_v3  ;;  %26495 = vmatprep.subr.mxu1 %v34641_v3 }
0x126e   :  { %26449 = vmatpush3.msra.mxu0 %v34798_v63  ;;  %26496 = vmatpush3.msra.mxu1 %v34799_v50 }
0x126f   :  { %26450 = vmatprep.subr.mxu0 %v34641_v3  ;;  %26497 = vmatprep.mubr.msk.f32.mxu1 %vm29465_vm0, %v34641_v3 }
0x1270   :  { %26451 = vmatpush3.msra.mxu0 %v34800_v41  ;;  %26507 = vmatprep.subr.mxu1 %v34641_v3 }
0x1271   :  { %26453 = vmatmul.mubr.f32.vlgmr.msra.gmra.mxu0 %v31457_v36  ;;  %26486 = vmatprep.subr.mxu0 %v34641_v3 }
0x1272   :  { %26487 = vmatpush3.msra.mxu0 %v34776_v7  ;;  %26490 = vmatprep.mubr.msk.f32.mxu0 %vm29465_vm0, %v34641_v3 }
0x1273   :  { %26488 = vmatprep.subr.mxu0 %v34641_v3 }
0x1274   :  { %26489 = vmatpush3.msra.mxu0 %v34777_v1 }
0x1275   :  { %26500 = vmatprep.subr.mxu0 %v34641_v3 }
0x12ef   :  { %v8801_v49 = vpop.f32.mrf.mxu1 }
0x12f1   :  { %v26361_v43 = vpop.f32.mrf.mxu1 }
0x12f7   :  { %v8660_v59 = vpop.f32.mrf.mxu0 }
0x12f8   :  { %v8661_v30 = vadd.f32 %v8660_v59, %v31366_v45  ;;  %v34806_v59 = vld [vmem:[#allocation32_spill] sm:$0xff] }
0x12f9   :  { %v26330_v13 = vpop.f32.mrf.mxu0 }
0x12fa   :  { %v8802_v36 = vadd.f32 %v8801_v49, %v8661_v30  ;;  %v34805_v49 = vld [vmem:[#allocation31_spill] sm:$0xff]  ;;  %v34809_v30 = vld [vmem:[#allocation38_spill] sm:$0xff] }
0x130b   :  { %v8988_v38 = vpop.f32.mrf.mxu1 }
0x130d   :  { %v26423_v25 = vpop.f32.mrf.mxu1 }
0x1314   :  { %v8901_v15 = vpop.f32.mrf.mxu0 }
0x1315   :  { %v8902_v46 = vadd.f32 %v8901_v15, %v8802_v36  ;;  %v34808_v15 = vld [vmem:[#allocation37_spill] sm:$0xff] }
0x1316   :  { %v26392_v20 = vpop.f32.mrf.mxu0  ;;  %v34811_v36 = vld [vmem:[#allocation41_spill] sm:$0xff] }
0x1317   :  { %v8989_v0 = vadd.f32 %v8988_v38, %v8902_v46  ;;  %v34807_v38 = vld [vmem:[#allocation36_spill] sm:$0xff]  ;;  %v34813_v46 = vld [vmem:[#allocation45_spill] sm:$0xff] }
0x1329   :  { %v9186_v2 = vpop.f32.mrf.mxu1 }
0x132b   :  { %v26485_v8 = vpop.f32.mrf.mxu1 }
0x132c   :  { %v34812_v8 = vld [vmem:[#allocation43_spill] sm:$0xff] }
0x1331   :  { %v9101_v18 = vpop.f32.mrf.mxu0 }
0x1332   :  { %v9102_v41 = vadd.f32 %v9101_v18, %v8989_v0  ;;  %v34814_v0 = vld [vmem:[#allocation47_spill] sm:$0xff]  ;;  %v34815_v18 = vld [vmem:[#allocation50_spill] sm:$0xff] }
0x1333   :  { %v26454_v50 = vpop.f32.mrf.mxu0 }
0x1334   :  { %v9187_v63 = vadd.f32 %v9186_v2, %v9102_v41  ;;  %v34803_v50 = vld [vmem:[#allocation30_spill] sm:$0xff]  ;;  %v34804_v41 = vld [vmem:[#allocation35_spill] sm:$0xff]  ;;  %v34810_v2 = vld [vmem:[#allocation40_spill] sm:$0xff] }
0x1336   :  { %v9190_v31 = vmul.f32 0.5, %v9187_v63  ;;  %v34802_v63 = vld [vmem:[#allocation28_spill] sm:$0xff] }
0x1338   :  { %v31602_v43 = vadd.f32 %v9190_v31, %v34801_v32 }
0x133a   :  { %v9193_v13 = vsel %vm72_vm2, %v31602_v43, 0 }
0x133b   :  { %v9262_v25 = vand.u32 4294901760, %v9193_v13 }
0x133d   :  { %v9263_v20 = vsub.f32 %v9193_v13, %v9262_v25  ;;  %26498 = vmatmul.mubr.f32.vlgmr.msra.gmra.mxu1 %v9262_v25  ;;  %v34816_v13 = vld [vmem:[#allocation51_spill] sm:$0xff] }
0x133e   :  { %26508 = vmatpush3.msra.mxu1 %v34776_v7  ;;  %26511 = vmatprep.mubr.msk.f32.mxu1 %vm29465_vm0, %v34641_v3 }
0x133f   :  { %26509 = vmatprep.subr.mxu1 %v34641_v3  ;;  %v9264_v45 = vand.u32 4294901760, %v9263_v20 }
0x1340   :  { %26510 = vmatpush3.msra.mxu1 %v34777_v1 }
0x1341   :  { %26512 = vmatmul.mubr.f32.vlgmr.msra.gmra.mxu1 %v9264_v45  ;;  %26521 = vmatprep.subr.mxu1 %v34641_v3  ;;  %v9265_v32 = vsub.f32 %v9263_v20, %v9264_v45  ;;  %v34819_v45 = vld [vmem:[#allocation56_spill] sm:$0xff] }
0x1342   :  { %26522 = vmatpush3.msra.mxu1 %v34776_v7  ;;  %26525 = vmatprep.mubr.msk.f32.mxu1 %vm29465_vm0, %v34641_v3 }
0x1343   :  { %26523 = vmatprep.subr.mxu1 %v34641_v3  ;;  %v9266_v31 = vand.u32 4294901760, %v9265_v32 }
0x1344   :  { %26524 = vmatpush3.msra.mxu1 %v34777_v1 }
0x1345   :  { %26491 = vmatmul.mubr.f32.vlgmr.msra.gmra.mxu0 %v9266_v31  ;;  %26526 = vmatmul.mubr.f32.vlgmr.msra.gmra.mxu1 %v9262_v25 }
0x1346   :  { %26501 = vmatpush3.msra.mxu0 %v34802_v63  ;;  %26504 = vmatprep.mubr.msk.f32.mxu0 %vm29465_vm0, %v34641_v3 }
0x1347   :  { %26502 = vmatprep.subr.mxu0 %v34641_v3  ;;  %26559 = vmatprep.subr.mxu1 %v34641_v3 }
0x1348   :  { %26503 = vmatpush3.msra.mxu0 %v34803_v50  ;;  %26560 = vmatpush3.msra.mxu1 %v34804_v41 }
0x1349   :  { %26514 = vmatprep.subr.mxu0 %v34641_v3  ;;  %26505 = vmatmul.mubr.f32.vlgmr.msra.gmra.mxu0 %v9263_v20  ;;  %v34818_v20 = vld [vmem:[#allocation55_spill] sm:$0xff] }
0x134a   :  { %26515 = vmatpush3.msra.mxu0 %v34805_v49  ;;  %26518 = vmatprep.mubr.msk.f32.mxu0 %vm29465_vm0, %v34641_v3 }
0x134b   :  { %26516 = vmatprep.subr.mxu0 %v34641_v3  ;;  %26561 = vmatprep.subr.mxu1 %v34641_v3 }
0x134c   :  { %26517 = vmatpush3.msra.mxu0 %v34806_v59  ;;  %26562 = vmatpush3.msra.mxu1 %v34807_v38 }
0x134d   :  { %26519 = vmatmul.mubr.f32.vlgmr.msra.gmra.mxu0 %v9262_v25  ;;  %26563 = vmatprep.subr.mxu1 %v34641_v3  ;;  %v34817_v25 = vld [vmem:[#allocation53_spill] sm:$0xff] }
0x134e   :  { %26564 = vmatpush3.msra.mxu1 %v34808_v15  ;;  %26528 = vmatprep.subr.mxu0 %v34641_v3 }
0x134f   :  { %26565 = vmatprep.subr.mxu1 %v34641_v3  ;;  %26529 = vmatpush3.msra.mxu0 %v29821_v52 }
0x1350   :  { %26566 = vmatpush3.msra.mxu1 %v34809_v30  ;;  %26530 = vmatprep.subr.mxu0 %v34641_v3 }
0x1351   :  { %26567 = vmatprep.subr.mxu1 %v34641_v3  ;;  %26531 = vmatpush3.msra.mxu0 %v29826_v55 }
0x1352   :  { %26568 = vmatpush3.msra.mxu1 %v34810_v2  ;;  %26532 = vmatprep.subr.mxu0 %v34641_v3 }
0x1353   :  { %26569 = vmatprep.subr.mxu1 %v34641_v3  ;;  %26533 = vmatpush3.msra.mxu0 %v29836_v58 }
0x1354   :  { %26570 = vmatpush3.msra.mxu1 %v34811_v36  ;;  %26534 = vmatprep.subr.mxu0 %v34641_v3 }
0x1355   :  { %26571 = vmatprep.subr.mxu1 %v34641_v3  ;;  %26535 = vmatpush3.msra.mxu0 %v29848_v6 }
0x1356   :  { %26572 = vmatpush3.msra.mxu1 %v34812_v8  ;;  %26536 = vmatprep.subr.mxu0 %v34641_v3 }
0x1357   :  { %26573 = vmatprep.subr.mxu1 %v34641_v3  ;;  %26537 = vmatpush3.msra.mxu0 %v29863_v23 }
0x1358   :  { %26574 = vmatpush3.msra.mxu1 %v34813_v46  ;;  %26538 = vmatprep.subr.mxu0 %v34641_v3 }
0x1359   :  { %26575 = vmatprep.subr.mxu1 %v34641_v3  ;;  %26539 = vmatpush3.msra.mxu0 %v29874_v29 }
0x135a   :  { %26576 = vmatpush3.msra.mxu1 %v34814_v0  ;;  %26540 = vmatprep.subr.mxu0 %v34641_v3 }
0x135b   :  { %26577 = vmatprep.subr.mxu1 %v34641_v3  ;;  %26541 = vmatpush3.msra.mxu0 %v29889_v35 }
0x135c   :  { %26578 = vmatpush3.msra.mxu1 %v34815_v18  ;;  %26542 = vmatprep.subr.mxu0 %v34641_v3 }
0x135d   :  { %26579 = vmatprep.subr.mxu1 %v34641_v3  ;;  %26543 = vmatpush3.msra.mxu0 %v29906_v51 }
0x135e   :  { %26580 = vmatpush3.msra.mxu1 %v34816_v13  ;;  %26544 = vmatprep.subr.mxu0 %v34641_v3 }
0x135f   :  { %26581 = vmatprep.subr.mxu1 %v34641_v3  ;;  %26545 = vmatpush3.msra.mxu0 %v29922_v16 }
0x1360   :  { %26582 = vmatpush3.msra.mxu1 %v34817_v25  ;;  %26546 = vmatprep.subr.mxu0 %v34641_v3 }
0x1361   :  { %26583 = vmatprep.subr.mxu1 %v34641_v3  ;;  %26547 = vmatpush3.msra.mxu0 %v29941_v53 }
0x1362   :  { %26584 = vmatpush3.msra.mxu1 %v34818_v20  ;;  %26548 = vmatprep.subr.mxu0 %v34641_v3 }
0x1363   :  { %26585 = vmatprep.subr.mxu1 %v34641_v3  ;;  %26587 = vmatprep.mubr.msk.f32.mxu1 %vm29465_vm0, %v34641_v3 }
0x1364   :  { %26586 = vmatpush3.msra.mxu1 %v34819_v45  ;;  %26549 = vmatpush3.msra.mxu0 %v29952_v57 }
0x1365   :  { %26621 = vmatprep.subr.mxu1 %v34641_v3  ;;  %26550 = vmatprep.subr.mxu0 %v34641_v3 }
0x1366   :  { %26551 = vmatpush3.msra.mxu0 %v29968_v12  ;;  %26556 = vmatprep.mubr.msk.f32.mxu0 %vm29465_vm0, %v34641_v3 }
0x1367   :  { %26552 = vmatprep.subr.mxu0 %v34641_v3 }
0x1368   :  { %26553 = vmatpush3.msra.mxu0 %v29985_v17 }
0x1369   :  { %26554 = vmatprep.subr.mxu0 %v34641_v3 }
0x136a   :  { %26555 = vmatpush3.msra.mxu0 %v30001_v62 }
0x136b   :  { %26590 = vmatprep.subr.mxu0 %v34641_v3 }
0x13fd   :  { %v9349_v32 = vpop.f32.mrf.mxu1 }
0x13ff   :  { %v26499_v31 = vpop.f32.mrf.mxu1 }
0x1401   :  { %v9500_v45 = vpop.f32.mrf.mxu1 }
0x1403   :  { %v26513_v20 = vpop.f32.mrf.mxu1 }
0x1405   :  { %v9268_v25 = vpop.f32.mrf.mxu0  ;;  %v9650_v13 = vpop.f32.mrf.mxu1 }
0x1406   :  { %v9350_v46 = vadd.f32 %v9349_v32, %v9268_v25 }
0x1407   :  { %v26492_v18 = vpop.f32.mrf.mxu0  ;;  %v26527_v0 = vpop.f32.mrf.mxu1 }
0x1409   :  { %v9425_v8 = vpop.f32.mrf.mxu0 }
0x140a   :  { %v9426_v36 = vadd.f32 %v9425_v8, %v9350_v46 }
0x140b   :  { %v26506_v2 = vpop.f32.mrf.mxu0 }
0x140c   :  { %v9501_v30 = vadd.f32 %v9500_v45, %v9426_v36  ;;  %v34824_v2 = vld [vmem:[#allocation54_spill] sm:$0xff] }
0x140d   :  { %v9577_v15 = vpop.f32.mrf.mxu0 }
0x140e   :  { %v9578_v38 = vadd.f32 %v9577_v15, %v9501_v30  ;;  %v34823_v30 = vld [vmem:[#allocation34_spill] sm:$0xff] }
0x140f   :  { %v26520_v59 = vpop.f32.mrf.mxu0 }
0x1410   :  { %v9651_v49 = vadd.f32 %v9650_v13, %v9578_v38  ;;  %v34821_v59 = vld [vmem:[#allocation33_spill] sm:$0xff]  ;;  %v34822_v38 = vld [vmem:[#allocation52_spill] sm:$0xff] }
0x1412   :  { %v9654_v41 = vmul.f32 %v9651_v49, %v31219_v11  ;;  %v34820_v49 = vld [vmem:[#allocation49_spill] sm:$0xff] }
0x1414   :  { %v9656_v50 = vsel %vm1947_vm8, %v9654_v41, 0 }
0x1415   :  { %v31692_v31 = vand.u32 4294901760, %v9656_v50 }
0x1417   :  { %v31695_v20 = vsub.f32 %v9656_v50, %v31692_v31  ;;  %26588 = vmatmul.mubr.f32.vlgmr.msra.gmra.mxu1 %v31692_v31 }
0x1418   :  { %26622 = vmatpush3.msra.mxu1 %v29821_v52  ;;  %26649 = vmatprep.mubr.msk.f32.mxu1 %vm29465_vm0, %v34641_v3 }
0x1419   :  { %v9739_v15 = vand.u32 4294901760, %v31695_v20  ;;  %26623 = vmatprep.subr.mxu1 %v34641_v3 }
0x141a   :  { %26624 = vmatpush3.msra.mxu1 %v29826_v55 }
0x141b   :  { %v9740_v41 = vsub.f32 %v31695_v20, %v9739_v15  ;;  %26625 = vmatprep.subr.mxu1 %v34641_v3 }
0x141c   :  { %26626 = vmatpush3.msra.mxu1 %v29836_v58 }
0x141d   :  { %26627 = vmatprep.subr.mxu1 %v34641_v3  ;;  %v9741_v50 = vand.u32 4294901760, %v9740_v41 }
0x141e   :  { %26628 = vmatpush3.msra.mxu1 %v29848_v6 }
0x141f   :  { %26629 = vmatprep.subr.mxu1 %v34641_v3  ;;  %26557 = vmatmul.mubr.f32.vlgmr.msra.gmra.mxu0 %v9741_v50 }
0x1420   :  { %26591 = vmatpush3.msra.mxu0 %v29824_v54  ;;  %26630 = vmatpush3.msra.mxu1 %v29863_v23 }
0x1421   :  { %26592 = vmatprep.subr.mxu0 %v34641_v3  ;;  %26631 = vmatprep.subr.mxu1 %v34641_v3 }
0x1422   :  { %26593 = vmatpush3.msra.mxu0 %v29834_v56  ;;  %26632 = vmatpush3.msra.mxu1 %v29874_v29 }
0x1423   :  { %26594 = vmatprep.subr.mxu0 %v34641_v3  ;;  %26633 = vmatprep.subr.mxu1 %v34641_v3 }
0x1424   :  { %26595 = vmatpush3.msra.mxu0 %v29846_v5  ;;  %26634 = vmatpush3.msra.mxu1 %v29889_v35 }
0x1425   :  { %26596 = vmatprep.subr.mxu0 %v34641_v3  ;;  %26635 = vmatprep.subr.mxu1 %v34641_v3 }
0x1426   :  { %26597 = vmatpush3.msra.mxu0 %v29860_v22  ;;  %26636 = vmatpush3.msra.mxu1 %v29906_v51 }
0x1427   :  { %26598 = vmatprep.subr.mxu0 %v34641_v3  ;;  %26637 = vmatprep.subr.mxu1 %v34641_v3 }
0x1428   :  { %26599 = vmatpush3.msra.mxu0 %v29878_v10  ;;  %26638 = vmatpush3.msra.mxu1 %v29922_v16 }
0x1429   :  { %26600 = vmatprep.subr.mxu0 %v34641_v3  ;;  %26639 = vmatprep.subr.mxu1 %v34641_v3 }
0x142a   :  { %26601 = vmatpush3.msra.mxu0 %v29887_v34  ;;  %26640 = vmatpush3.msra.mxu1 %v29941_v53 }
0x142b   :  { %26602 = vmatprep.subr.mxu0 %v34641_v3  ;;  %26641 = vmatprep.subr.mxu1 %v34641_v3 }
0x142c   :  { %26603 = vmatpush3.msra.mxu0 %v29904_v48  ;;  %26642 = vmatpush3.msra.mxu1 %v29952_v57 }
0x142d   :  { %26604 = vmatprep.subr.mxu0 %v34641_v3  ;;  %26643 = vmatprep.subr.mxu1 %v34641_v3 }
0x142e   :  { %26605 = vmatpush3.msra.mxu0 %v29920_v9  ;;  %26644 = vmatpush3.msra.mxu1 %v29968_v12 }
0x142f   :  { %26606 = vmatprep.subr.mxu0 %v34641_v3  ;;  %26645 = vmatprep.subr.mxu1 %v34641_v3 }
0x1430   :  { %26607 = vmatpush3.msra.mxu0 %v29937_v39  ;;  %26646 = vmatpush3.msra.mxu1 %v29985_v17 }
0x1431   :  { %26608 = vmatprep.subr.mxu0 %v34641_v3  ;;  %26647 = vmatprep.subr.mxu1 %v34641_v3 }
0x1432   :  { %26609 = vmatpush3.msra.mxu0 %v29957_v40  ;;  %26648 = vmatpush3.msra.mxu1 %v30001_v62 }
0x1433   :  { %26610 = vmatprep.subr.mxu0 %v34641_v3  ;;  %26650 = vmatmul.mubr.f32.vlgmr.msra.gmra.mxu1 %v9739_v15 }
0x1434   :  { %26683 = vmatprep.subr.mxu1 %v34641_v3  ;;  %26611 = vmatpush3.msra.mxu0 %v29966_v44 }
0x1435   :  { %26684 = vmatpush3.msra.mxu1 %v29821_v52  ;;  %26612 = vmatprep.subr.mxu0 %v34641_v3 }
0x1436   :  { %26685 = vmatprep.subr.mxu1 %v34641_v3  ;;  %26613 = vmatpush3.msra.mxu0 %v29983_v26 }
0x1437   :  { %26686 = vmatpush3.msra.mxu1 %v29826_v55  ;;  %26614 = vmatprep.subr.mxu0 %v34641_v3 }
0x1438   :  { %26687 = vmatprep.subr.mxu1 %v34641_v3  ;;  %26615 = vmatpush3.msra.mxu0 %v29999_v61 }
0x1439   :  { %26688 = vmatpush3.msra.mxu1 %v29836_v58  ;;  %26616 = vmatprep.subr.mxu0 %v34641_v3 }
0x143a   :  { %26689 = vmatprep.subr.mxu1 %v34641_v3  ;;  %26617 = vmatpush3.msra.mxu0 %v30017_v33 }
0x143b   :  { %26618 = vmatprep.mubr.msk.f32.mxu0 %vm29465_vm0, %v34641_v3  ;;  %26690 = vmatpush3.msra.mxu1 %v29848_v6 }
0x143c   :  { %26619 = vmatmul.mubr.f32.vlgmr.msra.gmra.mxu0 %v31695_v20  ;;  %26652 = vmatprep.subr.mxu0 %v34641_v3 }
0x143d   :  { %26691 = vmatprep.subr.mxu1 %v34641_v3  ;;  %26653 = vmatpush3.msra.mxu0 %v29831_v60 }
0x143e   :  { %26692 = vmatpush3.msra.mxu1 %v29863_v23  ;;  %26654 = vmatprep.subr.mxu0 %v34641_v3 }
0x143f   :  { %26693 = vmatprep.subr.mxu1 %v34641_v3  ;;  %26655 = vmatpush3.msra.mxu0 %v29843_v4 }
0x1440   :  { %26694 = vmatpush3.msra.mxu1 %v29874_v29  ;;  %26656 = vmatprep.subr.mxu0 %v34641_v3 }
0x1441   :  { %26695 = vmatprep.subr.mxu1 %v34641_v3  ;;  %26657 = vmatpush3.msra.mxu0 %v29857_v19 }
0x1442   :  { %26696 = vmatpush3.msra.mxu1 %v29889_v35  ;;  %26658 = vmatprep.subr.mxu0 %v34641_v3 }
0x1443   :  { %26697 = vmatprep.subr.mxu1 %v34641_v3  ;;  %26659 = vmatpush3.msra.mxu0 %v29872_v28 }
0x1444   :  { %26698 = vmatpush3.msra.mxu1 %v29906_v51  ;;  %26660 = vmatprep.subr.mxu0 %v34641_v3 }
0x1445   :  { %26699 = vmatprep.subr.mxu1 %v34641_v3  ;;  %26661 = vmatpush3.msra.mxu0 %v29894_v37 }
0x1446   :  { %26700 = vmatpush3.msra.mxu1 %v29922_v16  ;;  %26662 = vmatprep.subr.mxu0 %v34641_v3 }
0x1447   :  { %26701 = vmatprep.subr.mxu1 %v34641_v3  ;;  %26663 = vmatpush3.msra.mxu0 %v29901_v47 }
0x1448   :  { %26702 = vmatpush3.msra.mxu1 %v29941_v53  ;;  %26664 = vmatprep.subr.mxu0 %v34641_v3 }
0x1449   :  { %26703 = vmatprep.subr.mxu1 %v34641_v3  ;;  %26665 = vmatpush3.msra.mxu0 %v34768_v42 }
0x144a   :  { %26704 = vmatpush3.msra.mxu1 %v29952_v57  ;;  %26666 = vmatprep.subr.mxu0 %v34641_v3 }
0x144b   :  { %26705 = vmatprep.subr.mxu1 %v34641_v3  ;;  %26667 = vmatpush3.msra.mxu0 %v34769_v14 }
0x144c   :  { %26706 = vmatpush3.msra.mxu1 %v29968_v12  ;;  %26668 = vmatprep.subr.mxu0 %v34641_v3 }
0x144d   :  { %26707 = vmatprep.subr.mxu1 %v34641_v3  ;;  %26669 = vmatpush3.msra.mxu0 %v34770_v27 }
0x144e   :  { %26708 = vmatpush3.msra.mxu1 %v29985_v17  ;;  %26670 = vmatprep.subr.mxu0 %v34641_v3 }
0x144f   :  { %26709 = vmatprep.subr.mxu1 %v34641_v3  ;;  %26671 = vmatpush3.msra.mxu0 %v34771_v21 }
0x1450   :  { %26710 = vmatpush3.msra.mxu1 %v30001_v62  ;;  %26711 = vmatprep.mubr.msk.f32.mxu1 %vm29465_vm0, %v34641_v3 }
0x1451   :  { %26672 = vmatprep.subr.mxu0 %v34641_v3  ;;  %26712 = vmatmul.mubr.f32.vlgmr.msra.gmra.mxu1 %v31692_v31 }
0x1452   :  { %26673 = vmatpush3.msra.mxu0 %v34772_v24  ;;  %26680 = vmatprep.mubr.msk.f32.mxu0 %vm29465_vm0, %v34641_v3 }
0x1453   :  { %26674 = vmatprep.subr.mxu0 %v34641_v3  ;;  %26721 = vmatprep.subr.mxu1 %v34641_v3 }
0x1454   :  { %26675 = vmatpush3.msra.mxu0 %v34820_v49  ;;  %26722 = vmatpush3.msra.mxu1 %v34821_v59 }
0x1455   :  { %26676 = vmatprep.subr.mxu0 %v34641_v3  ;;  %26723 = vmatprep.subr.mxu1 %v34641_v3 }
0x1456   :  { %26677 = vmatpush3.msra.mxu0 %v34822_v38  ;;  %26724 = vmatpush3.msra.mxu1 %v34823_v30 }
0x1457   :  { %26678 = vmatprep.subr.mxu0 %v34641_v3  ;;  %26725 = vmatprep.mubr.msk.f32.mxu1 %vm29465_vm0, %v34641_v3 }
0x1458   :  { %26679 = vmatpush3.msra.mxu0 %v34824_v2  ;;  %26735 = vmatprep.subr.mxu1 %v34641_v3 }
0x1459   :  { %26681 = vmatmul.mubr.f32.vlgmr.msra.gmra.mxu0 %v31692_v31  ;;  %26714 = vmatprep.subr.mxu0 %v34641_v3 }
0x145a   :  { %26715 = vmatpush3.msra.mxu0 %v34776_v7  ;;  %26718 = vmatprep.mubr.msk.f32.mxu0 %vm29465_vm0, %v34641_v3 }
0x145b   :  { %26716 = vmatprep.subr.mxu0 %v34641_v3 }
0x145c   :  { %26717 = vmatpush3.msra.mxu0 %v34777_v1 }
0x145d   :  { %26728 = vmatprep.subr.mxu0 %v34641_v3 }
0x14d7   :  { %v9884_v36 = vpop.f32.mrf.mxu1 }
0x14d9   :  { %v26589_v8 = vpop.f32.mrf.mxu1 }
0x14df   :  { %v9743_v46 = vpop.f32.mrf.mxu0 }
0x14e0   :  { %v9885_v31 = vadd.f32 %v9884_v36, %v9743_v46  ;;  %v34826_v46 = vld [vmem:[#allocation35_spill] sm:$0xff] }
0x14e1   :  { %v26558_v0 = vpop.f32.mrf.mxu0 }
0x14f3   :  { %v10071_v18 = vpop.f32.mrf.mxu1 }
0x14f5   :  { %v26651_v13 = vpop.f32.mrf.mxu1 }
0x14f6   :  { %v34828_v13 = vld [vmem:[#allocation32_spill] sm:$0xff] }
0x14fc   :  { %v9984_v25 = vpop.f32.mrf.mxu0 }
0x14fd   :  { %v9985_v15 = vadd.f32 %v9984_v25, %v9885_v31  ;;  %v34829_v25 = vld [vmem:[#allocation36_spill] sm:$0xff]  ;;  %v34833_v31 = vld [vmem:[#allocation41_spill] sm:$0xff] }
0x14fe   :  { %v26620_v45 = vpop.f32.mrf.mxu0 }
0x14ff   :  { %v10072_v41 = vadd.f32 %v10071_v18, %v9985_v15  ;;  %v34827_v18 = vld [vmem:[#allocation31_spill] sm:$0xff]  ;;  %v34830_v45 = vld [vmem:[#allocation37_spill] sm:$0xff] }
0x1500   :  { %v34835_v15 = vld [vmem:[#allocation45_spill] sm:$0xff] }
0x1511   :  { %v10269_v32 = vpop.f32.mrf.mxu1 }
0x1513   :  { %v26713_v20 = vpop.f32.mrf.mxu1 }
0x1514   :  { %v34834_v20 = vld [vmem:[#allocation43_spill] sm:$0xff] }
0x1519   :  { %v10184_v50 = vpop.f32.mrf.mxu0 }
0x151a   :  { %v10185_v30 = vadd.f32 %v10184_v50, %v10072_v41  ;;  %v34836_v41 = vld [vmem:[#allocation47_spill] sm:$0xff]  ;;  %v34837_v50 = vld [vmem:[#allocation50_spill] sm:$0xff] }
0x151b   :  { %v26682_v59 = vpop.f32.mrf.mxu0 }
0x151c   :  { %v31835_v2 = vadd.f32 %v10269_v32, %v10185_v30  ;;  %v34825_v30 = vld [vmem:[#allocation30_spill] sm:$0xff]  ;;  %v34832_v32 = vld [vmem:[#allocation40_spill] sm:$0xff] }
0x151e   :  { %v10273_v38 = vadd.f32 %v31835_v2, %v31602_v43 }
0x1520   :  { %v10275_v8 = vsel %vm72_vm2, %v10273_v38, 0 }
0x1521   :  { %v10344_v0 = vand.u32 4294901760, %v10275_v8 }
0x1523   :  { %v10345_v49 = vsub.f32 %v10275_v8, %v10344_v0  ;;  %26726 = vmatmul.mubr.f32.vlgmr.msra.gmra.mxu1 %v10344_v0  ;;  %v34838_v8 = vld [vmem:[#allocation51_spill] sm:$0xff] }
0x1524   :  { %26736 = vmatpush3.msra.mxu1 %v34776_v7  ;;  %26739 = vmatprep.mubr.msk.f32.mxu1 %vm29465_vm0, %v34641_v3 }
0x1525   :  { %v10346_v36 = vand.u32 4294901760, %v10345_v49  ;;  %26737 = vmatprep.subr.mxu1 %v34641_v3 }
0x1526   :  { %26738 = vmatpush3.msra.mxu1 %v34777_v1 }
0x1527   :  { %v10347_v59 = vsub.f32 %v10345_v49, %v10346_v36  ;;  %26740 = vmatmul.mubr.f32.vlgmr.msra.gmra.mxu1 %v10346_v36  ;;  %26749 = vmatprep.subr.mxu1 %v34641_v3  ;;  %v34840_v36 = vld [vmem:[#allocation55_spill] sm:$0xff] }
0x1528   :  { %26750 = vmatpush3.msra.mxu1 %v34776_v7  ;;  %26753 = vmatprep.mubr.msk.f32.mxu1 %vm29465_vm0, %v34641_v3 }
0x1529   :  { %26751 = vmatprep.subr.mxu1 %v34641_v3  ;;  %v10348_v38 = vand.u32 4294901760, %v10347_v59  ;;  %v34841_v59 = vld [vmem:[#allocation56_spill] sm:$0xff] }
0x152a   :  { %26752 = vmatpush3.msra.mxu1 %v34777_v1 }
0x152b   :  { %26719 = vmatmul.mubr.f32.vlgmr.msra.gmra.mxu0 %v10348_v38  ;;  %26754 = vmatmul.mubr.f32.vlgmr.msra.gmra.mxu1 %v10344_v0 }
0x152c   :  { %26729 = vmatpush3.msra.mxu0 %v34802_v63  ;;  %26732 = vmatprep.mubr.msk.f32.mxu0 %vm29465_vm0, %v34641_v3 }
0x152d   :  { %26730 = vmatprep.subr.mxu0 %v34641_v3  ;;  %26787 = vmatprep.subr.mxu1 %v34641_v3 }
0x152e   :  { %26731 = vmatpush3.msra.mxu0 %v34825_v30  ;;  %26788 = vmatpush3.msra.mxu1 %v34826_v46 }
0x152f   :  { %26742 = vmatprep.subr.mxu0 %v34641_v3  ;;  %26733 = vmatmul.mubr.f32.vlgmr.msra.gmra.mxu0 %v10345_v49  ;;  %v34831_v49 = vld [vmem:[#allocation38_spill] sm:$0xff] }
0x1530   :  { %26743 = vmatpush3.msra.mxu0 %v34827_v18  ;;  %26746 = vmatprep.mubr.msk.f32.mxu0 %vm29465_vm0, %v34641_v3 }
0x1531   :  { %26744 = vmatprep.subr.mxu0 %v34641_v3  ;;  %26789 = vmatprep.subr.mxu1 %v34641_v3 }
0x1532   :  { %26745 = vmatpush3.msra.mxu0 %v34828_v13  ;;  %26790 = vmatpush3.msra.mxu1 %v34829_v25 }
0x1533   :  { %26747 = vmatmul.mubr.f32.vlgmr.msra.gmra.mxu0 %v10344_v0  ;;  %26791 = vmatprep.subr.mxu1 %v34641_v3  ;;  %v34839_v0 = vld [vmem:[#allocation53_spill] sm:$0xff] }
0x1534   :  { %26792 = vmatpush3.msra.mxu1 %v34830_v45  ;;  %26756 = vmatprep.subr.mxu0 %v34641_v3 }
0x1535   :  { %26793 = vmatprep.subr.mxu1 %v34641_v3  ;;  %26757 = vmatpush3.msra.mxu0 %v29821_v52 }
0x1536   :  { %26794 = vmatpush3.msra.mxu1 %v34831_v49  ;;  %26758 = vmatprep.subr.mxu0 %v34641_v3 }
0x1537   :  { %26795 = vmatprep.subr.mxu1 %v34641_v3  ;;  %26759 = vmatpush3.msra.mxu0 %v29826_v55 }
0x1538   :  { %26796 = vmatpush3.msra.mxu1 %v34832_v32  ;;  %26760 = vmatprep.subr.mxu0 %v34641_v3 }
0x1539   :  { %26797 = vmatprep.subr.mxu1 %v34641_v3  ;;  %26761 = vmatpush3.msra.mxu0 %v29836_v58 }
0x153a   :  { %26798 = vmatpush3.msra.mxu1 %v34833_v31  ;;  %26762 = vmatprep.subr.mxu0 %v34641_v3 }
0x153b   :  { %26799 = vmatprep.subr.mxu1 %v34641_v3  ;;  %26763 = vmatpush3.msra.mxu0 %v29848_v6 }
0x153c   :  { %26800 = vmatpush3.msra.mxu1 %v34834_v20  ;;  %26764 = vmatprep.subr.mxu0 %v34641_v3 }
0x153d   :  { %26801 = vmatprep.subr.mxu1 %v34641_v3  ;;  %26765 = vmatpush3.msra.mxu0 %v29863_v23 }
0x153e   :  { %26802 = vmatpush3.msra.mxu1 %v34835_v15  ;;  %26766 = vmatprep.subr.mxu0 %v34641_v3 }
0x153f   :  { %26803 = vmatprep.subr.mxu1 %v34641_v3  ;;  %26767 = vmatpush3.msra.mxu0 %v29874_v29 }
0x1540   :  { %26804 = vmatpush3.msra.mxu1 %v34836_v41  ;;  %26768 = vmatprep.subr.mxu0 %v34641_v3 }
0x1541   :  { %26805 = vmatprep.subr.mxu1 %v34641_v3  ;;  %26769 = vmatpush3.msra.mxu0 %v29889_v35 }
0x1542   :  { %26806 = vmatpush3.msra.mxu1 %v34837_v50  ;;  %26770 = vmatprep.subr.mxu0 %v34641_v3 }
0x1543   :  { %26807 = vmatprep.subr.mxu1 %v34641_v3  ;;  %26771 = vmatpush3.msra.mxu0 %v29906_v51 }
0x1544   :  { %26808 = vmatpush3.msra.mxu1 %v34838_v8  ;;  %26772 = vmatprep.subr.mxu0 %v34641_v3 }
0x1545   :  { %26809 = vmatprep.subr.mxu1 %v34641_v3  ;;  %26773 = vmatpush3.msra.mxu0 %v29922_v16 }
0x1546   :  { %26810 = vmatpush3.msra.mxu1 %v34839_v0  ;;  %26774 = vmatprep.subr.mxu0 %v34641_v3 }
0x1547   :  { %26811 = vmatprep.subr.mxu1 %v34641_v3  ;;  %26775 = vmatpush3.msra.mxu0 %v29941_v53 }
0x1548   :  { %26812 = vmatpush3.msra.mxu1 %v34840_v36  ;;  %26776 = vmatprep.subr.mxu0 %v34641_v3 }
0x1549   :  { %26813 = vmatprep.subr.mxu1 %v34641_v3  ;;  %26815 = vmatprep.mubr.msk.f32.mxu1 %vm29465_vm0, %v34641_v3 }
0x154a   :  { %26814 = vmatpush3.msra.mxu1 %v34841_v59  ;;  %26777 = vmatpush3.msra.mxu0 %v29952_v57 }
0x154b   :  { %26849 = vmatprep.subr.mxu1 %v34641_v3  ;;  %26778 = vmatprep.subr.mxu0 %v34641_v3 }
0x154c   :  { %26779 = vmatpush3.msra.mxu0 %v29968_v12  ;;  %26784 = vmatprep.mubr.msk.f32.mxu0 %vm29465_vm0, %v34641_v3 }
0x154d   :  { %26780 = vmatprep.subr.mxu0 %v34641_v3 }
0x154e   :  { %26781 = vmatpush3.msra.mxu0 %v29985_v17 }
0x154f   :  { %26782 = vmatprep.subr.mxu0 %v34641_v3 }
0x1550   :  { %26783 = vmatpush3.msra.mxu0 %v30001_v62 }
0x1551   :  { %26818 = vmatprep.subr.mxu0 %v34641_v3 }
0x15e3   :  { %v10431_v38 = vpop.f32.mrf.mxu1 }
0x15e5   :  { %v26727_v59 = vpop.f32.mrf.mxu1 }
0x15e7   :  { %v10582_v36 = vpop.f32.mrf.mxu1 }
0x15e9   :  { %v26741_v0 = vpop.f32.mrf.mxu1 }
0x15eb   :  { %v10350_v8 = vpop.f32.mrf.mxu0  ;;  %v10732_v50 = vpop.f32.mrf.mxu1 }
0x15ec   :  { %v10432_v20 = vadd.f32 %v10431_v38, %v10350_v8 }
0x15ed   :  { %v26720_v41 = vpop.f32.mrf.mxu0  ;;  %v26755_v15 = vpop.f32.mrf.mxu1 }
0x15ef   :  { %v10507_v31 = vpop.f32.mrf.mxu0 }
0x15f0   :  { %v10508_v32 = vadd.f32 %v10507_v31, %v10432_v20 }
0x15f1   :  { %v26734_v49 = vpop.f32.mrf.mxu0 }
0x15f2   :  { %v10583_v45 = vadd.f32 %v10582_v36, %v10508_v32  ;;  %v34847_v49 = vld [vmem:[#allocation57_spill] sm:$0xff]  ;;  %v34848_v32 = vld [vmem:[#allocation59_spill] sm:$0xff] }
0x15f3   :  { %v10659_v25 = vpop.f32.mrf.mxu0 }
0x15f4   :  { %v10660_v46 = vadd.f32 %v10659_v25, %v10583_v45  ;;  %v34846_v45 = vld [vmem:[#allocation54_spill] sm:$0xff] }
0x15f5   :  { %v26748_v13 = vpop.f32.mrf.mxu0 }
0x15f6   :  { %v10733_v18 = vadd.f32 %v10732_v50, %v10660_v46  ;;  %v34843_v46 = vld [vmem:[#allocation63_spill] sm:$0xff]  ;;  %v34845_v13 = vld [vmem:[#allocation64_spill] sm:$0xff] }
0x15f8   :  { %v10736_v30 = vmul.f32 %v10733_v18, %v31219_v11  ;;  %v34844_v18 = vld [vmem:[#allocation52_spill] sm:$0xff] }
0x15fa   :  { %v10738_v63 = vsel %vm1947_vm8, %v10736_v30, 0  ;;  %v34842_v30 = vld [vmem:[#allocation49_spill] sm:$0xff] }
0x15fb   :  { %v31926_v59 = vand.u32 4294901760, %v10738_v63 }
0x15fd   :  { %v31929_v0 = vsub.f32 %v10738_v63, %v31926_v59  ;;  %26816 = vmatmul.mubr.f32.vlgmr.msra.gmra.mxu1 %v31926_v59 }
0x15fe   :  { %26850 = vmatpush3.msra.mxu1 %v29821_v52  ;;  %26877 = vmatprep.mubr.msk.f32.mxu1 %vm29465_vm0, %v34641_v3 }
0x15ff   :  { %v10821_v25 = vand.u32 4294901760, %v31929_v0  ;;  %26851 = vmatprep.subr.mxu1 %v34641_v3 }
0x1600   :  { %26852 = vmatpush3.msra.mxu1 %v29826_v55 }
0x1601   :  { %v10822_v11 = vsub.f32 %v31929_v0, %v10821_v25  ;;  %26853 = vmatprep.subr.mxu1 %v34641_v3 }
0x1602   :  { %26854 = vmatpush3.msra.mxu1 %v29836_v58 }
0x1603   :  { %26855 = vmatprep.subr.mxu1 %v34641_v3  ;;  %v10823_v63 = vand.u32 4294901760, %v10822_v11 }
0x1604   :  { %26856 = vmatpush3.msra.mxu1 %v29848_v6 }
0x1605   :  { %26857 = vmatprep.subr.mxu1 %v34641_v3  ;;  %26785 = vmatmul.mubr.f32.vlgmr.msra.gmra.mxu0 %v10823_v63 }
0x1606   :  { %26819 = vmatpush3.msra.mxu0 %v29824_v54  ;;  %26858 = vmatpush3.msra.mxu1 %v29863_v23 }
0x1607   :  { %26820 = vmatprep.subr.mxu0 %v34641_v3  ;;  %26859 = vmatprep.subr.mxu1 %v34641_v3 }
0x1608   :  { %26821 = vmatpush3.msra.mxu0 %v29834_v56  ;;  %26860 = vmatpush3.msra.mxu1 %v29874_v29 }
0x1609   :  { %26822 = vmatprep.subr.mxu0 %v34641_v3  ;;  %26861 = vmatprep.subr.mxu1 %v34641_v3 }
0x160a   :  { %26823 = vmatpush3.msra.mxu0 %v29846_v5  ;;  %26862 = vmatpush3.msra.mxu1 %v29889_v35 }
0x160b   :  { %26824 = vmatprep.subr.mxu0 %v34641_v3  ;;  %26863 = vmatprep.subr.mxu1 %v34641_v3 }
0x160c   :  { %26825 = vmatpush3.msra.mxu0 %v29860_v22  ;;  %26864 = vmatpush3.msra.mxu1 %v29906_v51 }
0x160d   :  { %26826 = vmatprep.subr.mxu0 %v34641_v3  ;;  %26865 = vmatprep.subr.mxu1 %v34641_v3 }
0x160e   :  { %26827 = vmatpush3.msra.mxu0 %v29878_v10  ;;  %26866 = vmatpush3.msra.mxu1 %v29922_v16 }
0x160f   :  { %26828 = vmatprep.subr.mxu0 %v34641_v3  ;;  %26867 = vmatprep.subr.mxu1 %v34641_v3 }
0x1610   :  { %26829 = vmatpush3.msra.mxu0 %v29887_v34  ;;  %26868 = vmatpush3.msra.mxu1 %v29941_v53 }
0x1611   :  { %26830 = vmatprep.subr.mxu0 %v34641_v3  ;;  %26869 = vmatprep.subr.mxu1 %v34641_v3 }
0x1612   :  { %26831 = vmatpush3.msra.mxu0 %v29904_v48  ;;  %26870 = vmatpush3.msra.mxu1 %v29952_v57 }
0x1613   :  { %26832 = vmatprep.subr.mxu0 %v34641_v3  ;;  %26871 = vmatprep.subr.mxu1 %v34641_v3 }
0x1614   :  { %26833 = vmatpush3.msra.mxu0 %v29920_v9  ;;  %26872 = vmatpush3.msra.mxu1 %v29968_v12 }
0x1615   :  { %26834 = vmatprep.subr.mxu0 %v34641_v3  ;;  %26873 = vmatprep.subr.mxu1 %v34641_v3 }
0x1616   :  { %26835 = vmatpush3.msra.mxu0 %v29937_v39  ;;  %26874 = vmatpush3.msra.mxu1 %v29985_v17 }
0x1617   :  { %26836 = vmatprep.subr.mxu0 %v34641_v3  ;;  %26875 = vmatprep.subr.mxu1 %v34641_v3 }
0x1618   :  { %26837 = vmatpush3.msra.mxu0 %v29957_v40  ;;  %26876 = vmatpush3.msra.mxu1 %v30001_v62 }
0x1619   :  { %26838 = vmatprep.subr.mxu0 %v34641_v3  ;;  %26878 = vmatmul.mubr.f32.vlgmr.msra.gmra.mxu1 %v10821_v25 }
0x161a   :  { %26911 = vmatprep.subr.mxu1 %v34641_v3  ;;  %26839 = vmatpush3.msra.mxu0 %v29966_v44 }
0x161b   :  { %26912 = vmatpush3.msra.mxu1 %v29821_v52  ;;  %26840 = vmatprep.subr.mxu0 %v34641_v3 }
0x161c   :  { %26913 = vmatprep.subr.mxu1 %v34641_v3  ;;  %26841 = vmatpush3.msra.mxu0 %v29983_v26 }
0x161d   :  { %26914 = vmatpush3.msra.mxu1 %v29826_v55  ;;  %26842 = vmatprep.subr.mxu0 %v34641_v3 }
0x161e   :  { %26915 = vmatprep.subr.mxu1 %v34641_v3  ;;  %26843 = vmatpush3.msra.mxu0 %v29999_v61 }
0x161f   :  { %26916 = vmatpush3.msra.mxu1 %v29836_v58  ;;  %26844 = vmatprep.subr.mxu0 %v34641_v3 }
0x1620   :  { %26917 = vmatprep.subr.mxu1 %v34641_v3  ;;  %26845 = vmatpush3.msra.mxu0 %v30017_v33 }
0x1621   :  { %26846 = vmatprep.mubr.msk.f32.mxu0 %vm29465_vm0, %v34641_v3  ;;  %26918 = vmatpush3.msra.mxu1 %v29848_v6 }
0x1622   :  { %26847 = vmatmul.mubr.f32.vlgmr.msra.gmra.mxu0 %v31929_v0  ;;  %26880 = vmatprep.subr.mxu0 %v34641_v3 }
0x1623   :  { %26919 = vmatprep.subr.mxu1 %v34641_v3  ;;  %26881 = vmatpush3.msra.mxu0 %v29831_v60 }
0x1624   :  { %26920 = vmatpush3.msra.mxu1 %v29863_v23  ;;  %26882 = vmatprep.subr.mxu0 %v34641_v3 }
0x1625   :  { %26921 = vmatprep.subr.mxu1 %v34641_v3  ;;  %26883 = vmatpush3.msra.mxu0 %v29843_v4 }
0x1626   :  { %26922 = vmatpush3.msra.mxu1 %v29874_v29  ;;  %26884 = vmatprep.subr.mxu0 %v34641_v3 }
0x1627   :  { %26923 = vmatprep.subr.mxu1 %v34641_v3  ;;  %26885 = vmatpush3.msra.mxu0 %v29857_v19 }
0x1628   :  { %26924 = vmatpush3.msra.mxu1 %v29889_v35  ;;  %26886 = vmatprep.subr.mxu0 %v34641_v3 }
0x1629   :  { %26925 = vmatprep.subr.mxu1 %v34641_v3  ;;  %26887 = vmatpush3.msra.mxu0 %v29872_v28 }
0x162a   :  { %26926 = vmatpush3.msra.mxu1 %v29906_v51  ;;  %26888 = vmatprep.subr.mxu0 %v34641_v3 }
0x162b   :  { %26927 = vmatprep.subr.mxu1 %v34641_v3  ;;  %26889 = vmatpush3.msra.mxu0 %v29894_v37 }
0x162c   :  { %26928 = vmatpush3.msra.mxu1 %v29922_v16  ;;  %26890 = vmatprep.subr.mxu0 %v34641_v3 }
0x162d   :  { %26929 = vmatprep.subr.mxu1 %v34641_v3  ;;  %26891 = vmatpush3.msra.mxu0 %v29901_v47 }
0x162e   :  { %26930 = vmatpush3.msra.mxu1 %v29941_v53  ;;  %26892 = vmatprep.subr.mxu0 %v34641_v3 }
0x162f   :  { %26931 = vmatprep.subr.mxu1 %v34641_v3  ;;  %26893 = vmatpush3.msra.mxu0 %v34768_v42 }
0x1630   :  { %26932 = vmatpush3.msra.mxu1 %v29952_v57  ;;  %26894 = vmatprep.subr.mxu0 %v34641_v3 }
0x1631   :  { %26933 = vmatprep.subr.mxu1 %v34641_v3  ;;  %26895 = vmatpush3.msra.mxu0 %v34769_v14 }
0x1632   :  { %26934 = vmatpush3.msra.mxu1 %v29968_v12  ;;  %26896 = vmatprep.subr.mxu0 %v34641_v3 }
0x1633   :  { %26935 = vmatprep.subr.mxu1 %v34641_v3  ;;  %26897 = vmatpush3.msra.mxu0 %v34770_v27 }
0x1634   :  { %26936 = vmatpush3.msra.mxu1 %v29985_v17  ;;  %26898 = vmatprep.subr.mxu0 %v34641_v3 }
0x1635   :  { %26937 = vmatprep.subr.mxu1 %v34641_v3  ;;  %26899 = vmatpush3.msra.mxu0 %v34771_v21 }
0x1636   :  { %26938 = vmatpush3.msra.mxu1 %v30001_v62  ;;  %26939 = vmatprep.mubr.msk.f32.mxu1 %vm29465_vm0, %v34641_v3 }
0x1637   :  { %26900 = vmatprep.subr.mxu0 %v34641_v3  ;;  %26940 = vmatmul.mubr.f32.vlgmr.msra.gmra.mxu1 %v31926_v59 }
0x1638   :  { %26901 = vmatpush3.msra.mxu0 %v34772_v24  ;;  %26908 = vmatprep.mubr.msk.f32.mxu0 %vm29465_vm0, %v34641_v3 }
0x1639   :  { %26902 = vmatprep.subr.mxu0 %v34641_v3  ;;  %26949 = vmatprep.subr.mxu1 %v34641_v3 }
0x163a   :  { %26903 = vmatpush3.msra.mxu0 %v34842_v30  ;;  %26950 = vmatpush3.msra.mxu1 %v34843_v46 }
0x163b   :  { %26904 = vmatprep.subr.mxu0 %v34641_v3  ;;  %26951 = vmatprep.subr.mxu1 %v34641_v3 }
0x163c   :  { %26905 = vmatpush3.msra.mxu0 %v34844_v18  ;;  %26952 = vmatpush3.msra.mxu1 %v34845_v13 }
0x163d   :  { %26906 = vmatprep.subr.mxu0 %v34641_v3  ;;  %26953 = vmatprep.mubr.msk.f32.mxu1 %vm29465_vm0, %v34641_v3 }
0x163e   :  { %26907 = vmatpush3.msra.mxu0 %v34846_v45  ;;  %26963 = vmatprep.subr.mxu1 %v34641_v3 }
0x163f   :  { %26909 = vmatmul.mubr.f32.vlgmr.msra.gmra.mxu0 %v31926_v59  ;;  %26942 = vmatprep.subr.mxu0 %v34641_v3 }
0x1640   :  { %26943 = vmatpush3.msra.mxu0 %v34847_v49  ;;  %26946 = vmatprep.mubr.msk.f32.mxu0 %vm29465_vm0, %v34641_v3 }
0x1641   :  { %26944 = vmatprep.subr.mxu0 %v34641_v3 }
0x1642   :  { %26945 = vmatpush3.msra.mxu0 %v34848_v32 }
0x1643   :  { %26956 = vmatprep.subr.mxu0 %v34641_v3 }
0x16bd   :  { %v10966_v31 = vpop.f32.mrf.mxu1 }
0x16bf   :  { %v26817_v20 = vpop.f32.mrf.mxu1 }
0x16c5   :  { %v10825_v15 = vpop.f32.mrf.mxu0 }
0x16c6   :  { %v10826_v59 = vadd.f32 %v10825_v15, %v31835_v2  ;;  %v34853_v15 = vld [vmem:[#allocation60_spill] sm:$0xff] }
0x16c7   :  { %v26786_v41 = vpop.f32.mrf.mxu0 }
0x16c8   :  { %v10967_v25 = vadd.f32 %v10966_v31, %v10826_v59  ;;  %v29211_v59 = vld [vmem:[%s34420_s4 + $0x34] ss:$8 sps:$4 sm:$0xff]  }
0x16d9   :  { %v11153_v50 = vpop.f32.mrf.mxu1 }
0x16db   :  { %v26879_v8 = vpop.f32.mrf.mxu1 }
0x16e2   :  { %v11066_v36 = vpop.f32.mrf.mxu0 }
0x16e3   :  { %v11067_v63 = vadd.f32 %v11066_v36, %v10967_v25  ;;  %v29212_v25 = vld [vmem:[%s34420_s4 + $0x30] ss:$8 sps:$4 sm:$0xff]  }
0x16e4   :  { %v26848_v38 = vpop.f32.mrf.mxu0 }
0x16e5   :  { %v11154_v13 = vadd.f32 %v11153_v50, %v11067_v63  ;;  %v29210_v50 = vld [vmem:[%s34418_s2 + $0x8] ss:$12 sps:$4 sm:$0xff]   ;;  %v34854_v38 = vld [vmem:[#allocation62_spill] sm:$0xff]  ;;  %v34857_v63 = vmov 0  }
0x16f7   :  { %v11351_v0 = vpop.f32.mrf.mxu1 }
0x16f9   :  { %v26941_v11 = vpop.f32.mrf.mxu1 }
0x16fa   :  { %v34856_v11 = vld [vmem:[#allocation10_spill] sm:$0xff] }
0x16ff   :  { %v11266_v46 = vpop.f32.mrf.mxu0 }
0x1700   :  { %v11267_v45 = vadd.f32 %v11266_v46, %v11154_v13  ;;  %v34850_v46 = vld [vmem:[#allocation58_spill] sm:$0xff]  ;;  %v11836_v13 = vpop.permute.xlu1 %11835 }
0x1701   :  { %v26910_v18 = vpop.f32.mrf.mxu0 }
0x1702   :  { %v11352_v30 = vadd.f32 %v11351_v0, %v11267_v45  ;;  %v34851_v18 = vld [vmem:[#allocation11_spill] sm:$0xff]  ;;  %v34852_v45 = vld [vmem:[#allocation61_spill] sm:$0xff] }
0x1703   :  { %v34855_v0 = vld [vmem:[#allocation9_spill] sm:$0xff] }
0x1704   :  { %v11355_v24 = vmul.f32 0.5, %v11352_v30 }
0x1706   :  { %v32071_v20 = vadd.f32 %v11355_v24, %v31602_v43 }
0x1708   :  { %34849 = vst [vmem:[#allocation65_spill] sm:$0xff] %v32071_v20  ;;  %v11358_v41 = vsel %vm72_vm2, %v32071_v20, 0  ;;  %v11838_v31 = vsel %vm72_vm2, %v32071_v20, %v11836_v13  ;;  %v29215_v13 = vld [vmem:[%s34420_s4 + $0x20] ss:$8 sps:$4 sm:$0xff]  }
0x1709   :  { %v32075_v8 = vand.u32 4294901760, %v11358_v41  ;;  %v11839_v36 = vpack.c.bf16 %v11838_v31, %v11838_v31  ;;  %v29216_v31 = vld [vmem:[%s34418_s2] ss:$12 sps:$4 sm:$0xff]  }
0x170b   :  { %v32078_v2 = vsub.f32 %v11358_v41, %v32075_v8  ;;  %26954 = vmatmul.mubr.f32.vlgmr.msra.gmra.mxu1 %v32075_v8  ;;  %v29213_v41 = vld [vmem:[%s34418_s2 + $0x4] ss:$12 sps:$4 sm:$0xff]  }
0x170c   :  { %26964 = vmatpush3.msra.mxu1 %v34847_v49  ;;  %26967 = vmatprep.mubr.msk.f32.mxu1 %vm29465_vm0, %v34641_v3 }
0x170d   :  { %26965 = vmatprep.subr.mxu1 %v34641_v3  ;;  %v32086_v24 = vand.u32 4294901760, %v32078_v2 }
0x170e   :  { %26966 = vmatpush3.msra.mxu1 %v34848_v32 }
0x170f   :  { %26977 = vmatprep.subr.mxu1 %v34641_v3  ;;  %26968 = vmatmul.mubr.f32.vlgmr.msra.gmra.mxu1 %v32086_v24  ;;  %v11430_v43 = vsub.f32 %v32078_v2, %v32086_v24 }
0x1710   :  { %26978 = vmatpush3.msra.mxu1 %v34847_v49  ;;  %26981 = vmatprep.mubr.msk.f32.mxu1 %vm29465_vm0, %v34641_v3 }
0x1711   :  { %26979 = vmatprep.subr.mxu1 %v34641_v3  ;;  %v32097_v30 = vand.u32 4294901760, %v11430_v43  ;;  %v29214_v43 = vld [vmem:[%s34420_s4 + $0x24] ss:$8 sps:$4 sm:$0xff]  }
0x1712   :  { %26980 = vmatpush3.msra.mxu1 %v34848_v32 }
0x1713   :  { %26984 = vmatprep.subr.bf16.mxu1 %v34641_v3  ;;  %26947 = vmatmul.mubr.f32.vlgmr.msra.gmra.mxu0 %v32097_v30 }
0x1714   :  { %26957 = vmatpush3.msra.mxu0 %v34850_v46  ;;  %26982 = vmatmul.mubr.f32.vlgmr.msra.gmra.mxu1 %v32075_v8 }
0x1715   :  { %26985 = vmatpush3.bf16.msra.mxu1 %v34851_v18  ;;  %26958 = vmatprep.subr.mxu0 %v34641_v3 }
0x1716   :  { %26959 = vmatpush3.msra.mxu0 %v34852_v45  ;;  %26960 = vmatprep.mubr.msk.f32.mxu0 %vm29465_vm0, %v34641_v3 }
0x1717   :  { %26970 = vmatprep.subr.mxu0 %v34641_v3  ;;  %26986 = vmatprep.subr.bf16.mxu1 %v34641_v3 }
0x1718   :  { %26961 = vmatmul.mubr.f32.vlgmr.msra.gmra.mxu0 %v32078_v2  ;;  %26988 = vmatprep.mubr.msk.bf16.mxu1 %vm29465_vm0, %v34641_v3 }
0x1719   :  { %26971 = vmatpush3.msra.mxu0 %v34853_v15  ;;  %26987 = vmatpush3.bf16.msra.mxu1 %v29210_v50  ;;  %v29217_v50 = vld [vmem:[%s34420_s4 + $0x14] ss:$8 sps:$4 sm:$0xff]  }
0x171a   :  { %26972 = vmatprep.subr.mxu0 %v34641_v3  ;;  %26974 = vmatprep.mubr.msk.f32.mxu0 %vm29465_vm0, %v34641_v3 }
0x171b   :  { %26973 = vmatpush3.msra.mxu0 %v34854_v38  ;;  %11984 = vmatprep.subr.bf16.mxu1 %v29211_v59  ;;  %v29218_v59 = vld [vmem:[#allocation4 + $0x74] ss:$8 sps:$4 sm:$0xff]  }
0x171c   :  { %23044 = vmatprep.subr.msk.bf16.mxu0 %vm126_vm1, %v34855_v0  ;;  %26989 = vmatmul.mubr.msk.bf16.vlgmr.msra.gmra.mxu1 %vm122_vm3, %v11839_v36  ;;  %v29233_v0 = vld [vmem:[#allocation4 + $0x20] ss:$8 sps:$4 sm:$0xff]  }
0x171d   :  { %26975 = vmatmul.mubr.f32.vlgmr.msra.gmra.mxu0 %v32075_v8  ;;  %11985 = vmatpush1.bf16.msra.mxu1 %v29212_v25  ;;  %v29219_v25 = vld [vmem:[%s34420_s4 + $0x10] ss:$8 sps:$4 sm:$0xff]  }
0x171e   :  { %11856 = vmatpush1.bf16.msra.mxu0 %v34856_v11  ;;  %11875 = vmatprep.mubr.bf16.mxu0 %v34857_v63  ;;  %v29232_v11 = vld [vmem:[#allocation4 + $0x24] ss:$8 sps:$4 sm:$0xff]  }
0x171f   :  { %11857 = vmatprep.subr.bf16.mxu0 %v29213_v41  ;;  %11986 = vmatprep.subr.bf16.mxu1 %v29214_v43  ;;  %v29220_v41 = vld [vmem:[#allocation4 + $0x70] ss:$8 sps:$4 sm:$0xff]   ;;  %v29221_v43 = vld [vmem:[%s34420_s4 + $0x4] ss:$8 sps:$4 sm:$0xff]  }
0x1720   :  { %12008 = vmatprep.mubr.bf16.mxu1 %v34857_v63  ;;  %v29229_v63 = vld [vmem:[#allocation4 + $0x40] ss:$8 sps:$4 sm:$0xff]  }
0x1721   :  { %11987 = vmatpush1.bf16.msra.mxu1 %v29215_v13  ;;  %v29222_v13 = vld [vmem:[#allocation4 + $0x64] ss:$8 sps:$4 sm:$0xff]  }
0x1722   :  { %11858 = vmatpush1.bf16.msra.mxu0 %v29216_v31  ;;  %11988 = vmatprep.subr.bf16.mxu1 %v29217_v50  ;;  %v29223_v31 = vld [vmem:[%s34420_s4] ss:$8 sps:$4 sm:$0xff]   ;;  %v29225_v50 = vld [vmem:[#allocation6 + $0x74] ss:$8 sps:$4 sm:$0xff]  }
0x1723   :  { %11929 = vmatprep.subr.bf16.mxu0 %v29218_v59  ;;  %v29226_v59 = vld [vmem:[#allocation4 + $0x54] ss:$8 sps:$4 sm:$0xff]  }
0x1725   :  { %23045 = vmatmul.mubr.msk.bf16.vlgmr.msra.gmra.mxu0 %vm122_vm3, %v11839_v36  ;;  %11989 = vmatpush1.bf16.msra.mxu1 %v29219_v25  ;;  %v29224_v36 = vld [vmem:[#allocation4 + $0x60] ss:$8 sps:$4 sm:$0xff]   ;;  %v29227_v25 = vld [vmem:[#allocation4 + $0x50] ss:$8 sps:$4 sm:$0xff]  }
0x1726   :  { %11930 = vmatpush1.bf16.msra.mxu0 %v29220_v41  ;;  %11990 = vmatprep.subr.bf16.mxu1 %v29221_v43  ;;  %v29228_v41 = vld [vmem:[#allocation4 + $0x44] ss:$8 sps:$4 sm:$0xff]   ;;  %v29230_v43 = vld [vmem:[#allocation4 + $0x34] ss:$8 sps:$4 sm:$0xff]  }
0x1727   :  { %11931 = vmatprep.subr.bf16.mxu0 %v29222_v13  ;;  %v29231_v13 = vld [vmem:[#allocation4 + $0x30] ss:$8 sps:$4 sm:$0xff]  }
0x1729   :  { %11991 = vmatpush1.bf16.msra.mxu1 %v29223_v31  ;;  %v29234_v31 = vld [vmem:[#allocation4 + $0x14] ss:$8 sps:$4 sm:$0xff]  }
0x172a   :  { %11932 = vmatpush1.bf16.msra.mxu0 %v29224_v36  ;;  %12023 = vmatprep.subr.bf16.mxu1 %v29225_v50  ;;  %v29235_v36 = vld [vmem:[#allocation4 + $0x10] ss:$8 sps:$4 sm:$0xff]   ;;  %v29236_v50 = vld [vmem:[#allocation4 + $0x4] ss:$8 sps:$4 sm:$0xff]  }
0x172b   :  { %11933 = vmatprep.subr.bf16.mxu0 %v29226_v59  ;;  %v29237_v59 = vld [vmem:[#allocation4] ss:$8 sps:$4 sm:$0xff]  }
0x172e   :  { %11934 = vmatpush1.bf16.msra.mxu0 %v29227_v25  ;;  %v29238_v25 = vld [vmem:[#allocation4 + $0xf4] ss:$8 sps:$4 sm:$0xff]  }
0x172f   :  { %11935 = vmatprep.subr.bf16.mxu0 %v29228_v41  ;;  %v29239_v41 = vld [vmem:[#allocation4 + $0xf0] ss:$8 sps:$4 sm:$0xff]  }
0x1732   :  { %11936 = vmatpush1.bf16.msra.mxu0 %v29229_v63  ;;  %v29240_v63 = vld [vmem:[#allocation4 + $0xe4] ss:$8 sps:$4 sm:$0xff]  }
0x1733   :  { %11937 = vmatprep.subr.bf16.mxu0 %v29230_v43  ;;  %v29241_v43 = vld [vmem:[#allocation4 + $0xe0] ss:$8 sps:$4 sm:$0xff]  }
0x1736   :  { %11938 = vmatpush1.bf16.msra.mxu0 %v29231_v13  ;;  %v29242_v13 = vld [vmem:[#allocation4 + $0xd4] ss:$8 sps:$4 sm:$0xff]  }
0x1737   :  { %11939 = vmatprep.subr.bf16.mxu0 %v29232_v11  ;;  %v29243_v11 = vld [vmem:[#allocation4 + $0xd0] ss:$8 sps:$4 sm:$0xff]  }
0x173a   :  { %11940 = vmatpush1.bf16.msra.mxu0 %v29233_v0  ;;  %v29244_v0 = vld [vmem:[#allocation4 + $0xc4] ss:$8 sps:$4 sm:$0xff]  }
0x173b   :  { %11941 = vmatprep.subr.bf16.mxu0 %v29234_v31  ;;  %v29245_v31 = vld [vmem:[#allocation4 + $0xc0] ss:$8 sps:$4 sm:$0xff]  }
0x173e   :  { %11942 = vmatpush1.bf16.msra.mxu0 %v29235_v36  ;;  %v29246_v36 = vld [vmem:[#allocation4 + $0xb4] ss:$8 sps:$4 sm:$0xff]  }
0x173f   :  { %11943 = vmatprep.subr.bf16.mxu0 %v29236_v50  ;;  %v29247_v50 = vld [vmem:[#allocation4 + $0xb0] ss:$8 sps:$4 sm:$0xff]  }
0x1742   :  { %11944 = vmatpush1.bf16.msra.mxu0 %v29237_v59  ;;  %v29248_v59 = vld [vmem:[#allocation4 + $0xa4] ss:$8 sps:$4 sm:$0xff]  }
0x1743   :  { %11945 = vmatprep.subr.bf16.mxu0 %v29238_v25  ;;  %v29249_v25 = vld [vmem:[#allocation4 + $0xa0] ss:$8 sps:$4 sm:$0xff]  }
0x1746   :  { %11946 = vmatpush2.bf16.msra.mxu0 %v29239_v41  ;;  %v29250_v41 = vld [vmem:[#allocation4 + $0x94] ss:$8 sps:$4 sm:$0xff]  }
0x1747   :  { %11947 = vmatprep.subr.bf16.mxu0 %v29240_v63  ;;  %v29251_v63 = vld [vmem:[#allocation4 + $0x90] ss:$8 sps:$4 sm:$0xff]  }
0x174a   :  { %11948 = vmatpush2.bf16.msra.mxu0 %v29241_v43  ;;  %v29252_v43 = vld [vmem:[#allocation4 + $0x84] ss:$8 sps:$4 sm:$0xff]  }
0x174b   :  { %11949 = vmatprep.subr.bf16.mxu0 %v29242_v13  ;;  %v29253_v13 = vld [vmem:[#allocation4 + $0x80] ss:$8 sps:$4 sm:$0xff]  }
0x174e   :  { %11950 = vmatpush2.bf16.msra.mxu0 %v29243_v11  ;;  %v29254_v11 = vld [vmem:[%s34422_s6 + $0x78] sm:$0xff]  }
0x174f   :  { %11951 = vmatprep.subr.bf16.mxu0 %v29244_v0 }
0x1752   :  { %11952 = vmatpush2.bf16.msra.mxu0 %v29245_v31 }
0x1753   :  { %11953 = vmatprep.subr.bf16.mxu0 %v29246_v36 }
0x1756   :  { %11954 = vmatpush2.bf16.msra.mxu0 %v29247_v50 }
0x1757   :  { %11955 = vmatprep.subr.bf16.mxu0 %v29248_v59 }
0x175a   :  { %11956 = vmatpush2.bf16.msra.mxu0 %v29249_v25 }
0x175b   :  { %11957 = vmatprep.subr.bf16.mxu0 %v29250_v41 }
0x175e   :  { %11958 = vmatpush2.bf16.msra.mxu0 %v29251_v63 }
0x175f   :  { %11959 = vmatprep.subr.bf16.mxu0 %v29252_v43 }
0x1762   :  { %11960 = vmatpush2.bf16.msra.mxu0 %v29253_v13  ;;  %v34858_v13 = vld [vmem:[#allocation13_spill] sm:$0xff] }
0x1763   :  { %24029 = vmatprep.subr.bf16.mxu0 %v29254_v11 }
0x17cb   :  { %v11514_v0 = vpop.f32.mrf.mxu1 }
0x17cd   :  { %v26955_v31 = vpop.f32.mrf.mxu1 }
0x17cf   :  { %v11665_v36 = vpop.f32.mrf.mxu1 }
0x17d1   :  { %v26969_v50 = vpop.f32.mrf.mxu1 }
0x17d3   :  { %v11433_v59 = vpop.f32.mrf.mxu0 }
0x17d4   :  { %v11515_v38 = vadd.f32 %v11514_v0, %v11433_v59  ;;  %v11815_v25 = vpop.f32.mrf.mxu1  ;;  %v34861_v59 = vld [vmem:[#allocation14_spill] sm:$0xff] }
0x17d5   :  { %v26948_v15 = vpop.f32.mrf.mxu0 }
0x17d6   :  { %v26983_v41 = vpop.f32.mrf.mxu1  ;;  %v29255_v15 = vld [vmem:[#allocation6 + $0x70] ss:$8 sps:$4 sm:$0xff]  }
0x17d8   :  { %v11590_v45 = vpop.f32.mrf.mxu0 }
0x17d9   :  { %v11591_v63 = vadd.f32 %v11590_v45, %v11515_v38  ;;  %v34860_v38 = vld [vmem:[#allocation12_spill] sm:$0xff] }
0x17da   :  { %v26962_v18 = vpop.f32.mrf.mxu0 }
0x17db   :  { %v11666_v43 = vadd.f32 %v11665_v36, %v11591_v63  ;;  %v29256_v18 = vld [vmem:[#allocation6 + $0x64] ss:$8 sps:$4 sm:$0xff]  }
0x17dc   :  { %v11918_v46 = vpop.f32.mrf.mxu1 }
0x17dd   :  { %v11919_v32 = vadd.f32 %v11918_v46, %v34858_v13  ;;  %v11742_v49 = vpop.f32.mrf.mxu0 }
0x17de   :  { %v11743_v20 = vadd.f32 %v11742_v49, %v11666_v43  ;;  %v26990_v21 = vpop.f32.mrf.mxu1 }
0x17df   :  { %v11926_v11 = vmax.f32 %v11919_v32, 0.0  ;;  %v26976_v27 = vpop.f32.mrf.mxu0  ;;  %v29257_v21 = vld [vmem:[#allocation6 + $0x60] ss:$8 sps:$4 sm:$0xff]  }
0x17e0   :  { %v32166_v31 = vadd.f32 %v11815_v25, %v11743_v20  ;;  %v11921_v50 = vpop.f32.mrf.mxu1  ;;  %v29258_v20 = vld [vmem:[#allocation6 + $0x54] ss:$8 sps:$4 sm:$0xff]  }
0x17e1   :  { %v11972_v14 = vpack.c.bf16 %v11926_v11, %v11926_v11  ;;  %v29260_v11 = vld [vmem:[#allocation6 + $0x44] ss:$8 sps:$4 sm:$0xff]   ;;  %v29261_v50 = vld [vmem:[#allocation6 + $0x40] ss:$8 sps:$4 sm:$0xff]  }
0x17e2   :  { %34859 = vst [vmem:[#allocation69_spill] sm:$0xff] %v32166_v31  ;;  %v26991_v0 = vpop.f32.mrf.mxu1 }
0x17e3   :  { %23047 = vmatmul.mubr.msk.bf16.vlgmr.msra.gmra.mxu1 %vm532_vm4, %v11972_v14  ;;  %v29259_v14 = vld [vmem:[#allocation6 + $0x50] ss:$8 sps:$4 sm:$0xff]   ;;  %v29262_v0 = vld [vmem:[%s34422_s6 + $0x38] sm:$0xff]  }
0x17e4   :  { %12024 = vmatpush1.bf16.msra.mxu1 %v29255_v15  ;;  %v29263_v15 = vld [vmem:[#allocation6 + $0x34] ss:$8 sps:$4 sm:$0xff]  }
0x17e5   :  { %v11877_v45 = vpop.f32.mrf.mxu0  ;;  %12025 = vmatprep.subr.bf16.mxu1 %v29256_v18  ;;  %v29265_v18 = vld [vmem:[#allocation6 + $0x30] ss:$8 sps:$4 sm:$0xff]  }
0x17e6   :  { %v11878_v36 = vadd.f32 %v11877_v45, %v34860_v38  ;;  %v29264_v45 = vld [vmem:[%s34422_s6 + $0x70] sm:$0xff]  }
0x17e7   :  { %v11879_v46 = vpop.f32.mrf.mxu0 }
0x17e8   :  { %v11880_v49 = vadd.f32 %v11879_v46, %v34861_v59  ;;  %12026 = vmatpush1.bf16.msra.mxu1 %v29257_v21  ;;  %v11924_v27 = vmax.f32 %v11878_v36, 0.0  ;;  %v29266_v36 = vld [vmem:[%s34422_s6 + $0x30] sm:$0xff]   ;;  %v29267_v46 = vld [vmem:[#allocation6 + $0x24] ss:$8 sps:$4 sm:$0xff]   ;;  %v29269_v21 = vld [vmem:[#allocation6 + $0x20] ss:$8 sps:$4 sm:$0xff]  }
0x17e9   :  { %v11881_v32 = vpop.f32.mrf.mxu0  ;;  %12027 = vmatprep.subr.bf16.mxu1 %v29258_v20  ;;  %v29272_v20 = vld [vmem:[%s34422_s6 + $0x60] sm:$0xff]  }
0x17ea   :  { %v11925_v25 = vmax.f32 %v11880_v49, 0.0  ;;  %v11927_v43 = vpack.c.bf16 %v11924_v27, %v11924_v27  ;;  %v29268_v49 = vld [vmem:[%s34422_s6 + $0x68] sm:$0xff]  }
0x17eb   :  { %v11882_v41 = vpop.f32.mrf.mxu0  ;;  %v29270_v27 = vld [vmem:[%s34422_s6 + $0x28] sm:$0xff]  }
0x17ec   :  { %v11928_v63 = vpack.c.bf16 %v11925_v25, %v11925_v25  ;;  %12028 = vmatpush1.bf16.msra.mxu1 %v29259_v14  ;;  %v29271_v32 = vld [vmem:[#allocation6 + $0x14] ss:$8 sps:$4 sm:$0xff]   ;;  %v29273_v25 = vld [vmem:[#allocation6 + $0x10] ss:$8 sps:$4 sm:$0xff]   ;;  %v29274_v41 = vld [vmem:[%s34422_s6 + $0x20] sm:$0xff]  }
0x17ed   :  { %12029 = vmatprep.subr.bf16.mxu1 %v29260_v11  ;;  %v29276_v14 = vld [vmem:[%s34422_s6 + $0x58] sm:$0xff]  }
0x17ee   :  { %11961 = vmatprep.mubr.bf16.mxu0 %v11928_v63  ;;  %v29275_v63 = vld [vmem:[#allocation6 + $0x4] ss:$8 sps:$4 sm:$0xff]  }
0x17ef   :  { %11962 = vmatmul.mubr.bf16.vlgmr.msra.gmra.mxu0 %v11927_v43  ;;  %v29277_v43 = vld [vmem:[#allocation6] ss:$8 sps:$4 sm:$0xff]  }
0x17f0   :  { %12030 = vmatpush1.bf16.msra.mxu1 %v29261_v50  ;;  %24030 = vmatpush3.bf16.msra.mxu0 %v29262_v0  ;;  %v29278_v11 = vld [vmem:[%s34422_s6 + $0x18] sm:$0xff]   ;;  %v29279_v50 = vld [vmem:[#allocation6 + $0xf4] ss:$8 sps:$4 sm:$0xff]  }
0x17f1   :  { %12031 = vmatprep.subr.bf16.mxu1 %v29263_v15  ;;  %24031 = vmatprep.subr.bf16.mxu0 %v29264_v45  ;;  %v29280_v0 = vld [vmem:[%s34422_s6 + $0x50] sm:$0xff]  }
0x17f2   :  { %v29281_v15 = vld [vmem:[#allocation6 + $0xf0] ss:$8 sps:$4 sm:$0xff]  }
0x17f3   :  { %v29282_v45 = vld [vmem:[%s34422_s6 + $0x10] sm:$0xff]  }
0x17f4   :  { %12032 = vmatpush1.bf16.msra.mxu1 %v29265_v18  ;;  %24032 = vmatpush3.bf16.msra.mxu0 %v29266_v36  ;;  %v29283_v18 = vld [vmem:[#allocation6 + $0xe4] ss:$8 sps:$4 sm:$0xff]   ;;  %v29284_v36 = vld [vmem:[%s34422_s6 + $0x48] sm:$0xff]  }
0x17f5   :  { %12033 = vmatprep.subr.bf16.mxu1 %v29267_v46  ;;  %24033 = vmatprep.subr.bf16.mxu0 %v29268_v49  ;;  %v29285_v46 = vld [vmem:[#allocation6 + $0xe0] ss:$8 sps:$4 sm:$0xff]   ;;  %v29286_v49 = vld [vmem:[%s34422_s6 + $0x8] sm:$0xff]  }
0x17f8   :  { %12034 = vmatpush1.bf16.msra.mxu1 %v29269_v21  ;;  %24034 = vmatpush3.bf16.msra.mxu0 %v29270_v27  ;;  %v29287_v21 = vld [vmem:[#allocation6 + $0xd4] ss:$8 sps:$4 sm:$0xff]   ;;  %v29288_v27 = vld [vmem:[%s34422_s6 + $0x40] sm:$0xff]  }
0x17f9   :  { %12035 = vmatprep.subr.bf16.mxu1 %v29271_v32  ;;  %24035 = vmatprep.subr.bf16.mxu0 %v29272_v20  ;;  %v29289_v32 = vld [vmem:[#allocation6 + $0xd0] ss:$8 sps:$4 sm:$0xff]   ;;  %v29290_v20 = vld [vmem:[%s34422_s6] sm:$0xff]  }
0x17fc   :  { %12036 = vmatpush1.bf16.msra.mxu1 %v29273_v25  ;;  %24036 = vmatpush3.bf16.msra.mxu0 %v29274_v41  ;;  %v29291_v25 = vld [vmem:[#allocation6 + $0xc4] ss:$8 sps:$4 sm:$0xff]   ;;  %v29292_v41 = vld [vmem:[#allocation6 + $0xc0] ss:$8 sps:$4 sm:$0xff]  }
0x17fd   :  { %12037 = vmatprep.subr.bf16.mxu1 %v29275_v63  ;;  %24037 = vmatprep.subr.bf16.mxu0 %v29276_v14  ;;  %v29293_v63 = vld [vmem:[#allocation6 + $0xb4] ss:$8 sps:$4 sm:$0xff]   ;;  %v29294_v14 = vld [vmem:[#allocation6 + $0xb0] ss:$8 sps:$4 sm:$0xff]  }
0x1800   :  { %12038 = vmatpush1.bf16.msra.mxu1 %v29277_v43  ;;  %24038 = vmatpush3.bf16.msra.mxu0 %v29278_v11  ;;  %v29295_v43 = vld [vmem:[#allocation6 + $0xa4] ss:$8 sps:$4 sm:$0xff]   ;;  %v29296_v11 = vld [vmem:[#allocation6 + $0xa0] ss:$8 sps:$4 sm:$0xff]  }
0x1801   :  { %12039 = vmatprep.subr.bf16.mxu1 %v29279_v50  ;;  %24039 = vmatprep.subr.bf16.mxu0 %v29280_v0  ;;  %v29297_v50 = vld [vmem:[#allocation6 + $0x94] ss:$8 sps:$4 sm:$0xff]   ;;  %v29298_v0 = vld [vmem:[#allocation6 + $0x90] ss:$8 sps:$4 sm:$0xff]  }
0x1804   :  { %12040 = vmatpush2.bf16.msra.mxu1 %v29281_v15  ;;  %24040 = vmatpush3.bf16.msra.mxu0 %v29282_v45  ;;  %v29299_v15 = vld [vmem:[#allocation6 + $0x84] ss:$8 sps:$4 sm:$0xff]   ;;  %v29300_v45 = vld [vmem:[#allocation6 + $0x80] ss:$8 sps:$4 sm:$0xff]  }
0x1805   :  { %12041 = vmatprep.subr.bf16.mxu1 %v29283_v18  ;;  %24041 = vmatprep.subr.bf16.mxu0 %v29284_v36 }
0x1808   :  { %12042 = vmatpush2.bf16.msra.mxu1 %v29285_v46  ;;  %24042 = vmatpush3.bf16.msra.mxu0 %v29286_v49 }
0x1809   :  { %12043 = vmatprep.subr.bf16.mxu1 %v29287_v21  ;;  %24043 = vmatprep.subr.bf16.mxu0 %v29288_v27  ;;  %v34862_v21 = vld [vmem:[#allocation15_spill] sm:$0xff] }
0x180c   :  { %12044 = vmatpush2.bf16.msra.mxu1 %v29289_v32  ;;  %24044 = vmatpush3.bf16.msra.mxu0 %v29290_v20  ;;  %v34863_v20 = vld [vmem:[#allocation16_spill] sm:$0xff] }
0x180d   :  { %12045 = vmatprep.subr.bf16.mxu1 %v29291_v25  ;;  %27012 = vmatprep.subr.mxu0 %v34641_v3 }
0x1810   :  { %12046 = vmatpush2.bf16.msra.mxu1 %v29292_v41  ;;  %v34864_v41 = vld [vmem:[#allocation17_spill] sm:$0xff] }
0x1811   :  { %12047 = vmatprep.subr.bf16.mxu1 %v29293_v63 }
0x1814   :  { %12048 = vmatpush2.bf16.msra.mxu1 %v29294_v14 }
0x1815   :  { %12049 = vmatprep.subr.bf16.mxu1 %v29295_v43 }
0x1818   :  { %12050 = vmatpush2.bf16.msra.mxu1 %v29296_v11  ;;  %v34865_v11 = vld [vmem:[#allocation18_spill] sm:$0xff] }
0x1819   :  { %12051 = vmatprep.subr.bf16.mxu1 %v29297_v50 }
0x181c   :  { %12052 = vmatpush2.bf16.msra.mxu1 %v29298_v0 }
0x181d   :  { %12053 = vmatprep.subr.bf16.mxu1 %v29299_v15 }
0x1820   :  { %12054 = vmatpush2.bf16.msra.mxu1 %v29300_v45 }
0x1821   :  { %26992 = vmatprep.subr.mxu1 %v34641_v3 }
0x18a3   :  { %v12010_v18 = vpop.f32.mrf.mxu1 }
0x18a4   :  { %v12011_v27 = vadd.f32 %v12010_v18, %v34862_v21  ;;  %v34866_v18 = vld [vmem:[#allocation21_spill] sm:$0xff] }
0x18a5   :  { %v12012_v36 = vpop.f32.mrf.mxu1 }
0x18a6   :  { %v12013_v25 = vadd.f32 %v12012_v36, %v34863_v20  ;;  %v12017_v0 = vmax.f32 %v12011_v27, 0.0 }
0x18a7   :  { %v12014_v46 = vpop.f32.mrf.mxu1 }
0x18a8   :  { %v12018_v45 = vmax.f32 %v12013_v25, 0.0  ;;  %v34868_v25 = vld [vmem:[#allocation20_spill] sm:$0xff] }
0x18a9   :  { %v12015_v49 = vpop.f32.mrf.mxu1 }
0x18af   :  { %v11963_v32 = vpop.f32.mrf.mxu0 }
0x18b0   :  { %v11964_v63 = vadd.f32 %v11963_v32, %v34864_v41  ;;  %v34867_v32 = vld [vmem:[#allocation19_spill] sm:$0xff] }
0x18b1   :  { %v11965_v14 = vpop.f32.mrf.mxu0 }
0x18b2   :  { %v11970_v43 = vmax.f32 %v11964_v63, 0.0  ;;  %v11966_v50 = vadd.f32 %v11965_v14, %v34865_v11 }
0x18b3   :  { %v11967_v15 = vpop.f32.mrf.mxu0 }
0x18b4   :  { %v11971_v31 = vmax.f32 %v11966_v50, 0.0  ;;  %v12019_v59 = vadd.f32 %v12017_v0, %v11970_v43  ;;  %v34869_v0 = vld [vmem:[#allocation23_spill] sm:$0xff] }
0x18b5   :  { %v11968_v38 = vpop.f32.mrf.mxu0 }
0x18b6   :  { %v12020_v13 = vadd.f32 %v12018_v45, %v11971_v31  ;;  %v12021_v49 = vpack.c.bf16 %v12019_v59, %v12019_v59 }
0x18b8   :  { %v12022_v46 = vpack.c.bf16 %v12020_v13, %v12020_v13 }
0x18ba   :  { %12055 = vmatprep.mubr.bf16.mxu1 %v12022_v46 }
0x18bb   :  { %12056 = vmatmul.mubr.bf16.vlgmr.msra.gmra.mxu1 %v12021_v49 }
0x18bc   :  { %26993 = vmatpush3.msra.mxu1 %v34866_v18  ;;  %26994 = vmatprep.mubr.msk.f32.mxu1 %vm29465_vm0, %v34641_v3 }
0x18bd   :  { %26997 = vmatprep.subr.mxu1 %v34641_v3 }
0x197b   :  { %v12057_v36 = vpop.f32.mrf.mxu1 }
0x197c   :  { %v12058_v27 = vadd.f32 %v12057_v36, %v34867_v32  ;;  %v29301_v36 = vld [vmem:[%s34423_s7 + $0x4] ss:$0 sm:$0xff] }
0x197d   :  { %v12059_v63 = vpop.f32.mrf.mxu1 }
0x197e   :  { %v12060_v14 = vadd.f32 %v12059_v63, %v34868_v25  ;;  %v12064_v43 = vmax.f32 %v12058_v27, 0.0  ;;  %v34894_v25 = vld [vmem:[#allocation56_spill] sm:$0xff] }
0x197f   :  { %v12061_v38 = vpop.f32.mrf.mxu1 }
0x1980   :  { %v12065_v31 = vmax.f32 %v12060_v14, 0.0  ;;  %v12066_v50 = vpack.c.bf16 %v12064_v43, %v12064_v43 }
0x1981   :  { %v12062_v13 = vpop.f32.mrf.mxu1 }
0x1982   :  { %v12067_v59 = vpack.c.bf16 %v12065_v31, %v12065_v31 }
0x1984   :  { %12100 = vmatprep.mubr.bf16.mxu0 %v12067_v59  ;;  %v34870_v59 = vld [vmem:[#allocation66_spill] sm:$0xff] }
0x1985   :  { %12101 = vmatmul.mubr.bf16.vlgmr.msra.gmra.mxu0 %v12066_v50  ;;  %v6279_v50 = vmul.f32 %v34870_v59, %v34870_v59 }
0x1986   :  { %27013 = vmatpush3.msra.mxu0 %v34869_v0  ;;  %27014 = vmatprep.mubr.msk.f32.mxu0 %vm29465_vm0, %v34641_v3  ;;  %v34893_v0 = vld [vmem:[#allocation55_spill] sm:$0xff] }
0x1987   :  { %27022 = vmatprep.subr.mxu0 %v34641_v3 }
0x1a45   :  { %v24045_v15 = vpop.f32.mrf.mxu0 }
0x1a47   :  { %v24046_v45 = vpop.f32.mrf.mxu0 }
0x1a48   :  { %v24047_v46 = vadd.f32 %v24046_v45, %v24045_v15  ;;  %v6281_v15 = vsel %vm6280_vm9, %v6279_v50, 0.0  ;;  %v34871_v45 = vld [vmem:[#allocation67_spill] sm:$0xff]  ;;  %v34873_v50 = vld [vmem:[#allocation28_spill] sm:$0xff] }
0x1a49   :  { %v24048_v49 = vpop.f32.mrf.mxu0 }
0x1a4a   :  { %v12103_v27 = vadd.f32 %v29301_v36, %v24047_v46  ;;  %v11823_v46 = vmul.f32 %v34871_v45, %v34871_v45  ;;  %v34874_v45 = vld [vmem:[#allocation30_spill] sm:$0xff] }
0x1a4b   :  { %v24049_v63 = vpop.f32.mrf.mxu0 }
0x1a4c   :  { %v12109_v14 = vand.u32 2147483647, %v12103_v27  ;;  %v12108_v38 = vmul.f32 2.0, %v12103_v27  ;;  %v11824_v49 = vsel %vm6285_vm10, %v11823_v46, 0.0  ;;  %v34875_v46 = vld [vmem:[#allocation29_spill] sm:$0xff] }
0x1a4e   :  { %v12110_v43 = vadd.f32 1.0, %v12109_v14 }
0x1a50   :  { %29113 = vrcp.f32 %v12110_v43 }
0x1a5d   :  { %v29114_v31 = vpop.eup %29113 }
0x1a5e   :  { %v12112_v13 = vmul.f32 %v29114_v31, %v12108_v38 }
0x1a60   :  { %17372 = vrot.lane.b32.xlu1 %v12112_v13, %s29467_s18  ;;  %12114 = vrot.lane.b32.xlu0 %v12112_v13, %s29466_s17  ;;  %v17360_v36 = vmul.f32 %v12112_v13, %v12112_v13 }
0x1a62   :  { %v17361_v27 = vsel %vm6285_vm10, %v17360_v36, 0.0  ;;  %v34879_v36 = vld [vmem:[#allocation33_spill] sm:$0xff] }
0x1a84   :  { %6282 = vadd.xlane.f32.xlu1 %v6281_v15 }
0x1a88   :  { %11825 = vadd.xlane.f32.xlu1 %v11824_v49  ;;  %v34877_v49 = vld [vmem:[#allocation32_spill] sm:$0xff] }
0x1a8c   :  { %17362 = vadd.xlane.f32.xlu1 %v17361_v27  ;;  %v34880_v27 = vld [vmem:[#allocation34_spill] sm:$0xff] }
0x1ad2   :  { %v32244_v63 = vpop.permute.xlu0 %12114 }
0x1ad3   :  { %34872 = vst [vmem:[#allocation66_spill] sm:$0xff] %v32244_v63  ;;  %v12117_v14 = vsel %vm1011_vm6, 1.0, %v32244_v63  ;;  %v34890_v63 = vld [vmem:[#allocation50_spill] sm:$0xff] }
0x1ad4   :  { %v12119_v43 = vsel %vm1014_vm7, %v12117_v14, 0  ;;  %v34881_v14 = vld [vmem:[#allocation35_spill] sm:$0xff] }
0x1ad5   :  { %v12187_v38 = vand.u32 4294901760, %v12119_v43 }
0x1ad7   :  { %v12188_v31 = vsub.f32 %v12119_v43, %v12187_v38  ;;  %27015 = vmatmul.mubr.f32.vlgmr.msra.gmra.mxu0 %v12187_v38  ;;  %v34883_v43 = vld [vmem:[#allocation37_spill] sm:$0xff] }
0x1ad8   :  { %27023 = vmatpush3.msra.mxu0 %v34776_v7  ;;  %27026 = vmatprep.mubr.msk.f32.mxu0 %vm29465_vm0, %v34641_v3 }
0x1ad9   :  { %v12189_v13 = vand.u32 4294901760, %v12188_v31  ;;  %27024 = vmatprep.subr.mxu0 %v34641_v3 }
0x1ada   :  { %27025 = vmatpush3.msra.mxu0 %v34777_v1 }
0x1adb   :  { %v12190_v59 = vsub.f32 %v12188_v31, %v12189_v13  ;;  %27027 = vmatmul.mubr.f32.vlgmr.msra.gmra.mxu0 %v32097_v30  ;;  %27036 = vmatprep.subr.mxu0 %v34641_v3  ;;  %v34876_v30 = vld [vmem:[#allocation31_spill] sm:$0xff] }
0x1adc   :  { %27037 = vmatpush3.msra.mxu0 %v34873_v50  ;;  %27040 = vmatprep.mubr.msk.f32.mxu0 %vm29465_vm0, %v34641_v3 }
0x1add   :  { %v12191_v15 = vand.u32 4294901760, %v12190_v59  ;;  %27038 = vmatprep.subr.mxu0 %v34641_v3  ;;  %v34888_v59 = vld [vmem:[#allocation45_spill] sm:$0xff] }
0x1ade   :  { %27039 = vmatpush3.msra.mxu0 %v34874_v45 }
0x1adf   :  { %26995 = vmatmul.mubr.f32.vlgmr.msra.gmra.mxu1 %v12191_v15  ;;  %27041 = vmatmul.mubr.f32.vlgmr.msra.gmra.mxu0 %v32078_v2  ;;  %v34878_v2 = vld [vmem:[#allocation22_spill] sm:$0xff]  ;;  %v34889_v15 = vld [vmem:[#allocation47_spill] sm:$0xff] }
0x1ae0   :  { %26998 = vmatpush3.msra.mxu1 %v34875_v46  ;;  %27050 = vmatprep.subr.mxu0 %v34641_v3  ;;  %v34892_v46 = vld [vmem:[#allocation53_spill] sm:$0xff] }
0x1ae1   :  { %27051 = vmatpush3.msra.mxu0 %v34876_v30  ;;  %26999 = vmatprep.mubr.msk.f32.mxu1 %vm29465_vm0, %v34641_v3 }
0x1ae2   :  { %27052 = vmatprep.subr.mxu0 %v34641_v3  ;;  %27002 = vmatprep.subr.mxu1 %v34641_v3 }
0x1ae3   :  { %27053 = vmatpush3.msra.mxu0 %v34877_v49  ;;  %27054 = vmatprep.mubr.msk.f32.mxu0 %vm29465_vm0, %v34641_v3 }
0x1ae4   :  { %27000 = vmatmul.mubr.f32.vlgmr.msra.gmra.mxu1 %v12187_v38  ;;  %27055 = vmatmul.mubr.f32.vlgmr.msra.gmra.mxu0 %v32075_v8 }
0x1ae5   :  { %27003 = vmatpush3.msra.mxu1 %v34878_v2  ;;  %27004 = vmatprep.mubr.msk.f32.mxu1 %vm29465_vm0, %v34641_v3  ;;  %v34891_v2 = vld [vmem:[#allocation51_spill] sm:$0xff] }
0x1ae6   :  { %27007 = vmatprep.subr.mxu1 %v34641_v3  ;;  %27064 = vmatprep.subr.mxu0 %v34641_v3 }
0x1ae7   :  { %27065 = vmatpush3.msra.mxu0 %v29821_v52  ;;  %27092 = vmatprep.mubr.msk.f32.mxu0 %vm29465_vm0, %v34641_v3 }
0x1ae8   :  { %27005 = vmatmul.mubr.f32.vlgmr.msra.gmra.mxu1 %v12188_v31  ;;  %27066 = vmatprep.subr.mxu0 %v34641_v3  ;;  %v34886_v31 = vld [vmem:[#allocation41_spill] sm:$0xff] }
0x1ae9   :  { %27008 = vmatpush3.msra.mxu1 %v34866_v18  ;;  %27009 = vmatprep.mubr.msk.f32.mxu1 %vm29465_vm0, %v34641_v3 }
0x1aea   :  { %27017 = vmatprep.subr.mxu1 %v34641_v3  ;;  %27067 = vmatpush3.msra.mxu0 %v29826_v55 }
0x1aeb   :  { %27068 = vmatprep.subr.mxu0 %v34641_v3 }
0x1aec   :  { %27010 = vmatmul.mubr.f32.vlgmr.msra.gmra.mxu1 %v12189_v13  ;;  %27069 = vmatpush3.msra.mxu0 %v29836_v58  ;;  %v34887_v13 = vld [vmem:[#allocation43_spill] sm:$0xff] }
0x1aed   :  { %27018 = vmatpush3.msra.mxu1 %v34866_v18  ;;  %27019 = vmatprep.mubr.msk.f32.mxu1 %vm29465_vm0, %v34641_v3 }
0x1aee   :  { %27029 = vmatprep.subr.mxu1 %v34641_v3  ;;  %27070 = vmatprep.subr.mxu0 %v34641_v3 }
0x1aef   :  { %27071 = vmatpush3.msra.mxu0 %v29848_v6 }
0x1af0   :  { %27020 = vmatmul.mubr.f32.vlgmr.msra.gmra.mxu1 %v12187_v38  ;;  %27072 = vmatprep.subr.mxu0 %v34641_v3  ;;  %v34885_v38 = vld [vmem:[#allocation40_spill] sm:$0xff] }
0x1af1   :  { %27030 = vmatpush3.msra.mxu1 %v34879_v36  ;;  %27033 = vmatprep.mubr.msk.f32.mxu1 %vm29465_vm0, %v34641_v3 }
0x1af2   :  { %27031 = vmatprep.subr.mxu1 %v34641_v3  ;;  %27073 = vmatpush3.msra.mxu0 %v29863_v23 }
0x1af3   :  { %27032 = vmatpush3.msra.mxu1 %v34880_v27  ;;  %27074 = vmatprep.subr.mxu0 %v34641_v3 }
0x1af4   :  { %27043 = vmatprep.subr.mxu1 %v34641_v3  ;;  %27034 = vmatmul.mubr.f32.vlgmr.msra.gmra.mxu1 %v32075_v8 }
0x1af5   :  { %27044 = vmatpush3.msra.mxu1 %v34776_v7  ;;  %27047 = vmatprep.mubr.msk.f32.mxu1 %vm29465_vm0, %v34641_v3 }
0x1af6   :  { %27045 = vmatprep.subr.mxu1 %v34641_v3  ;;  %27075 = vmatpush3.msra.mxu0 %v29874_v29 }
0x1af7   :  { %27046 = vmatpush3.msra.mxu1 %v34777_v1  ;;  %27076 = vmatprep.subr.mxu0 %v34641_v3 }
0x1af8   :  { %27057 = vmatprep.subr.mxu1 %v34641_v3  ;;  %27048 = vmatmul.mubr.f32.vlgmr.msra.gmra.mxu1 %v32086_v24  ;;  %v34882_v24 = vld [vmem:[#allocation36_spill] sm:$0xff] }
0x1af9   :  { %27058 = vmatpush3.msra.mxu1 %v34776_v7  ;;  %27061 = vmatprep.mubr.msk.f32.mxu1 %vm29465_vm0, %v34641_v3 }
0x1afa   :  { %27059 = vmatprep.subr.mxu1 %v34641_v3  ;;  %27077 = vmatpush3.msra.mxu0 %v29889_v35 }
0x1afb   :  { %27060 = vmatpush3.msra.mxu1 %v34777_v1  ;;  %27078 = vmatprep.subr.mxu0 %v34641_v3 }
0x1afc   :  { %27062 = vmatmul.mubr.f32.vlgmr.msra.gmra.mxu1 %v32075_v8  ;;  %27095 = vmatprep.subr.mxu1 %v34641_v3  ;;  %v34884_v8 = vld [vmem:[#allocation38_spill] sm:$0xff] }
0x1afd   :  { %27096 = vmatpush3.msra.mxu1 %v34881_v14  ;;  %27079 = vmatpush3.msra.mxu0 %v29906_v51 }
0x1afe   :  { %27097 = vmatprep.subr.mxu1 %v34641_v3  ;;  %27080 = vmatprep.subr.mxu0 %v34641_v3 }
0x1aff   :  { %27098 = vmatpush3.msra.mxu1 %v34882_v24  ;;  %27081 = vmatpush3.msra.mxu0 %v29922_v16 }
0x1b00   :  { %27099 = vmatprep.subr.mxu1 %v34641_v3  ;;  %27082 = vmatprep.subr.mxu0 %v34641_v3 }
0x1b01   :  { %27100 = vmatpush3.msra.mxu1 %v34883_v43  ;;  %27083 = vmatpush3.msra.mxu0 %v29941_v53 }
0x1b02   :  { %27101 = vmatprep.subr.mxu1 %v34641_v3  ;;  %27084 = vmatprep.subr.mxu0 %v34641_v3 }
0x1b03   :  { %27102 = vmatpush3.msra.mxu1 %v34884_v8  ;;  %27123 = vmatprep.mubr.msk.f32.mxu1 %vm29465_vm0, %v34641_v3 }
0x1b04   :  { %27103 = vmatprep.subr.mxu1 %v34641_v3  ;;  %27085 = vmatpush3.msra.mxu0 %v29952_v57 }
0x1b05   :  { %27104 = vmatpush3.msra.mxu1 %v34885_v38  ;;  %27086 = vmatprep.subr.mxu0 %v34641_v3 }
0x1b06   :  { %27105 = vmatprep.subr.mxu1 %v34641_v3  ;;  %27087 = vmatpush3.msra.mxu0 %v29968_v12 }
0x1b07   :  { %27106 = vmatpush3.msra.mxu1 %v34886_v31  ;;  %27088 = vmatprep.subr.mxu0 %v34641_v3 }
0x1b08   :  { %27107 = vmatprep.subr.mxu1 %v34641_v3  ;;  %27089 = vmatpush3.msra.mxu0 %v29985_v17 }
0x1b09   :  { %27108 = vmatpush3.msra.mxu1 %v34887_v13  ;;  %27090 = vmatprep.subr.mxu0 %v34641_v3 }
0x1b0a   :  { %27109 = vmatprep.subr.mxu1 %v34641_v3  ;;  %27091 = vmatpush3.msra.mxu0 %v30001_v62 }
0x1b0b   :  { %27110 = vmatpush3.msra.mxu1 %v34888_v59  ;;  %27126 = vmatprep.subr.mxu0 %v34641_v3 }
0x1b0c   :  { %27111 = vmatprep.subr.mxu1 %v34641_v3 }
0x1b0d   :  { %27112 = vmatpush3.msra.mxu1 %v34889_v15 }
0x1b0e   :  { %27113 = vmatprep.subr.mxu1 %v34641_v3 }
0x1b0f   :  { %27114 = vmatpush3.msra.mxu1 %v34890_v63 }
0x1b10   :  { %27115 = vmatprep.subr.mxu1 %v34641_v3 }
0x1b11   :  { %27116 = vmatpush3.msra.mxu1 %v34891_v2 }
0x1b12   :  { %27117 = vmatprep.subr.mxu1 %v34641_v3 }
0x1b13   :  { %27118 = vmatpush3.msra.mxu1 %v34892_v46 }
0x1b14   :  { %27119 = vmatprep.subr.mxu1 %v34641_v3 }
0x1b15   :  { %27120 = vmatpush3.msra.mxu1 %v34893_v0 }
0x1b16   :  { %27121 = vmatprep.subr.mxu1 %v34641_v3 }
0x1b17   :  { %27122 = vmatpush3.msra.mxu1 %v34894_v25 }
0x1b18   :  { %27157 = vmatprep.subr.mxu1 %v34641_v3 }
0x1b97   :  { %v12491_v32 = vpop.f32.mrf.mxu0 }
0x1b99   :  { %v27016_v18 = vpop.f32.mrf.mxu0 }
0x1b9b   :  { %v12640_v11 = vpop.f32.mrf.mxu0 }
0x1b9d   :  { %v27028_v41 = vpop.f32.mrf.mxu0 }
0x1b9f   :  { %v12193_v20 = vpop.f32.mrf.mxu1  ;;  %v12797_v21 = vpop.f32.mrf.mxu0 }
0x1ba1   :  { %v26996_v2 = vpop.f32.mrf.mxu1  ;;  %v27042_v63 = vpop.f32.mrf.mxu0 }
0x1ba4   :  { %v12269_v15 = vpop.f32.mrf.mxu1  ;;  %v12949_v46 = vpop.f32.mrf.mxu0 }
0x1ba5   :  { %v12270_v25 = vadd.f32 %v12269_v15, %v12193_v20 }
0x1ba6   :  { %v27001_v59 = vpop.f32.mrf.mxu1  ;;  %v27056_v13 = vpop.f32.mrf.mxu0 }
0x1ba8   :  { %v12343_v31 = vpop.f32.mrf.mxu1 }
0x1ba9   :  { %v12344_v49 = vadd.f32 %v12343_v31, %v12270_v25 }
0x1baa   :  { %v27006_v0 = vpop.f32.mrf.mxu1 }
0x1bac   :  { %v12417_v38 = vpop.f32.mrf.mxu1 }
0x1bad   :  { %v12418_v18 = vadd.f32 %v12417_v38, %v12344_v49  ;;  %v34900_v49 = vld [vmem:[#allocation52_spill] sm:$0xff] }
0x1bae   :  { %v27011_v8 = vpop.f32.mrf.mxu1 }
0x1baf   :  { %v12492_v2 = vadd.f32 %v12491_v32, %v12418_v18  ;;  %v34895_v32 = vld [vmem:[#allocation42_spill] sm:$0xff] }
0x1bb0   :  { %v12563_v43 = vpop.f32.mrf.mxu1 }
0x1bb1   :  { %v32367_v13 = vadd.f32 %v12563_v43, %v12492_v2  ;;  %v34904_v43 = vld [vmem:[#allocation27_spill] sm:$0xff] }
0x1bb2   :  { %v27021_v24 = vpop.f32.mrf.mxu1 }
0x1bb3   :  { %v34903_v24 = vld [vmem:[#allocation26_spill] sm:$0xff] }
0x1bb4   :  { %v12721_v30 = vpop.f32.mrf.mxu1 }
0x1bb5   :  { %v12722_v14 = vadd.f32 %v12721_v30, %v12640_v11  ;;  %v34899_v30 = vld [vmem:[#allocation49_spill] sm:$0xff] }
0x1bb6   :  { %v27035_v41 = vpop.f32.mrf.mxu1 }
0x1bb7   :  { %v12798_v45 = vadd.f32 %v12797_v21, %v12722_v14  ;;  %v34902_v14 = vld [vmem:[#allocation54_spill] sm:$0xff] }
0x1bb8   :  { %v12872_v50 = vpop.f32.mrf.mxu1 }
0x1bb9   :  { %v12873_v63 = vadd.f32 %v12872_v50, %v12798_v45  ;;  %v34896_v50 = vld [vmem:[#allocation44_spill] sm:$0xff]  ;;  %v34897_v45 = vld [vmem:[#allocation46_spill] sm:$0xff] }
0x1bba   :  { %v27049_v1 = vpop.f32.mrf.mxu1 }
0x1bbb   :  { %v12950_v7 = vadd.f32 %v12949_v46, %v12873_v63  ;;  %v34898_v46 = vld [vmem:[#allocation48_spill] sm:$0xff] }
0x1bbc   :  { %v13022_v59 = vpop.f32.mrf.mxu1 }
0x1bbd   :  { %v13023_v0 = vadd.f32 %v13022_v59, %v12950_v7 }
0x1bbe   :  { %v27063_v27 = vpop.f32.mrf.mxu1 }
0x1bbf   :  { %v13026_v8 = vmul.f32 %v13023_v0, %v32367_v13  ;;  %v34901_v27 = vld [vmem:[#allocation34_spill] sm:$0xff] }
0x1bc1   :  { %v13028_v20 = vsel %vm1947_vm8, %v13026_v8, 0 }
0x1bc2   :  { %v32371_v25 = vand.u32 4294901760, %v13028_v20 }
0x1bc4   :  { %v32374_v11 = vsub.f32 %v13028_v20, %v32371_v25  ;;  %27124 = vmatmul.mubr.f32.vlgmr.msra.gmra.mxu1 %v32371_v25 }
0x1bc5   :  { %27158 = vmatpush3.msra.mxu1 %v29821_v52  ;;  %27185 = vmatprep.mubr.msk.f32.mxu1 %vm29465_vm0, %v34641_v3 }
0x1bc6   :  { %v13111_v1 = vand.u32 4294901760, %v32374_v11  ;;  %27159 = vmatprep.subr.mxu1 %v34641_v3 }
0x1bc7   :  { %27160 = vmatpush3.msra.mxu1 %v29826_v55 }
0x1bc8   :  { %v13112_v7 = vsub.f32 %v32374_v11, %v13111_v1  ;;  %27161 = vmatprep.subr.mxu1 %v34641_v3 }
0x1bc9   :  { %27162 = vmatpush3.msra.mxu1 %v29836_v58 }
0x1bca   :  { %v13113_v21 = vand.u32 4294901760, %v13112_v7  ;;  %27163 = vmatprep.subr.mxu1 %v34641_v3 }
0x1bcb   :  { %27164 = vmatpush3.msra.mxu1 %v29848_v6 }
0x1bcc   :  { %27165 = vmatprep.subr.mxu1 %v34641_v3  ;;  %27093 = vmatmul.mubr.f32.vlgmr.msra.gmra.mxu0 %v13113_v21 }
0x1bcd   :  { %27127 = vmatpush3.msra.mxu0 %v29824_v54  ;;  %27166 = vmatpush3.msra.mxu1 %v29863_v23 }
0x1bce   :  { %27128 = vmatprep.subr.mxu0 %v34641_v3  ;;  %27167 = vmatprep.subr.mxu1 %v34641_v3 }
0x1bcf   :  { %27129 = vmatpush3.msra.mxu0 %v29834_v56  ;;  %27168 = vmatpush3.msra.mxu1 %v29874_v29 }
0x1bd0   :  { %27130 = vmatprep.subr.mxu0 %v34641_v3  ;;  %27169 = vmatprep.subr.mxu1 %v34641_v3 }
0x1bd1   :  { %27131 = vmatpush3.msra.mxu0 %v29846_v5  ;;  %27170 = vmatpush3.msra.mxu1 %v29889_v35 }
0x1bd2   :  { %27132 = vmatprep.subr.mxu0 %v34641_v3  ;;  %27171 = vmatprep.subr.mxu1 %v34641_v3 }
0x1bd3   :  { %27133 = vmatpush3.msra.mxu0 %v29860_v22  ;;  %27172 = vmatpush3.msra.mxu1 %v29906_v51 }
0x1bd4   :  { %27134 = vmatprep.subr.mxu0 %v34641_v3  ;;  %27173 = vmatprep.subr.mxu1 %v34641_v3 }
0x1bd5   :  { %27135 = vmatpush3.msra.mxu0 %v29878_v10  ;;  %27174 = vmatpush3.msra.mxu1 %v29922_v16 }
0x1bd6   :  { %27136 = vmatprep.subr.mxu0 %v34641_v3  ;;  %27175 = vmatprep.subr.mxu1 %v34641_v3 }
0x1bd7   :  { %27137 = vmatpush3.msra.mxu0 %v29887_v34  ;;  %27176 = vmatpush3.msra.mxu1 %v29941_v53 }
0x1bd8   :  { %27138 = vmatprep.subr.mxu0 %v34641_v3  ;;  %27177 = vmatprep.subr.mxu1 %v34641_v3 }
0x1bd9   :  { %27139 = vmatpush3.msra.mxu0 %v29904_v48  ;;  %27178 = vmatpush3.msra.mxu1 %v29952_v57 }
0x1bda   :  { %27140 = vmatprep.subr.mxu0 %v34641_v3  ;;  %27179 = vmatprep.subr.mxu1 %v34641_v3 }
0x1bdb   :  { %27141 = vmatpush3.msra.mxu0 %v29920_v9  ;;  %27180 = vmatpush3.msra.mxu1 %v29968_v12 }
0x1bdc   :  { %27142 = vmatprep.subr.mxu0 %v34641_v3  ;;  %27181 = vmatprep.subr.mxu1 %v34641_v3 }
0x1bdd   :  { %27143 = vmatpush3.msra.mxu0 %v29937_v39  ;;  %27182 = vmatpush3.msra.mxu1 %v29985_v17 }
0x1bde   :  { %27144 = vmatprep.subr.mxu0 %v34641_v3  ;;  %27183 = vmatprep.subr.mxu1 %v34641_v3 }
0x1bdf   :  { %27145 = vmatpush3.msra.mxu0 %v29957_v40  ;;  %27184 = vmatpush3.msra.mxu1 %v30001_v62 }
0x1be0   :  { %27146 = vmatprep.subr.mxu0 %v34641_v3  ;;  %27186 = vmatmul.mubr.f32.vlgmr.msra.gmra.mxu1 %v13111_v1 }
0x1be1   :  { %27219 = vmatprep.subr.mxu1 %v34641_v3  ;;  %27147 = vmatpush3.msra.mxu0 %v29966_v44 }
0x1be2   :  { %27220 = vmatpush3.msra.mxu1 %v29821_v52  ;;  %27148 = vmatprep.subr.mxu0 %v34641_v3 }
0x1be3   :  { %27221 = vmatprep.subr.mxu1 %v34641_v3  ;;  %27149 = vmatpush3.msra.mxu0 %v29983_v26 }
0x1be4   :  { %27222 = vmatpush3.msra.mxu1 %v29826_v55  ;;  %27150 = vmatprep.subr.mxu0 %v34641_v3 }
0x1be5   :  { %27223 = vmatprep.subr.mxu1 %v34641_v3  ;;  %27151 = vmatpush3.msra.mxu0 %v29999_v61 }
0x1be6   :  { %27224 = vmatpush3.msra.mxu1 %v29836_v58  ;;  %27152 = vmatprep.subr.mxu0 %v34641_v3 }
0x1be7   :  { %27225 = vmatprep.subr.mxu1 %v34641_v3  ;;  %27153 = vmatpush3.msra.mxu0 %v30017_v33 }
0x1be8   :  { %27154 = vmatprep.mubr.msk.f32.mxu0 %vm29465_vm0, %v34641_v3  ;;  %27226 = vmatpush3.msra.mxu1 %v29848_v6 }
0x1be9   :  { %27155 = vmatmul.mubr.f32.vlgmr.msra.gmra.mxu0 %v32374_v11  ;;  %27188 = vmatprep.subr.mxu0 %v34641_v3 }
0x1bea   :  { %27227 = vmatprep.subr.mxu1 %v34641_v3  ;;  %27189 = vmatpush3.msra.mxu0 %v29831_v60 }
0x1beb   :  { %27228 = vmatpush3.msra.mxu1 %v29863_v23  ;;  %27190 = vmatprep.subr.mxu0 %v34641_v3 }
0x1bec   :  { %27229 = vmatprep.subr.mxu1 %v34641_v3  ;;  %27191 = vmatpush3.msra.mxu0 %v29843_v4 }
0x1bed   :  { %27230 = vmatpush3.msra.mxu1 %v29874_v29  ;;  %27192 = vmatprep.subr.mxu0 %v34641_v3 }
0x1bee   :  { %27231 = vmatprep.subr.mxu1 %v34641_v3  ;;  %27193 = vmatpush3.msra.mxu0 %v29857_v19 }
0x1bef   :  { %27232 = vmatpush3.msra.mxu1 %v29889_v35  ;;  %27194 = vmatprep.subr.mxu0 %v34641_v3 }
0x1bf0   :  { %27233 = vmatprep.subr.mxu1 %v34641_v3  ;;  %27195 = vmatpush3.msra.mxu0 %v29872_v28 }
0x1bf1   :  { %27234 = vmatpush3.msra.mxu1 %v29906_v51  ;;  %27196 = vmatprep.subr.mxu0 %v34641_v3 }
0x1bf2   :  { %27235 = vmatprep.subr.mxu1 %v34641_v3  ;;  %27197 = vmatpush3.msra.mxu0 %v29894_v37 }
0x1bf3   :  { %27236 = vmatpush3.msra.mxu1 %v29922_v16  ;;  %27198 = vmatprep.subr.mxu0 %v34641_v3 }
0x1bf4   :  { %27237 = vmatprep.subr.mxu1 %v34641_v3  ;;  %27199 = vmatpush3.msra.mxu0 %v29901_v47 }
0x1bf5   :  { %27238 = vmatpush3.msra.mxu1 %v29941_v53  ;;  %27200 = vmatprep.subr.mxu0 %v34641_v3 }
0x1bf6   :  { %27239 = vmatprep.subr.mxu1 %v34641_v3  ;;  %27201 = vmatpush3.msra.mxu0 %v34768_v42 }
0x1bf7   :  { %27240 = vmatpush3.msra.mxu1 %v29952_v57  ;;  %27202 = vmatprep.subr.mxu0 %v34641_v3 }
0x1bf8   :  { %27241 = vmatprep.subr.mxu1 %v34641_v3  ;;  %27203 = vmatpush3.msra.mxu0 %v34895_v32 }
0x1bf9   :  { %27242 = vmatpush3.msra.mxu1 %v29968_v12  ;;  %27204 = vmatprep.subr.mxu0 %v34641_v3 }
0x1bfa   :  { %27243 = vmatprep.subr.mxu1 %v34641_v3  ;;  %27205 = vmatpush3.msra.mxu0 %v34896_v50 }
0x1bfb   :  { %27244 = vmatpush3.msra.mxu1 %v29985_v17  ;;  %27206 = vmatprep.subr.mxu0 %v34641_v3 }
0x1bfc   :  { %27245 = vmatprep.subr.mxu1 %v34641_v3  ;;  %27207 = vmatpush3.msra.mxu0 %v34897_v45 }
0x1bfd   :  { %27246 = vmatpush3.msra.mxu1 %v30001_v62  ;;  %27247 = vmatprep.mubr.msk.f32.mxu1 %vm29465_vm0, %v34641_v3 }
0x1bfe   :  { %27208 = vmatprep.subr.mxu0 %v34641_v3  ;;  %27248 = vmatmul.mubr.f32.vlgmr.msra.gmra.mxu1 %v32371_v25 }
0x1bff   :  { %27209 = vmatpush3.msra.mxu0 %v34898_v46  ;;  %27216 = vmatprep.mubr.msk.f32.mxu0 %vm29465_vm0, %v34641_v3 }
0x1c00   :  { %27210 = vmatprep.subr.mxu0 %v34641_v3  ;;  %27257 = vmatprep.subr.mxu1 %v34641_v3 }
0x1c01   :  { %27211 = vmatpush3.msra.mxu0 %v34899_v30  ;;  %27258 = vmatpush3.msra.mxu1 %v34879_v36 }
0x1c02   :  { %27212 = vmatprep.subr.mxu0 %v34641_v3  ;;  %27259 = vmatprep.subr.mxu1 %v34641_v3 }
0x1c03   :  { %27213 = vmatpush3.msra.mxu0 %v34900_v49  ;;  %27260 = vmatpush3.msra.mxu1 %v34901_v27  ;;  %v34905_v27 = vld [vmem:[#allocation65_spill] sm:$0xff] }
0x1c04   :  { %27214 = vmatprep.subr.mxu0 %v34641_v3  ;;  %27261 = vmatprep.mubr.msk.f32.mxu1 %vm29465_vm0, %v34641_v3 }
0x1c05   :  { %27215 = vmatpush3.msra.mxu0 %v34902_v14  ;;  %27271 = vmatprep.subr.mxu1 %v34641_v3 }
0x1c06   :  { %27217 = vmatmul.mubr.f32.vlgmr.msra.gmra.mxu0 %v32371_v25  ;;  %27250 = vmatprep.subr.mxu0 %v34641_v3 }
0x1c07   :  { %27251 = vmatpush3.msra.mxu0 %v34903_v24  ;;  %27254 = vmatprep.mubr.msk.f32.mxu0 %vm29465_vm0, %v34641_v3 }
0x1c08   :  { %27252 = vmatprep.subr.mxu0 %v34641_v3 }
0x1c09   :  { %27253 = vmatpush3.msra.mxu0 %v34904_v43 }
0x1c0a   :  { %27264 = vmatprep.subr.mxu0 %v34641_v3 }
0x1c84   :  { %v13256_v38 = vpop.f32.mrf.mxu1 }
0x1c86   :  { %v27125_v31 = vpop.f32.mrf.mxu1 }
0x1c8c   :  { %v13115_v15 = vpop.f32.mrf.mxu0 }
0x1c8d   :  { %v13257_v8 = vadd.f32 %v13256_v38, %v13115_v15 }
0x1c8e   :  { %v27094_v18 = vpop.f32.mrf.mxu0 }
0x1ca0   :  { %v13443_v41 = vpop.f32.mrf.mxu1 }
0x1ca2   :  { %v27187_v2 = vpop.f32.mrf.mxu1 }
0x1ca3   :  { %v34907_v2 = vld [vmem:[#allocation30_spill] sm:$0xff] }
0x1ca9   :  { %v13356_v63 = vpop.f32.mrf.mxu0 }
0x1caa   :  { %v13357_v25 = vadd.f32 %v13356_v63, %v13257_v8  ;;  %v34908_v63 = vld [vmem:[#allocation35_spill] sm:$0xff]  ;;  %v34911_v8 = vld [vmem:[#allocation36_spill] sm:$0xff] }
0x1cab   :  { %v27156_v59 = vpop.f32.mrf.mxu0 }
0x1cac   :  { %v13444_v11 = vadd.f32 %v13443_v41, %v13357_v25  ;;  %v34906_v41 = vld [vmem:[#allocation28_spill] sm:$0xff]  ;;  %v34909_v59 = vld [vmem:[#allocation31_spill] sm:$0xff] }
0x1cad   :  { %v34914_v25 = vld [vmem:[#allocation40_spill] sm:$0xff] }
0x1cbe   :  { %v13641_v0 = vpop.f32.mrf.mxu1 }
0x1cc0   :  { %v27249_v20 = vpop.f32.mrf.mxu1 }
0x1cc1   :  { %v34912_v20 = vld [vmem:[#allocation37_spill] sm:$0xff] }
0x1cc6   :  { %v13556_v1 = vpop.f32.mrf.mxu0 }
0x1cc7   :  { %v13557_v7 = vadd.f32 %v13556_v1, %v13444_v11  ;;  %v34915_v11 = vld [vmem:[#allocation41_spill] sm:$0xff]  ;;  %v34916_v1 = vld [vmem:[#allocation43_spill] sm:$0xff] }
0x1cc8   :  { %v27218_v21 = vpop.f32.mrf.mxu0 }
0x1cc9   :  { %v32514_v14 = vadd.f32 %v13641_v0, %v13557_v7  ;;  %v34910_v0 = vld [vmem:[#allocation32_spill] sm:$0xff]  ;;  %v34917_v7 = vld [vmem:[#allocation45_spill] sm:$0xff]  ;;  %v34918_v21 = vld [vmem:[#allocation47_spill] sm:$0xff] }
0x1ccb   :  { %v13645_v49 = vadd.f32 %v32514_v14, %v34905_v27 }
0x1ccd   :  { %v13647_v31 = vsel %vm72_vm2, %v13645_v49, 0 }
0x1cce   :  { %v13716_v18 = vand.u32 4294901760, %v13647_v31 }
0x1cd0   :  { %v13717_v36 = vsub.f32 %v13647_v31, %v13716_v18  ;;  %27262 = vmatmul.mubr.f32.vlgmr.msra.gmra.mxu1 %v13716_v18  ;;  %v34919_v31 = vld [vmem:[#allocation50_spill] sm:$0xff] }
0x1cd1   :  { %27272 = vmatpush3.msra.mxu1 %v34903_v24  ;;  %27275 = vmatprep.mubr.msk.f32.mxu1 %vm29465_vm0, %v34641_v3 }
0x1cd2   :  { %v13718_v38 = vand.u32 4294901760, %v13717_v36  ;;  %27273 = vmatprep.subr.mxu1 %v34641_v3 }
0x1cd3   :  { %27274 = vmatpush3.msra.mxu1 %v34904_v43 }
0x1cd4   :  { %v13719_v15 = vsub.f32 %v13717_v36, %v13718_v38  ;;  %27276 = vmatmul.mubr.f32.vlgmr.msra.gmra.mxu1 %v13718_v38  ;;  %27285 = vmatprep.subr.mxu1 %v34641_v3  ;;  %v34921_v38 = vld [vmem:[#allocation53_spill] sm:$0xff] }
0x1cd5   :  { %27286 = vmatpush3.msra.mxu1 %v34903_v24  ;;  %27289 = vmatprep.mubr.msk.f32.mxu1 %vm29465_vm0, %v34641_v3 }
0x1cd6   :  { %27287 = vmatprep.subr.mxu1 %v34641_v3  ;;  %v13720_v49 = vand.u32 4294901760, %v13719_v15  ;;  %v34922_v15 = vld [vmem:[#allocation55_spill] sm:$0xff] }
0x1cd7   :  { %27288 = vmatpush3.msra.mxu1 %v34904_v43 }
0x1cd8   :  { %27255 = vmatmul.mubr.f32.vlgmr.msra.gmra.mxu0 %v13720_v49  ;;  %27290 = vmatmul.mubr.f32.vlgmr.msra.gmra.mxu1 %v13716_v18  ;;  %v34923_v49 = vld [vmem:[#allocation56_spill] sm:$0xff] }
0x1cd9   :  { %27265 = vmatpush3.msra.mxu0 %v34906_v41  ;;  %27268 = vmatprep.mubr.msk.f32.mxu0 %vm29465_vm0, %v34641_v3 }
0x1cda   :  { %27266 = vmatprep.subr.mxu0 %v34641_v3  ;;  %27323 = vmatprep.subr.mxu1 %v34641_v3 }
0x1cdb   :  { %27267 = vmatpush3.msra.mxu0 %v34907_v2  ;;  %27324 = vmatpush3.msra.mxu1 %v34908_v63 }
0x1cdc   :  { %27278 = vmatprep.subr.mxu0 %v34641_v3  ;;  %27269 = vmatmul.mubr.f32.vlgmr.msra.gmra.mxu0 %v13717_v36  ;;  %v34913_v36 = vld [vmem:[#allocation38_spill] sm:$0xff] }
0x1cdd   :  { %27279 = vmatpush3.msra.mxu0 %v34909_v59  ;;  %27282 = vmatprep.mubr.msk.f32.mxu0 %vm29465_vm0, %v34641_v3 }
0x1cde   :  { %27280 = vmatprep.subr.mxu0 %v34641_v3  ;;  %27325 = vmatprep.subr.mxu1 %v34641_v3 }
0x1cdf   :  { %27281 = vmatpush3.msra.mxu0 %v34910_v0  ;;  %27326 = vmatpush3.msra.mxu1 %v34911_v8 }
0x1ce0   :  { %27283 = vmatmul.mubr.f32.vlgmr.msra.gmra.mxu0 %v13716_v18  ;;  %27327 = vmatprep.subr.mxu1 %v34641_v3  ;;  %v34920_v18 = vld [vmem:[#allocation51_spill] sm:$0xff] }
0x1ce1   :  { %27328 = vmatpush3.msra.mxu1 %v34912_v20  ;;  %27292 = vmatprep.subr.mxu0 %v34641_v3 }
0x1ce2   :  { %27329 = vmatprep.subr.mxu1 %v34641_v3  ;;  %27293 = vmatpush3.msra.mxu0 %v29821_v52 }
0x1ce3   :  { %27330 = vmatpush3.msra.mxu1 %v34913_v36  ;;  %27294 = vmatprep.subr.mxu0 %v34641_v3 }
0x1ce4   :  { %27331 = vmatprep.subr.mxu1 %v34641_v3  ;;  %27295 = vmatpush3.msra.mxu0 %v29826_v55 }
0x1ce5   :  { %27332 = vmatpush3.msra.mxu1 %v34914_v25  ;;  %27296 = vmatprep.subr.mxu0 %v34641_v3 }
0x1ce6   :  { %27333 = vmatprep.subr.mxu1 %v34641_v3  ;;  %27297 = vmatpush3.msra.mxu0 %v29836_v58 }
0x1ce7   :  { %27334 = vmatpush3.msra.mxu1 %v34915_v11  ;;  %27298 = vmatprep.subr.mxu0 %v34641_v3 }
0x1ce8   :  { %27335 = vmatprep.subr.mxu1 %v34641_v3  ;;  %27299 = vmatpush3.msra.mxu0 %v29848_v6 }
0x1ce9   :  { %27336 = vmatpush3.msra.mxu1 %v34916_v1  ;;  %27300 = vmatprep.subr.mxu0 %v34641_v3 }
0x1cea   :  { %27337 = vmatprep.subr.mxu1 %v34641_v3  ;;  %27301 = vmatpush3.msra.mxu0 %v29863_v23 }
0x1ceb   :  { %27338 = vmatpush3.msra.mxu1 %v34917_v7  ;;  %27302 = vmatprep.subr.mxu0 %v34641_v3 }
0x1cec   :  { %27339 = vmatprep.subr.mxu1 %v34641_v3  ;;  %27303 = vmatpush3.msra.mxu0 %v29874_v29 }
0x1ced   :  { %27340 = vmatpush3.msra.mxu1 %v34918_v21  ;;  %27304 = vmatprep.subr.mxu0 %v34641_v3 }
0x1cee   :  { %27341 = vmatprep.subr.mxu1 %v34641_v3  ;;  %27305 = vmatpush3.msra.mxu0 %v29889_v35 }
0x1cef   :  { %27342 = vmatpush3.msra.mxu1 %v34919_v31  ;;  %27306 = vmatprep.subr.mxu0 %v34641_v3 }
0x1cf0   :  { %27343 = vmatprep.subr.mxu1 %v34641_v3  ;;  %27307 = vmatpush3.msra.mxu0 %v29906_v51 }
0x1cf1   :  { %27344 = vmatpush3.msra.mxu1 %v34920_v18  ;;  %27308 = vmatprep.subr.mxu0 %v34641_v3 }
0x1cf2   :  { %27345 = vmatprep.subr.mxu1 %v34641_v3  ;;  %27309 = vmatpush3.msra.mxu0 %v29922_v16 }
0x1cf3   :  { %27346 = vmatpush3.msra.mxu1 %v34921_v38  ;;  %27310 = vmatprep.subr.mxu0 %v34641_v3 }
0x1cf4   :  { %27347 = vmatprep.subr.mxu1 %v34641_v3  ;;  %27311 = vmatpush3.msra.mxu0 %v29941_v53 }
0x1cf5   :  { %27348 = vmatpush3.msra.mxu1 %v34922_v15  ;;  %27312 = vmatprep.subr.mxu0 %v34641_v3 }
0x1cf6   :  { %27349 = vmatprep.subr.mxu1 %v34641_v3  ;;  %27351 = vmatprep.mubr.msk.f32.mxu1 %vm29465_vm0, %v34641_v3 }
0x1cf7   :  { %27350 = vmatpush3.msra.mxu1 %v34923_v49  ;;  %27313 = vmatpush3.msra.mxu0 %v29952_v57 }
0x1cf8   :  { %27385 = vmatprep.subr.mxu1 %v34641_v3  ;;  %27314 = vmatprep.subr.mxu0 %v34641_v3 }
0x1cf9   :  { %27315 = vmatpush3.msra.mxu0 %v29968_v12  ;;  %27320 = vmatprep.mubr.msk.f32.mxu0 %vm29465_vm0, %v34641_v3 }
0x1cfa   :  { %27316 = vmatprep.subr.mxu0 %v34641_v3 }
0x1cfb   :  { %27317 = vmatpush3.msra.mxu0 %v29985_v17 }
0x1cfc   :  { %27318 = vmatprep.subr.mxu0 %v34641_v3 }
0x1cfd   :  { %27319 = vmatpush3.msra.mxu0 %v30001_v62 }
0x1cfe   :  { %27354 = vmatprep.subr.mxu0 %v34641_v3 }
0x1d90   :  { %v13803_v49 = vpop.f32.mrf.mxu1 }
0x1d92   :  { %v27263_v15 = vpop.f32.mrf.mxu1 }
0x1d94   :  { %v13954_v38 = vpop.f32.mrf.mxu1 }
0x1d96   :  { %v27277_v18 = vpop.f32.mrf.mxu1 }
0x1d98   :  { %v13722_v31 = vpop.f32.mrf.mxu0  ;;  %v14104_v21 = vpop.f32.mrf.mxu1 }
0x1d99   :  { %v13804_v11 = vadd.f32 %v13803_v49, %v13722_v31 }
0x1d9a   :  { %v27256_v7 = vpop.f32.mrf.mxu0  ;;  %v27291_v1 = vpop.f32.mrf.mxu1 }
0x1d9c   :  { %v13879_v25 = vpop.f32.mrf.mxu0 }
0x1d9d   :  { %v13880_v36 = vadd.f32 %v13879_v25, %v13804_v11 }
0x1d9e   :  { %v27270_v20 = vpop.f32.mrf.mxu0 }
0x1d9f   :  { %v13955_v8 = vadd.f32 %v13954_v38, %v13880_v36 }
0x1da0   :  { %v14031_v0 = vpop.f32.mrf.mxu0 }
0x1da1   :  { %v14032_v59 = vadd.f32 %v14031_v0, %v13955_v8  ;;  %v34927_v8 = vld [vmem:[#allocation54_spill] sm:$0xff] }
0x1da2   :  { %v27284_v63 = vpop.f32.mrf.mxu0 }
0x1da3   :  { %v14105_v2 = vadd.f32 %v14104_v21, %v14032_v59  ;;  %v34925_v63 = vld [vmem:[#allocation52_spill] sm:$0xff]  ;;  %v34926_v59 = vld [vmem:[#allocation34_spill] sm:$0xff] }
0x1da5   :  { %v14108_v41 = vmul.f32 %v14105_v2, %v32367_v13  ;;  %v34924_v2 = vld [vmem:[#allocation33_spill] sm:$0xff] }
0x1da7   :  { %v14110_v27 = vsel %vm1947_vm8, %v14108_v41, 0 }
0x1da8   :  { %v32605_v15 = vand.u32 4294901760, %v14110_v27 }
0x1daa   :  { %v32608_v18 = vsub.f32 %v14110_v27, %v32605_v15  ;;  %27352 = vmatmul.mubr.f32.vlgmr.msra.gmra.mxu1 %v32605_v15 }
0x1dab   :  { %27386 = vmatpush3.msra.mxu1 %v29821_v52  ;;  %27413 = vmatprep.mubr.msk.f32.mxu1 %vm29465_vm0, %v34641_v3 }
0x1dac   :  { %v14193_v0 = vand.u32 4294901760, %v32608_v18  ;;  %27387 = vmatprep.subr.mxu1 %v34641_v3 }
0x1dad   :  { %27388 = vmatpush3.msra.mxu1 %v29826_v55 }
0x1dae   :  { %v14194_v41 = vsub.f32 %v32608_v18, %v14193_v0  ;;  %27389 = vmatprep.subr.mxu1 %v34641_v3 }
0x1daf   :  { %27390 = vmatpush3.msra.mxu1 %v29836_v58 }
0x1db0   :  { %27391 = vmatprep.subr.mxu1 %v34641_v3  ;;  %v14195_v27 = vand.u32 4294901760, %v14194_v41 }
0x1db1   :  { %27392 = vmatpush3.msra.mxu1 %v29848_v6 }
0x1db2   :  { %27393 = vmatprep.subr.mxu1 %v34641_v3  ;;  %27321 = vmatmul.mubr.f32.vlgmr.msra.gmra.mxu0 %v14195_v27 }
0x1db3   :  { %27355 = vmatpush3.msra.mxu0 %v29824_v54  ;;  %27394 = vmatpush3.msra.mxu1 %v29863_v23 }
0x1db4   :  { %27356 = vmatprep.subr.mxu0 %v34641_v3  ;;  %27395 = vmatprep.subr.mxu1 %v34641_v3 }
0x1db5   :  { %27357 = vmatpush3.msra.mxu0 %v29834_v56  ;;  %27396 = vmatpush3.msra.mxu1 %v29874_v29 }
0x1db6   :  { %27358 = vmatprep.subr.mxu0 %v34641_v3  ;;  %27397 = vmatprep.subr.mxu1 %v34641_v3 }
0x1db7   :  { %27359 = vmatpush3.msra.mxu0 %v29846_v5  ;;  %27398 = vmatpush3.msra.mxu1 %v29889_v35 }
0x1db8   :  { %27360 = vmatprep.subr.mxu0 %v34641_v3  ;;  %27399 = vmatprep.subr.mxu1 %v34641_v3 }
0x1db9   :  { %27361 = vmatpush3.msra.mxu0 %v29860_v22  ;;  %27400 = vmatpush3.msra.mxu1 %v29906_v51 }
0x1dba   :  { %27362 = vmatprep.subr.mxu0 %v34641_v3  ;;  %27401 = vmatprep.subr.mxu1 %v34641_v3 }
0x1dbb   :  { %27363 = vmatpush3.msra.mxu0 %v29878_v10  ;;  %27402 = vmatpush3.msra.mxu1 %v29922_v16 }
0x1dbc   :  { %27364 = vmatprep.subr.mxu0 %v34641_v3  ;;  %27403 = vmatprep.subr.mxu1 %v34641_v3 }
0x1dbd   :  { %27365 = vmatpush3.msra.mxu0 %v29887_v34  ;;  %27404 = vmatpush3.msra.mxu1 %v29941_v53 }
0x1dbe   :  { %27366 = vmatprep.subr.mxu0 %v34641_v3  ;;  %27405 = vmatprep.subr.mxu1 %v34641_v3 }
0x1dbf   :  { %27367 = vmatpush3.msra.mxu0 %v29904_v48  ;;  %27406 = vmatpush3.msra.mxu1 %v29952_v57 }
0x1dc0   :  { %27368 = vmatprep.subr.mxu0 %v34641_v3  ;;  %27407 = vmatprep.subr.mxu1 %v34641_v3 }
0x1dc1   :  { %27369 = vmatpush3.msra.mxu0 %v29920_v9  ;;  %27408 = vmatpush3.msra.mxu1 %v29968_v12 }
0x1dc2   :  { %27370 = vmatprep.subr.mxu0 %v34641_v3  ;;  %27409 = vmatprep.subr.mxu1 %v34641_v3 }
0x1dc3   :  { %27371 = vmatpush3.msra.mxu0 %v29937_v39  ;;  %27410 = vmatpush3.msra.mxu1 %v29985_v17 }
0x1dc4   :  { %27372 = vmatprep.subr.mxu0 %v34641_v3  ;;  %27411 = vmatprep.subr.mxu1 %v34641_v3 }
0x1dc5   :  { %27373 = vmatpush3.msra.mxu0 %v29957_v40  ;;  %27412 = vmatpush3.msra.mxu1 %v30001_v62 }
0x1dc6   :  { %27374 = vmatprep.subr.mxu0 %v34641_v3  ;;  %27414 = vmatmul.mubr.f32.vlgmr.msra.gmra.mxu1 %v14193_v0 }
0x1dc7   :  { %27447 = vmatprep.subr.mxu1 %v34641_v3  ;;  %27375 = vmatpush3.msra.mxu0 %v29966_v44 }
0x1dc8   :  { %27448 = vmatpush3.msra.mxu1 %v29821_v52  ;;  %27376 = vmatprep.subr.mxu0 %v34641_v3 }
0x1dc9   :  { %27449 = vmatprep.subr.mxu1 %v34641_v3  ;;  %27377 = vmatpush3.msra.mxu0 %v29983_v26 }
0x1dca   :  { %27450 = vmatpush3.msra.mxu1 %v29826_v55  ;;  %27378 = vmatprep.subr.mxu0 %v34641_v3 }
0x1dcb   :  { %27451 = vmatprep.subr.mxu1 %v34641_v3  ;;  %27379 = vmatpush3.msra.mxu0 %v29999_v61 }
0x1dcc   :  { %27452 = vmatpush3.msra.mxu1 %v29836_v58  ;;  %27380 = vmatprep.subr.mxu0 %v34641_v3 }
0x1dcd   :  { %27453 = vmatprep.subr.mxu1 %v34641_v3  ;;  %27381 = vmatpush3.msra.mxu0 %v30017_v33 }
0x1dce   :  { %27382 = vmatprep.mubr.msk.f32.mxu0 %vm29465_vm0, %v34641_v3  ;;  %27454 = vmatpush3.msra.mxu1 %v29848_v6 }
0x1dcf   :  { %27383 = vmatmul.mubr.f32.vlgmr.msra.gmra.mxu0 %v32608_v18  ;;  %27416 = vmatprep.subr.mxu0 %v34641_v3 }
0x1dd0   :  { %27455 = vmatprep.subr.mxu1 %v34641_v3  ;;  %27417 = vmatpush3.msra.mxu0 %v29831_v60 }
0x1dd1   :  { %27456 = vmatpush3.msra.mxu1 %v29863_v23  ;;  %27418 = vmatprep.subr.mxu0 %v34641_v3 }
0x1dd2   :  { %27457 = vmatprep.subr.mxu1 %v34641_v3  ;;  %27419 = vmatpush3.msra.mxu0 %v29843_v4 }
0x1dd3   :  { %27458 = vmatpush3.msra.mxu1 %v29874_v29  ;;  %27420 = vmatprep.subr.mxu0 %v34641_v3 }
0x1dd4   :  { %27459 = vmatprep.subr.mxu1 %v34641_v3  ;;  %27421 = vmatpush3.msra.mxu0 %v29857_v19 }
0x1dd5   :  { %27460 = vmatpush3.msra.mxu1 %v29889_v35  ;;  %27422 = vmatprep.subr.mxu0 %v34641_v3 }
0x1dd6   :  { %27461 = vmatprep.subr.mxu1 %v34641_v3  ;;  %27423 = vmatpush3.msra.mxu0 %v29872_v28 }
0x1dd7   :  { %27462 = vmatpush3.msra.mxu1 %v29906_v51  ;;  %27424 = vmatprep.subr.mxu0 %v34641_v3 }
0x1dd8   :  { %27463 = vmatprep.subr.mxu1 %v34641_v3  ;;  %27425 = vmatpush3.msra.mxu0 %v29894_v37 }
0x1dd9   :  { %27464 = vmatpush3.msra.mxu1 %v29922_v16  ;;  %27426 = vmatprep.subr.mxu0 %v34641_v3 }
0x1dda   :  { %27465 = vmatprep.subr.mxu1 %v34641_v3  ;;  %27427 = vmatpush3.msra.mxu0 %v29901_v47 }
0x1ddb   :  { %27466 = vmatpush3.msra.mxu1 %v29941_v53  ;;  %27428 = vmatprep.subr.mxu0 %v34641_v3 }
0x1ddc   :  { %27467 = vmatprep.subr.mxu1 %v34641_v3  ;;  %27429 = vmatpush3.msra.mxu0 %v34768_v42 }
0x1ddd   :  { %27468 = vmatpush3.msra.mxu1 %v29952_v57  ;;  %27430 = vmatprep.subr.mxu0 %v34641_v3 }
0x1dde   :  { %27469 = vmatprep.subr.mxu1 %v34641_v3  ;;  %27431 = vmatpush3.msra.mxu0 %v34895_v32 }
0x1ddf   :  { %27470 = vmatpush3.msra.mxu1 %v29968_v12  ;;  %27432 = vmatprep.subr.mxu0 %v34641_v3 }
0x1de0   :  { %27471 = vmatprep.subr.mxu1 %v34641_v3  ;;  %27433 = vmatpush3.msra.mxu0 %v34896_v50 }
0x1de1   :  { %27472 = vmatpush3.msra.mxu1 %v29985_v17  ;;  %27434 = vmatprep.subr.mxu0 %v34641_v3 }
0x1de2   :  { %27473 = vmatprep.subr.mxu1 %v34641_v3  ;;  %27435 = vmatpush3.msra.mxu0 %v34897_v45 }
0x1de3   :  { %27474 = vmatpush3.msra.mxu1 %v30001_v62  ;;  %27475 = vmatprep.mubr.msk.f32.mxu1 %vm29465_vm0, %v34641_v3 }
0x1de4   :  { %27436 = vmatprep.subr.mxu0 %v34641_v3  ;;  %27476 = vmatmul.mubr.f32.vlgmr.msra.gmra.mxu1 %v32605_v15 }
0x1de5   :  { %27437 = vmatpush3.msra.mxu0 %v34898_v46  ;;  %27444 = vmatprep.mubr.msk.f32.mxu0 %vm29465_vm0, %v34641_v3 }
0x1de6   :  { %27438 = vmatprep.subr.mxu0 %v34641_v3  ;;  %27485 = vmatprep.subr.mxu1 %v34641_v3 }
0x1de7   :  { %27439 = vmatpush3.msra.mxu0 %v34899_v30  ;;  %27486 = vmatpush3.msra.mxu1 %v34924_v2  ;;  %v34928_v30 = vld [vmem:[#allocation65_spill] sm:$0xff] }
0x1de8   :  { %27440 = vmatprep.subr.mxu0 %v34641_v3  ;;  %27487 = vmatprep.subr.mxu1 %v34641_v3 }
0x1de9   :  { %27441 = vmatpush3.msra.mxu0 %v34925_v63  ;;  %27488 = vmatpush3.msra.mxu1 %v34926_v59 }
0x1dea   :  { %27442 = vmatprep.subr.mxu0 %v34641_v3  ;;  %27489 = vmatprep.mubr.msk.f32.mxu1 %vm29465_vm0, %v34641_v3 }
0x1deb   :  { %27443 = vmatpush3.msra.mxu0 %v34927_v8  ;;  %27499 = vmatprep.subr.mxu1 %v34641_v3 }
0x1dec   :  { %27445 = vmatmul.mubr.f32.vlgmr.msra.gmra.mxu0 %v32605_v15  ;;  %27478 = vmatprep.subr.mxu0 %v34641_v3 }
0x1ded   :  { %27479 = vmatpush3.msra.mxu0 %v34903_v24  ;;  %27482 = vmatprep.mubr.msk.f32.mxu0 %vm29465_vm0, %v34641_v3 }
0x1dee   :  { %27480 = vmatprep.subr.mxu0 %v34641_v3 }
0x1def   :  { %27481 = vmatpush3.msra.mxu0 %v34904_v43 }
0x1df0   :  { %27492 = vmatprep.subr.mxu0 %v34641_v3 }
0x1e6a   :  { %v14338_v20 = vpop.f32.mrf.mxu1 }
0x1e6c   :  { %v27353_v36 = vpop.f32.mrf.mxu1 }
0x1e72   :  { %v14197_v25 = vpop.f32.mrf.mxu0 }
0x1e73   :  { %v14198_v38 = vadd.f32 %v14197_v25, %v32514_v14  ;;  %v34933_v25 = vld [vmem:[#allocation32_spill] sm:$0xff] }
0x1e74   :  { %v27322_v11 = vpop.f32.mrf.mxu0 }
0x1e75   :  { %v14339_v15 = vadd.f32 %v14338_v20, %v14198_v38  ;;  %v34932_v20 = vld [vmem:[#allocation31_spill] sm:$0xff]  ;;  %v34936_v38 = vld [vmem:[#allocation38_spill] sm:$0xff] }
0x1e86   :  { %v14525_v1 = vpop.f32.mrf.mxu1 }
0x1e88   :  { %v27415_v7 = vpop.f32.mrf.mxu1 }
0x1e8f   :  { %v14438_v21 = vpop.f32.mrf.mxu0 }
0x1e90   :  { %v14439_v0 = vadd.f32 %v14438_v21, %v14339_v15  ;;  %v34935_v21 = vld [vmem:[#allocation37_spill] sm:$0xff] }
0x1e91   :  { %v27384_v31 = vpop.f32.mrf.mxu0  ;;  %v34938_v15 = vld [vmem:[#allocation41_spill] sm:$0xff] }
0x1e92   :  { %v14526_v41 = vadd.f32 %v14525_v1, %v14439_v0  ;;  %v34934_v1 = vld [vmem:[#allocation36_spill] sm:$0xff]  ;;  %v34940_v0 = vld [vmem:[#allocation45_spill] sm:$0xff] }
0x1ea4   :  { %v14723_v49 = vpop.f32.mrf.mxu1 }
0x1ea6   :  { %v27477_v18 = vpop.f32.mrf.mxu1 }
0x1ea7   :  { %v34939_v18 = vld [vmem:[#allocation43_spill] sm:$0xff] }
0x1eac   :  { %v14638_v27 = vpop.f32.mrf.mxu0 }
0x1ead   :  { %v14639_v8 = vadd.f32 %v14638_v27, %v14526_v41  ;;  %v34941_v41 = vld [vmem:[#allocation47_spill] sm:$0xff]  ;;  %v34942_v27 = vld [vmem:[#allocation50_spill] sm:$0xff] }
0x1eae   :  { %v27446_v59 = vpop.f32.mrf.mxu0 }
0x1eaf   :  { %v14724_v63 = vadd.f32 %v14723_v49, %v14639_v8  ;;  %v34930_v59 = vld [vmem:[#allocation30_spill] sm:$0xff]  ;;  %v34931_v8 = vld [vmem:[#allocation35_spill] sm:$0xff]  ;;  %v34937_v49 = vld [vmem:[#allocation40_spill] sm:$0xff] }
0x1eb1   :  { %v14727_v2 = vmul.f32 0.5, %v14724_v63  ;;  %v34929_v63 = vld [vmem:[#allocation28_spill] sm:$0xff] }
0x1eb3   :  { %v32750_v36 = vadd.f32 %v14727_v2, %v34928_v30 }
0x1eb5   :  { %v14730_v11 = vsel %vm72_vm2, %v32750_v36, 0 }
0x1eb6   :  { %v14799_v7 = vand.u32 4294901760, %v14730_v11 }
0x1eb8   :  { %v14800_v31 = vsub.f32 %v14730_v11, %v14799_v7  ;;  %27490 = vmatmul.mubr.f32.vlgmr.msra.gmra.mxu1 %v14799_v7  ;;  %v34943_v11 = vld [vmem:[#allocation51_spill] sm:$0xff] }
0x1eb9   :  { %27500 = vmatpush3.msra.mxu1 %v34903_v24  ;;  %27503 = vmatprep.mubr.msk.f32.mxu1 %vm29465_vm0, %v34641_v3 }
0x1eba   :  { %27501 = vmatprep.subr.mxu1 %v34641_v3  ;;  %v14801_v14 = vand.u32 4294901760, %v14800_v31 }
0x1ebb   :  { %27502 = vmatpush3.msra.mxu1 %v34904_v43 }
0x1ebc   :  { %27504 = vmatmul.mubr.f32.vlgmr.msra.gmra.mxu1 %v14801_v14  ;;  %27513 = vmatprep.subr.mxu1 %v34641_v3  ;;  %v14802_v30 = vsub.f32 %v14800_v31, %v14801_v14  ;;  %v34946_v14 = vld [vmem:[#allocation56_spill] sm:$0xff] }
0x1ebd   :  { %27514 = vmatpush3.msra.mxu1 %v34903_v24  ;;  %27517 = vmatprep.mubr.msk.f32.mxu1 %vm29465_vm0, %v34641_v3 }
0x1ebe   :  { %27515 = vmatprep.subr.mxu1 %v34641_v3  ;;  %v14803_v2 = vand.u32 4294901760, %v14802_v30 }
0x1ebf   :  { %27516 = vmatpush3.msra.mxu1 %v34904_v43 }
0x1ec0   :  { %27483 = vmatmul.mubr.f32.vlgmr.msra.gmra.mxu0 %v14803_v2  ;;  %27518 = vmatmul.mubr.f32.vlgmr.msra.gmra.mxu1 %v14799_v7 }
0x1ec1   :  { %27493 = vmatpush3.msra.mxu0 %v34929_v63  ;;  %27496 = vmatprep.mubr.msk.f32.mxu0 %vm29465_vm0, %v34641_v3 }
0x1ec2   :  { %27494 = vmatprep.subr.mxu0 %v34641_v3  ;;  %27551 = vmatprep.subr.mxu1 %v34641_v3 }
0x1ec3   :  { %27495 = vmatpush3.msra.mxu0 %v34930_v59  ;;  %27552 = vmatpush3.msra.mxu1 %v34931_v8 }
0x1ec4   :  { %27506 = vmatprep.subr.mxu0 %v34641_v3  ;;  %27497 = vmatmul.mubr.f32.vlgmr.msra.gmra.mxu0 %v14800_v31  ;;  %v34945_v31 = vld [vmem:[#allocation55_spill] sm:$0xff] }
0x1ec5   :  { %27507 = vmatpush3.msra.mxu0 %v34932_v20  ;;  %27510 = vmatprep.mubr.msk.f32.mxu0 %vm29465_vm0, %v34641_v3 }
0x1ec6   :  { %27508 = vmatprep.subr.mxu0 %v34641_v3  ;;  %27553 = vmatprep.subr.mxu1 %v34641_v3 }
0x1ec7   :  { %27509 = vmatpush3.msra.mxu0 %v34933_v25  ;;  %27554 = vmatpush3.msra.mxu1 %v34934_v1 }
0x1ec8   :  { %27511 = vmatmul.mubr.f32.vlgmr.msra.gmra.mxu0 %v14799_v7  ;;  %27555 = vmatprep.subr.mxu1 %v34641_v3  ;;  %v34944_v7 = vld [vmem:[#allocation53_spill] sm:$0xff] }
0x1ec9   :  { %27556 = vmatpush3.msra.mxu1 %v34935_v21  ;;  %27520 = vmatprep.subr.mxu0 %v34641_v3 }
0x1eca   :  { %27557 = vmatprep.subr.mxu1 %v34641_v3  ;;  %27521 = vmatpush3.msra.mxu0 %v29821_v52 }
0x1ecb   :  { %27558 = vmatpush3.msra.mxu1 %v34936_v38  ;;  %27522 = vmatprep.subr.mxu0 %v34641_v3 }
0x1ecc   :  { %27559 = vmatprep.subr.mxu1 %v34641_v3  ;;  %27523 = vmatpush3.msra.mxu0 %v29826_v55 }
0x1ecd   :  { %27560 = vmatpush3.msra.mxu1 %v34937_v49  ;;  %27524 = vmatprep.subr.mxu0 %v34641_v3 }
0x1ece   :  { %27561 = vmatprep.subr.mxu1 %v34641_v3  ;;  %27525 = vmatpush3.msra.mxu0 %v29836_v58 }
0x1ecf   :  { %27562 = vmatpush3.msra.mxu1 %v34938_v15  ;;  %27526 = vmatprep.subr.mxu0 %v34641_v3 }
0x1ed0   :  { %27563 = vmatprep.subr.mxu1 %v34641_v3  ;;  %27527 = vmatpush3.msra.mxu0 %v29848_v6 }
0x1ed1   :  { %27564 = vmatpush3.msra.mxu1 %v34939_v18  ;;  %27528 = vmatprep.subr.mxu0 %v34641_v3 }
0x1ed2   :  { %27565 = vmatprep.subr.mxu1 %v34641_v3  ;;  %27529 = vmatpush3.msra.mxu0 %v29863_v23 }
0x1ed3   :  { %27566 = vmatpush3.msra.mxu1 %v34940_v0  ;;  %27530 = vmatprep.subr.mxu0 %v34641_v3 }
0x1ed4   :  { %27567 = vmatprep.subr.mxu1 %v34641_v3  ;;  %27531 = vmatpush3.msra.mxu0 %v29874_v29 }
0x1ed5   :  { %27568 = vmatpush3.msra.mxu1 %v34941_v41  ;;  %27532 = vmatprep.subr.mxu0 %v34641_v3 }
0x1ed6   :  { %27569 = vmatprep.subr.mxu1 %v34641_v3  ;;  %27533 = vmatpush3.msra.mxu0 %v29889_v35 }
0x1ed7   :  { %27570 = vmatpush3.msra.mxu1 %v34942_v27  ;;  %27534 = vmatprep.subr.mxu0 %v34641_v3 }
0x1ed8   :  { %27571 = vmatprep.subr.mxu1 %v34641_v3  ;;  %27535 = vmatpush3.msra.mxu0 %v29906_v51 }
0x1ed9   :  { %27572 = vmatpush3.msra.mxu1 %v34943_v11  ;;  %27536 = vmatprep.subr.mxu0 %v34641_v3 }
0x1eda   :  { %27573 = vmatprep.subr.mxu1 %v34641_v3  ;;  %27537 = vmatpush3.msra.mxu0 %v29922_v16 }
0x1edb   :  { %27574 = vmatpush3.msra.mxu1 %v34944_v7  ;;  %27538 = vmatprep.subr.mxu0 %v34641_v3 }
0x1edc   :  { %27575 = vmatprep.subr.mxu1 %v34641_v3  ;;  %27539 = vmatpush3.msra.mxu0 %v29941_v53 }
0x1edd   :  { %27576 = vmatpush3.msra.mxu1 %v34945_v31  ;;  %27540 = vmatprep.subr.mxu0 %v34641_v3 }
0x1ede   :  { %27577 = vmatprep.subr.mxu1 %v34641_v3  ;;  %27579 = vmatprep.mubr.msk.f32.mxu1 %vm29465_vm0, %v34641_v3 }
0x1edf   :  { %27578 = vmatpush3.msra.mxu1 %v34946_v14  ;;  %27541 = vmatpush3.msra.mxu0 %v29952_v57 }
0x1ee0   :  { %27613 = vmatprep.subr.mxu1 %v34641_v3  ;;  %27542 = vmatprep.subr.mxu0 %v34641_v3 }
0x1ee1   :  { %27543 = vmatpush3.msra.mxu0 %v29968_v12  ;;  %27548 = vmatprep.mubr.msk.f32.mxu0 %vm29465_vm0, %v34641_v3 }
0x1ee2   :  { %27544 = vmatprep.subr.mxu0 %v34641_v3 }
0x1ee3   :  { %27545 = vmatpush3.msra.mxu0 %v29985_v17 }
0x1ee4   :  { %27546 = vmatprep.subr.mxu0 %v34641_v3 }
0x1ee5   :  { %27547 = vmatpush3.msra.mxu0 %v30001_v62 }
0x1ee6   :  { %27582 = vmatprep.subr.mxu0 %v34641_v3 }
0x1f78   :  { %v14886_v30 = vpop.f32.mrf.mxu1 }
0x1f7a   :  { %v27491_v2 = vpop.f32.mrf.mxu1 }
0x1f7c   :  { %v15037_v14 = vpop.f32.mrf.mxu1 }
0x1f7e   :  { %v27505_v31 = vpop.f32.mrf.mxu1 }
0x1f80   :  { %v14805_v7 = vpop.f32.mrf.mxu0  ;;  %v15187_v11 = vpop.f32.mrf.mxu1 }
0x1f81   :  { %v14887_v0 = vadd.f32 %v14886_v30, %v14805_v7 }
0x1f82   :  { %v27484_v27 = vpop.f32.mrf.mxu0  ;;  %v27519_v41 = vpop.f32.mrf.mxu1 }
0x1f84   :  { %v14962_v18 = vpop.f32.mrf.mxu0 }
0x1f85   :  { %v14963_v15 = vadd.f32 %v14962_v18, %v14887_v0 }
0x1f86   :  { %v27498_v49 = vpop.f32.mrf.mxu0 }
0x1f87   :  { %v15038_v38 = vadd.f32 %v15037_v14, %v14963_v15  ;;  %v34951_v49 = vld [vmem:[#allocation54_spill] sm:$0xff] }
0x1f88   :  { %v15114_v21 = vpop.f32.mrf.mxu0 }
0x1f89   :  { %v15115_v1 = vadd.f32 %v15114_v21, %v15038_v38  ;;  %v34950_v38 = vld [vmem:[#allocation34_spill] sm:$0xff] }
0x1f8a   :  { %v27512_v25 = vpop.f32.mrf.mxu0 }
0x1f8b   :  { %v15188_v20 = vadd.f32 %v15187_v11, %v15115_v1  ;;  %v34948_v25 = vld [vmem:[#allocation33_spill] sm:$0xff]  ;;  %v34949_v1 = vld [vmem:[#allocation52_spill] sm:$0xff] }
0x1f8d   :  { %v15191_v8 = vmul.f32 %v15188_v20, %v32367_v13  ;;  %v34947_v20 = vld [vmem:[#allocation49_spill] sm:$0xff] }
0x1f8f   :  { %v15193_v59 = vsel %vm1947_vm8, %v15191_v8, 0 }
0x1f90   :  { %v32840_v2 = vand.u32 4294901760, %v15193_v59 }
0x1f92   :  { %v32843_v31 = vsub.f32 %v15193_v59, %v32840_v2  ;;  %27580 = vmatmul.mubr.f32.vlgmr.msra.gmra.mxu1 %v32840_v2 }
0x1f93   :  { %27614 = vmatpush3.msra.mxu1 %v29821_v52  ;;  %27641 = vmatprep.mubr.msk.f32.mxu1 %vm29465_vm0, %v34641_v3 }
0x1f94   :  { %v15276_v21 = vand.u32 4294901760, %v32843_v31  ;;  %27615 = vmatprep.subr.mxu1 %v34641_v3 }
0x1f95   :  { %27616 = vmatpush3.msra.mxu1 %v29826_v55 }
0x1f96   :  { %v15277_v8 = vsub.f32 %v32843_v31, %v15276_v21  ;;  %27617 = vmatprep.subr.mxu1 %v34641_v3 }
0x1f97   :  { %27618 = vmatpush3.msra.mxu1 %v29836_v58 }
0x1f98   :  { %27619 = vmatprep.subr.mxu1 %v34641_v3  ;;  %v15278_v59 = vand.u32 4294901760, %v15277_v8 }
0x1f99   :  { %27620 = vmatpush3.msra.mxu1 %v29848_v6 }
0x1f9a   :  { %27621 = vmatprep.subr.mxu1 %v34641_v3  ;;  %27549 = vmatmul.mubr.f32.vlgmr.msra.gmra.mxu0 %v15278_v59 }
0x1f9b   :  { %27583 = vmatpush3.msra.mxu0 %v29824_v54  ;;  %27622 = vmatpush3.msra.mxu1 %v29863_v23 }
0x1f9c   :  { %27584 = vmatprep.subr.mxu0 %v34641_v3  ;;  %27623 = vmatprep.subr.mxu1 %v34641_v3 }
0x1f9d   :  { %27585 = vmatpush3.msra.mxu0 %v29834_v56  ;;  %27624 = vmatpush3.msra.mxu1 %v29874_v29 }
0x1f9e   :  { %27586 = vmatprep.subr.mxu0 %v34641_v3  ;;  %27625 = vmatprep.subr.mxu1 %v34641_v3 }
0x1f9f   :  { %27587 = vmatpush3.msra.mxu0 %v29846_v5  ;;  %27626 = vmatpush3.msra.mxu1 %v29889_v35 }
0x1fa0   :  { %27588 = vmatprep.subr.mxu0 %v34641_v3  ;;  %27627 = vmatprep.subr.mxu1 %v34641_v3 }
0x1fa1   :  { %27589 = vmatpush3.msra.mxu0 %v29860_v22  ;;  %27628 = vmatpush3.msra.mxu1 %v29906_v51 }
0x1fa2   :  { %27590 = vmatprep.subr.mxu0 %v34641_v3  ;;  %27629 = vmatprep.subr.mxu1 %v34641_v3 }
0x1fa3   :  { %27591 = vmatpush3.msra.mxu0 %v29878_v10  ;;  %27630 = vmatpush3.msra.mxu1 %v29922_v16 }
0x1fa4   :  { %27592 = vmatprep.subr.mxu0 %v34641_v3  ;;  %27631 = vmatprep.subr.mxu1 %v34641_v3 }
0x1fa5   :  { %27593 = vmatpush3.msra.mxu0 %v29887_v34  ;;  %27632 = vmatpush3.msra.mxu1 %v29941_v53 }
0x1fa6   :  { %27594 = vmatprep.subr.mxu0 %v34641_v3  ;;  %27633 = vmatprep.subr.mxu1 %v34641_v3 }
0x1fa7   :  { %27595 = vmatpush3.msra.mxu0 %v29904_v48  ;;  %27634 = vmatpush3.msra.mxu1 %v29952_v57 }
0x1fa8   :  { %27596 = vmatprep.subr.mxu0 %v34641_v3  ;;  %27635 = vmatprep.subr.mxu1 %v34641_v3 }
0x1fa9   :  { %27597 = vmatpush3.msra.mxu0 %v29920_v9  ;;  %27636 = vmatpush3.msra.mxu1 %v29968_v12 }
0x1faa   :  { %27598 = vmatprep.subr.mxu0 %v34641_v3  ;;  %27637 = vmatprep.subr.mxu1 %v34641_v3 }
0x1fab   :  { %27599 = vmatpush3.msra.mxu0 %v29937_v39  ;;  %27638 = vmatpush3.msra.mxu1 %v29985_v17 }
0x1fac   :  { %27600 = vmatprep.subr.mxu0 %v34641_v3  ;;  %27639 = vmatprep.subr.mxu1 %v34641_v3 }
0x1fad   :  { %27601 = vmatpush3.msra.mxu0 %v29957_v40  ;;  %27640 = vmatpush3.msra.mxu1 %v30001_v62 }
0x1fae   :  { %27602 = vmatprep.subr.mxu0 %v34641_v3  ;;  %27642 = vmatmul.mubr.f32.vlgmr.msra.gmra.mxu1 %v15276_v21 }
0x1faf   :  { %27675 = vmatprep.subr.mxu1 %v34641_v3  ;;  %27603 = vmatpush3.msra.mxu0 %v29966_v44 }
0x1fb0   :  { %27676 = vmatpush3.msra.mxu1 %v29821_v52  ;;  %27604 = vmatprep.subr.mxu0 %v34641_v3 }
0x1fb1   :  { %27677 = vmatprep.subr.mxu1 %v34641_v3  ;;  %27605 = vmatpush3.msra.mxu0 %v29983_v26 }
0x1fb2   :  { %27678 = vmatpush3.msra.mxu1 %v29826_v55  ;;  %27606 = vmatprep.subr.mxu0 %v34641_v3 }
0x1fb3   :  { %27679 = vmatprep.subr.mxu1 %v34641_v3  ;;  %27607 = vmatpush3.msra.mxu0 %v29999_v61 }
0x1fb4   :  { %27680 = vmatpush3.msra.mxu1 %v29836_v58  ;;  %27608 = vmatprep.subr.mxu0 %v34641_v3 }
0x1fb5   :  { %27681 = vmatprep.subr.mxu1 %v34641_v3  ;;  %27609 = vmatpush3.msra.mxu0 %v30017_v33 }
0x1fb6   :  { %27610 = vmatprep.mubr.msk.f32.mxu0 %vm29465_vm0, %v34641_v3  ;;  %27682 = vmatpush3.msra.mxu1 %v29848_v6 }
0x1fb7   :  { %27611 = vmatmul.mubr.f32.vlgmr.msra.gmra.mxu0 %v32843_v31  ;;  %27644 = vmatprep.subr.mxu0 %v34641_v3 }
0x1fb8   :  { %27683 = vmatprep.subr.mxu1 %v34641_v3  ;;  %27645 = vmatpush3.msra.mxu0 %v29831_v60 }
0x1fb9   :  { %27684 = vmatpush3.msra.mxu1 %v29863_v23  ;;  %27646 = vmatprep.subr.mxu0 %v34641_v3 }
0x1fba   :  { %27685 = vmatprep.subr.mxu1 %v34641_v3  ;;  %27647 = vmatpush3.msra.mxu0 %v29843_v4 }
0x1fbb   :  { %27686 = vmatpush3.msra.mxu1 %v29874_v29  ;;  %27648 = vmatprep.subr.mxu0 %v34641_v3 }
0x1fbc   :  { %27687 = vmatprep.subr.mxu1 %v34641_v3  ;;  %27649 = vmatpush3.msra.mxu0 %v29857_v19 }
0x1fbd   :  { %27688 = vmatpush3.msra.mxu1 %v29889_v35  ;;  %27650 = vmatprep.subr.mxu0 %v34641_v3 }
0x1fbe   :  { %27689 = vmatprep.subr.mxu1 %v34641_v3  ;;  %27651 = vmatpush3.msra.mxu0 %v29872_v28 }
0x1fbf   :  { %27690 = vmatpush3.msra.mxu1 %v29906_v51  ;;  %27652 = vmatprep.subr.mxu0 %v34641_v3 }
0x1fc0   :  { %27691 = vmatprep.subr.mxu1 %v34641_v3  ;;  %27653 = vmatpush3.msra.mxu0 %v29894_v37 }
0x1fc1   :  { %27692 = vmatpush3.msra.mxu1 %v29922_v16  ;;  %27654 = vmatprep.subr.mxu0 %v34641_v3 }
0x1fc2   :  { %27693 = vmatprep.subr.mxu1 %v34641_v3  ;;  %27655 = vmatpush3.msra.mxu0 %v29901_v47 }
0x1fc3   :  { %27694 = vmatpush3.msra.mxu1 %v29941_v53  ;;  %27656 = vmatprep.subr.mxu0 %v34641_v3 }
0x1fc4   :  { %27695 = vmatprep.subr.mxu1 %v34641_v3  ;;  %27657 = vmatpush3.msra.mxu0 %v34768_v42 }
0x1fc5   :  { %27696 = vmatpush3.msra.mxu1 %v29952_v57  ;;  %27658 = vmatprep.subr.mxu0 %v34641_v3 }
0x1fc6   :  { %27697 = vmatprep.subr.mxu1 %v34641_v3  ;;  %27659 = vmatpush3.msra.mxu0 %v34895_v32 }
0x1fc7   :  { %27698 = vmatpush3.msra.mxu1 %v29968_v12  ;;  %27660 = vmatprep.subr.mxu0 %v34641_v3 }
0x1fc8   :  { %27699 = vmatprep.subr.mxu1 %v34641_v3  ;;  %27661 = vmatpush3.msra.mxu0 %v34896_v50 }
0x1fc9   :  { %27700 = vmatpush3.msra.mxu1 %v29985_v17  ;;  %27662 = vmatprep.subr.mxu0 %v34641_v3 }
0x1fca   :  { %27701 = vmatprep.subr.mxu1 %v34641_v3  ;;  %27663 = vmatpush3.msra.mxu0 %v34897_v45 }
0x1fcb   :  { %27702 = vmatpush3.msra.mxu1 %v30001_v62  ;;  %27703 = vmatprep.mubr.msk.f32.mxu1 %vm29465_vm0, %v34641_v3 }
0x1fcc   :  { %27664 = vmatprep.subr.mxu0 %v34641_v3  ;;  %27704 = vmatmul.mubr.f32.vlgmr.msra.gmra.mxu1 %v32840_v2 }
0x1fcd   :  { %27665 = vmatpush3.msra.mxu0 %v34898_v46  ;;  %27672 = vmatprep.mubr.msk.f32.mxu0 %vm29465_vm0, %v34641_v3 }
0x1fce   :  { %27666 = vmatprep.subr.mxu0 %v34641_v3  ;;  %27713 = vmatprep.subr.mxu1 %v34641_v3 }
0x1fcf   :  { %27667 = vmatpush3.msra.mxu0 %v34947_v20  ;;  %27714 = vmatpush3.msra.mxu1 %v34948_v25 }
0x1fd0   :  { %27668 = vmatprep.subr.mxu0 %v34641_v3  ;;  %27715 = vmatprep.subr.mxu1 %v34641_v3 }
0x1fd1   :  { %27669 = vmatpush3.msra.mxu0 %v34949_v1  ;;  %27716 = vmatpush3.msra.mxu1 %v34950_v38 }
0x1fd2   :  { %27670 = vmatprep.subr.mxu0 %v34641_v3  ;;  %27717 = vmatprep.mubr.msk.f32.mxu1 %vm29465_vm0, %v34641_v3 }
0x1fd3   :  { %27671 = vmatpush3.msra.mxu0 %v34951_v49  ;;  %27727 = vmatprep.subr.mxu1 %v34641_v3 }
0x1fd4   :  { %27673 = vmatmul.mubr.f32.vlgmr.msra.gmra.mxu0 %v32840_v2  ;;  %27706 = vmatprep.subr.mxu0 %v34641_v3 }
0x1fd5   :  { %27707 = vmatpush3.msra.mxu0 %v34903_v24  ;;  %27710 = vmatprep.mubr.msk.f32.mxu0 %vm29465_vm0, %v34641_v3 }
0x1fd6   :  { %27708 = vmatprep.subr.mxu0 %v34641_v3 }
0x1fd7   :  { %27709 = vmatpush3.msra.mxu0 %v34904_v43 }
0x1fd8   :  { %27720 = vmatprep.subr.mxu0 %v34641_v3 }
0x2052   :  { %v15421_v15 = vpop.f32.mrf.mxu1 }
0x2054   :  { %v27581_v18 = vpop.f32.mrf.mxu1 }
0x205a   :  { %v15280_v0 = vpop.f32.mrf.mxu0 }
0x205b   :  { %v15422_v2 = vadd.f32 %v15421_v15, %v15280_v0  ;;  %v34953_v0 = vld [vmem:[#allocation35_spill] sm:$0xff] }
0x205c   :  { %v27550_v41 = vpop.f32.mrf.mxu0 }
0x206e   :  { %v15608_v27 = vpop.f32.mrf.mxu1 }
0x2070   :  { %v27643_v11 = vpop.f32.mrf.mxu1 }
0x2071   :  { %v34955_v11 = vld [vmem:[#allocation32_spill] sm:$0xff] }
0x2077   :  { %v15521_v7 = vpop.f32.mrf.mxu0 }
0x2078   :  { %v15522_v21 = vadd.f32 %v15521_v7, %v15422_v2  ;;  %v34956_v7 = vld [vmem:[#allocation36_spill] sm:$0xff]  ;;  %v34960_v2 = vld [vmem:[#allocation41_spill] sm:$0xff] }
0x2079   :  { %v27612_v14 = vpop.f32.mrf.mxu0 }
0x207a   :  { %v15609_v8 = vadd.f32 %v15608_v27, %v15522_v21  ;;  %v34954_v27 = vld [vmem:[#allocation31_spill] sm:$0xff]  ;;  %v34957_v14 = vld [vmem:[#allocation37_spill] sm:$0xff] }
0x207b   :  { %v34962_v21 = vld [vmem:[#allocation45_spill] sm:$0xff] }
0x208c   :  { %v15806_v30 = vpop.f32.mrf.mxu1 }
0x208e   :  { %v27705_v31 = vpop.f32.mrf.mxu1 }
0x208f   :  { %v34961_v31 = vld [vmem:[#allocation43_spill] sm:$0xff] }
0x2094   :  { %v15721_v59 = vpop.f32.mrf.mxu0 }
0x2095   :  { %v15722_v38 = vadd.f32 %v15721_v59, %v15609_v8  ;;  %v34963_v8 = vld [vmem:[#allocation47_spill] sm:$0xff]  ;;  %v34964_v59 = vld [vmem:[#allocation50_spill] sm:$0xff] }
0x2096   :  { %v27674_v25 = vpop.f32.mrf.mxu0 }
0x2097   :  { %v32983_v49 = vadd.f32 %v15806_v30, %v15722_v38  ;;  %v34952_v38 = vld [vmem:[#allocation30_spill] sm:$0xff]  ;;  %v34959_v30 = vld [vmem:[#allocation40_spill] sm:$0xff] }
0x2099   :  { %v15810_v1 = vadd.f32 %v32983_v49, %v32750_v36 }
0x209b   :  { %v15812_v18 = vsel %vm72_vm2, %v15810_v1, 0 }
0x209c   :  { %v15881_v41 = vand.u32 4294901760, %v15812_v18 }
0x209e   :  { %v15882_v20 = vsub.f32 %v15812_v18, %v15881_v41  ;;  %27718 = vmatmul.mubr.f32.vlgmr.msra.gmra.mxu1 %v15881_v41  ;;  %v34965_v18 = vld [vmem:[#allocation51_spill] sm:$0xff] }
0x209f   :  { %27728 = vmatpush3.msra.mxu1 %v34903_v24  ;;  %27731 = vmatprep.mubr.msk.f32.mxu1 %vm29465_vm0, %v34641_v3 }
0x20a0   :  { %v15883_v15 = vand.u32 4294901760, %v15882_v20  ;;  %27729 = vmatprep.subr.mxu1 %v34641_v3 }
0x20a1   :  { %27730 = vmatpush3.msra.mxu1 %v34904_v43 }
0x20a2   :  { %v15884_v25 = vsub.f32 %v15882_v20, %v15883_v15  ;;  %27732 = vmatmul.mubr.f32.vlgmr.msra.gmra.mxu1 %v15883_v15  ;;  %27741 = vmatprep.subr.mxu1 %v34641_v3  ;;  %v34967_v15 = vld [vmem:[#allocation55_spill] sm:$0xff] }
0x20a3   :  { %27742 = vmatpush3.msra.mxu1 %v34903_v24  ;;  %27745 = vmatprep.mubr.msk.f32.mxu1 %vm29465_vm0, %v34641_v3 }
0x20a4   :  { %27743 = vmatprep.subr.mxu1 %v34641_v3  ;;  %v15885_v1 = vand.u32 4294901760, %v15884_v25  ;;  %v34968_v25 = vld [vmem:[#allocation56_spill] sm:$0xff] }
0x20a5   :  { %27744 = vmatpush3.msra.mxu1 %v34904_v43 }
0x20a6   :  { %27711 = vmatmul.mubr.f32.vlgmr.msra.gmra.mxu0 %v15885_v1  ;;  %27746 = vmatmul.mubr.f32.vlgmr.msra.gmra.mxu1 %v15881_v41 }
0x20a7   :  { %27721 = vmatpush3.msra.mxu0 %v34929_v63  ;;  %27724 = vmatprep.mubr.msk.f32.mxu0 %vm29465_vm0, %v34641_v3 }
0x20a8   :  { %27722 = vmatprep.subr.mxu0 %v34641_v3  ;;  %27779 = vmatprep.subr.mxu1 %v34641_v3 }
0x20a9   :  { %27723 = vmatpush3.msra.mxu0 %v34952_v38  ;;  %27780 = vmatpush3.msra.mxu1 %v34953_v0 }
0x20aa   :  { %27734 = vmatprep.subr.mxu0 %v34641_v3  ;;  %27725 = vmatmul.mubr.f32.vlgmr.msra.gmra.mxu0 %v15882_v20  ;;  %v34958_v20 = vld [vmem:[#allocation38_spill] sm:$0xff] }
0x20ab   :  { %27735 = vmatpush3.msra.mxu0 %v34954_v27  ;;  %27738 = vmatprep.mubr.msk.f32.mxu0 %vm29465_vm0, %v34641_v3 }
0x20ac   :  { %27736 = vmatprep.subr.mxu0 %v34641_v3  ;;  %27781 = vmatprep.subr.mxu1 %v34641_v3 }
0x20ad   :  { %27737 = vmatpush3.msra.mxu0 %v34955_v11  ;;  %27782 = vmatpush3.msra.mxu1 %v34956_v7 }
0x20ae   :  { %27739 = vmatmul.mubr.f32.vlgmr.msra.gmra.mxu0 %v15881_v41  ;;  %27783 = vmatprep.subr.mxu1 %v34641_v3  ;;  %v34966_v41 = vld [vmem:[#allocation53_spill] sm:$0xff] }
0x20af   :  { %27784 = vmatpush3.msra.mxu1 %v34957_v14  ;;  %27748 = vmatprep.subr.mxu0 %v34641_v3 }
0x20b0   :  { %27785 = vmatprep.subr.mxu1 %v34641_v3  ;;  %27749 = vmatpush3.msra.mxu0 %v29821_v52 }
0x20b1   :  { %27786 = vmatpush3.msra.mxu1 %v34958_v20  ;;  %27750 = vmatprep.subr.mxu0 %v34641_v3 }
0x20b2   :  { %27787 = vmatprep.subr.mxu1 %v34641_v3  ;;  %27751 = vmatpush3.msra.mxu0 %v29826_v55 }
0x20b3   :  { %27788 = vmatpush3.msra.mxu1 %v34959_v30  ;;  %27752 = vmatprep.subr.mxu0 %v34641_v3 }
0x20b4   :  { %27789 = vmatprep.subr.mxu1 %v34641_v3  ;;  %27753 = vmatpush3.msra.mxu0 %v29836_v58 }
0x20b5   :  { %27790 = vmatpush3.msra.mxu1 %v34960_v2  ;;  %27754 = vmatprep.subr.mxu0 %v34641_v3 }
0x20b6   :  { %27791 = vmatprep.subr.mxu1 %v34641_v3  ;;  %27755 = vmatpush3.msra.mxu0 %v29848_v6 }
0x20b7   :  { %27792 = vmatpush3.msra.mxu1 %v34961_v31  ;;  %27756 = vmatprep.subr.mxu0 %v34641_v3 }
0x20b8   :  { %27793 = vmatprep.subr.mxu1 %v34641_v3  ;;  %27757 = vmatpush3.msra.mxu0 %v29863_v23 }
0x20b9   :  { %27794 = vmatpush3.msra.mxu1 %v34962_v21  ;;  %27758 = vmatprep.subr.mxu0 %v34641_v3 }
0x20ba   :  { %27795 = vmatprep.subr.mxu1 %v34641_v3  ;;  %27759 = vmatpush3.msra.mxu0 %v29874_v29 }
0x20bb   :  { %27796 = vmatpush3.msra.mxu1 %v34963_v8  ;;  %27760 = vmatprep.subr.mxu0 %v34641_v3 }
0x20bc   :  { %27797 = vmatprep.subr.mxu1 %v34641_v3  ;;  %27761 = vmatpush3.msra.mxu0 %v29889_v35 }
0x20bd   :  { %27798 = vmatpush3.msra.mxu1 %v34964_v59  ;;  %27762 = vmatprep.subr.mxu0 %v34641_v3 }
0x20be   :  { %27799 = vmatprep.subr.mxu1 %v34641_v3  ;;  %27763 = vmatpush3.msra.mxu0 %v29906_v51 }
0x20bf   :  { %27800 = vmatpush3.msra.mxu1 %v34965_v18  ;;  %27764 = vmatprep.subr.mxu0 %v34641_v3 }
0x20c0   :  { %27801 = vmatprep.subr.mxu1 %v34641_v3  ;;  %27765 = vmatpush3.msra.mxu0 %v29922_v16 }
0x20c1   :  { %27802 = vmatpush3.msra.mxu1 %v34966_v41  ;;  %27766 = vmatprep.subr.mxu0 %v34641_v3 }
0x20c2   :  { %27803 = vmatprep.subr.mxu1 %v34641_v3  ;;  %27767 = vmatpush3.msra.mxu0 %v29941_v53 }
0x20c3   :  { %27804 = vmatpush3.msra.mxu1 %v34967_v15  ;;  %27768 = vmatprep.subr.mxu0 %v34641_v3 }
0x20c4   :  { %27805 = vmatprep.subr.mxu1 %v34641_v3  ;;  %27807 = vmatprep.mubr.msk.f32.mxu1 %vm29465_vm0, %v34641_v3 }
0x20c5   :  { %27806 = vmatpush3.msra.mxu1 %v34968_v25  ;;  %27769 = vmatpush3.msra.mxu0 %v29952_v57 }
0x20c6   :  { %27841 = vmatprep.subr.mxu1 %v34641_v3  ;;  %27770 = vmatprep.subr.mxu0 %v34641_v3 }
0x20c7   :  { %27771 = vmatpush3.msra.mxu0 %v29968_v12  ;;  %27776 = vmatprep.mubr.msk.f32.mxu0 %vm29465_vm0, %v34641_v3 }
0x20c8   :  { %27772 = vmatprep.subr.mxu0 %v34641_v3 }
0x20c9   :  { %27773 = vmatpush3.msra.mxu0 %v29985_v17 }
0x20ca   :  { %27774 = vmatprep.subr.mxu0 %v34641_v3 }
0x20cb   :  { %27775 = vmatpush3.msra.mxu0 %v30001_v62 }
0x20cc   :  { %27810 = vmatprep.subr.mxu0 %v34641_v3 }
0x215e   :  { %v15968_v1 = vpop.f32.mrf.mxu1 }
0x2160   :  { %v27719_v25 = vpop.f32.mrf.mxu1 }
0x2162   :  { %v16119_v15 = vpop.f32.mrf.mxu1 }
0x2164   :  { %v27733_v41 = vpop.f32.mrf.mxu1 }
0x2166   :  { %v15887_v18 = vpop.f32.mrf.mxu0  ;;  %v16269_v59 = vpop.f32.mrf.mxu1 }
0x2167   :  { %v15969_v31 = vadd.f32 %v15968_v1, %v15887_v18 }
0x2168   :  { %v27712_v8 = vpop.f32.mrf.mxu0  ;;  %v27747_v21 = vpop.f32.mrf.mxu1 }
0x216a   :  { %v16044_v2 = vpop.f32.mrf.mxu0 }
0x216b   :  { %v16045_v30 = vadd.f32 %v16044_v2, %v15969_v31 }
0x216c   :  { %v27726_v20 = vpop.f32.mrf.mxu0 }
0x216d   :  { %v16120_v14 = vadd.f32 %v16119_v15, %v16045_v30  ;;  %v34974_v20 = vld [vmem:[#allocation57_spill] sm:$0xff]  ;;  %v34975_v30 = vld [vmem:[#allocation59_spill] sm:$0xff] }
0x216e   :  { %v16196_v7 = vpop.f32.mrf.mxu0 }
0x216f   :  { %v16197_v0 = vadd.f32 %v16196_v7, %v16120_v14  ;;  %v34973_v14 = vld [vmem:[#allocation54_spill] sm:$0xff] }
0x2170   :  { %v27740_v11 = vpop.f32.mrf.mxu0 }
0x2171   :  { %v16270_v27 = vadd.f32 %v16269_v59, %v16197_v0  ;;  %v34970_v0 = vld [vmem:[#allocation63_spill] sm:$0xff]  ;;  %v34972_v11 = vld [vmem:[#allocation64_spill] sm:$0xff] }
0x2173   :  { %v16273_v38 = vmul.f32 %v16270_v27, %v32367_v13  ;;  %v34971_v27 = vld [vmem:[#allocation52_spill] sm:$0xff] }
0x2175   :  { %v16275_v63 = vsel %vm1947_vm8, %v16273_v38, 0  ;;  %v34969_v38 = vld [vmem:[#allocation49_spill] sm:$0xff] }
0x2176   :  { %v33074_v25 = vand.u32 4294901760, %v16275_v63 }
0x2178   :  { %v33077_v41 = vsub.f32 %v16275_v63, %v33074_v25  ;;  %27808 = vmatmul.mubr.f32.vlgmr.msra.gmra.mxu1 %v33074_v25 }
0x2179   :  { %27842 = vmatpush3.msra.mxu1 %v29821_v52  ;;  %27869 = vmatprep.mubr.msk.f32.mxu1 %vm29465_vm0, %v34641_v3 }
0x217a   :  { %v16358_v7 = vand.u32 4294901760, %v33077_v41  ;;  %27843 = vmatprep.subr.mxu1 %v34641_v3 }
0x217b   :  { %27844 = vmatpush3.msra.mxu1 %v29826_v55 }
0x217c   :  { %v16359_v13 = vsub.f32 %v33077_v41, %v16358_v7  ;;  %27845 = vmatprep.subr.mxu1 %v34641_v3 }
0x217d   :  { %27846 = vmatpush3.msra.mxu1 %v29836_v58 }
0x217e   :  { %27847 = vmatprep.subr.mxu1 %v34641_v3  ;;  %v16360_v63 = vand.u32 4294901760, %v16359_v13 }
0x217f   :  { %27848 = vmatpush3.msra.mxu1 %v29848_v6 }
0x2180   :  { %27849 = vmatprep.subr.mxu1 %v34641_v3  ;;  %27777 = vmatmul.mubr.f32.vlgmr.msra.gmra.mxu0 %v16360_v63 }
0x2181   :  { %27811 = vmatpush3.msra.mxu0 %v29824_v54  ;;  %27850 = vmatpush3.msra.mxu1 %v29863_v23 }
0x2182   :  { %27812 = vmatprep.subr.mxu0 %v34641_v3  ;;  %27851 = vmatprep.subr.mxu1 %v34641_v3 }
0x2183   :  { %27813 = vmatpush3.msra.mxu0 %v29834_v56  ;;  %27852 = vmatpush3.msra.mxu1 %v29874_v29 }
0x2184   :  { %27814 = vmatprep.subr.mxu0 %v34641_v3  ;;  %27853 = vmatprep.subr.mxu1 %v34641_v3 }
0x2185   :  { %27815 = vmatpush3.msra.mxu0 %v29846_v5  ;;  %27854 = vmatpush3.msra.mxu1 %v29889_v35 }
0x2186   :  { %27816 = vmatprep.subr.mxu0 %v34641_v3  ;;  %27855 = vmatprep.subr.mxu1 %v34641_v3 }
0x2187   :  { %27817 = vmatpush3.msra.mxu0 %v29860_v22  ;;  %27856 = vmatpush3.msra.mxu1 %v29906_v51 }
0x2188   :  { %27818 = vmatprep.subr.mxu0 %v34641_v3  ;;  %27857 = vmatprep.subr.mxu1 %v34641_v3 }
0x2189   :  { %27819 = vmatpush3.msra.mxu0 %v29878_v10  ;;  %27858 = vmatpush3.msra.mxu1 %v29922_v16 }
0x218a   :  { %27820 = vmatprep.subr.mxu0 %v34641_v3  ;;  %27859 = vmatprep.subr.mxu1 %v34641_v3 }
0x218b   :  { %27821 = vmatpush3.msra.mxu0 %v29887_v34  ;;  %27860 = vmatpush3.msra.mxu1 %v29941_v53 }
0x218c   :  { %27822 = vmatprep.subr.mxu0 %v34641_v3  ;;  %27861 = vmatprep.subr.mxu1 %v34641_v3 }
0x218d   :  { %27823 = vmatpush3.msra.mxu0 %v29904_v48  ;;  %27862 = vmatpush3.msra.mxu1 %v29952_v57 }
0x218e   :  { %27824 = vmatprep.subr.mxu0 %v34641_v3  ;;  %27863 = vmatprep.subr.mxu1 %v34641_v3 }
0x218f   :  { %27825 = vmatpush3.msra.mxu0 %v29920_v9  ;;  %27864 = vmatpush3.msra.mxu1 %v29968_v12 }
0x2190   :  { %27826 = vmatprep.subr.mxu0 %v34641_v3  ;;  %27865 = vmatprep.subr.mxu1 %v34641_v3 }
0x2191   :  { %27827 = vmatpush3.msra.mxu0 %v29937_v39  ;;  %27866 = vmatpush3.msra.mxu1 %v29985_v17 }
0x2192   :  { %27828 = vmatprep.subr.mxu0 %v34641_v3  ;;  %27867 = vmatprep.subr.mxu1 %v34641_v3 }
0x2193   :  { %27829 = vmatpush3.msra.mxu0 %v29957_v40  ;;  %27868 = vmatpush3.msra.mxu1 %v30001_v62 }
0x2194   :  { %27830 = vmatprep.subr.mxu0 %v34641_v3  ;;  %27870 = vmatmul.mubr.f32.vlgmr.msra.gmra.mxu1 %v16358_v7 }
0x2195   :  { %27903 = vmatprep.subr.mxu1 %v34641_v3  ;;  %27831 = vmatpush3.msra.mxu0 %v29966_v44 }
0x2196   :  { %27904 = vmatpush3.msra.mxu1 %v29821_v52  ;;  %27832 = vmatprep.subr.mxu0 %v34641_v3 }
0x2197   :  { %27905 = vmatprep.subr.mxu1 %v34641_v3  ;;  %27833 = vmatpush3.msra.mxu0 %v29983_v26 }
0x2198   :  { %27906 = vmatpush3.msra.mxu1 %v29826_v55  ;;  %27834 = vmatprep.subr.mxu0 %v34641_v3 }
0x2199   :  { %27907 = vmatprep.subr.mxu1 %v34641_v3  ;;  %27835 = vmatpush3.msra.mxu0 %v29999_v61 }
0x219a   :  { %27908 = vmatpush3.msra.mxu1 %v29836_v58  ;;  %27836 = vmatprep.subr.mxu0 %v34641_v3 }
0x219b   :  { %27909 = vmatprep.subr.mxu1 %v34641_v3  ;;  %27837 = vmatpush3.msra.mxu0 %v30017_v33 }
0x219c   :  { %27838 = vmatprep.mubr.msk.f32.mxu0 %vm29465_vm0, %v34641_v3  ;;  %27910 = vmatpush3.msra.mxu1 %v29848_v6 }
0x219d   :  { %27839 = vmatmul.mubr.f32.vlgmr.msra.gmra.mxu0 %v33077_v41  ;;  %27872 = vmatprep.subr.mxu0 %v34641_v3 }
0x219e   :  { %27911 = vmatprep.subr.mxu1 %v34641_v3  ;;  %27873 = vmatpush3.msra.mxu0 %v29831_v60 }
0x219f   :  { %27912 = vmatpush3.msra.mxu1 %v29863_v23  ;;  %27874 = vmatprep.subr.mxu0 %v34641_v3 }
0x21a0   :  { %27913 = vmatprep.subr.mxu1 %v34641_v3  ;;  %27875 = vmatpush3.msra.mxu0 %v29843_v4 }
0x21a1   :  { %27914 = vmatpush3.msra.mxu1 %v29874_v29  ;;  %27876 = vmatprep.subr.mxu0 %v34641_v3 }
0x21a2   :  { %27915 = vmatprep.subr.mxu1 %v34641_v3  ;;  %27877 = vmatpush3.msra.mxu0 %v29857_v19 }
0x21a3   :  { %27916 = vmatpush3.msra.mxu1 %v29889_v35  ;;  %27878 = vmatprep.subr.mxu0 %v34641_v3 }
0x21a4   :  { %27917 = vmatprep.subr.mxu1 %v34641_v3  ;;  %27879 = vmatpush3.msra.mxu0 %v29872_v28 }
0x21a5   :  { %27918 = vmatpush3.msra.mxu1 %v29906_v51  ;;  %27880 = vmatprep.subr.mxu0 %v34641_v3 }
0x21a6   :  { %27919 = vmatprep.subr.mxu1 %v34641_v3  ;;  %27881 = vmatpush3.msra.mxu0 %v29894_v37 }
0x21a7   :  { %27920 = vmatpush3.msra.mxu1 %v29922_v16  ;;  %27882 = vmatprep.subr.mxu0 %v34641_v3 }
0x21a8   :  { %27921 = vmatprep.subr.mxu1 %v34641_v3  ;;  %27883 = vmatpush3.msra.mxu0 %v29901_v47 }
0x21a9   :  { %27922 = vmatpush3.msra.mxu1 %v29941_v53  ;;  %27884 = vmatprep.subr.mxu0 %v34641_v3 }
0x21aa   :  { %27923 = vmatprep.subr.mxu1 %v34641_v3  ;;  %27885 = vmatpush3.msra.mxu0 %v34768_v42 }
0x21ab   :  { %27924 = vmatpush3.msra.mxu1 %v29952_v57  ;;  %27886 = vmatprep.subr.mxu0 %v34641_v3 }
0x21ac   :  { %27925 = vmatprep.subr.mxu1 %v34641_v3  ;;  %27887 = vmatpush3.msra.mxu0 %v34895_v32 }
0x21ad   :  { %27926 = vmatpush3.msra.mxu1 %v29968_v12  ;;  %27888 = vmatprep.subr.mxu0 %v34641_v3 }
0x21ae   :  { %27927 = vmatprep.subr.mxu1 %v34641_v3  ;;  %27889 = vmatpush3.msra.mxu0 %v34896_v50 }
0x21af   :  { %27928 = vmatpush3.msra.mxu1 %v29985_v17  ;;  %27890 = vmatprep.subr.mxu0 %v34641_v3 }
0x21b0   :  { %27929 = vmatprep.subr.mxu1 %v34641_v3  ;;  %27891 = vmatpush3.msra.mxu0 %v34897_v45 }
0x21b1   :  { %27930 = vmatpush3.msra.mxu1 %v30001_v62  ;;  %27931 = vmatprep.mubr.msk.f32.mxu1 %vm29465_vm0, %v34641_v3 }
0x21b2   :  { %27892 = vmatprep.subr.mxu0 %v34641_v3  ;;  %27932 = vmatmul.mubr.f32.vlgmr.msra.gmra.mxu1 %v33074_v25 }
0x21b3   :  { %27893 = vmatpush3.msra.mxu0 %v34898_v46  ;;  %27900 = vmatprep.mubr.msk.f32.mxu0 %vm29465_vm0, %v34641_v3 }
0x21b4   :  { %27894 = vmatprep.subr.mxu0 %v34641_v3  ;;  %27941 = vmatprep.subr.mxu1 %v34641_v3 }
0x21b5   :  { %27895 = vmatpush3.msra.mxu0 %v34969_v38  ;;  %27942 = vmatpush3.msra.mxu1 %v34970_v0 }
0x21b6   :  { %27896 = vmatprep.subr.mxu0 %v34641_v3  ;;  %27943 = vmatprep.subr.mxu1 %v34641_v3 }
0x21b7   :  { %27897 = vmatpush3.msra.mxu0 %v34971_v27  ;;  %27944 = vmatpush3.msra.mxu1 %v34972_v11 }
0x21b8   :  { %27898 = vmatprep.subr.mxu0 %v34641_v3  ;;  %27945 = vmatprep.mubr.msk.f32.mxu1 %vm29465_vm0, %v34641_v3 }
0x21b9   :  { %27899 = vmatpush3.msra.mxu0 %v34973_v14  ;;  %27955 = vmatprep.subr.mxu1 %v34641_v3 }
0x21ba   :  { %27901 = vmatmul.mubr.f32.vlgmr.msra.gmra.mxu0 %v33074_v25  ;;  %27934 = vmatprep.subr.mxu0 %v34641_v3 }
0x21bb   :  { %27935 = vmatpush3.msra.mxu0 %v34974_v20  ;;  %27938 = vmatprep.mubr.msk.f32.mxu0 %vm29465_vm0, %v34641_v3 }
0x21bc   :  { %27936 = vmatprep.subr.mxu0 %v34641_v3 }
0x21bd   :  { %27937 = vmatpush3.msra.mxu0 %v34975_v30 }
0x21be   :  { %27948 = vmatprep.subr.mxu0 %v34641_v3 }
0x2238   :  { %v16503_v2 = vpop.f32.mrf.mxu1 }
0x223a   :  { %v27809_v31 = vpop.f32.mrf.mxu1 }
0x2240   :  { %v16362_v21 = vpop.f32.mrf.mxu0 }
0x2241   :  { %v16363_v25 = vadd.f32 %v16362_v21, %v32983_v49  ;;  %v34980_v21 = vld [vmem:[#allocation60_spill] sm:$0xff] }
0x2242   :  { %v27778_v8 = vpop.f32.mrf.mxu0 }
0x2243   :  { %v16504_v7 = vadd.f32 %v16503_v2, %v16363_v25  ;;  %v29303_v25 = vld [vmem:[%s34420_s4 + $0x34] ss:$8 sps:$4 sm:$0xff]  }
0x2254   :  { %v16690_v59 = vpop.f32.mrf.mxu1 }
0x2256   :  { %v27871_v18 = vpop.f32.mrf.mxu1 }
0x225d   :  { %v16603_v15 = vpop.f32.mrf.mxu0 }
0x225e   :  { %v16604_v63 = vadd.f32 %v16603_v15, %v16504_v7  ;;  %v29304_v7 = vld [vmem:[%s34420_s4 + $0x30] ss:$8 sps:$4 sm:$0xff]  }
0x225f   :  { %v27840_v1 = vpop.f32.mrf.mxu0 }
0x2260   :  { %v16691_v11 = vadd.f32 %v16690_v59, %v16604_v63  ;;  %v29302_v59 = vld [vmem:[%s34418_s2 + $0x8] ss:$12 sps:$4 sm:$0xff]   ;;  %v34981_v1 = vld [vmem:[#allocation62_spill] sm:$0xff]  ;;  %v34984_v63 = vmov 0  }
0x2272   :  { %v16888_v41 = vpop.f32.mrf.mxu1 }
0x2274   :  { %v27933_v13 = vpop.f32.mrf.mxu1 }
0x2275   :  { %v34983_v13 = vld [vmem:[#allocation10_spill] sm:$0xff] }
0x227a   :  { %v16803_v0 = vpop.f32.mrf.mxu0 }
0x227b   :  { %v16804_v14 = vadd.f32 %v16803_v0, %v16691_v11  ;;  %v34977_v0 = vld [vmem:[#allocation58_spill] sm:$0xff]  ;;  %v17373_v11 = vpop.permute.xlu1 %17372 }
0x227c   :  { %v27902_v27 = vpop.f32.mrf.mxu0 }
0x227d   :  { %v16889_v38 = vadd.f32 %v16888_v41, %v16804_v14  ;;  %v34978_v27 = vld [vmem:[#allocation11_spill] sm:$0xff]  ;;  %v34979_v14 = vld [vmem:[#allocation61_spill] sm:$0xff] }
0x227e   :  { %v34982_v41 = vld [vmem:[#allocation9_spill] sm:$0xff] }
0x227f   :  { %v16892_v46 = vmul.f32 0.5, %v16889_v38 }
0x2281   :  { %v33219_v31 = vadd.f32 %v16892_v46, %v32750_v36 }
0x2283   :  { %34976 = vst [vmem:[#allocation67_spill] sm:$0xff] %v33219_v31  ;;  %v16895_v8 = vsel %vm72_vm2, %v33219_v31, 0  ;;  %v17375_v2 = vsel %vm72_vm2, %v33219_v31, %v17373_v11  ;;  %v29308_v11 = vld [vmem:[%s34418_s2] ss:$12 sps:$4 sm:$0xff]  }
0x2284   :  { %v33223_v18 = vand.u32 4294901760, %v16895_v8  ;;  %v17376_v15 = vpack.c.bf16 %v17375_v2, %v17375_v2  ;;  %v29309_v2 = vld [vmem:[%s34420_s4 + $0x14] ss:$8 sps:$4 sm:$0xff]  }
0x2286   :  { %v33226_v49 = vsub.f32 %v16895_v8, %v33223_v18  ;;  %27946 = vmatmul.mubr.f32.vlgmr.msra.gmra.mxu1 %v33223_v18  ;;  %v29305_v8 = vld [vmem:[%s34418_s2 + $0x4] ss:$12 sps:$4 sm:$0xff]  }
0x2287   :  { %27956 = vmatpush3.msra.mxu1 %v34974_v20  ;;  %27959 = vmatprep.mubr.msk.f32.mxu1 %vm29465_vm0, %v34641_v3 }
0x2288   :  { %27957 = vmatprep.subr.mxu1 %v34641_v3  ;;  %v33234_v46 = vand.u32 4294901760, %v33226_v49 }
0x2289   :  { %27958 = vmatpush3.msra.mxu1 %v34975_v30 }
0x228a   :  { %27969 = vmatprep.subr.mxu1 %v34641_v3  ;;  %27960 = vmatmul.mubr.f32.vlgmr.msra.gmra.mxu1 %v33234_v46  ;;  %v16967_v36 = vsub.f32 %v33226_v49, %v33234_v46 }
0x228b   :  { %27970 = vmatpush3.msra.mxu1 %v34974_v20  ;;  %27973 = vmatprep.mubr.msk.f32.mxu1 %vm29465_vm0, %v34641_v3 }
0x228c   :  { %27971 = vmatprep.subr.mxu1 %v34641_v3  ;;  %v33245_v38 = vand.u32 4294901760, %v16967_v36  ;;  %v29306_v36 = vld [vmem:[%s34420_s4 + $0x24] ss:$8 sps:$4 sm:$0xff]  }
0x228d   :  { %27972 = vmatpush3.msra.mxu1 %v34975_v30 }
0x228e   :  { %27976 = vmatprep.subr.bf16.mxu1 %v34641_v3  ;;  %27939 = vmatmul.mubr.f32.vlgmr.msra.gmra.mxu0 %v33245_v38 }
0x228f   :  { %27949 = vmatpush3.msra.mxu0 %v34977_v0  ;;  %27974 = vmatmul.mubr.f32.vlgmr.msra.gmra.mxu1 %v33223_v18 }
0x2290   :  { %27977 = vmatpush3.bf16.msra.mxu1 %v34978_v27  ;;  %27950 = vmatprep.subr.mxu0 %v34641_v3  ;;  %v29307_v27 = vld [vmem:[%s34420_s4 + $0x20] ss:$8 sps:$4 sm:$0xff]  }
0x2291   :  { %27951 = vmatpush3.msra.mxu0 %v34979_v14  ;;  %27952 = vmatprep.mubr.msk.f32.mxu0 %vm29465_vm0, %v34641_v3 }
0x2292   :  { %27962 = vmatprep.subr.mxu0 %v34641_v3  ;;  %27978 = vmatprep.subr.bf16.mxu1 %v34641_v3 }
0x2293   :  { %27953 = vmatmul.mubr.f32.vlgmr.msra.gmra.mxu0 %v33226_v49  ;;  %27980 = vmatprep.mubr.msk.bf16.mxu1 %vm29465_vm0, %v34641_v3 }
0x2294   :  { %27963 = vmatpush3.msra.mxu0 %v34980_v21  ;;  %27979 = vmatpush3.bf16.msra.mxu1 %v29302_v59  ;;  %v29310_v59 = vld [vmem:[#allocation4 + $0x74] ss:$8 sps:$4 sm:$0xff]  }
0x2295   :  { %27964 = vmatprep.subr.mxu0 %v34641_v3  ;;  %27966 = vmatprep.mubr.msk.f32.mxu0 %vm29465_vm0, %v34641_v3 }
0x2296   :  { %27965 = vmatpush3.msra.mxu0 %v34981_v1  ;;  %17521 = vmatprep.subr.bf16.mxu1 %v29303_v25  ;;  %v29311_v25 = vld [vmem:[%s34420_s4 + $0x10] ss:$8 sps:$4 sm:$0xff]  }
0x2297   :  { %23048 = vmatprep.subr.msk.bf16.mxu0 %vm126_vm1, %v34982_v41  ;;  %27981 = vmatmul.mubr.msk.bf16.vlgmr.msra.gmra.mxu1 %vm122_vm3, %v17376_v15  ;;  %v29312_v41 = vld [vmem:[#allocation4 + $0x70] ss:$8 sps:$4 sm:$0xff]  }
0x2298   :  { %27967 = vmatmul.mubr.f32.vlgmr.msra.gmra.mxu0 %v33223_v18  ;;  %17522 = vmatpush1.bf16.msra.mxu1 %v29304_v7  ;;  %v29313_v7 = vld [vmem:[%s34420_s4 + $0x4] ss:$8 sps:$4 sm:$0xff]  }
0x2299   :  { %17393 = vmatpush1.bf16.msra.mxu0 %v34983_v13  ;;  %17412 = vmatprep.mubr.bf16.mxu0 %v34984_v63  ;;  %v29314_v13 = vld [vmem:[#allocation4 + $0x64] ss:$8 sps:$4 sm:$0xff]  }
0x229a   :  { %17394 = vmatprep.subr.bf16.mxu0 %v29305_v8  ;;  %17523 = vmatprep.subr.bf16.mxu1 %v29306_v36  ;;  %v29317_v8 = vld [vmem:[#allocation6 + $0x74] ss:$8 sps:$4 sm:$0xff]  }
0x229b   :  { %17545 = vmatprep.mubr.bf16.mxu1 %v34984_v63  ;;  %v29315_v63 = vld [vmem:[%s34420_s4] ss:$8 sps:$4 sm:$0xff]   ;;  %v29318_v36 = vld [vmem:[#allocation4 + $0x54] ss:$8 sps:$4 sm:$0xff]  }
0x229c   :  { %17524 = vmatpush1.bf16.msra.mxu1 %v29307_v27  ;;  %v29319_v27 = vld [vmem:[#allocation4 + $0x50] ss:$8 sps:$4 sm:$0xff]  }
0x229d   :  { %17395 = vmatpush1.bf16.msra.mxu0 %v29308_v11  ;;  %17525 = vmatprep.subr.bf16.mxu1 %v29309_v2  ;;  %v29320_v11 = vld [vmem:[#allocation4 + $0x44] ss:$8 sps:$4 sm:$0xff]   ;;  %v29321_v2 = vld [vmem:[#allocation4 + $0x40] ss:$8 sps:$4 sm:$0xff]  }
0x229e   :  { %17466 = vmatprep.subr.bf16.mxu0 %v29310_v59  ;;  %v29322_v59 = vld [vmem:[#allocation4 + $0x34] ss:$8 sps:$4 sm:$0xff]  }
0x22a0   :  { %23049 = vmatmul.mubr.msk.bf16.vlgmr.msra.gmra.mxu0 %vm122_vm3, %v17376_v15  ;;  %17526 = vmatpush1.bf16.msra.mxu1 %v29311_v25  ;;  %v29316_v15 = vld [vmem:[#allocation4 + $0x60] ss:$8 sps:$4 sm:$0xff]   ;;  %v29323_v25 = vld [vmem:[#allocation4 + $0x30] ss:$8 sps:$4 sm:$0xff]  }
0x22a1   :  { %17467 = vmatpush1.bf16.msra.mxu0 %v29312_v41  ;;  %17527 = vmatprep.subr.bf16.mxu1 %v29313_v7  ;;  %v29324_v41 = vld [vmem:[#allocation4 + $0x24] ss:$8 sps:$4 sm:$0xff]   ;;  %v29325_v7 = vld [vmem:[#allocation4 + $0x20] ss:$8 sps:$4 sm:$0xff]  }
0x22a2   :  { %17468 = vmatprep.subr.bf16.mxu0 %v29314_v13  ;;  %v29326_v13 = vld [vmem:[#allocation4 + $0x14] ss:$8 sps:$4 sm:$0xff]  }
0x22a4   :  { %17528 = vmatpush1.bf16.msra.mxu1 %v29315_v63  ;;  %v29327_v63 = vld [vmem:[#allocation4 + $0x10] ss:$8 sps:$4 sm:$0xff]  }
0x22a5   :  { %17469 = vmatpush1.bf16.msra.mxu0 %v29316_v15  ;;  %17560 = vmatprep.subr.bf16.mxu1 %v29317_v8  ;;  %v29328_v15 = vld [vmem:[#allocation4 + $0x4] ss:$8 sps:$4 sm:$0xff]   ;;  %v29329_v8 = vld [vmem:[#allocation4] ss:$8 sps:$4 sm:$0xff]  }
0x22a6   :  { %17470 = vmatprep.subr.bf16.mxu0 %v29318_v36  ;;  %v29330_v36 = vld [vmem:[#allocation4 + $0xf4] ss:$8 sps:$4 sm:$0xff]  }
0x22a9   :  { %17471 = vmatpush1.bf16.msra.mxu0 %v29319_v27  ;;  %v29331_v27 = vld [vmem:[#allocation4 + $0xf0] ss:$8 sps:$4 sm:$0xff]  }
0x22aa   :  { %17472 = vmatprep.subr.bf16.mxu0 %v29320_v11  ;;  %v29332_v11 = vld [vmem:[#allocation4 + $0xe4] ss:$8 sps:$4 sm:$0xff]  }
0x22ad   :  { %17473 = vmatpush1.bf16.msra.mxu0 %v29321_v2  ;;  %v29333_v2 = vld [vmem:[#allocation4 + $0xe0] ss:$8 sps:$4 sm:$0xff]  }
0x22ae   :  { %17474 = vmatprep.subr.bf16.mxu0 %v29322_v59  ;;  %v29334_v59 = vld [vmem:[#allocation4 + $0xd4] ss:$8 sps:$4 sm:$0xff]  }
0x22b1   :  { %17475 = vmatpush1.bf16.msra.mxu0 %v29323_v25  ;;  %v29335_v25 = vld [vmem:[#allocation4 + $0xd0] ss:$8 sps:$4 sm:$0xff]  }
0x22b2   :  { %17476 = vmatprep.subr.bf16.mxu0 %v29324_v41  ;;  %v29336_v41 = vld [vmem:[#allocation4 + $0xc4] ss:$8 sps:$4 sm:$0xff]  }
0x22b5   :  { %17477 = vmatpush1.bf16.msra.mxu0 %v29325_v7  ;;  %v29337_v7 = vld [vmem:[#allocation4 + $0xc0] ss:$8 sps:$4 sm:$0xff]  }
0x22b6   :  { %17478 = vmatprep.subr.bf16.mxu0 %v29326_v13  ;;  %v29338_v13 = vld [vmem:[#allocation4 + $0xb4] ss:$8 sps:$4 sm:$0xff]  }
0x22b9   :  { %17479 = vmatpush1.bf16.msra.mxu0 %v29327_v63  ;;  %v29339_v63 = vld [vmem:[#allocation4 + $0xb0] ss:$8 sps:$4 sm:$0xff]  }
0x22ba   :  { %17480 = vmatprep.subr.bf16.mxu0 %v29328_v15  ;;  %v29340_v15 = vld [vmem:[#allocation4 + $0xa4] ss:$8 sps:$4 sm:$0xff]  }
0x22bd   :  { %17481 = vmatpush1.bf16.msra.mxu0 %v29329_v8  ;;  %v29341_v8 = vld [vmem:[#allocation4 + $0xa0] ss:$8 sps:$4 sm:$0xff]  }
0x22be   :  { %17482 = vmatprep.subr.bf16.mxu0 %v29330_v36  ;;  %v29342_v36 = vld [vmem:[#allocation4 + $0x94] ss:$8 sps:$4 sm:$0xff]  }
0x22c1   :  { %17483 = vmatpush2.bf16.msra.mxu0 %v29331_v27  ;;  %v29343_v27 = vld [vmem:[#allocation4 + $0x90] ss:$8 sps:$4 sm:$0xff]  }
0x22c2   :  { %17484 = vmatprep.subr.bf16.mxu0 %v29332_v11  ;;  %v29344_v11 = vld [vmem:[#allocation4 + $0x84] ss:$8 sps:$4 sm:$0xff]  }
0x22c5   :  { %17485 = vmatpush2.bf16.msra.mxu0 %v29333_v2  ;;  %v29345_v2 = vld [vmem:[#allocation4 + $0x80] ss:$8 sps:$4 sm:$0xff]  }
0x22c6   :  { %17486 = vmatprep.subr.bf16.mxu0 %v29334_v59  ;;  %v29346_v59 = vld [vmem:[%s34422_s6 + $0x78] sm:$0xff]  }
0x22c9   :  { %17487 = vmatpush2.bf16.msra.mxu0 %v29335_v25 }
0x22ca   :  { %17488 = vmatprep.subr.bf16.mxu0 %v29336_v41 }
0x22cd   :  { %17489 = vmatpush2.bf16.msra.mxu0 %v29337_v7 }
0x22ce   :  { %17490 = vmatprep.subr.bf16.mxu0 %v29338_v13 }
0x22d1   :  { %17491 = vmatpush2.bf16.msra.mxu0 %v29339_v63 }
0x22d2   :  { %17492 = vmatprep.subr.bf16.mxu0 %v29340_v15 }
0x22d5   :  { %17493 = vmatpush2.bf16.msra.mxu0 %v29341_v8 }
0x22d6   :  { %17494 = vmatprep.subr.bf16.mxu0 %v29342_v36 }
0x22d9   :  { %17495 = vmatpush2.bf16.msra.mxu0 %v29343_v27 }
0x22da   :  { %17496 = vmatprep.subr.bf16.mxu0 %v29344_v11 }
0x22dd   :  { %17497 = vmatpush2.bf16.msra.mxu0 %v29345_v2  ;;  %v34985_v2 = vld [vmem:[#allocation13_spill] sm:$0xff] }
0x22de   :  { %24516 = vmatprep.subr.bf16.mxu0 %v29346_v59 }
0x2346   :  { %v17051_v25 = vpop.f32.mrf.mxu1 }
0x2348   :  { %v27947_v41 = vpop.f32.mrf.mxu1 }
0x234a   :  { %v17202_v7 = vpop.f32.mrf.mxu1 }
0x234c   :  { %v27961_v13 = vpop.f32.mrf.mxu1 }
0x234e   :  { %v16970_v63 = vpop.f32.mrf.mxu0 }
0x234f   :  { %v17052_v15 = vadd.f32 %v17051_v25, %v16970_v63  ;;  %v17352_v8 = vpop.f32.mrf.mxu1 }
0x2350   :  { %v27940_v1 = vpop.f32.mrf.mxu0 }
0x2351   :  { %v27975_v36 = vpop.f32.mrf.mxu1  ;;  %v29347_v1 = vld [vmem:[#allocation6 + $0x70] ss:$8 sps:$4 sm:$0xff]  }
0x2353   :  { %v17127_v21 = vpop.f32.mrf.mxu0 }
0x2354   :  { %v17128_v27 = vadd.f32 %v17127_v21, %v17052_v15  ;;  %v34987_v15 = vld [vmem:[#allocation14_spill] sm:$0xff] }
0x2355   :  { %v27954_v14 = vpop.f32.mrf.mxu0 }
0x2356   :  { %v17203_v11 = vadd.f32 %v17202_v7, %v17128_v27  ;;  %v29348_v14 = vld [vmem:[#allocation6 + $0x64] ss:$8 sps:$4 sm:$0xff]   ;;  %v34986_v7 = vld [vmem:[#allocation12_spill] sm:$0xff] }
0x2357   :  { %v17455_v0 = vpop.f32.mrf.mxu1 }
0x2358   :  { %v17456_v30 = vadd.f32 %v17455_v0, %v34985_v2  ;;  %v17279_v20 = vpop.f32.mrf.mxu0  ;;  %v29352_v2 = vld [vmem:[#allocation6 + $0x44] ss:$8 sps:$4 sm:$0xff]  }
0x2359   :  { %v17280_v31 = vadd.f32 %v17279_v20, %v17203_v11  ;;  %v27982_v45 = vpop.f32.mrf.mxu1 }
0x235a   :  { %v17463_v59 = vmax.f32 %v17456_v30, 0.0  ;;  %v27968_v50 = vpop.f32.mrf.mxu0  ;;  %v29349_v45 = vld [vmem:[#allocation6 + $0x60] ss:$8 sps:$4 sm:$0xff]  }
0x235b   :  { %v33314_v41 = vadd.f32 %v17352_v8, %v17280_v31  ;;  %v17458_v13 = vpop.f32.mrf.mxu1  ;;  %v29350_v31 = vld [vmem:[#allocation6 + $0x54] ss:$8 sps:$4 sm:$0xff]  }
0x235c   :  { %v17509_v32 = vpack.c.bf16 %v17463_v59, %v17463_v59  ;;  %v29353_v59 = vld [vmem:[#allocation6 + $0x40] ss:$8 sps:$4 sm:$0xff]  }
0x235d   :  { %v27983_v25 = vpop.f32.mrf.mxu1  ;;  %v29354_v13 = vld [vmem:[%s34422_s6 + $0x38] sm:$0xff]  }
0x235e   :  { %23051 = vmatmul.mubr.msk.bf16.vlgmr.msra.gmra.mxu1 %vm532_vm4, %v17509_v32  ;;  %v29351_v32 = vld [vmem:[#allocation6 + $0x50] ss:$8 sps:$4 sm:$0xff]   ;;  %v29355_v25 = vld [vmem:[#allocation6 + $0x34] ss:$8 sps:$4 sm:$0xff]  }
0x235f   :  { %17561 = vmatpush1.bf16.msra.mxu1 %v29347_v1  ;;  %v29356_v1 = vld [vmem:[%s34422_s6 + $0x70] sm:$0xff]  }
0x2360   :  { %v17414_v21 = vpop.f32.mrf.mxu0  ;;  %17562 = vmatprep.subr.bf16.mxu1 %v29348_v14  ;;  %v29358_v14 = vld [vmem:[%s34422_s6 + $0x30] sm:$0xff]  }
0x2361   :  { %v17415_v63 = vadd.f32 %v17414_v21, %v34986_v7  ;;  %v29357_v21 = vld [vmem:[#allocation6 + $0x30] ss:$8 sps:$4 sm:$0xff]   ;;  %v29359_v7 = vld [vmem:[#allocation6 + $0x24] ss:$8 sps:$4 sm:$0xff]  }
0x2362   :  { %v17416_v0 = vpop.f32.mrf.mxu0 }
0x2363   :  { %v17417_v20 = vadd.f32 %v17416_v0, %v34987_v15  ;;  %17563 = vmatpush1.bf16.msra.mxu1 %v29349_v45  ;;  %v17461_v50 = vmax.f32 %v17415_v63, 0.0  ;;  %v29360_v63 = vld [vmem:[%s34422_s6 + $0x68] sm:$0xff]   ;;  %v29361_v0 = vld [vmem:[#allocation6 + $0x20] ss:$8 sps:$4 sm:$0xff]  }
0x2364   :  { %v17418_v30 = vpop.f32.mrf.mxu0  ;;  %17564 = vmatprep.subr.bf16.mxu1 %v29350_v31  ;;  %v29362_v15 = vld [vmem:[%s34422_s6 + $0x28] sm:$0xff]   ;;  %v29364_v45 = vld [vmem:[%s34422_s6 + $0x60] sm:$0xff]  }
0x2365   :  { %v17462_v8 = vmax.f32 %v17417_v20, 0.0  ;;  %v17464_v11 = vpack.c.bf16 %v17461_v50, %v17461_v50  ;;  %v29363_v20 = vld [vmem:[#allocation6 + $0x14] ss:$8 sps:$4 sm:$0xff]   ;;  %v29365_v50 = vld [vmem:[#allocation6 + $0x10] ss:$8 sps:$4 sm:$0xff]   ;;  %v29366_v30 = vld [vmem:[%s34422_s6 + $0x20] sm:$0xff]  }
0x2366   :  { %v17419_v36 = vpop.f32.mrf.mxu0  ;;  %v29367_v31 = vld [vmem:[#allocation6 + $0x4] ss:$8 sps:$4 sm:$0xff]  }
0x2367   :  { %v17465_v27 = vpack.c.bf16 %v17462_v8, %v17462_v8  ;;  %17565 = vmatpush1.bf16.msra.mxu1 %v29351_v32  ;;  %v29368_v8 = vld [vmem:[%s34422_s6 + $0x58] sm:$0xff]   ;;  %v29371_v32 = vld [vmem:[#allocation6 + $0xf4] ss:$8 sps:$4 sm:$0xff]  }
0x2368   :  { %17566 = vmatprep.subr.bf16.mxu1 %v29352_v2  ;;  %v29369_v36 = vld [vmem:[#allocation6] ss:$8 sps:$4 sm:$0xff]   ;;  %v29373_v2 = vld [vmem:[#allocation6 + $0xf0] ss:$8 sps:$4 sm:$0xff]  }
0x2369   :  { %17498 = vmatprep.mubr.bf16.mxu0 %v17465_v27  ;;  %v29370_v27 = vld [vmem:[%s34422_s6 + $0x18] sm:$0xff]  }
0x236a   :  { %17499 = vmatmul.mubr.bf16.vlgmr.msra.gmra.mxu0 %v17464_v11  ;;  %v29372_v11 = vld [vmem:[%s34422_s6 + $0x50] sm:$0xff]  }
0x236b   :  { %17567 = vmatpush1.bf16.msra.mxu1 %v29353_v59  ;;  %24517 = vmatpush3.bf16.msra.mxu0 %v29354_v13  ;;  %v29374_v59 = vld [vmem:[%s34422_s6 + $0x10] sm:$0xff]   ;;  %v29375_v13 = vld [vmem:[#allocation6 + $0xe4] ss:$8 sps:$4 sm:$0xff]  }
0x236c   :  { %17568 = vmatprep.subr.bf16.mxu1 %v29355_v25  ;;  %24518 = vmatprep.subr.bf16.mxu0 %v29356_v1  ;;  %v29376_v25 = vld [vmem:[%s34422_s6 + $0x48] sm:$0xff]   ;;  %v29377_v1 = vld [vmem:[#allocation6 + $0xe0] ss:$8 sps:$4 sm:$0xff]  }
0x236f   :  { %17569 = vmatpush1.bf16.msra.mxu1 %v29357_v21  ;;  %24519 = vmatpush3.bf16.msra.mxu0 %v29358_v14  ;;  %v29378_v21 = vld [vmem:[%s34422_s6 + $0x8] sm:$0xff]  }
0x2370   :  { %17570 = vmatprep.subr.bf16.mxu1 %v29359_v7  ;;  %24520 = vmatprep.subr.bf16.mxu0 %v29360_v63  ;;  %v29379_v14 = vld [vmem:[#allocation6 + $0xd4] ss:$8 sps:$4 sm:$0xff]   ;;  %v29380_v7 = vld [vmem:[%s34422_s6 + $0x40] sm:$0xff]   ;;  %v29381_v63 = vld [vmem:[#allocation6 + $0xd0] ss:$8 sps:$4 sm:$0xff]  }
0x2373   :  { %17571 = vmatpush1.bf16.msra.mxu1 %v29361_v0  ;;  %24521 = vmatpush3.bf16.msra.mxu0 %v29362_v15  ;;  %v29382_v0 = vld [vmem:[%s34422_s6] sm:$0xff]  }
0x2374   :  { %17572 = vmatprep.subr.bf16.mxu1 %v29363_v20  ;;  %24522 = vmatprep.subr.bf16.mxu0 %v29364_v45  ;;  %v29383_v15 = vld [vmem:[#allocation6 + $0xc4] ss:$8 sps:$4 sm:$0xff]   ;;  %v29384_v20 = vld [vmem:[#allocation6 + $0xc0] ss:$8 sps:$4 sm:$0xff]   ;;  %v29385_v45 = vld [vmem:[#allocation6 + $0xb4] ss:$8 sps:$4 sm:$0xff]  }
0x2377   :  { %17573 = vmatpush1.bf16.msra.mxu1 %v29365_v50  ;;  %24523 = vmatpush3.bf16.msra.mxu0 %v29366_v30  ;;  %v29386_v50 = vld [vmem:[#allocation6 + $0xb0] ss:$8 sps:$4 sm:$0xff]   ;;  %v29387_v30 = vld [vmem:[#allocation6 + $0xa4] ss:$8 sps:$4 sm:$0xff]  }
0x2378   :  { %17574 = vmatprep.subr.bf16.mxu1 %v29367_v31  ;;  %24524 = vmatprep.subr.bf16.mxu0 %v29368_v8  ;;  %v29388_v31 = vld [vmem:[#allocation6 + $0xa0] ss:$8 sps:$4 sm:$0xff]   ;;  %v29389_v8 = vld [vmem:[#allocation6 + $0x94] ss:$8 sps:$4 sm:$0xff]  }
0x237b   :  { %17575 = vmatpush1.bf16.msra.mxu1 %v29369_v36  ;;  %24525 = vmatpush3.bf16.msra.mxu0 %v29370_v27  ;;  %v29390_v36 = vld [vmem:[#allocation6 + $0x90] ss:$8 sps:$4 sm:$0xff]   ;;  %v29391_v27 = vld [vmem:[#allocation6 + $0x84] ss:$8 sps:$4 sm:$0xff]  }
0x237c   :  { %17576 = vmatprep.subr.bf16.mxu1 %v29371_v32  ;;  %24526 = vmatprep.subr.bf16.mxu0 %v29372_v11  ;;  %v29392_v32 = vld [vmem:[#allocation6 + $0x80] ss:$8 sps:$4 sm:$0xff]  }
0x237f   :  { %17577 = vmatpush2.bf16.msra.mxu1 %v29373_v2  ;;  %24527 = vmatpush3.bf16.msra.mxu0 %v29374_v59 }
0x2380   :  { %17578 = vmatprep.subr.bf16.mxu1 %v29375_v13  ;;  %24528 = vmatprep.subr.bf16.mxu0 %v29376_v25  ;;  %v34988_v25 = vld [vmem:[#allocation15_spill] sm:$0xff] }
0x2383   :  { %17579 = vmatpush2.bf16.msra.mxu1 %v29377_v1  ;;  %24529 = vmatpush3.bf16.msra.mxu0 %v29378_v21 }
0x2384   :  { %17580 = vmatprep.subr.bf16.mxu1 %v29379_v14  ;;  %24530 = vmatprep.subr.bf16.mxu0 %v29380_v7  ;;  %v34989_v14 = vld [vmem:[#allocation16_spill] sm:$0xff] }
0x2387   :  { %17581 = vmatpush2.bf16.msra.mxu1 %v29381_v63  ;;  %24531 = vmatpush3.bf16.msra.mxu0 %v29382_v0  ;;  %v34990_v63 = vld [vmem:[#allocation17_spill] sm:$0xff] }
0x2388   :  { %17582 = vmatprep.subr.bf16.mxu1 %v29383_v15  ;;  %28004 = vmatprep.subr.mxu0 %v34641_v3 }
0x238b   :  { %17583 = vmatpush2.bf16.msra.mxu1 %v29384_v20 }
0x238c   :  { %17584 = vmatprep.subr.bf16.mxu1 %v29385_v45  ;;  %v34991_v45 = vld [vmem:[#allocation18_spill] sm:$0xff] }
0x238f   :  { %17585 = vmatpush2.bf16.msra.mxu1 %v29386_v50 }
0x2390   :  { %17586 = vmatprep.subr.bf16.mxu1 %v29387_v30 }
0x2393   :  { %17587 = vmatpush2.bf16.msra.mxu1 %v29388_v31 }
0x2394   :  { %17588 = vmatprep.subr.bf16.mxu1 %v29389_v8 }
0x2397   :  { %17589 = vmatpush2.bf16.msra.mxu1 %v29390_v36 }
0x2398   :  { %17590 = vmatprep.subr.bf16.mxu1 %v29391_v27 }
0x239b   :  { %17591 = vmatpush2.bf16.msra.mxu1 %v29392_v32 }
0x239c   :  { %27984 = vmatprep.subr.mxu1 %v34641_v3 }
0x241e   :  { %v17547_v11 = vpop.f32.mrf.mxu1 }
0x241f   :  { %v17548_v1 = vadd.f32 %v17547_v11, %v34988_v25  ;;  %v34992_v11 = vld [vmem:[#allocation21_spill] sm:$0xff]  ;;  %v34993_v25 = vld [vmem:[#allocation19_spill] sm:$0xff] }
0x2420   :  { %v17549_v2 = vpop.f32.mrf.mxu1 }
0x2421   :  { %v17550_v7 = vadd.f32 %v17549_v2, %v34989_v14  ;;  %v17554_v30 = vmax.f32 %v17548_v1, 0.0  ;;  %v34994_v14 = vld [vmem:[#allocation20_spill] sm:$0xff] }
0x2422   :  { %v17551_v59 = vpop.f32.mrf.mxu1 }
0x2423   :  { %v17555_v8 = vmax.f32 %v17550_v7, 0.0 }
0x2424   :  { %v17552_v13 = vpop.f32.mrf.mxu1 }
0x242a   :  { %v17500_v21 = vpop.f32.mrf.mxu0 }
0x242b   :  { %v17501_v0 = vadd.f32 %v17500_v21, %v34990_v63 }
0x242c   :  { %v17502_v15 = vpop.f32.mrf.mxu0 }
0x242d   :  { %v17507_v20 = vmax.f32 %v17501_v0, 0.0  ;;  %v17503_v50 = vadd.f32 %v17502_v15, %v34991_v45 }
0x242e   :  { %v17504_v31 = vpop.f32.mrf.mxu0 }
0x242f   :  { %v17508_v36 = vmax.f32 %v17503_v50, 0.0  ;;  %v17556_v27 = vadd.f32 %v17554_v30, %v17507_v20  ;;  %v34995_v50 = vld [vmem:[#allocation23_spill] sm:$0xff] }
0x2430   :  { %v17505_v32 = vpop.f32.mrf.mxu0 }
0x2431   :  { %v17557_v42 = vadd.f32 %v17555_v8, %v17508_v36  ;;  %v17558_v13 = vpack.c.bf16 %v17556_v27, %v17556_v27  ;;  %v29393_v27 = vld [vmem:[%s34423_s7 + $0x4] ss:$0 sm:$0xff] }
0x2433   :  { %v17559_v59 = vpack.c.bf16 %v17557_v42, %v17557_v42 }
0x2435   :  { %17592 = vmatprep.mubr.bf16.mxu1 %v17559_v59 }
0x2436   :  { %17593 = vmatmul.mubr.bf16.vlgmr.msra.gmra.mxu1 %v17558_v13 }
0x2437   :  { %27985 = vmatpush3.msra.mxu1 %v34992_v11  ;;  %27986 = vmatprep.mubr.msk.f32.mxu1 %vm29465_vm0, %v34641_v3 }
0x2438   :  { %27989 = vmatprep.subr.mxu1 %v34641_v3 }
0x24f6   :  { %v17594_v2 = vpop.f32.mrf.mxu1 }
0x24f7   :  { %v17595_v1 = vadd.f32 %v17594_v2, %v34993_v25 }
0x24f8   :  { %v17596_v21 = vpop.f32.mrf.mxu1 }
0x24f9   :  { %v17597_v7 = vadd.f32 %v17596_v21, %v34994_v14  ;;  %v17601_v63 = vmax.f32 %v17595_v1, 0.0 }
0x24fa   :  { %v17598_v0 = vpop.f32.mrf.mxu1 }
0x24fb   :  { %v17602_v15 = vmax.f32 %v17597_v7, 0.0  ;;  %v17603_v45 = vpack.c.bf16 %v17601_v63, %v17601_v63  ;;  %v34996_v63 = vld [vmem:[#allocation24_spill] sm:$0xff] }
0x24fc   :  { %v17599_v42 = vpop.f32.mrf.mxu1  ;;  %v6284_v0 = vmul.f32 %v34996_v63, %v34996_v63  ;;  %v35009_v63 = vld [vmem:[#allocation37_spill] sm:$0xff] }
0x24fd   :  { %v17604_v20 = vpack.c.bf16 %v17602_v15, %v17602_v15  ;;  %v34997_v42 = vld [vmem:[#allocation69_spill] sm:$0xff] }
0x24fe   :  { %v6286_v15 = vsel %vm6285_vm10, %v6284_v0, 0.0  ;;  %v35011_v0 = vld [vmem:[#allocation40_spill] sm:$0xff] }
0x24ff   :  { %17637 = vmatprep.mubr.bf16.mxu0 %v17604_v20  ;;  %v11819_v20 = vmul.f32 %v34997_v42, %v34997_v42  ;;  %v35013_v42 = vld [vmem:[#allocation43_spill] sm:$0xff] }
0x2500   :  { %17638 = vmatmul.mubr.bf16.vlgmr.msra.gmra.mxu0 %v17603_v45 }
0x2501   :  { %28005 = vmatpush3.msra.mxu0 %v34995_v50  ;;  %28006 = vmatprep.mubr.msk.f32.mxu0 %vm29465_vm0, %v34641_v3  ;;  %v11820_v45 = vsel %vm6280_vm9, %v11819_v20, 0.0  ;;  %v17356_v50 = vmul.f32 %v33314_v41, %v33314_v41  ;;  %v35014_v20 = vld [vmem:[#allocation45_spill] sm:$0xff] }
0x2502   :  { %28014 = vmatprep.subr.mxu0 %v34641_v3 }
0x25c0   :  { %v24532_v30 = vpop.f32.mrf.mxu0 }
0x25c2   :  { %v24533_v31 = vpop.f32.mrf.mxu0 }
0x25c3   :  { %v24534_v8 = vadd.f32 %v24533_v31, %v24532_v30  ;;  %v17357_v30 = vsel %vm6280_vm9, %v17356_v50, 0.0  ;;  %v35016_v50 = vld [vmem:[#allocation50_spill] sm:$0xff] }
0x25c4   :  { %v24535_v36 = vpop.f32.mrf.mxu0 }
0x25c5   :  { %v17640_v32 = vadd.f32 %v29393_v27, %v24534_v8 }
0x25c6   :  { %v24536_v59 = vpop.f32.mrf.mxu0 }
0x25c7   :  { %v17646_v13 = vand.u32 2147483647, %v17640_v32  ;;  %v17645_v25 = vmul.f32 2.0, %v17640_v32 }
0x25c9   :  { %v17647_v2 = vadd.f32 1.0, %v17646_v13  ;;  %v34999_v13 = vld [vmem:[#allocation28_spill] sm:$0xff] }
0x25cb   :  { %29115 = vrcp.f32 %v17647_v2 }
0x25d8   :  { %v29116_v1 = vpop.eup %29115 }
0x25d9   :  { %v17649_v21 = vmul.f32 %v29116_v1, %v17645_v25  ;;  %v35000_v25 = vld [vmem:[#allocation30_spill] sm:$0xff]  ;;  %v35001_v1 = vld [vmem:[#allocation29_spill] sm:$0xff] }
0x25db   :  { %17651 = vrot.lane.b32.xlu0 %v17649_v21, %s29466_s17  ;;  %v22897_v14 = vmul.f32 %v17649_v21, %v17649_v21  ;;  %v35003_v21 = vld [vmem:[#allocation32_spill] sm:$0xff] }
0x25dd   :  { %v22898_v7 = vsel %vm6285_vm10, %v22897_v14, 0.0  ;;  %v35005_v14 = vld [vmem:[#allocation33_spill] sm:$0xff] }
0x25de   :  { %22899 = vadd.xlane.f32.xlu1 %v22898_v7  ;;  %v35007_v7 = vld [vmem:[#allocation35_spill] sm:$0xff] }
0x25fa   :  { %6287 = vadd.xlane.f32.xlu0 %v6286_v15  ;;  %v35012_v15 = vld [vmem:[#allocation41_spill] sm:$0xff] }
0x25fe   :  { %11821 = vadd.xlane.f32.xlu0 %v11820_v45  ;;  %v35015_v45 = vld [vmem:[#allocation47_spill] sm:$0xff] }
0x2602   :  { %17358 = vadd.xlane.f32.xlu0 %v17357_v30  ;;  %v35017_v30 = vld [vmem:[#allocation51_spill] sm:$0xff] }
0x264d   :  { %v33394_v31 = vpop.permute.xlu0 %17651 }
0x264e   :  { %34998 = vst [vmem:[#allocation65_spill] sm:$0xff] %v33394_v31  ;;  %v17654_v8 = vsel %vm1011_vm6, 1.0, %v33394_v31 }
0x264f   :  { %v17656_v36 = vsel %vm1014_vm7, %v17654_v8, 0  ;;  %v35018_v8 = vld [vmem:[#allocation53_spill] sm:$0xff] }
0x2650   :  { %v17724_v27 = vand.u32 4294901760, %v17656_v36 }
0x2652   :  { %v17725_v32 = vsub.f32 %v17656_v36, %v17724_v27  ;;  %28007 = vmatmul.mubr.f32.vlgmr.msra.gmra.mxu0 %v17724_v27  ;;  %v35019_v36 = vld [vmem:[#allocation55_spill] sm:$0xff] }
0x2653   :  { %28015 = vmatpush3.msra.mxu0 %v34903_v24  ;;  %28018 = vmatprep.mubr.msk.f32.mxu0 %vm29465_vm0, %v34641_v3 }
0x2654   :  { %v17726_v41 = vand.u32 4294901760, %v17725_v32  ;;  %28016 = vmatprep.subr.mxu0 %v34641_v3 }
0x2655   :  { %28017 = vmatpush3.msra.mxu0 %v34904_v43 }
0x2656   :  { %v17727_v59 = vsub.f32 %v17725_v32, %v17726_v41  ;;  %28019 = vmatmul.mubr.f32.vlgmr.msra.gmra.mxu0 %v33245_v38  ;;  %28028 = vmatprep.subr.mxu0 %v34641_v3  ;;  %v35002_v38 = vld [vmem:[#allocation31_spill] sm:$0xff] }
0x2657   :  { %28029 = vmatpush3.msra.mxu0 %v34999_v13  ;;  %28032 = vmatprep.mubr.msk.f32.mxu0 %vm29465_vm0, %v34641_v3 }
0x2658   :  { %v17728_v2 = vand.u32 4294901760, %v17727_v59  ;;  %28030 = vmatprep.subr.mxu0 %v34641_v3 }
0x2659   :  { %28031 = vmatpush3.msra.mxu0 %v35000_v25 }
0x265a   :  { %27987 = vmatmul.mubr.f32.vlgmr.msra.gmra.mxu1 %v17728_v2  ;;  %28033 = vmatmul.mubr.f32.vlgmr.msra.gmra.mxu0 %v33226_v49  ;;  %v35004_v49 = vld [vmem:[#allocation22_spill] sm:$0xff] }
0x265b   :  { %27990 = vmatpush3.msra.mxu1 %v35001_v1  ;;  %28042 = vmatprep.subr.mxu0 %v34641_v3 }
0x265c   :  { %28043 = vmatpush3.msra.mxu0 %v35002_v38  ;;  %27991 = vmatprep.mubr.msk.f32.mxu1 %vm29465_vm0, %v34641_v3 }
0x265d   :  { %28044 = vmatprep.subr.mxu0 %v34641_v3  ;;  %27994 = vmatprep.subr.mxu1 %v34641_v3 }
0x265e   :  { %28045 = vmatpush3.msra.mxu0 %v35003_v21  ;;  %28046 = vmatprep.mubr.msk.f32.mxu0 %vm29465_vm0, %v34641_v3 }
0x265f   :  { %27992 = vmatmul.mubr.f32.vlgmr.msra.gmra.mxu1 %v17724_v27  ;;  %28047 = vmatmul.mubr.f32.vlgmr.msra.gmra.mxu0 %v33223_v18 }
0x2660   :  { %27995 = vmatpush3.msra.mxu1 %v35004_v49  ;;  %27996 = vmatprep.mubr.msk.f32.mxu1 %vm29465_vm0, %v34641_v3 }
0x2661   :  { %27999 = vmatprep.subr.mxu1 %v34641_v3  ;;  %28056 = vmatprep.subr.mxu0 %v34641_v3 }
0x2662   :  { %28057 = vmatpush3.msra.mxu0 %v29821_v52  ;;  %28084 = vmatprep.mubr.msk.f32.mxu0 %vm29465_vm0, %v34641_v3 }
0x2663   :  { %27997 = vmatmul.mubr.f32.vlgmr.msra.gmra.mxu1 %v17725_v32  ;;  %28058 = vmatprep.subr.mxu0 %v34641_v3 }
0x2664   :  { %28000 = vmatpush3.msra.mxu1 %v34992_v11  ;;  %28001 = vmatprep.mubr.msk.f32.mxu1 %vm29465_vm0, %v34641_v3 }
0x2665   :  { %28009 = vmatprep.subr.mxu1 %v34641_v3  ;;  %28059 = vmatpush3.msra.mxu0 %v29826_v55 }
0x2666   :  { %28060 = vmatprep.subr.mxu0 %v34641_v3 }
0x2667   :  { %28002 = vmatmul.mubr.f32.vlgmr.msra.gmra.mxu1 %v17726_v41  ;;  %28061 = vmatpush3.msra.mxu0 %v29836_v58 }
0x2668   :  { %28010 = vmatpush3.msra.mxu1 %v34992_v11  ;;  %28011 = vmatprep.mubr.msk.f32.mxu1 %vm29465_vm0, %v34641_v3  ;;  %v35006_v11 = vld [vmem:[#allocation34_spill] sm:$0xff] }
0x2669   :  { %28021 = vmatprep.subr.mxu1 %v34641_v3  ;;  %28062 = vmatprep.subr.mxu0 %v34641_v3 }
0x266a   :  { %28063 = vmatpush3.msra.mxu0 %v29848_v6 }
0x266b   :  { %28012 = vmatmul.mubr.f32.vlgmr.msra.gmra.mxu1 %v17724_v27  ;;  %28064 = vmatprep.subr.mxu0 %v34641_v3  ;;  %v35020_v27 = vld [vmem:[#allocation56_spill] sm:$0xff] }
0x266c   :  { %28022 = vmatpush3.msra.mxu1 %v35005_v14  ;;  %28025 = vmatprep.mubr.msk.f32.mxu1 %vm29465_vm0, %v34641_v3 }
0x266d   :  { %28023 = vmatprep.subr.mxu1 %v34641_v3  ;;  %28065 = vmatpush3.msra.mxu0 %v29863_v23 }
0x266e   :  { %28024 = vmatpush3.msra.mxu1 %v35006_v11  ;;  %28066 = vmatprep.subr.mxu0 %v34641_v3 }
0x266f   :  { %28035 = vmatprep.subr.mxu1 %v34641_v3  ;;  %28026 = vmatmul.mubr.f32.vlgmr.msra.gmra.mxu1 %v33223_v18 }
0x2670   :  { %28036 = vmatpush3.msra.mxu1 %v34903_v24  ;;  %28039 = vmatprep.mubr.msk.f32.mxu1 %vm29465_vm0, %v34641_v3 }
0x2671   :  { %28037 = vmatprep.subr.mxu1 %v34641_v3  ;;  %28067 = vmatpush3.msra.mxu0 %v29874_v29 }
0x2672   :  { %28038 = vmatpush3.msra.mxu1 %v34904_v43  ;;  %28068 = vmatprep.subr.mxu0 %v34641_v3 }
0x2673   :  { %28049 = vmatprep.subr.mxu1 %v34641_v3  ;;  %28040 = vmatmul.mubr.f32.vlgmr.msra.gmra.mxu1 %v33234_v46  ;;  %v35008_v46 = vld [vmem:[#allocation36_spill] sm:$0xff] }
0x2674   :  { %28050 = vmatpush3.msra.mxu1 %v34903_v24  ;;  %28053 = vmatprep.mubr.msk.f32.mxu1 %vm29465_vm0, %v34641_v3 }
0x2675   :  { %28051 = vmatprep.subr.mxu1 %v34641_v3  ;;  %28069 = vmatpush3.msra.mxu0 %v29889_v35 }
0x2676   :  { %28052 = vmatpush3.msra.mxu1 %v34904_v43  ;;  %28070 = vmatprep.subr.mxu0 %v34641_v3 }
0x2677   :  { %28054 = vmatmul.mubr.f32.vlgmr.msra.gmra.mxu1 %v33223_v18  ;;  %28087 = vmatprep.subr.mxu1 %v34641_v3  ;;  %v35010_v18 = vld [vmem:[#allocation38_spill] sm:$0xff] }
0x2678   :  { %28088 = vmatpush3.msra.mxu1 %v35007_v7  ;;  %28071 = vmatpush3.msra.mxu0 %v29906_v51 }
0x2679   :  { %28089 = vmatprep.subr.mxu1 %v34641_v3  ;;  %28072 = vmatprep.subr.mxu0 %v34641_v3 }
0x267a   :  { %28090 = vmatpush3.msra.mxu1 %v35008_v46  ;;  %28073 = vmatpush3.msra.mxu0 %v29922_v16 }
0x267b   :  { %28091 = vmatprep.subr.mxu1 %v34641_v3  ;;  %28074 = vmatprep.subr.mxu0 %v34641_v3 }
0x267c   :  { %28092 = vmatpush3.msra.mxu1 %v35009_v63  ;;  %28075 = vmatpush3.msra.mxu0 %v29941_v53 }
0x267d   :  { %28093 = vmatprep.subr.mxu1 %v34641_v3  ;;  %28076 = vmatprep.subr.mxu0 %v34641_v3 }
0x267e   :  { %28094 = vmatpush3.msra.mxu1 %v35010_v18  ;;  %28115 = vmatprep.mubr.msk.f32.mxu1 %vm29465_vm0, %v34641_v3 }
0x267f   :  { %28095 = vmatprep.subr.mxu1 %v34641_v3  ;;  %28077 = vmatpush3.msra.mxu0 %v29952_v57 }
0x2680   :  { %28096 = vmatpush3.msra.mxu1 %v35011_v0  ;;  %28078 = vmatprep.subr.mxu0 %v34641_v3 }
0x2681   :  { %28097 = vmatprep.subr.mxu1 %v34641_v3  ;;  %28079 = vmatpush3.msra.mxu0 %v29968_v12 }
0x2682   :  { %28098 = vmatpush3.msra.mxu1 %v35012_v15  ;;  %28080 = vmatprep.subr.mxu0 %v34641_v3 }
0x2683   :  { %28099 = vmatprep.subr.mxu1 %v34641_v3  ;;  %28081 = vmatpush3.msra.mxu0 %v29985_v17 }
0x2684   :  { %28100 = vmatpush3.msra.mxu1 %v35013_v42  ;;  %28082 = vmatprep.subr.mxu0 %v34641_v3 }
0x2685   :  { %28101 = vmatprep.subr.mxu1 %v34641_v3  ;;  %28083 = vmatpush3.msra.mxu0 %v30001_v62 }
0x2686   :  { %28102 = vmatpush3.msra.mxu1 %v35014_v20  ;;  %28118 = vmatprep.subr.mxu0 %v34641_v3 }
0x2687   :  { %28103 = vmatprep.subr.mxu1 %v34641_v3 }
0x2688   :  { %28104 = vmatpush3.msra.mxu1 %v35015_v45 }
0x2689   :  { %28105 = vmatprep.subr.mxu1 %v34641_v3 }
0x268a   :  { %28106 = vmatpush3.msra.mxu1 %v35016_v50 }
0x268b   :  { %28107 = vmatprep.subr.mxu1 %v34641_v3 }
0x268c   :  { %28108 = vmatpush3.msra.mxu1 %v35017_v30 }
0x268d   :  { %28109 = vmatprep.subr.mxu1 %v34641_v3 }
0x268e   :  { %28110 = vmatpush3.msra.mxu1 %v35018_v8 }
0x268f   :  { %28111 = vmatprep.subr.mxu1 %v34641_v3 }
0x2690   :  { %28112 = vmatpush3.msra.mxu1 %v35019_v36 }
0x2691   :  { %28113 = vmatprep.subr.mxu1 %v34641_v3 }
0x2692   :  { %28114 = vmatpush3.msra.mxu1 %v35020_v27 }
0x2693   :  { %28149 = vmatprep.subr.mxu1 %v34641_v3 }
0x2712   :  { %v18028_v32 = vpop.f32.mrf.mxu0 }
0x2714   :  { %v28008_v41 = vpop.f32.mrf.mxu0 }
0x2716   :  { %v18177_v59 = vpop.f32.mrf.mxu0 }
0x2718   :  { %v28020_v2 = vpop.f32.mrf.mxu0 }
0x271a   :  { %v17730_v1 = vpop.f32.mrf.mxu1  ;;  %v18334_v49 = vpop.f32.mrf.mxu0 }
0x271c   :  { %v27988_v31 = vpop.f32.mrf.mxu1  ;;  %v28034_v30 = vpop.f32.mrf.mxu0 }
0x271f   :  { %v17806_v50 = vpop.f32.mrf.mxu1  ;;  %v18486_v8 = vpop.f32.mrf.mxu0 }
0x2720   :  { %v17807_v27 = vadd.f32 %v17806_v50, %v17730_v1  ;;  %v35027_v50 = vld [vmem:[#allocation52_spill] sm:$0xff] }
0x2721   :  { %v27993_v45 = vpop.f32.mrf.mxu1  ;;  %v28048_v20 = vpop.f32.mrf.mxu0 }
0x2723   :  { %v17880_v42 = vpop.f32.mrf.mxu1 }
0x2724   :  { %v17881_v46 = vadd.f32 %v17880_v42, %v17807_v27  ;;  %v35029_v27 = vld [vmem:[#allocation26_spill] sm:$0xff] }
0x2725   :  { %v27998_v36 = vpop.f32.mrf.mxu1 }
0x2727   :  { %v17954_v15 = vpop.f32.mrf.mxu1 }
0x2728   :  { %v17955_v41 = vadd.f32 %v17954_v15, %v17881_v46  ;;  %v35024_v46 = vld [vmem:[#allocation46_spill] sm:$0xff]  ;;  %v35026_v15 = vld [vmem:[#allocation49_spill] sm:$0xff] }
0x2729   :  { %v28003_v0 = vpop.f32.mrf.mxu1 }
0x272a   :  { %v18029_v31 = vadd.f32 %v18028_v32, %v17955_v41  ;;  %v35030_v32 = vld [vmem:[#allocation27_spill] sm:$0xff] }
0x272b   :  { %v18100_v18 = vpop.f32.mrf.mxu1 }
0x272c   :  { %v33517_v20 = vadd.f32 %v18100_v18, %v18029_v31  ;;  %v35025_v18 = vld [vmem:[#allocation48_spill] sm:$0xff] }
0x272d   :  { %v28013_v63 = vpop.f32.mrf.mxu1 }
0x272f   :  { %v18258_v21 = vpop.f32.mrf.mxu1 }
0x2730   :  { %v18259_v38 = vadd.f32 %v18258_v21, %v18177_v59 }
0x2731   :  { %v28027_v2 = vpop.f32.mrf.mxu1 }
0x2732   :  { %v18335_v7 = vadd.f32 %v18334_v49, %v18259_v38  ;;  %v35022_v38 = vld [vmem:[#allocation42_spill] sm:$0xff] }
0x2733   :  { %v18409_v25 = vpop.f32.mrf.mxu1 }
0x2734   :  { %v18410_v30 = vadd.f32 %v18409_v25, %v18335_v7  ;;  %v35021_v25 = vld [vmem:[#allocation39_spill] sm:$0xff]  ;;  %v35023_v7 = vld [vmem:[#allocation44_spill] sm:$0xff] }
0x2735   :  { %v28041_v13 = vpop.f32.mrf.mxu1 }
0x2736   :  { %v18487_v43 = vadd.f32 %v18486_v8, %v18410_v30  ;;  %v35028_v8 = vld [vmem:[#allocation54_spill] sm:$0xff] }
0x2737   :  { %v18559_v45 = vpop.f32.mrf.mxu1 }
0x2738   :  { %v18560_v36 = vadd.f32 %v18559_v45, %v18487_v43 }
0x2739   :  { %v28055_v24 = vpop.f32.mrf.mxu1 }
0x273a   :  { %v18563_v0 = vmul.f32 %v18560_v36, %v33517_v20 }
0x273c   :  { %v18565_v63 = vsel %vm1947_vm8, %v18563_v0, 0 }
0x273d   :  { %v33521_v42 = vand.u32 4294901760, %v18565_v63 }
0x273f   :  { %v33524_v21 = vsub.f32 %v18565_v63, %v33521_v42  ;;  %28116 = vmatmul.mubr.f32.vlgmr.msra.gmra.mxu1 %v33521_v42 }
0x2740   :  { %28150 = vmatpush3.msra.mxu1 %v29821_v52  ;;  %28177 = vmatprep.mubr.msk.f32.mxu1 %vm29465_vm0, %v34641_v3 }
0x2741   :  { %v18648_v13 = vand.u32 4294901760, %v33524_v21  ;;  %28151 = vmatprep.subr.mxu1 %v34641_v3 }
0x2742   :  { %28152 = vmatpush3.msra.mxu1 %v29826_v55 }
0x2743   :  { %v18649_v24 = vsub.f32 %v33524_v21, %v18648_v13  ;;  %28153 = vmatprep.subr.mxu1 %v34641_v3 }
0x2744   :  { %28154 = vmatpush3.msra.mxu1 %v29836_v58 }
0x2745   :  { %v18650_v43 = vand.u32 4294901760, %v18649_v24  ;;  %28155 = vmatprep.subr.mxu1 %v34641_v3 }
0x2746   :  { %28156 = vmatpush3.msra.mxu1 %v29848_v6 }
0x2747   :  { %28157 = vmatprep.subr.mxu1 %v34641_v3  ;;  %28085 = vmatmul.mubr.f32.vlgmr.msra.gmra.mxu0 %v18650_v43 }
0x2748   :  { %28119 = vmatpush3.msra.mxu0 %v29824_v54  ;;  %28158 = vmatpush3.msra.mxu1 %v29863_v23 }
0x2749   :  { %28120 = vmatprep.subr.mxu0 %v34641_v3  ;;  %28159 = vmatprep.subr.mxu1 %v34641_v3 }
0x274a   :  { %28121 = vmatpush3.msra.mxu0 %v29834_v56  ;;  %28160 = vmatpush3.msra.mxu1 %v29874_v29 }
0x274b   :  { %28122 = vmatprep.subr.mxu0 %v34641_v3  ;;  %28161 = vmatprep.subr.mxu1 %v34641_v3 }
0x274c   :  { %28123 = vmatpush3.msra.mxu0 %v29846_v5  ;;  %28162 = vmatpush3.msra.mxu1 %v29889_v35 }
0x274d   :  { %28124 = vmatprep.subr.mxu0 %v34641_v3  ;;  %28163 = vmatprep.subr.mxu1 %v34641_v3 }
0x274e   :  { %28125 = vmatpush3.msra.mxu0 %v29860_v22  ;;  %28164 = vmatpush3.msra.mxu1 %v29906_v51 }
0x274f   :  { %28126 = vmatprep.subr.mxu0 %v34641_v3  ;;  %28165 = vmatprep.subr.mxu1 %v34641_v3 }
0x2750   :  { %28127 = vmatpush3.msra.mxu0 %v29878_v10  ;;  %28166 = vmatpush3.msra.mxu1 %v29922_v16 }
0x2751   :  { %28128 = vmatprep.subr.mxu0 %v34641_v3  ;;  %28167 = vmatprep.subr.mxu1 %v34641_v3 }
0x2752   :  { %28129 = vmatpush3.msra.mxu0 %v29887_v34  ;;  %28168 = vmatpush3.msra.mxu1 %v29941_v53 }
0x2753   :  { %28130 = vmatprep.subr.mxu0 %v34641_v3  ;;  %28169 = vmatprep.subr.mxu1 %v34641_v3 }
0x2754   :  { %28131 = vmatpush3.msra.mxu0 %v29904_v48  ;;  %28170 = vmatpush3.msra.mxu1 %v29952_v57 }
0x2755   :  { %28132 = vmatprep.subr.mxu0 %v34641_v3  ;;  %28171 = vmatprep.subr.mxu1 %v34641_v3 }
0x2756   :  { %28133 = vmatpush3.msra.mxu0 %v29920_v9  ;;  %28172 = vmatpush3.msra.mxu1 %v29968_v12 }
0x2757   :  { %28134 = vmatprep.subr.mxu0 %v34641_v3  ;;  %28173 = vmatprep.subr.mxu1 %v34641_v3 }
0x2758   :  { %28135 = vmatpush3.msra.mxu0 %v29937_v39  ;;  %28174 = vmatpush3.msra.mxu1 %v29985_v17 }
0x2759   :  { %28136 = vmatprep.subr.mxu0 %v34641_v3  ;;  %28175 = vmatprep.subr.mxu1 %v34641_v3 }
0x275a   :  { %28137 = vmatpush3.msra.mxu0 %v29957_v40  ;;  %28176 = vmatpush3.msra.mxu1 %v30001_v62 }
0x275b   :  { %28138 = vmatprep.subr.mxu0 %v34641_v3  ;;  %28178 = vmatmul.mubr.f32.vlgmr.msra.gmra.mxu1 %v18648_v13 }
0x275c   :  { %28211 = vmatprep.subr.mxu1 %v34641_v3  ;;  %28139 = vmatpush3.msra.mxu0 %v29966_v44 }
0x275d   :  { %28212 = vmatpush3.msra.mxu1 %v29821_v52  ;;  %28140 = vmatprep.subr.mxu0 %v34641_v3 }
0x275e   :  { %28213 = vmatprep.subr.mxu1 %v34641_v3  ;;  %28141 = vmatpush3.msra.mxu0 %v29983_v26 }
0x275f   :  { %28214 = vmatpush3.msra.mxu1 %v29826_v55  ;;  %28142 = vmatprep.subr.mxu0 %v34641_v3 }
0x2760   :  { %28215 = vmatprep.subr.mxu1 %v34641_v3  ;;  %28143 = vmatpush3.msra.mxu0 %v29999_v61 }
0x2761   :  { %28216 = vmatpush3.msra.mxu1 %v29836_v58  ;;  %28144 = vmatprep.subr.mxu0 %v34641_v3 }
0x2762   :  { %28217 = vmatprep.subr.mxu1 %v34641_v3  ;;  %28145 = vmatpush3.msra.mxu0 %v30017_v33 }
0x2763   :  { %28146 = vmatprep.mubr.msk.f32.mxu0 %vm29465_vm0, %v34641_v3  ;;  %28218 = vmatpush3.msra.mxu1 %v29848_v6 }
0x2764   :  { %28147 = vmatmul.mubr.f32.vlgmr.msra.gmra.mxu0 %v33524_v21  ;;  %28180 = vmatprep.subr.mxu0 %v34641_v3 }
0x2765   :  { %28219 = vmatprep.subr.mxu1 %v34641_v3  ;;  %28181 = vmatpush3.msra.mxu0 %v29831_v60 }
0x2766   :  { %28220 = vmatpush3.msra.mxu1 %v29863_v23  ;;  %28182 = vmatprep.subr.mxu0 %v34641_v3 }
0x2767   :  { %28221 = vmatprep.subr.mxu1 %v34641_v3  ;;  %28183 = vmatpush3.msra.mxu0 %v29843_v4 }
0x2768   :  { %28222 = vmatpush3.msra.mxu1 %v29874_v29  ;;  %28184 = vmatprep.subr.mxu0 %v34641_v3 }
0x2769   :  { %28223 = vmatprep.subr.mxu1 %v34641_v3  ;;  %28185 = vmatpush3.msra.mxu0 %v29857_v19 }
0x276a   :  { %28224 = vmatpush3.msra.mxu1 %v29889_v35  ;;  %28186 = vmatprep.subr.mxu0 %v34641_v3 }
0x276b   :  { %28225 = vmatprep.subr.mxu1 %v34641_v3  ;;  %28187 = vmatpush3.msra.mxu0 %v29872_v28 }
0x276c   :  { %28226 = vmatpush3.msra.mxu1 %v29906_v51  ;;  %28188 = vmatprep.subr.mxu0 %v34641_v3 }
0x276d   :  { %28227 = vmatprep.subr.mxu1 %v34641_v3  ;;  %28189 = vmatpush3.msra.mxu0 %v29894_v37 }
0x276e   :  { %28228 = vmatpush3.msra.mxu1 %v29922_v16  ;;  %28190 = vmatprep.subr.mxu0 %v34641_v3 }
0x276f   :  { %28229 = vmatprep.subr.mxu1 %v34641_v3  ;;  %28191 = vmatpush3.msra.mxu0 %v29901_v47 }
0x2770   :  { %28230 = vmatpush3.msra.mxu1 %v29941_v53  ;;  %28192 = vmatprep.subr.mxu0 %v34641_v3 }
0x2771   :  { %28231 = vmatprep.subr.mxu1 %v34641_v3  ;;  %28193 = vmatpush3.msra.mxu0 %v35021_v25 }
0x2772   :  { %28232 = vmatpush3.msra.mxu1 %v29952_v57  ;;  %28194 = vmatprep.subr.mxu0 %v34641_v3 }
0x2773   :  { %28233 = vmatprep.subr.mxu1 %v34641_v3  ;;  %28195 = vmatpush3.msra.mxu0 %v35022_v38 }
0x2774   :  { %28234 = vmatpush3.msra.mxu1 %v29968_v12  ;;  %28196 = vmatprep.subr.mxu0 %v34641_v3 }
0x2775   :  { %28235 = vmatprep.subr.mxu1 %v34641_v3  ;;  %28197 = vmatpush3.msra.mxu0 %v35023_v7 }
0x2776   :  { %28236 = vmatpush3.msra.mxu1 %v29985_v17  ;;  %28198 = vmatprep.subr.mxu0 %v34641_v3 }
0x2777   :  { %28237 = vmatprep.subr.mxu1 %v34641_v3  ;;  %28199 = vmatpush3.msra.mxu0 %v35024_v46 }
0x2778   :  { %28238 = vmatpush3.msra.mxu1 %v30001_v62  ;;  %28239 = vmatprep.mubr.msk.f32.mxu1 %vm29465_vm0, %v34641_v3 }
0x2779   :  { %28200 = vmatprep.subr.mxu0 %v34641_v3  ;;  %28240 = vmatmul.mubr.f32.vlgmr.msra.gmra.mxu1 %v33521_v42 }
0x277a   :  { %28201 = vmatpush3.msra.mxu0 %v35025_v18  ;;  %28208 = vmatprep.mubr.msk.f32.mxu0 %vm29465_vm0, %v34641_v3 }
0x277b   :  { %28202 = vmatprep.subr.mxu0 %v34641_v3  ;;  %28249 = vmatprep.subr.mxu1 %v34641_v3 }
0x277c   :  { %28203 = vmatpush3.msra.mxu0 %v35026_v15  ;;  %28250 = vmatpush3.msra.mxu1 %v35005_v14 }
0x277d   :  { %28204 = vmatprep.subr.mxu0 %v34641_v3  ;;  %28251 = vmatprep.subr.mxu1 %v34641_v3 }
0x277e   :  { %28205 = vmatpush3.msra.mxu0 %v35027_v50  ;;  %28252 = vmatpush3.msra.mxu1 %v35006_v11  ;;  %v35031_v11 = vld [vmem:[#allocation67_spill] sm:$0xff] }
0x277f   :  { %28206 = vmatprep.subr.mxu0 %v34641_v3  ;;  %28253 = vmatprep.mubr.msk.f32.mxu1 %vm29465_vm0, %v34641_v3 }
0x2780   :  { %28207 = vmatpush3.msra.mxu0 %v35028_v8  ;;  %28263 = vmatprep.subr.mxu1 %v34641_v3 }
0x2781   :  { %28209 = vmatmul.mubr.f32.vlgmr.msra.gmra.mxu0 %v33521_v42  ;;  %28242 = vmatprep.subr.mxu0 %v34641_v3 }
0x2782   :  { %28243 = vmatpush3.msra.mxu0 %v35029_v27  ;;  %28246 = vmatprep.mubr.msk.f32.mxu0 %vm29465_vm0, %v34641_v3 }
0x2783   :  { %28244 = vmatprep.subr.mxu0 %v34641_v3 }
0x2784   :  { %28245 = vmatpush3.msra.mxu0 %v35030_v32 }
0x2785   :  { %28256 = vmatprep.subr.mxu0 %v34641_v3 }
0x27ff   :  { %v18793_v59 = vpop.f32.mrf.mxu1 }
0x2801   :  { %v28117_v1 = vpop.f32.mrf.mxu1 }
0x2807   :  { %v18652_v49 = vpop.f32.mrf.mxu0 }
0x2808   :  { %v18794_v0 = vadd.f32 %v18793_v59, %v18652_v49 }
0x2809   :  { %v28086_v41 = vpop.f32.mrf.mxu0 }
0x281b   :  { %v18980_v2 = vpop.f32.mrf.mxu1 }
0x281d   :  { %v28179_v31 = vpop.f32.mrf.mxu1 }
0x281e   :  { %v35033_v31 = vld [vmem:[#allocation30_spill] sm:$0xff] }
0x2824   :  { %v18893_v30 = vpop.f32.mrf.mxu0 }
0x2825   :  { %v18894_v42 = vadd.f32 %v18893_v30, %v18794_v0  ;;  %v35034_v30 = vld [vmem:[#allocation35_spill] sm:$0xff]  ;;  %v35037_v0 = vld [vmem:[#allocation36_spill] sm:$0xff] }
0x2826   :  { %v28148_v45 = vpop.f32.mrf.mxu0 }
0x2827   :  { %v18981_v21 = vadd.f32 %v18980_v2, %v18894_v42  ;;  %v35032_v2 = vld [vmem:[#allocation28_spill] sm:$0xff]  ;;  %v35035_v45 = vld [vmem:[#allocation31_spill] sm:$0xff] }
0x2828   :  { %v35040_v42 = vld [vmem:[#allocation40_spill] sm:$0xff] }
0x2839   :  { %v19178_v36 = vpop.f32.mrf.mxu1 }
0x283b   :  { %v28241_v63 = vpop.f32.mrf.mxu1 }
0x283c   :  { %v35038_v63 = vld [vmem:[#allocation37_spill] sm:$0xff] }
0x2841   :  { %v19093_v13 = vpop.f32.mrf.mxu0 }
0x2842   :  { %v19094_v24 = vadd.f32 %v19093_v13, %v18981_v21  ;;  %v35041_v21 = vld [vmem:[#allocation41_spill] sm:$0xff]  ;;  %v35042_v13 = vld [vmem:[#allocation43_spill] sm:$0xff] }
0x2843   :  { %v28210_v43 = vpop.f32.mrf.mxu0 }
0x2844   :  { %v33664_v8 = vadd.f32 %v19178_v36, %v19094_v24  ;;  %v35036_v36 = vld [vmem:[#allocation32_spill] sm:$0xff]  ;;  %v35043_v24 = vld [vmem:[#allocation45_spill] sm:$0xff]  ;;  %v35044_v43 = vld [vmem:[#allocation47_spill] sm:$0xff] }
0x2846   :  { %v19182_v50 = vadd.f32 %v33664_v8, %v35031_v11 }
0x2848   :  { %v19184_v1 = vsel %vm72_vm2, %v19182_v50, 0 }
0x2849   :  { %v19253_v41 = vand.u32 4294901760, %v19184_v1 }
0x284b   :  { %v19254_v14 = vsub.f32 %v19184_v1, %v19253_v41  ;;  %28254 = vmatmul.mubr.f32.vlgmr.msra.gmra.mxu1 %v19253_v41  ;;  %v35045_v1 = vld [vmem:[#allocation50_spill] sm:$0xff] }
0x284c   :  { %28264 = vmatpush3.msra.mxu1 %v35029_v27  ;;  %28267 = vmatprep.mubr.msk.f32.mxu1 %vm29465_vm0, %v34641_v3 }
0x284d   :  { %v19255_v59 = vand.u32 4294901760, %v19254_v14  ;;  %28265 = vmatprep.subr.mxu1 %v34641_v3 }
0x284e   :  { %28266 = vmatpush3.msra.mxu1 %v35030_v32 }
0x284f   :  { %v19256_v49 = vsub.f32 %v19254_v14, %v19255_v59  ;;  %28268 = vmatmul.mubr.f32.vlgmr.msra.gmra.mxu1 %v19255_v59  ;;  %28277 = vmatprep.subr.mxu1 %v34641_v3  ;;  %v35047_v59 = vld [vmem:[#allocation53_spill] sm:$0xff] }
0x2850   :  { %28278 = vmatpush3.msra.mxu1 %v35029_v27  ;;  %28281 = vmatprep.mubr.msk.f32.mxu1 %vm29465_vm0, %v34641_v3 }
0x2851   :  { %28279 = vmatprep.subr.mxu1 %v34641_v3  ;;  %v19257_v50 = vand.u32 4294901760, %v19256_v49  ;;  %v35048_v49 = vld [vmem:[#allocation55_spill] sm:$0xff] }
0x2852   :  { %28280 = vmatpush3.msra.mxu1 %v35030_v32 }
0x2853   :  { %28247 = vmatmul.mubr.f32.vlgmr.msra.gmra.mxu0 %v19257_v50  ;;  %28282 = vmatmul.mubr.f32.vlgmr.msra.gmra.mxu1 %v19253_v41  ;;  %v35049_v50 = vld [vmem:[#allocation56_spill] sm:$0xff] }
0x2854   :  { %28257 = vmatpush3.msra.mxu0 %v35032_v2  ;;  %28260 = vmatprep.mubr.msk.f32.mxu0 %vm29465_vm0, %v34641_v3 }
0x2855   :  { %28258 = vmatprep.subr.mxu0 %v34641_v3  ;;  %28315 = vmatprep.subr.mxu1 %v34641_v3 }
0x2856   :  { %28259 = vmatpush3.msra.mxu0 %v35033_v31  ;;  %28316 = vmatpush3.msra.mxu1 %v35034_v30 }
0x2857   :  { %28270 = vmatprep.subr.mxu0 %v34641_v3  ;;  %28261 = vmatmul.mubr.f32.vlgmr.msra.gmra.mxu0 %v19254_v14  ;;  %v35039_v14 = vld [vmem:[#allocation38_spill] sm:$0xff] }
0x2858   :  { %28271 = vmatpush3.msra.mxu0 %v35035_v45  ;;  %28274 = vmatprep.mubr.msk.f32.mxu0 %vm29465_vm0, %v34641_v3 }
0x2859   :  { %28272 = vmatprep.subr.mxu0 %v34641_v3  ;;  %28317 = vmatprep.subr.mxu1 %v34641_v3 }
0x285a   :  { %28273 = vmatpush3.msra.mxu0 %v35036_v36  ;;  %28318 = vmatpush3.msra.mxu1 %v35037_v0 }
0x285b   :  { %28275 = vmatmul.mubr.f32.vlgmr.msra.gmra.mxu0 %v19253_v41  ;;  %28319 = vmatprep.subr.mxu1 %v34641_v3  ;;  %v35046_v41 = vld [vmem:[#allocation51_spill] sm:$0xff] }
0x285c   :  { %28320 = vmatpush3.msra.mxu1 %v35038_v63  ;;  %28284 = vmatprep.subr.mxu0 %v34641_v3 }
0x285d   :  { %28321 = vmatprep.subr.mxu1 %v34641_v3  ;;  %28285 = vmatpush3.msra.mxu0 %v29821_v52 }
0x285e   :  { %28322 = vmatpush3.msra.mxu1 %v35039_v14  ;;  %28286 = vmatprep.subr.mxu0 %v34641_v3 }
0x285f   :  { %28323 = vmatprep.subr.mxu1 %v34641_v3  ;;  %28287 = vmatpush3.msra.mxu0 %v29826_v55 }
0x2860   :  { %28324 = vmatpush3.msra.mxu1 %v35040_v42  ;;  %28288 = vmatprep.subr.mxu0 %v34641_v3 }
0x2861   :  { %28325 = vmatprep.subr.mxu1 %v34641_v3  ;;  %28289 = vmatpush3.msra.mxu0 %v29836_v58 }
0x2862   :  { %28326 = vmatpush3.msra.mxu1 %v35041_v21  ;;  %28290 = vmatprep.subr.mxu0 %v34641_v3 }
0x2863   :  { %28327 = vmatprep.subr.mxu1 %v34641_v3  ;;  %28291 = vmatpush3.msra.mxu0 %v29848_v6 }
0x2864   :  { %28328 = vmatpush3.msra.mxu1 %v35042_v13  ;;  %28292 = vmatprep.subr.mxu0 %v34641_v3 }
0x2865   :  { %28329 = vmatprep.subr.mxu1 %v34641_v3  ;;  %28293 = vmatpush3.msra.mxu0 %v29863_v23 }
0x2866   :  { %28330 = vmatpush3.msra.mxu1 %v35043_v24  ;;  %28294 = vmatprep.subr.mxu0 %v34641_v3 }
0x2867   :  { %28331 = vmatprep.subr.mxu1 %v34641_v3  ;;  %28295 = vmatpush3.msra.mxu0 %v29874_v29 }
0x2868   :  { %28332 = vmatpush3.msra.mxu1 %v35044_v43  ;;  %28296 = vmatprep.subr.mxu0 %v34641_v3 }
0x2869   :  { %28333 = vmatprep.subr.mxu1 %v34641_v3  ;;  %28297 = vmatpush3.msra.mxu0 %v29889_v35 }
0x286a   :  { %28334 = vmatpush3.msra.mxu1 %v35045_v1  ;;  %28298 = vmatprep.subr.mxu0 %v34641_v3 }
0x286b   :  { %28335 = vmatprep.subr.mxu1 %v34641_v3  ;;  %28299 = vmatpush3.msra.mxu0 %v29906_v51 }
0x286c   :  { %28336 = vmatpush3.msra.mxu1 %v35046_v41  ;;  %28300 = vmatprep.subr.mxu0 %v34641_v3 }
0x286d   :  { %28337 = vmatprep.subr.mxu1 %v34641_v3  ;;  %28301 = vmatpush3.msra.mxu0 %v29922_v16 }
0x286e   :  { %28338 = vmatpush3.msra.mxu1 %v35047_v59  ;;  %28302 = vmatprep.subr.mxu0 %v34641_v3 }
0x286f   :  { %28339 = vmatprep.subr.mxu1 %v34641_v3  ;;  %28303 = vmatpush3.msra.mxu0 %v29941_v53 }
0x2870   :  { %28340 = vmatpush3.msra.mxu1 %v35048_v49  ;;  %28304 = vmatprep.subr.mxu0 %v34641_v3 }
0x2871   :  { %28341 = vmatprep.subr.mxu1 %v34641_v3  ;;  %28343 = vmatprep.mubr.msk.f32.mxu1 %vm29465_vm0, %v34641_v3 }
0x2872   :  { %28342 = vmatpush3.msra.mxu1 %v35049_v50  ;;  %28305 = vmatpush3.msra.mxu0 %v29952_v57 }
0x2873   :  { %28377 = vmatprep.subr.mxu1 %v34641_v3  ;;  %28306 = vmatprep.subr.mxu0 %v34641_v3 }
0x2874   :  { %28307 = vmatpush3.msra.mxu0 %v29968_v12  ;;  %28312 = vmatprep.mubr.msk.f32.mxu0 %vm29465_vm0, %v34641_v3 }
0x2875   :  { %28308 = vmatprep.subr.mxu0 %v34641_v3 }
0x2876   :  { %28309 = vmatpush3.msra.mxu0 %v29985_v17 }
0x2877   :  { %28310 = vmatprep.subr.mxu0 %v34641_v3 }
0x2878   :  { %28311 = vmatpush3.msra.mxu0 %v30001_v62 }
0x2879   :  { %28346 = vmatprep.subr.mxu0 %v34641_v3 }
0x290b   :  { %v19340_v50 = vpop.f32.mrf.mxu1 }
0x290d   :  { %v28255_v49 = vpop.f32.mrf.mxu1 }
0x290f   :  { %v19491_v59 = vpop.f32.mrf.mxu1 }
0x2911   :  { %v28269_v41 = vpop.f32.mrf.mxu1 }
0x2913   :  { %v19259_v1 = vpop.f32.mrf.mxu0  ;;  %v19641_v43 = vpop.f32.mrf.mxu1 }
0x2914   :  { %v19341_v21 = vadd.f32 %v19340_v50, %v19259_v1 }
0x2915   :  { %v28248_v24 = vpop.f32.mrf.mxu0  ;;  %v28283_v13 = vpop.f32.mrf.mxu1 }
0x2917   :  { %v19416_v42 = vpop.f32.mrf.mxu0 }
0x2918   :  { %v19417_v14 = vadd.f32 %v19416_v42, %v19341_v21 }
0x2919   :  { %v28262_v63 = vpop.f32.mrf.mxu0 }
0x291a   :  { %v19492_v0 = vadd.f32 %v19491_v59, %v19417_v14 }
0x291b   :  { %v19568_v36 = vpop.f32.mrf.mxu0 }
0x291c   :  { %v19569_v45 = vadd.f32 %v19568_v36, %v19492_v0  ;;  %v35053_v0 = vld [vmem:[#allocation54_spill] sm:$0xff] }
0x291d   :  { %v28276_v30 = vpop.f32.mrf.mxu0 }
0x291e   :  { %v19642_v31 = vadd.f32 %v19641_v43, %v19569_v45  ;;  %v35051_v30 = vld [vmem:[#allocation52_spill] sm:$0xff]  ;;  %v35052_v45 = vld [vmem:[#allocation34_spill] sm:$0xff] }
0x2920   :  { %v19645_v2 = vmul.f32 %v19642_v31, %v33517_v20  ;;  %v35050_v31 = vld [vmem:[#allocation33_spill] sm:$0xff] }
0x2922   :  { %v19647_v11 = vsel %vm1947_vm8, %v19645_v2, 0 }
0x2923   :  { %v33755_v49 = vand.u32 4294901760, %v19647_v11 }
0x2925   :  { %v33758_v41 = vsub.f32 %v19647_v11, %v33755_v49  ;;  %28344 = vmatmul.mubr.f32.vlgmr.msra.gmra.mxu1 %v33755_v49 }
0x2926   :  { %28378 = vmatpush3.msra.mxu1 %v29821_v52  ;;  %28405 = vmatprep.mubr.msk.f32.mxu1 %vm29465_vm0, %v34641_v3 }
0x2927   :  { %v19730_v36 = vand.u32 4294901760, %v33758_v41  ;;  %28379 = vmatprep.subr.mxu1 %v34641_v3 }
0x2928   :  { %28380 = vmatpush3.msra.mxu1 %v29826_v55 }
0x2929   :  { %v19731_v2 = vsub.f32 %v33758_v41, %v19730_v36  ;;  %28381 = vmatprep.subr.mxu1 %v34641_v3 }
0x292a   :  { %28382 = vmatpush3.msra.mxu1 %v29836_v58 }
0x292b   :  { %28383 = vmatprep.subr.mxu1 %v34641_v3  ;;  %v19732_v11 = vand.u32 4294901760, %v19731_v2 }
0x292c   :  { %28384 = vmatpush3.msra.mxu1 %v29848_v6 }
0x292d   :  { %28385 = vmatprep.subr.mxu1 %v34641_v3  ;;  %28313 = vmatmul.mubr.f32.vlgmr.msra.gmra.mxu0 %v19732_v11 }
0x292e   :  { %28347 = vmatpush3.msra.mxu0 %v29824_v54  ;;  %28386 = vmatpush3.msra.mxu1 %v29863_v23 }
0x292f   :  { %28348 = vmatprep.subr.mxu0 %v34641_v3  ;;  %28387 = vmatprep.subr.mxu1 %v34641_v3 }
0x2930   :  { %28349 = vmatpush3.msra.mxu0 %v29834_v56  ;;  %28388 = vmatpush3.msra.mxu1 %v29874_v29 }
0x2931   :  { %28350 = vmatprep.subr.mxu0 %v34641_v3  ;;  %28389 = vmatprep.subr.mxu1 %v34641_v3 }
0x2932   :  { %28351 = vmatpush3.msra.mxu0 %v29846_v5  ;;  %28390 = vmatpush3.msra.mxu1 %v29889_v35 }
0x2933   :  { %28352 = vmatprep.subr.mxu0 %v34641_v3  ;;  %28391 = vmatprep.subr.mxu1 %v34641_v3 }
0x2934   :  { %28353 = vmatpush3.msra.mxu0 %v29860_v22  ;;  %28392 = vmatpush3.msra.mxu1 %v29906_v51 }
0x2935   :  { %28354 = vmatprep.subr.mxu0 %v34641_v3  ;;  %28393 = vmatprep.subr.mxu1 %v34641_v3 }
0x2936   :  { %28355 = vmatpush3.msra.mxu0 %v29878_v10  ;;  %28394 = vmatpush3.msra.mxu1 %v29922_v16 }
0x2937   :  { %28356 = vmatprep.subr.mxu0 %v34641_v3  ;;  %28395 = vmatprep.subr.mxu1 %v34641_v3 }
0x2938   :  { %28357 = vmatpush3.msra.mxu0 %v29887_v34  ;;  %28396 = vmatpush3.msra.mxu1 %v29941_v53 }
0x2939   :  { %28358 = vmatprep.subr.mxu0 %v34641_v3  ;;  %28397 = vmatprep.subr.mxu1 %v34641_v3 }
0x293a   :  { %28359 = vmatpush3.msra.mxu0 %v29904_v48  ;;  %28398 = vmatpush3.msra.mxu1 %v29952_v57 }
0x293b   :  { %28360 = vmatprep.subr.mxu0 %v34641_v3  ;;  %28399 = vmatprep.subr.mxu1 %v34641_v3 }
0x293c   :  { %28361 = vmatpush3.msra.mxu0 %v29920_v9  ;;  %28400 = vmatpush3.msra.mxu1 %v29968_v12 }
0x293d   :  { %28362 = vmatprep.subr.mxu0 %v34641_v3  ;;  %28401 = vmatprep.subr.mxu1 %v34641_v3 }
0x293e   :  { %28363 = vmatpush3.msra.mxu0 %v29937_v39  ;;  %28402 = vmatpush3.msra.mxu1 %v29985_v17 }
0x293f   :  { %28364 = vmatprep.subr.mxu0 %v34641_v3  ;;  %28403 = vmatprep.subr.mxu1 %v34641_v3 }
0x2940   :  { %28365 = vmatpush3.msra.mxu0 %v29957_v40  ;;  %28404 = vmatpush3.msra.mxu1 %v30001_v62 }
0x2941   :  { %28366 = vmatprep.subr.mxu0 %v34641_v3  ;;  %28406 = vmatmul.mubr.f32.vlgmr.msra.gmra.mxu1 %v19730_v36 }
0x2942   :  { %28439 = vmatprep.subr.mxu1 %v34641_v3  ;;  %28367 = vmatpush3.msra.mxu0 %v29966_v44 }
0x2943   :  { %28440 = vmatpush3.msra.mxu1 %v29821_v52  ;;  %28368 = vmatprep.subr.mxu0 %v34641_v3 }
0x2944   :  { %28441 = vmatprep.subr.mxu1 %v34641_v3  ;;  %28369 = vmatpush3.msra.mxu0 %v29983_v26 }
0x2945   :  { %28442 = vmatpush3.msra.mxu1 %v29826_v55  ;;  %28370 = vmatprep.subr.mxu0 %v34641_v3 }
0x2946   :  { %28443 = vmatprep.subr.mxu1 %v34641_v3  ;;  %28371 = vmatpush3.msra.mxu0 %v29999_v61 }
0x2947   :  { %28444 = vmatpush3.msra.mxu1 %v29836_v58  ;;  %28372 = vmatprep.subr.mxu0 %v34641_v3 }
0x2948   :  { %28445 = vmatprep.subr.mxu1 %v34641_v3  ;;  %28373 = vmatpush3.msra.mxu0 %v30017_v33 }
0x2949   :  { %28374 = vmatprep.mubr.msk.f32.mxu0 %vm29465_vm0, %v34641_v3  ;;  %28446 = vmatpush3.msra.mxu1 %v29848_v6 }
0x294a   :  { %28375 = vmatmul.mubr.f32.vlgmr.msra.gmra.mxu0 %v33758_v41  ;;  %28408 = vmatprep.subr.mxu0 %v34641_v3 }
0x294b   :  { %28447 = vmatprep.subr.mxu1 %v34641_v3  ;;  %28409 = vmatpush3.msra.mxu0 %v29831_v60 }
0x294c   :  { %28448 = vmatpush3.msra.mxu1 %v29863_v23  ;;  %28410 = vmatprep.subr.mxu0 %v34641_v3 }
0x294d   :  { %28449 = vmatprep.subr.mxu1 %v34641_v3  ;;  %28411 = vmatpush3.msra.mxu0 %v29843_v4 }
0x294e   :  { %28450 = vmatpush3.msra.mxu1 %v29874_v29  ;;  %28412 = vmatprep.subr.mxu0 %v34641_v3 }
0x294f   :  { %28451 = vmatprep.subr.mxu1 %v34641_v3  ;;  %28413 = vmatpush3.msra.mxu0 %v29857_v19 }
0x2950   :  { %28452 = vmatpush3.msra.mxu1 %v29889_v35  ;;  %28414 = vmatprep.subr.mxu0 %v34641_v3 }
0x2951   :  { %28453 = vmatprep.subr.mxu1 %v34641_v3  ;;  %28415 = vmatpush3.msra.mxu0 %v29872_v28 }
0x2952   :  { %28454 = vmatpush3.msra.mxu1 %v29906_v51  ;;  %28416 = vmatprep.subr.mxu0 %v34641_v3 }
0x2953   :  { %28455 = vmatprep.subr.mxu1 %v34641_v3  ;;  %28417 = vmatpush3.msra.mxu0 %v29894_v37 }
0x2954   :  { %28456 = vmatpush3.msra.mxu1 %v29922_v16  ;;  %28418 = vmatprep.subr.mxu0 %v34641_v3 }
0x2955   :  { %28457 = vmatprep.subr.mxu1 %v34641_v3  ;;  %28419 = vmatpush3.msra.mxu0 %v29901_v47 }
0x2956   :  { %28458 = vmatpush3.msra.mxu1 %v29941_v53  ;;  %28420 = vmatprep.subr.mxu0 %v34641_v3 }
0x2957   :  { %28459 = vmatprep.subr.mxu1 %v34641_v3  ;;  %28421 = vmatpush3.msra.mxu0 %v35021_v25 }
0x2958   :  { %28460 = vmatpush3.msra.mxu1 %v29952_v57  ;;  %28422 = vmatprep.subr.mxu0 %v34641_v3 }
0x2959   :  { %28461 = vmatprep.subr.mxu1 %v34641_v3  ;;  %28423 = vmatpush3.msra.mxu0 %v35022_v38 }
0x295a   :  { %28462 = vmatpush3.msra.mxu1 %v29968_v12  ;;  %28424 = vmatprep.subr.mxu0 %v34641_v3 }
0x295b   :  { %28463 = vmatprep.subr.mxu1 %v34641_v3  ;;  %28425 = vmatpush3.msra.mxu0 %v35023_v7 }
0x295c   :  { %28464 = vmatpush3.msra.mxu1 %v29985_v17  ;;  %28426 = vmatprep.subr.mxu0 %v34641_v3 }
0x295d   :  { %28465 = vmatprep.subr.mxu1 %v34641_v3  ;;  %28427 = vmatpush3.msra.mxu0 %v35024_v46 }
0x295e   :  { %28466 = vmatpush3.msra.mxu1 %v30001_v62  ;;  %28467 = vmatprep.mubr.msk.f32.mxu1 %vm29465_vm0, %v34641_v3 }
0x295f   :  { %28428 = vmatprep.subr.mxu0 %v34641_v3  ;;  %28468 = vmatmul.mubr.f32.vlgmr.msra.gmra.mxu1 %v33755_v49 }
0x2960   :  { %28429 = vmatpush3.msra.mxu0 %v35025_v18  ;;  %28436 = vmatprep.mubr.msk.f32.mxu0 %vm29465_vm0, %v34641_v3 }
0x2961   :  { %28430 = vmatprep.subr.mxu0 %v34641_v3  ;;  %28477 = vmatprep.subr.mxu1 %v34641_v3 }
0x2962   :  { %28431 = vmatpush3.msra.mxu0 %v35026_v15  ;;  %28478 = vmatpush3.msra.mxu1 %v35050_v31  ;;  %v35054_v15 = vld [vmem:[#allocation67_spill] sm:$0xff] }
0x2963   :  { %28432 = vmatprep.subr.mxu0 %v34641_v3  ;;  %28479 = vmatprep.subr.mxu1 %v34641_v3 }
0x2964   :  { %28433 = vmatpush3.msra.mxu0 %v35051_v30  ;;  %28480 = vmatpush3.msra.mxu1 %v35052_v45 }
0x2965   :  { %28434 = vmatprep.subr.mxu0 %v34641_v3  ;;  %28481 = vmatprep.mubr.msk.f32.mxu1 %vm29465_vm0, %v34641_v3 }
0x2966   :  { %28435 = vmatpush3.msra.mxu0 %v35053_v0  ;;  %28491 = vmatprep.subr.mxu1 %v34641_v3 }
0x2967   :  { %28437 = vmatmul.mubr.f32.vlgmr.msra.gmra.mxu0 %v33755_v49  ;;  %28470 = vmatprep.subr.mxu0 %v34641_v3 }
0x2968   :  { %28471 = vmatpush3.msra.mxu0 %v35029_v27  ;;  %28474 = vmatprep.mubr.msk.f32.mxu0 %vm29465_vm0, %v34641_v3 }
0x2969   :  { %28472 = vmatprep.subr.mxu0 %v34641_v3 }
0x296a   :  { %28473 = vmatpush3.msra.mxu0 %v35030_v32 }
0x296b   :  { %28484 = vmatprep.subr.mxu0 %v34641_v3 }
0x29e5   :  { %v19875_v63 = vpop.f32.mrf.mxu1 }
0x29e7   :  { %v28345_v14 = vpop.f32.mrf.mxu1 }
0x29ed   :  { %v19734_v42 = vpop.f32.mrf.mxu0 }
0x29ee   :  { %v19735_v59 = vadd.f32 %v19734_v42, %v33664_v8  ;;  %v35059_v42 = vld [vmem:[#allocation32_spill] sm:$0xff] }
0x29ef   :  { %v28314_v21 = vpop.f32.mrf.mxu0 }
0x29f0   :  { %v19876_v49 = vadd.f32 %v19875_v63, %v19735_v59  ;;  %v35058_v63 = vld [vmem:[#allocation31_spill] sm:$0xff]  ;;  %v35062_v59 = vld [vmem:[#allocation38_spill] sm:$0xff] }
0x2a01   :  { %v20062_v13 = vpop.f32.mrf.mxu1 }
0x2a03   :  { %v28407_v24 = vpop.f32.mrf.mxu1 }
0x2a0a   :  { %v19975_v43 = vpop.f32.mrf.mxu0 }
0x2a0b   :  { %v19976_v36 = vadd.f32 %v19975_v43, %v19876_v49  ;;  %v35061_v43 = vld [vmem:[#allocation37_spill] sm:$0xff] }
0x2a0c   :  { %v28376_v1 = vpop.f32.mrf.mxu0  ;;  %v35064_v49 = vld [vmem:[#allocation41_spill] sm:$0xff] }
0x2a0d   :  { %v20063_v2 = vadd.f32 %v20062_v13, %v19976_v36  ;;  %v35060_v13 = vld [vmem:[#allocation36_spill] sm:$0xff]  ;;  %v35066_v36 = vld [vmem:[#allocation45_spill] sm:$0xff] }
0x2a1f   :  { %v20260_v50 = vpop.f32.mrf.mxu1 }
0x2a21   :  { %v28469_v41 = vpop.f32.mrf.mxu1 }
0x2a22   :  { %v35065_v41 = vld [vmem:[#allocation43_spill] sm:$0xff] }
0x2a27   :  { %v20175_v11 = vpop.f32.mrf.mxu0 }
0x2a28   :  { %v20176_v0 = vadd.f32 %v20175_v11, %v20063_v2  ;;  %v35067_v2 = vld [vmem:[#allocation47_spill] sm:$0xff]  ;;  %v35068_v11 = vld [vmem:[#allocation50_spill] sm:$0xff] }
0x2a29   :  { %v28438_v45 = vpop.f32.mrf.mxu0 }
0x2a2a   :  { %v20261_v30 = vadd.f32 %v20260_v50, %v20176_v0  ;;  %v35056_v45 = vld [vmem:[#allocation30_spill] sm:$0xff]  ;;  %v35057_v0 = vld [vmem:[#allocation35_spill] sm:$0xff]  ;;  %v35063_v50 = vld [vmem:[#allocation40_spill] sm:$0xff] }
0x2a2c   :  { %v20264_v31 = vmul.f32 0.5, %v20261_v30  ;;  %v35055_v30 = vld [vmem:[#allocation28_spill] sm:$0xff] }
0x2a2e   :  { %v33900_v14 = vadd.f32 %v20264_v31, %v35054_v15 }
0x2a30   :  { %v20267_v21 = vsel %vm72_vm2, %v33900_v14, 0 }
0x2a31   :  { %v20336_v24 = vand.u32 4294901760, %v20267_v21 }
0x2a33   :  { %v20337_v1 = vsub.f32 %v20267_v21, %v20336_v24  ;;  %28482 = vmatmul.mubr.f32.vlgmr.msra.gmra.mxu1 %v20336_v24  ;;  %v35069_v21 = vld [vmem:[#allocation51_spill] sm:$0xff] }
0x2a34   :  { %28492 = vmatpush3.msra.mxu1 %v35029_v27  ;;  %28495 = vmatprep.mubr.msk.f32.mxu1 %vm29465_vm0, %v34641_v3 }
0x2a35   :  { %28493 = vmatprep.subr.mxu1 %v34641_v3  ;;  %v20338_v8 = vand.u32 4294901760, %v20337_v1 }
0x2a36   :  { %28494 = vmatpush3.msra.mxu1 %v35030_v32 }
0x2a37   :  { %28496 = vmatmul.mubr.f32.vlgmr.msra.gmra.mxu1 %v20338_v8  ;;  %28505 = vmatprep.subr.mxu1 %v34641_v3  ;;  %v20339_v15 = vsub.f32 %v20337_v1, %v20338_v8  ;;  %v35072_v8 = vld [vmem:[#allocation56_spill] sm:$0xff] }
0x2a38   :  { %28506 = vmatpush3.msra.mxu1 %v35029_v27  ;;  %28509 = vmatprep.mubr.msk.f32.mxu1 %vm29465_vm0, %v34641_v3 }
0x2a39   :  { %28507 = vmatprep.subr.mxu1 %v34641_v3  ;;  %v20340_v31 = vand.u32 4294901760, %v20339_v15 }
0x2a3a   :  { %28508 = vmatpush3.msra.mxu1 %v35030_v32 }
0x2a3b   :  { %28475 = vmatmul.mubr.f32.vlgmr.msra.gmra.mxu0 %v20340_v31  ;;  %28510 = vmatmul.mubr.f32.vlgmr.msra.gmra.mxu1 %v20336_v24 }
0x2a3c   :  { %28485 = vmatpush3.msra.mxu0 %v35055_v30  ;;  %28488 = vmatprep.mubr.msk.f32.mxu0 %vm29465_vm0, %v34641_v3 }
0x2a3d   :  { %28486 = vmatprep.subr.mxu0 %v34641_v3  ;;  %28543 = vmatprep.subr.mxu1 %v34641_v3 }
0x2a3e   :  { %28487 = vmatpush3.msra.mxu0 %v35056_v45  ;;  %28544 = vmatpush3.msra.mxu1 %v35057_v0 }
0x2a3f   :  { %28498 = vmatprep.subr.mxu0 %v34641_v3  ;;  %28489 = vmatmul.mubr.f32.vlgmr.msra.gmra.mxu0 %v20337_v1  ;;  %v35071_v1 = vld [vmem:[#allocation55_spill] sm:$0xff] }
0x2a40   :  { %28499 = vmatpush3.msra.mxu0 %v35058_v63  ;;  %28502 = vmatprep.mubr.msk.f32.mxu0 %vm29465_vm0, %v34641_v3 }
0x2a41   :  { %28500 = vmatprep.subr.mxu0 %v34641_v3  ;;  %28545 = vmatprep.subr.mxu1 %v34641_v3 }
0x2a42   :  { %28501 = vmatpush3.msra.mxu0 %v35059_v42  ;;  %28546 = vmatpush3.msra.mxu1 %v35060_v13 }
0x2a43   :  { %28503 = vmatmul.mubr.f32.vlgmr.msra.gmra.mxu0 %v20336_v24  ;;  %28547 = vmatprep.subr.mxu1 %v34641_v3  ;;  %v35070_v24 = vld [vmem:[#allocation53_spill] sm:$0xff] }
0x2a44   :  { %28548 = vmatpush3.msra.mxu1 %v35061_v43  ;;  %28512 = vmatprep.subr.mxu0 %v34641_v3 }
0x2a45   :  { %28549 = vmatprep.subr.mxu1 %v34641_v3  ;;  %28513 = vmatpush3.msra.mxu0 %v29821_v52 }
0x2a46   :  { %28550 = vmatpush3.msra.mxu1 %v35062_v59  ;;  %28514 = vmatprep.subr.mxu0 %v34641_v3 }
0x2a47   :  { %28551 = vmatprep.subr.mxu1 %v34641_v3  ;;  %28515 = vmatpush3.msra.mxu0 %v29826_v55 }
0x2a48   :  { %28552 = vmatpush3.msra.mxu1 %v35063_v50  ;;  %28516 = vmatprep.subr.mxu0 %v34641_v3 }
0x2a49   :  { %28553 = vmatprep.subr.mxu1 %v34641_v3  ;;  %28517 = vmatpush3.msra.mxu0 %v29836_v58 }
0x2a4a   :  { %28554 = vmatpush3.msra.mxu1 %v35064_v49  ;;  %28518 = vmatprep.subr.mxu0 %v34641_v3 }
0x2a4b   :  { %28555 = vmatprep.subr.mxu1 %v34641_v3  ;;  %28519 = vmatpush3.msra.mxu0 %v29848_v6 }
0x2a4c   :  { %28556 = vmatpush3.msra.mxu1 %v35065_v41  ;;  %28520 = vmatprep.subr.mxu0 %v34641_v3 }
0x2a4d   :  { %28557 = vmatprep.subr.mxu1 %v34641_v3  ;;  %28521 = vmatpush3.msra.mxu0 %v29863_v23 }
0x2a4e   :  { %28558 = vmatpush3.msra.mxu1 %v35066_v36  ;;  %28522 = vmatprep.subr.mxu0 %v34641_v3 }
0x2a4f   :  { %28559 = vmatprep.subr.mxu1 %v34641_v3  ;;  %28523 = vmatpush3.msra.mxu0 %v29874_v29 }
0x2a50   :  { %28560 = vmatpush3.msra.mxu1 %v35067_v2  ;;  %28524 = vmatprep.subr.mxu0 %v34641_v3 }
0x2a51   :  { %28561 = vmatprep.subr.mxu1 %v34641_v3  ;;  %28525 = vmatpush3.msra.mxu0 %v29889_v35 }
0x2a52   :  { %28562 = vmatpush3.msra.mxu1 %v35068_v11  ;;  %28526 = vmatprep.subr.mxu0 %v34641_v3 }
0x2a53   :  { %28563 = vmatprep.subr.mxu1 %v34641_v3  ;;  %28527 = vmatpush3.msra.mxu0 %v29906_v51 }
0x2a54   :  { %28564 = vmatpush3.msra.mxu1 %v35069_v21  ;;  %28528 = vmatprep.subr.mxu0 %v34641_v3 }
0x2a55   :  { %28565 = vmatprep.subr.mxu1 %v34641_v3  ;;  %28529 = vmatpush3.msra.mxu0 %v29922_v16 }
0x2a56   :  { %28566 = vmatpush3.msra.mxu1 %v35070_v24  ;;  %28530 = vmatprep.subr.mxu0 %v34641_v3 }
0x2a57   :  { %28567 = vmatprep.subr.mxu1 %v34641_v3  ;;  %28531 = vmatpush3.msra.mxu0 %v29941_v53 }
0x2a58   :  { %28568 = vmatpush3.msra.mxu1 %v35071_v1  ;;  %28532 = vmatprep.subr.mxu0 %v34641_v3 }
0x2a59   :  { %28569 = vmatprep.subr.mxu1 %v34641_v3  ;;  %28571 = vmatprep.mubr.msk.f32.mxu1 %vm29465_vm0, %v34641_v3 }
0x2a5a   :  { %28570 = vmatpush3.msra.mxu1 %v35072_v8  ;;  %28533 = vmatpush3.msra.mxu0 %v29952_v57 }
0x2a5b   :  { %28605 = vmatprep.subr.mxu1 %v34641_v3  ;;  %28534 = vmatprep.subr.mxu0 %v34641_v3 }
0x2a5c   :  { %28535 = vmatpush3.msra.mxu0 %v29968_v12  ;;  %28540 = vmatprep.mubr.msk.f32.mxu0 %vm29465_vm0, %v34641_v3 }
0x2a5d   :  { %28536 = vmatprep.subr.mxu0 %v34641_v3 }
0x2a5e   :  { %28537 = vmatpush3.msra.mxu0 %v29985_v17 }
0x2a5f   :  { %28538 = vmatprep.subr.mxu0 %v34641_v3 }
0x2a60   :  { %28539 = vmatpush3.msra.mxu0 %v30001_v62 }
0x2a61   :  { %28574 = vmatprep.subr.mxu0 %v34641_v3 }
0x2af3   :  { %v20423_v15 = vpop.f32.mrf.mxu1 }
0x2af5   :  { %v28483_v31 = vpop.f32.mrf.mxu1 }
0x2af7   :  { %v20574_v8 = vpop.f32.mrf.mxu1 }
0x2af9   :  { %v28497_v1 = vpop.f32.mrf.mxu1 }
0x2afb   :  { %v20342_v24 = vpop.f32.mrf.mxu0  ;;  %v20724_v21 = vpop.f32.mrf.mxu1 }
0x2afc   :  { %v20424_v36 = vadd.f32 %v20423_v15, %v20342_v24 }
0x2afd   :  { %v28476_v11 = vpop.f32.mrf.mxu0  ;;  %v28511_v2 = vpop.f32.mrf.mxu1 }
0x2aff   :  { %v20499_v41 = vpop.f32.mrf.mxu0 }
0x2b00   :  { %v20500_v49 = vadd.f32 %v20499_v41, %v20424_v36 }
0x2b01   :  { %v28490_v50 = vpop.f32.mrf.mxu0 }
0x2b02   :  { %v20575_v59 = vadd.f32 %v20574_v8, %v20500_v49  ;;  %v35077_v50 = vld [vmem:[#allocation54_spill] sm:$0xff] }
0x2b03   :  { %v20651_v43 = vpop.f32.mrf.mxu0 }
0x2b04   :  { %v20652_v13 = vadd.f32 %v20651_v43, %v20575_v59  ;;  %v35076_v59 = vld [vmem:[#allocation34_spill] sm:$0xff] }
0x2b05   :  { %v28504_v42 = vpop.f32.mrf.mxu0 }
0x2b06   :  { %v20725_v63 = vadd.f32 %v20724_v21, %v20652_v13  ;;  %v35074_v42 = vld [vmem:[#allocation33_spill] sm:$0xff]  ;;  %v35075_v13 = vld [vmem:[#allocation52_spill] sm:$0xff] }
0x2b08   :  { %v20728_v0 = vmul.f32 %v20725_v63, %v33517_v20  ;;  %v35073_v63 = vld [vmem:[#allocation49_spill] sm:$0xff] }
0x2b0a   :  { %v20730_v45 = vsel %vm1947_vm8, %v20728_v0, 0 }
0x2b0b   :  { %v33990_v31 = vand.u32 4294901760, %v20730_v45 }
0x2b0d   :  { %v33993_v1 = vsub.f32 %v20730_v45, %v33990_v31  ;;  %28572 = vmatmul.mubr.f32.vlgmr.msra.gmra.mxu1 %v33990_v31 }
0x2b0e   :  { %28606 = vmatpush3.msra.mxu1 %v29821_v52  ;;  %28633 = vmatprep.mubr.msk.f32.mxu1 %vm29465_vm0, %v34641_v3 }
0x2b0f   :  { %v20813_v43 = vand.u32 4294901760, %v33993_v1  ;;  %28607 = vmatprep.subr.mxu1 %v34641_v3 }
0x2b10   :  { %28608 = vmatpush3.msra.mxu1 %v29826_v55 }
0x2b11   :  { %v20814_v0 = vsub.f32 %v33993_v1, %v20813_v43  ;;  %28609 = vmatprep.subr.mxu1 %v34641_v3 }
0x2b12   :  { %28610 = vmatpush3.msra.mxu1 %v29836_v58 }
0x2b13   :  { %28611 = vmatprep.subr.mxu1 %v34641_v3  ;;  %v20815_v45 = vand.u32 4294901760, %v20814_v0 }
0x2b14   :  { %28612 = vmatpush3.msra.mxu1 %v29848_v6 }
0x2b15   :  { %28613 = vmatprep.subr.mxu1 %v34641_v3  ;;  %28541 = vmatmul.mubr.f32.vlgmr.msra.gmra.mxu0 %v20815_v45 }
0x2b16   :  { %28575 = vmatpush3.msra.mxu0 %v29824_v54  ;;  %28614 = vmatpush3.msra.mxu1 %v29863_v23 }
0x2b17   :  { %28576 = vmatprep.subr.mxu0 %v34641_v3  ;;  %28615 = vmatprep.subr.mxu1 %v34641_v3 }
0x2b18   :  { %28577 = vmatpush3.msra.mxu0 %v29834_v56  ;;  %28616 = vmatpush3.msra.mxu1 %v29874_v29 }
0x2b19   :  { %28578 = vmatprep.subr.mxu0 %v34641_v3  ;;  %28617 = vmatprep.subr.mxu1 %v34641_v3 }
0x2b1a   :  { %28579 = vmatpush3.msra.mxu0 %v29846_v5  ;;  %28618 = vmatpush3.msra.mxu1 %v29889_v35 }
0x2b1b   :  { %28580 = vmatprep.subr.mxu0 %v34641_v3  ;;  %28619 = vmatprep.subr.mxu1 %v34641_v3 }
0x2b1c   :  { %28581 = vmatpush3.msra.mxu0 %v29860_v22  ;;  %28620 = vmatpush3.msra.mxu1 %v29906_v51 }
0x2b1d   :  { %28582 = vmatprep.subr.mxu0 %v34641_v3  ;;  %28621 = vmatprep.subr.mxu1 %v34641_v3 }
0x2b1e   :  { %28583 = vmatpush3.msra.mxu0 %v29878_v10  ;;  %28622 = vmatpush3.msra.mxu1 %v29922_v16 }
0x2b1f   :  { %28584 = vmatprep.subr.mxu0 %v34641_v3  ;;  %28623 = vmatprep.subr.mxu1 %v34641_v3 }
0x2b20   :  { %28585 = vmatpush3.msra.mxu0 %v29887_v34  ;;  %28624 = vmatpush3.msra.mxu1 %v29941_v53 }
0x2b21   :  { %28586 = vmatprep.subr.mxu0 %v34641_v3  ;;  %28625 = vmatprep.subr.mxu1 %v34641_v3 }
0x2b22   :  { %28587 = vmatpush3.msra.mxu0 %v29904_v48  ;;  %28626 = vmatpush3.msra.mxu1 %v29952_v57 }
0x2b23   :  { %28588 = vmatprep.subr.mxu0 %v34641_v3  ;;  %28627 = vmatprep.subr.mxu1 %v34641_v3 }
0x2b24   :  { %28589 = vmatpush3.msra.mxu0 %v29920_v9  ;;  %28628 = vmatpush3.msra.mxu1 %v29968_v12 }
0x2b25   :  { %28590 = vmatprep.subr.mxu0 %v34641_v3  ;;  %28629 = vmatprep.subr.mxu1 %v34641_v3 }
0x2b26   :  { %28591 = vmatpush3.msra.mxu0 %v29937_v39  ;;  %28630 = vmatpush3.msra.mxu1 %v29985_v17 }
0x2b27   :  { %28592 = vmatprep.subr.mxu0 %v34641_v3  ;;  %28631 = vmatprep.subr.mxu1 %v34641_v3 }
0x2b28   :  { %28593 = vmatpush3.msra.mxu0 %v29957_v40  ;;  %28632 = vmatpush3.msra.mxu1 %v30001_v62 }
0x2b29   :  { %28594 = vmatprep.subr.mxu0 %v34641_v3  ;;  %28634 = vmatmul.mubr.f32.vlgmr.msra.gmra.mxu1 %v20813_v43 }
0x2b2a   :  { %28667 = vmatprep.subr.mxu1 %v34641_v3  ;;  %28595 = vmatpush3.msra.mxu0 %v29966_v44 }
0x2b2b   :  { %28668 = vmatpush3.msra.mxu1 %v29821_v52  ;;  %28596 = vmatprep.subr.mxu0 %v34641_v3 }
0x2b2c   :  { %28669 = vmatprep.subr.mxu1 %v34641_v3  ;;  %28597 = vmatpush3.msra.mxu0 %v29983_v26 }
0x2b2d   :  { %28670 = vmatpush3.msra.mxu1 %v29826_v55  ;;  %28598 = vmatprep.subr.mxu0 %v34641_v3 }
0x2b2e   :  { %28671 = vmatprep.subr.mxu1 %v34641_v3  ;;  %28599 = vmatpush3.msra.mxu0 %v29999_v61 }
0x2b2f   :  { %28672 = vmatpush3.msra.mxu1 %v29836_v58  ;;  %28600 = vmatprep.subr.mxu0 %v34641_v3 }
0x2b30   :  { %28673 = vmatprep.subr.mxu1 %v34641_v3  ;;  %28601 = vmatpush3.msra.mxu0 %v30017_v33 }
0x2b31   :  { %28602 = vmatprep.mubr.msk.f32.mxu0 %vm29465_vm0, %v34641_v3  ;;  %28674 = vmatpush3.msra.mxu1 %v29848_v6 }
0x2b32   :  { %28603 = vmatmul.mubr.f32.vlgmr.msra.gmra.mxu0 %v33993_v1  ;;  %28636 = vmatprep.subr.mxu0 %v34641_v3 }
0x2b33   :  { %28675 = vmatprep.subr.mxu1 %v34641_v3  ;;  %28637 = vmatpush3.msra.mxu0 %v29831_v60 }
0x2b34   :  { %28676 = vmatpush3.msra.mxu1 %v29863_v23  ;;  %28638 = vmatprep.subr.mxu0 %v34641_v3 }
0x2b35   :  { %28677 = vmatprep.subr.mxu1 %v34641_v3  ;;  %28639 = vmatpush3.msra.mxu0 %v29843_v4 }
0x2b36   :  { %28678 = vmatpush3.msra.mxu1 %v29874_v29  ;;  %28640 = vmatprep.subr.mxu0 %v34641_v3 }
0x2b37   :  { %28679 = vmatprep.subr.mxu1 %v34641_v3  ;;  %28641 = vmatpush3.msra.mxu0 %v29857_v19 }
0x2b38   :  { %28680 = vmatpush3.msra.mxu1 %v29889_v35  ;;  %28642 = vmatprep.subr.mxu0 %v34641_v3 }
0x2b39   :  { %28681 = vmatprep.subr.mxu1 %v34641_v3  ;;  %28643 = vmatpush3.msra.mxu0 %v29872_v28 }
0x2b3a   :  { %28682 = vmatpush3.msra.mxu1 %v29906_v51  ;;  %28644 = vmatprep.subr.mxu0 %v34641_v3 }
0x2b3b   :  { %28683 = vmatprep.subr.mxu1 %v34641_v3  ;;  %28645 = vmatpush3.msra.mxu0 %v29894_v37 }
0x2b3c   :  { %28684 = vmatpush3.msra.mxu1 %v29922_v16  ;;  %28646 = vmatprep.subr.mxu0 %v34641_v3 }
0x2b3d   :  { %28685 = vmatprep.subr.mxu1 %v34641_v3  ;;  %28647 = vmatpush3.msra.mxu0 %v29901_v47 }
0x2b3e   :  { %28686 = vmatpush3.msra.mxu1 %v29941_v53  ;;  %28648 = vmatprep.subr.mxu0 %v34641_v3 }
0x2b3f   :  { %28687 = vmatprep.subr.mxu1 %v34641_v3  ;;  %28649 = vmatpush3.msra.mxu0 %v35021_v25 }
0x2b40   :  { %28688 = vmatpush3.msra.mxu1 %v29952_v57  ;;  %28650 = vmatprep.subr.mxu0 %v34641_v3 }
0x2b41   :  { %28689 = vmatprep.subr.mxu1 %v34641_v3  ;;  %28651 = vmatpush3.msra.mxu0 %v35022_v38 }
0x2b42   :  { %28690 = vmatpush3.msra.mxu1 %v29968_v12  ;;  %28652 = vmatprep.subr.mxu0 %v34641_v3 }
0x2b43   :  { %28691 = vmatprep.subr.mxu1 %v34641_v3  ;;  %28653 = vmatpush3.msra.mxu0 %v35023_v7 }
0x2b44   :  { %28692 = vmatpush3.msra.mxu1 %v29985_v17  ;;  %28654 = vmatprep.subr.mxu0 %v34641_v3 }
0x2b45   :  { %28693 = vmatprep.subr.mxu1 %v34641_v3  ;;  %28655 = vmatpush3.msra.mxu0 %v35024_v46 }
0x2b46   :  { %28694 = vmatpush3.msra.mxu1 %v30001_v62  ;;  %28695 = vmatprep.mubr.msk.f32.mxu1 %vm29465_vm0, %v34641_v3 }
0x2b47   :  { %28656 = vmatprep.subr.mxu0 %v34641_v3  ;;  %28696 = vmatmul.mubr.f32.vlgmr.msra.gmra.mxu1 %v33990_v31 }
0x2b48   :  { %28657 = vmatpush3.msra.mxu0 %v35025_v18  ;;  %28664 = vmatprep.mubr.msk.f32.mxu0 %vm29465_vm0, %v34641_v3 }
0x2b49   :  { %28658 = vmatprep.subr.mxu0 %v34641_v3  ;;  %28705 = vmatprep.subr.mxu1 %v34641_v3 }
0x2b4a   :  { %28659 = vmatpush3.msra.mxu0 %v35073_v63  ;;  %28706 = vmatpush3.msra.mxu1 %v35074_v42 }
0x2b4b   :  { %28660 = vmatprep.subr.mxu0 %v34641_v3  ;;  %28707 = vmatprep.subr.mxu1 %v34641_v3 }
0x2b4c   :  { %28661 = vmatpush3.msra.mxu0 %v35075_v13  ;;  %28708 = vmatpush3.msra.mxu1 %v35076_v59 }
0x2b4d   :  { %28662 = vmatprep.subr.mxu0 %v34641_v3  ;;  %28709 = vmatprep.mubr.msk.f32.mxu1 %vm29465_vm0, %v34641_v3 }
0x2b4e   :  { %28663 = vmatpush3.msra.mxu0 %v35077_v50  ;;  %28719 = vmatprep.subr.mxu1 %v34641_v3 }
0x2b4f   :  { %28665 = vmatmul.mubr.f32.vlgmr.msra.gmra.mxu0 %v33990_v31  ;;  %28698 = vmatprep.subr.mxu0 %v34641_v3 }
0x2b50   :  { %28699 = vmatpush3.msra.mxu0 %v35029_v27  ;;  %28702 = vmatprep.mubr.msk.f32.mxu0 %vm29465_vm0, %v34641_v3 }
0x2b51   :  { %28700 = vmatprep.subr.mxu0 %v34641_v3 }
0x2b52   :  { %28701 = vmatpush3.msra.mxu0 %v35030_v32 }
0x2b53   :  { %28712 = vmatprep.subr.mxu0 %v34641_v3 }
0x2bcd   :  { %v20958_v49 = vpop.f32.mrf.mxu1 }
0x2bcf   :  { %v28573_v41 = vpop.f32.mrf.mxu1 }
0x2bd5   :  { %v20817_v36 = vpop.f32.mrf.mxu0 }
0x2bd6   :  { %v20959_v31 = vadd.f32 %v20958_v49, %v20817_v36 }
0x2bd7   :  { %v28542_v2 = vpop.f32.mrf.mxu0 }
0x2be9   :  { %v21145_v11 = vpop.f32.mrf.mxu1 }
0x2beb   :  { %v28635_v21 = vpop.f32.mrf.mxu1 }
0x2bec   :  { %v35080_v21 = vld [vmem:[#allocation31_spill] sm:$0xff] }
0x2bf2   :  { %v21058_v24 = vpop.f32.mrf.mxu0 }
0x2bf3   :  { %v21059_v43 = vadd.f32 %v21058_v24, %v20959_v31  ;;  %v35083_v24 = vld [vmem:[#allocation37_spill] sm:$0xff]  ;;  %v35087_v31 = vld [vmem:[#allocation43_spill] sm:$0xff] }
0x2bf4   :  { %v28604_v8 = vpop.f32.mrf.mxu0 }
0x2bf5   :  { %v21146_v0 = vadd.f32 %v21145_v11, %v21059_v43  ;;  %v35079_v11 = vld [vmem:[#allocation35_spill] sm:$0xff]  ;;  %v35085_v8 = vld [vmem:[#allocation40_spill] sm:$0xff] }
0x2bf6   :  { %v35089_v43 = vld [vmem:[#allocation47_spill] sm:$0xff] }
0x2c07   :  { %v21343_v15 = vpop.f32.mrf.mxu1 }
0x2c09   :  { %v28697_v1 = vpop.f32.mrf.mxu1 }
0x2c0a   :  { %v35088_v1 = vld [vmem:[#allocation45_spill] sm:$0xff] }
0x2c0f   :  { %v21258_v45 = vpop.f32.mrf.mxu0 }
0x2c10   :  { %v21259_v42 = vadd.f32 %v21258_v45, %v21146_v0  ;;  %v35090_v0 = vld [vmem:[#allocation50_spill] sm:$0xff]  ;;  %v35091_v45 = vld [vmem:[#allocation51_spill] sm:$0xff] }
0x2c11   :  { %v28666_v59 = vpop.f32.mrf.mxu0 }
0x2c12   :  { %v34133_v50 = vadd.f32 %v21343_v15, %v21259_v42  ;;  %v35086_v15 = vld [vmem:[#allocation41_spill] sm:$0xff]  ;;  %v35093_v59 = vld [vmem:[#allocation55_spill] sm:$0xff] }
0x2c13   :  { %v35092_v42 = vld [vmem:[#allocation53_spill] sm:$0xff] }
0x2c14   :  { %v21347_v13 = vadd.f32 %v34133_v50, %v33900_v14 }
0x2c16   :  { %v21349_v41 = vsel %vm72_vm2, %v21347_v13, 0 }
0x2c17   :  { %v21418_v2 = vand.u32 4294901760, %v21349_v41 }
0x2c19   :  { %v21419_v63 = vsub.f32 %v21349_v41, %v21418_v2  ;;  %28710 = vmatmul.mubr.f32.vlgmr.msra.gmra.mxu1 %v21418_v2  ;;  %v35094_v41 = vld [vmem:[#allocation56_spill] sm:$0xff] }
0x2c1a   :  { %28720 = vmatpush3.msra.mxu1 %v35029_v27  ;;  %28723 = vmatprep.mubr.msk.f32.mxu1 %vm29465_vm0, %v34641_v3 }
0x2c1b   :  { %v21420_v49 = vand.u32 4294901760, %v21419_v63  ;;  %28721 = vmatprep.subr.mxu1 %v34641_v3 }
0x2c1c   :  { %28722 = vmatpush3.msra.mxu1 %v35030_v32 }
0x2c1d   :  { %v21421_v36 = vsub.f32 %v21419_v63, %v21420_v49  ;;  %28724 = vmatmul.mubr.f32.vlgmr.msra.gmra.mxu1 %v21420_v49  ;;  %28733 = vmatprep.subr.mxu1 %v34641_v3 }
0x2c1e   :  { %28734 = vmatpush3.msra.mxu1 %v35029_v27  ;;  %28737 = vmatprep.mubr.msk.f32.mxu1 %vm29465_vm0, %v34641_v3  ;;  %v35078_v27 = vld [vmem:[#allocation30_spill] sm:$0xff] }
0x2c1f   :  { %28735 = vmatprep.subr.mxu1 %v34641_v3  ;;  %v21422_v13 = vand.u32 4294901760, %v21421_v36 }
0x2c20   :  { %28736 = vmatpush3.msra.mxu1 %v35030_v32  ;;  %v35081_v32 = vld [vmem:[#allocation32_spill] sm:$0xff] }
0x2c21   :  { %28703 = vmatmul.mubr.f32.vlgmr.msra.gmra.mxu0 %v21422_v13  ;;  %28738 = vmatmul.mubr.f32.vlgmr.msra.gmra.mxu1 %v21418_v2 }
0x2c22   :  { %28713 = vmatpush3.msra.mxu0 %v35055_v30  ;;  %28716 = vmatprep.mubr.msk.f32.mxu0 %vm29465_vm0, %v34641_v3  ;;  %v35082_v30 = vld [vmem:[#allocation36_spill] sm:$0xff] }
0x2c23   :  { %28714 = vmatprep.subr.mxu0 %v34641_v3  ;;  %28771 = vmatprep.subr.mxu1 %v34641_v3 }
0x2c24   :  { %28715 = vmatpush3.msra.mxu0 %v35078_v27  ;;  %28772 = vmatpush3.msra.mxu1 %v35079_v11 }
0x2c25   :  { %28726 = vmatprep.subr.mxu0 %v34641_v3  ;;  %28717 = vmatmul.mubr.f32.vlgmr.msra.gmra.mxu0 %v21419_v63  ;;  %v35084_v63 = vld [vmem:[#allocation38_spill] sm:$0xff] }
0x2c26   :  { %28727 = vmatpush3.msra.mxu0 %v35080_v21  ;;  %28730 = vmatprep.mubr.msk.f32.mxu0 %vm29465_vm0, %v34641_v3 }
0x2c27   :  { %28728 = vmatprep.subr.mxu0 %v34641_v3  ;;  %28773 = vmatprep.subr.mxu1 %v34641_v3 }
0x2c28   :  { %28729 = vmatpush3.msra.mxu0 %v35081_v32  ;;  %28774 = vmatpush3.msra.mxu1 %v35082_v30 }
0x2c29   :  { %28731 = vmatmul.mubr.f32.vlgmr.msra.gmra.mxu0 %v21418_v2  ;;  %28775 = vmatprep.subr.mxu1 %v34641_v3 }
0x2c2a   :  { %28776 = vmatpush3.msra.mxu1 %v35083_v24  ;;  %28740 = vmatprep.subr.mxu0 %v34641_v3 }
0x2c2b   :  { %28777 = vmatprep.subr.mxu1 %v34641_v3  ;;  %28741 = vmatpush3.msra.mxu0 %v29821_v52 }
0x2c2c   :  { %28778 = vmatpush3.msra.mxu1 %v35084_v63  ;;  %28742 = vmatprep.subr.mxu0 %v34641_v3 }
0x2c2d   :  { %28779 = vmatprep.subr.mxu1 %v34641_v3  ;;  %28743 = vmatpush3.msra.mxu0 %v29826_v55 }
0x2c2e   :  { %28780 = vmatpush3.msra.mxu1 %v35085_v8  ;;  %28744 = vmatprep.subr.mxu0 %v34641_v3 }
0x2c2f   :  { %28781 = vmatprep.subr.mxu1 %v34641_v3  ;;  %28745 = vmatpush3.msra.mxu0 %v29836_v58 }
0x2c30   :  { %28782 = vmatpush3.msra.mxu1 %v35086_v15  ;;  %28746 = vmatprep.subr.mxu0 %v34641_v3 }
0x2c31   :  { %28783 = vmatprep.subr.mxu1 %v34641_v3  ;;  %28747 = vmatpush3.msra.mxu0 %v29848_v6 }
0x2c32   :  { %28784 = vmatpush3.msra.mxu1 %v35087_v31  ;;  %28748 = vmatprep.subr.mxu0 %v34641_v3 }
0x2c33   :  { %28785 = vmatprep.subr.mxu1 %v34641_v3  ;;  %28749 = vmatpush3.msra.mxu0 %v29863_v23 }
0x2c34   :  { %28786 = vmatpush3.msra.mxu1 %v35088_v1  ;;  %28750 = vmatprep.subr.mxu0 %v34641_v3 }
0x2c35   :  { %28787 = vmatprep.subr.mxu1 %v34641_v3  ;;  %28751 = vmatpush3.msra.mxu0 %v29874_v29 }
0x2c36   :  { %28788 = vmatpush3.msra.mxu1 %v35089_v43  ;;  %28752 = vmatprep.subr.mxu0 %v34641_v3 }
0x2c37   :  { %28789 = vmatprep.subr.mxu1 %v34641_v3  ;;  %28753 = vmatpush3.msra.mxu0 %v29889_v35 }
0x2c38   :  { %28790 = vmatpush3.msra.mxu1 %v35090_v0  ;;  %28754 = vmatprep.subr.mxu0 %v34641_v3 }
0x2c39   :  { %28791 = vmatprep.subr.mxu1 %v34641_v3  ;;  %28755 = vmatpush3.msra.mxu0 %v29906_v51 }
0x2c3a   :  { %28792 = vmatpush3.msra.mxu1 %v35091_v45  ;;  %28756 = vmatprep.subr.mxu0 %v34641_v3 }
0x2c3b   :  { %28793 = vmatprep.subr.mxu1 %v34641_v3  ;;  %28757 = vmatpush3.msra.mxu0 %v29922_v16 }
0x2c3c   :  { %28794 = vmatpush3.msra.mxu1 %v35092_v42  ;;  %28758 = vmatprep.subr.mxu0 %v34641_v3 }
0x2c3d   :  { %28795 = vmatprep.subr.mxu1 %v34641_v3  ;;  %28759 = vmatpush3.msra.mxu0 %v29941_v53 }
0x2c3e   :  { %28796 = vmatpush3.msra.mxu1 %v35093_v59  ;;  %28760 = vmatprep.subr.mxu0 %v34641_v3 }
0x2c3f   :  { %28797 = vmatprep.subr.mxu1 %v34641_v3  ;;  %28799 = vmatprep.mubr.msk.f32.mxu1 %vm29465_vm0, %v34641_v3 }
0x2c40   :  { %28798 = vmatpush3.msra.mxu1 %v35094_v41  ;;  %28761 = vmatpush3.msra.mxu0 %v29952_v57 }
0x2c41   :  { %28833 = vmatprep.subr.mxu1 %v34641_v3  ;;  %28762 = vmatprep.subr.mxu0 %v34641_v3 }
0x2c42   :  { %28763 = vmatpush3.msra.mxu0 %v29968_v12  ;;  %28768 = vmatprep.mubr.msk.f32.mxu0 %vm29465_vm0, %v34641_v3 }
0x2c43   :  { %28764 = vmatprep.subr.mxu0 %v34641_v3 }
0x2c44   :  { %28765 = vmatpush3.msra.mxu0 %v29985_v17 }
0x2c45   :  { %28766 = vmatprep.subr.mxu0 %v34641_v3 }
0x2c46   :  { %28767 = vmatpush3.msra.mxu0 %v30001_v62 }
0x2c47   :  { %28802 = vmatprep.subr.mxu0 %v34641_v3 }
0x2cd9   :  { %v21505_v2 = vpop.f32.mrf.mxu1 }
0x2cdb   :  { %v28711_v49 = vpop.f32.mrf.mxu1 }
0x2cdd   :  { %v21656_v36 = vpop.f32.mrf.mxu1 }
0x2cdf   :  { %v28725_v13 = vpop.f32.mrf.mxu1 }
0x2ce1   :  { %v21424_v27 = vpop.f32.mrf.mxu0  ;;  %v21806_v11 = vpop.f32.mrf.mxu1 }
0x2ce2   :  { %v21506_v30 = vadd.f32 %v21505_v2, %v21424_v27 }
0x2ce3   :  { %v28704_v21 = vpop.f32.mrf.mxu0  ;;  %v28739_v32 = vpop.f32.mrf.mxu1 }
0x2ce5   :  { %v21581_v24 = vpop.f32.mrf.mxu0 }
0x2ce6   :  { %v21582_v63 = vadd.f32 %v21581_v24, %v21506_v30 }
0x2ce7   :  { %v28718_v8 = vpop.f32.mrf.mxu0 }
0x2ce8   :  { %v21657_v15 = vadd.f32 %v21656_v36, %v21582_v63 }
0x2ce9   :  { %v21733_v31 = vpop.f32.mrf.mxu0 }
0x2cea   :  { %v21734_v1 = vadd.f32 %v21733_v31, %v21657_v15 }
0x2ceb   :  { %v28732_v43 = vpop.f32.mrf.mxu0 }
0x2cec   :  { %v21807_v0 = vadd.f32 %v21806_v11, %v21734_v1 }
0x2cee   :  { %v21810_v45 = vmul.f32 %v21807_v0, %v33517_v20  ;;  %v6288_v0 = vpop.xlane.xlu0 %6287 }
0x2cf0   :  { %v21812_v42 = vsel %vm1947_vm8, %v21810_v45, 0  ;;  %v6283_v45 = vpop.xlane.xlu1 %6282 }
0x2cf1   :  { %v34224_v59 = vand.u32 4294901760, %v21812_v42 }
0x2cf3   :  { %v34227_v41 = vsub.f32 %v21812_v42, %v34224_v59  ;;  %28800 = vmatmul.mubr.f32.vlgmr.msra.gmra.mxu1 %v34224_v59  ;;  %v11822_v42 = vpop.xlane.xlu0 %11821 }
0x2cf4   :  { %28834 = vmatpush3.msra.mxu1 %v29821_v52  ;;  %28861 = vmatprep.mubr.msk.f32.mxu1 %vm29465_vm0, %v34641_v3 }
0x2cf5   :  { %v21895_v2 = vand.u32 4294901760, %v34227_v41  ;;  %28835 = vmatprep.subr.mxu1 %v34641_v3 }
0x2cf6   :  { %28836 = vmatpush3.msra.mxu1 %v29826_v55 }
0x2cf7   :  { %v21896_v20 = vsub.f32 %v34227_v41, %v21895_v2  ;;  %28837 = vmatprep.subr.mxu1 %v34641_v3 }
0x2cf8   :  { %28838 = vmatpush3.msra.mxu1 %v29836_v58 }
0x2cf9   :  { %28839 = vmatprep.subr.mxu1 %v34641_v3  ;;  %v21897_v49 = vand.u32 4294901760, %v21896_v20 }
0x2cfa   :  { %28840 = vmatpush3.msra.mxu1 %v29848_v6 }
0x2cfb   :  { %28841 = vmatprep.subr.mxu1 %v34641_v3  ;;  %28769 = vmatmul.mubr.f32.vlgmr.msra.gmra.mxu0 %v21897_v49  ;;  %v11826_v49 = vpop.xlane.xlu1 %11825 }
0x2cfc   :  { %28803 = vmatpush3.msra.mxu0 %v29824_v54  ;;  %28842 = vmatpush3.msra.mxu1 %v29863_v23 }
0x2cfd   :  { %28804 = vmatprep.subr.mxu0 %v34641_v3  ;;  %28843 = vmatprep.subr.mxu1 %v34641_v3 }
0x2cfe   :  { %28805 = vmatpush3.msra.mxu0 %v29834_v56  ;;  %28844 = vmatpush3.msra.mxu1 %v29874_v29 }
0x2cff   :  { %28806 = vmatprep.subr.mxu0 %v34641_v3  ;;  %28845 = vmatprep.subr.mxu1 %v34641_v3 }
0x2d00   :  { %28807 = vmatpush3.msra.mxu0 %v29846_v5  ;;  %28846 = vmatpush3.msra.mxu1 %v29889_v35 }
0x2d01   :  { %28808 = vmatprep.subr.mxu0 %v34641_v3  ;;  %28847 = vmatprep.subr.mxu1 %v34641_v3 }
0x2d02   :  { %28809 = vmatpush3.msra.mxu0 %v29860_v22  ;;  %28848 = vmatpush3.msra.mxu1 %v29906_v51 }
0x2d03   :  { %28810 = vmatprep.subr.mxu0 %v34641_v3  ;;  %28849 = vmatprep.subr.mxu1 %v34641_v3 }
0x2d04   :  { %28811 = vmatpush3.msra.mxu0 %v29878_v10  ;;  %28850 = vmatpush3.msra.mxu1 %v29922_v16 }
0x2d05   :  { %28812 = vmatprep.subr.mxu0 %v34641_v3  ;;  %28851 = vmatprep.subr.mxu1 %v34641_v3 }
0x2d06   :  { %28813 = vmatpush3.msra.mxu0 %v29887_v34  ;;  %28852 = vmatpush3.msra.mxu1 %v29941_v53 }
0x2d07   :  { %28814 = vmatprep.subr.mxu0 %v34641_v3  ;;  %28853 = vmatprep.subr.mxu1 %v34641_v3 }
0x2d08   :  { %28815 = vmatpush3.msra.mxu0 %v29904_v48  ;;  %28854 = vmatpush3.msra.mxu1 %v29952_v57 }
0x2d09   :  { %28816 = vmatprep.subr.mxu0 %v34641_v3  ;;  %28855 = vmatprep.subr.mxu1 %v34641_v3 }
0x2d0a   :  { %28817 = vmatpush3.msra.mxu0 %v29920_v9  ;;  %28856 = vmatpush3.msra.mxu1 %v29968_v12 }
0x2d0b   :  { %28818 = vmatprep.subr.mxu0 %v34641_v3  ;;  %28857 = vmatprep.subr.mxu1 %v34641_v3 }
0x2d0c   :  { %28819 = vmatpush3.msra.mxu0 %v29937_v39  ;;  %28858 = vmatpush3.msra.mxu1 %v29985_v17 }
0x2d0d   :  { %28820 = vmatprep.subr.mxu0 %v34641_v3  ;;  %28859 = vmatprep.subr.mxu1 %v34641_v3 }
0x2d0e   :  { %28821 = vmatpush3.msra.mxu0 %v29957_v40  ;;  %28860 = vmatpush3.msra.mxu1 %v30001_v62  ;;  %v35100_v40 = vld [vmem:[#allocation57_spill] sm:$0xff] }
0x2d0f   :  { %28822 = vmatprep.subr.mxu0 %v34641_v3  ;;  %28862 = vmatmul.mubr.f32.vlgmr.msra.gmra.mxu1 %v21895_v2  ;;  %v11828_v2 = vsub.f32 1.0, %v11822_v42 }
0x2d10   :  { %28895 = vmatprep.subr.mxu1 %v34641_v3  ;;  %28823 = vmatpush3.msra.mxu0 %v29966_v44  ;;  %v35098_v44 = vld [vmem:[#allocation64_spill] sm:$0xff] }
0x2d11   :  { %28896 = vmatpush3.msra.mxu1 %v29821_v52  ;;  %28824 = vmatprep.subr.mxu0 %v34641_v3  ;;  %v35101_v52 = vld [vmem:[#allocation59_spill] sm:$0xff] }
0x2d12   :  { %28897 = vmatprep.subr.mxu1 %v34641_v3  ;;  %28825 = vmatpush3.msra.mxu0 %v29983_v26  ;;  %v35102_v26 = vld [vmem:[#allocation58_spill] sm:$0xff] }
0x2d13   :  { %28898 = vmatpush3.msra.mxu1 %v29826_v55  ;;  %28826 = vmatprep.subr.mxu0 %v34641_v3 }
0x2d14   :  { %28899 = vmatprep.subr.mxu1 %v34641_v3  ;;  %28827 = vmatpush3.msra.mxu0 %v29999_v61  ;;  %v35095_v61 = vld [vmem:[#allocation49_spill] sm:$0xff] }
0x2d15   :  { %28900 = vmatpush3.msra.mxu1 %v29836_v58  ;;  %28828 = vmatprep.subr.mxu0 %v34641_v3 }
0x2d16   :  { %28901 = vmatprep.subr.mxu1 %v34641_v3  ;;  %28829 = vmatpush3.msra.mxu0 %v30017_v33 }
0x2d17   :  { %28830 = vmatprep.mubr.msk.f32.mxu0 %vm29465_vm0, %v34641_v3  ;;  %28902 = vmatpush3.msra.mxu1 %v29848_v6 }
0x2d18   :  { %28831 = vmatmul.mubr.f32.vlgmr.msra.gmra.mxu0 %v34227_v41  ;;  %28864 = vmatprep.subr.mxu0 %v34641_v3  ;;  %v6291_v41 = vsub.f32 1.0, %v6283_v45 }
0x2d19   :  { %28903 = vmatprep.subr.mxu1 %v34641_v3  ;;  %28865 = vmatpush3.msra.mxu0 %v29831_v60 }
0x2d1a   :  { %28904 = vmatpush3.msra.mxu1 %v29863_v23  ;;  %28866 = vmatprep.subr.mxu0 %v34641_v3 }
0x2d1b   :  { %28905 = vmatprep.subr.mxu1 %v34641_v3  ;;  %28867 = vmatpush3.msra.mxu0 %v29843_v4 }
0x2d1c   :  { %28906 = vmatpush3.msra.mxu1 %v29874_v29  ;;  %28868 = vmatprep.subr.mxu0 %v34641_v3 }
0x2d1d   :  { %28907 = vmatprep.subr.mxu1 %v34641_v3  ;;  %28869 = vmatpush3.msra.mxu0 %v29857_v19 }
0x2d1e   :  { %28908 = vmatpush3.msra.mxu1 %v29889_v35  ;;  %28870 = vmatprep.subr.mxu0 %v34641_v3 }
0x2d1f   :  { %28909 = vmatprep.subr.mxu1 %v34641_v3  ;;  %28871 = vmatpush3.msra.mxu0 %v29872_v28 }
0x2d20   :  { %28910 = vmatpush3.msra.mxu1 %v29906_v51  ;;  %28872 = vmatprep.subr.mxu0 %v34641_v3 }
0x2d21   :  { %28911 = vmatprep.subr.mxu1 %v34641_v3  ;;  %28873 = vmatpush3.msra.mxu0 %v29894_v37 }
0x2d22   :  { %28912 = vmatpush3.msra.mxu1 %v29922_v16  ;;  %28874 = vmatprep.subr.mxu0 %v34641_v3 }
0x2d23   :  { %28913 = vmatprep.subr.mxu1 %v34641_v3  ;;  %28875 = vmatpush3.msra.mxu0 %v29901_v47 }
0x2d24   :  { %28914 = vmatpush3.msra.mxu1 %v29941_v53  ;;  %28876 = vmatprep.subr.mxu0 %v34641_v3 }
0x2d25   :  { %28915 = vmatprep.subr.mxu1 %v34641_v3  ;;  %28877 = vmatpush3.msra.mxu0 %v35021_v25  ;;  %v35103_v25 = vld [vmem:[#allocation61_spill] sm:$0xff] }
0x2d26   :  { %28916 = vmatpush3.msra.mxu1 %v29952_v57  ;;  %28878 = vmatprep.subr.mxu0 %v34641_v3 }
0x2d27   :  { %28917 = vmatprep.subr.mxu1 %v34641_v3  ;;  %28879 = vmatpush3.msra.mxu0 %v35022_v38  ;;  %v35104_v38 = vld [vmem:[#allocation60_spill] sm:$0xff] }
0x2d28   :  { %28918 = vmatpush3.msra.mxu1 %v29968_v12  ;;  %28880 = vmatprep.subr.mxu0 %v34641_v3  ;;  %v35099_v12 = vld [vmem:[#allocation54_spill] sm:$0xff] }
0x2d29   :  { %28919 = vmatprep.subr.mxu1 %v34641_v3  ;;  %28881 = vmatpush3.msra.mxu0 %v35023_v7  ;;  %v35105_v7 = vld [vmem:[#allocation62_spill] sm:$0xff] }
0x2d2a   :  { %28920 = vmatpush3.msra.mxu1 %v29985_v17  ;;  %28882 = vmatprep.subr.mxu0 %v34641_v3  ;;  %v35096_v17 = vld [vmem:[#allocation63_spill] sm:$0xff] }
0x2d2b   :  { %28921 = vmatprep.subr.mxu1 %v34641_v3  ;;  %28883 = vmatpush3.msra.mxu0 %v35024_v46 }
0x2d2c   :  { %28922 = vmatpush3.msra.mxu1 %v30001_v62  ;;  %28923 = vmatprep.mubr.msk.f32.mxu1 %vm29465_vm0, %v34641_v3  ;;  %v35097_v62 = vld [vmem:[#allocation52_spill] sm:$0xff] }
0x2d2d   :  { %28884 = vmatprep.subr.mxu0 %v34641_v3  ;;  %28924 = vmatmul.mubr.f32.vlgmr.msra.gmra.mxu1 %v34224_v59 }
0x2d2e   :  { %28885 = vmatpush3.msra.mxu0 %v35025_v18  ;;  %28892 = vmatprep.mubr.msk.f32.mxu0 %vm29465_vm0, %v34641_v3 }
0x2d2f   :  { %28886 = vmatprep.subr.mxu0 %v34641_v3  ;;  %28933 = vmatprep.subr.mxu1 %v34641_v3 }
0x2d30   :  { %28887 = vmatpush3.msra.mxu0 %v35095_v61  ;;  %28934 = vmatpush3.msra.mxu1 %v35096_v17  ;;  %v6292_v61 = vmul.f32 0.00011, %v6291_v41  ;;  %v11829_v17 = vmul.f32 0.0001045, %v11828_v2 }
0x2d31   :  { %28888 = vmatprep.subr.mxu0 %v34641_v3  ;;  %28935 = vmatprep.subr.mxu1 %v34641_v3 }
0x2d32   :  { %28889 = vmatpush3.msra.mxu0 %v35097_v62  ;;  %28936 = vmatpush3.msra.mxu1 %v35098_v44  ;;  %v17359_v62 = vpop.xlane.xlu0 %17358  ;;  %v11827_v44 = vmul.f32 0.16666667, %v11826_v49 }
0x2d33   :  { %28890 = vmatprep.subr.mxu0 %v34641_v3  ;;  %28937 = vmatprep.mubr.msk.f32.mxu1 %vm29465_vm0, %v34641_v3 }
0x2d34   :  { %28891 = vmatpush3.msra.mxu0 %v35099_v12  ;;  %28947 = vmatprep.subr.mxu1 %v34641_v3 }
0x2d35   :  { %28893 = vmatmul.mubr.f32.vlgmr.msra.gmra.mxu0 %v34224_v59  ;;  %28926 = vmatprep.subr.mxu0 %v34641_v3  ;;  %v6290_v59 = vmul.f32 0.16666667, %v6288_v0 }
0x2d36   :  { %28927 = vmatpush3.msra.mxu0 %v35100_v40  ;;  %28930 = vmatprep.mubr.msk.f32.mxu0 %vm29465_vm0, %v34641_v3 }
0x2d37   :  { %28928 = vmatprep.subr.mxu0 %v34641_v3  ;;  %v6294_v20 = vmul.f32 4.1e-06, %v6290_v59 }
0x2d38   :  { %28929 = vmatpush3.msra.mxu0 %v35101_v52 }
0x2d39   :  { %28940 = vmatprep.subr.mxu0 %v34641_v3  ;;  %v6295_v12 = vadd.f32 %v6294_v20, %v6292_v61 }
0x2db3   :  { %v22040_v54 = vpop.f32.mrf.mxu1 }
0x2db5   :  { %v28801_v55 = vpop.f32.mrf.mxu1 }
0x2dbb   :  { %v21899_v60 = vpop.f32.mrf.mxu0 }
0x2dbc   :  { %v21900_v19 = vadd.f32 %v21899_v60, %v34133_v50  ;;  %v11831_v60 = vmul.f32 4.1e-06, %v11827_v44 }
0x2dbd   :  { %v28770_v56 = vpop.f32.mrf.mxu0 }
0x2dbe   :  { %v22041_v23 = vadd.f32 %v22040_v54, %v21900_v19  ;;  %v35106_v54 = vld [vmem:[#allocation68_spill] sm:$0xff]  ;;  %v17363_v56 = vpop.xlane.xlu1 %17362 }
0x2dbf   :  { %v11833_v55 = vsel %vm1011_vm6, %v11822_v42, %v35106_v54 }
0x2dcf   :  { %v22227_v58 = vpop.f32.mrf.mxu1 }
0x2dd1   :  { %v28863_v4 = vpop.f32.mrf.mxu1 }
0x2dd8   :  { %v22140_v5 = vpop.f32.mrf.mxu0 }
0x2dd9   :  { %v22141_v29 = vadd.f32 %v22140_v5, %v22041_v23  ;;  %v11834_v5 = vsel %vm1014_vm7, %v11833_v55, 0.0  ;;  %v35108_v23 = vld [vmem:[#allocation25_spill] sm:$0xff] }
0x2dda   :  { %v28832_v6 = vpop.f32.mrf.mxu0 }
0x2ddb   :  { %v22228_v10 = vadd.f32 %v22227_v58, %v22141_v29  ;;  %v35107_v58 = vld [vmem:[#allocation66_spill] sm:$0xff] }
0x2ddc   :  { %v17370_v4 = vsel %vm1011_vm6, %v17359_v62, %v35107_v58 }
0x2ddd   :  { %v17371_v29 = vsel %vm1014_vm7, %v17370_v4, 0.0 }
0x2ded   :  { %v22425_v22 = vpop.f32.mrf.mxu1 }
0x2def   :  { %v28925_v28 = vpop.f32.mrf.mxu1 }
0x2df0   :  { %v6296_v28 = vsel %vm1011_vm6, %v6283_v45, %v35108_v23 }
0x2df5   :  { %v22340_v34 = vpop.f32.mrf.mxu0 }
0x2df6   :  { %v22341_v35 = vadd.f32 %v22340_v34, %v22228_v10  ;;  %v22900_v10 = vpop.xlane.xlu1 %22899  ;;  %v22915_v34 = vrot.slane %v11834_v5, 6 }
0x2df7   :  { %v28894_v37 = vpop.f32.mrf.mxu0 }
0x2df8   :  { %v22426_v47 = vadd.f32 %v22425_v22, %v22341_v35  ;;  %v17364_v22 = vmul.f32 0.16666667, %v17363_v56  ;;  %v6297_v37 = vsel %vm1014_vm7, %v6296_v28, 0.0 }
0x2dfa   :  { %v22429_v48 = vmul.f32 0.5, %v22426_v47  ;;  %v17368_v47 = vmul.f32 4.1e-06, %v17364_v22 }
0x2dfc   :  { %v34369_v51 = vadd.f32 %v22429_v48, %v33900_v14  ;;  %v22918_v48 = vrot.slane %v17371_v29, 4 }
0x2dfe   :  { %v22432_v9 = vsel %vm72_vm2, %v34369_v51, 0 }
0x2dff   :  { %v22501_v16 = vand.u32 4294901760, %v22432_v9 }
0x2e01   :  { %v22502_v39 = vsub.f32 %v22432_v9, %v22501_v16  ;;  %28938 = vmatmul.mubr.f32.vlgmr.msra.gmra.mxu1 %v22501_v16 }
0x2e02   :  { %28948 = vmatpush3.msra.mxu1 %v35100_v40  ;;  %28951 = vmatprep.mubr.msk.f32.mxu1 %vm29465_vm0, %v34641_v3 }
0x2e03   :  { %28949 = vmatprep.subr.mxu1 %v34641_v3  ;;  %v22503_v53 = vand.u32 4294901760, %v22502_v39 }
0x2e04   :  { %28950 = vmatpush3.msra.mxu1 %v35101_v52 }
0x2e05   :  { %28952 = vmatmul.mubr.f32.vlgmr.msra.gmra.mxu1 %v22503_v53  ;;  %28961 = vmatprep.subr.mxu1 %v34641_v3  ;;  %v22504_v57 = vsub.f32 %v22502_v39, %v22503_v53  ;;  %v35109_v53 = vld [vmem:[#allocation65_spill] sm:$0xff] }
0x2e06   :  { %28962 = vmatpush3.msra.mxu1 %v35100_v40  ;;  %28965 = vmatprep.mubr.msk.f32.mxu1 %vm29465_vm0, %v34641_v3  ;;  %v11830_v40 = vadd.f32 %v11829_v17, %v6295_v12 }
0x2e07   :  { %28963 = vmatprep.subr.mxu1 %v34641_v3  ;;  %v22505_v33 = vand.u32 4294901760, %v22504_v57 }
0x2e08   :  { %28964 = vmatpush3.msra.mxu1 %v35101_v52  ;;  %v17365_v52 = vsub.f32 1.0, %v17359_v62  ;;  %v11832_v6 = vadd.f32 %v11831_v60, %v11830_v40 }
0x2e09   :  { %28931 = vmatmul.mubr.f32.vlgmr.msra.gmra.mxu0 %v22505_v33  ;;  %28966 = vmatmul.mubr.f32.vlgmr.msra.gmra.mxu1 %v22501_v16  ;;  %v22924_v33 = vsel %vm22923_vm11, %v6297_v37, %v22915_v34 }
0x2e0a   :  { %28941 = vmatpush3.msra.mxu0 %v35102_v26  ;;  %28944 = vmatprep.mubr.msk.f32.mxu0 %vm29465_vm0, %v34641_v3  ;;  %v17366_v19 = vmul.f32 9.9275e-05, %v17365_v52 }
0x2e0b   :  { %28942 = vmatprep.subr.mxu0 %v34641_v3 }
0x2e0c   :  { %28943 = vmatpush3.msra.mxu0 %v35103_v25  ;;  %v17367_v35 = vadd.f32 %v17366_v19, %v11832_v6 }
0x2e0d   :  { %28954 = vmatprep.subr.mxu0 %v34641_v3  ;;  %28945 = vmatmul.mubr.f32.vlgmr.msra.gmra.mxu0 %v22502_v39 }
0x2e0e   :  { %28955 = vmatpush3.msra.mxu0 %v35104_v38  ;;  %28958 = vmatprep.mubr.msk.f32.mxu0 %vm29465_vm0, %v34641_v3  ;;  %v17369_v25 = vadd.f32 %v17368_v47, %v17367_v35  ;;  %vm22931_vm0 = vcmask 189440  }
0x2e0f   :  { %28956 = vmatprep.subr.mxu0 %v34641_v3 }
0x2e10   :  { %28957 = vmatpush3.msra.mxu0 %v35105_v7 }
0x2e11   :  { %28959 = vmatmul.mubr.f32.vlgmr.msra.gmra.mxu0 %v22501_v16  ;;  %v22901_v16 = vmul.f32 0.16666667, %v22900_v10 }
0x2ec1   :  { %v22588_v46 = vpop.f32.mrf.mxu1 }
0x2ec3   :  { %v28939_v18 = vpop.f32.mrf.mxu1 }
0x2ec4   :  { %v22905_v18 = vmul.f32 4.1e-06, %v22901_v16 }
0x2ec5   :  { %v22739_v14 = vpop.f32.mrf.mxu1 }
0x2ec7   :  { %v28953_v50 = vpop.f32.mrf.mxu1 }
0x2ec9   :  { %v22507_v36 = vpop.f32.mrf.mxu0  ;;  %v22889_v13 = vpop.f32.mrf.mxu1 }
0x2eca   :  { %v22589_v21 = vadd.f32 %v22588_v46, %v22507_v36  ;;  %v22926_v46 = vsel %vm22925_vm12, %v22924_v33, %v22918_v48 }
0x2ecb   :  { %v28932_v27 = vpop.f32.mrf.mxu0  ;;  %v28967_v11 = vpop.f32.mrf.mxu1 }
0x2ecd   :  { %v22664_v32 = vpop.f32.mrf.mxu0 }
0x2ece   :  { %v22665_v30 = vadd.f32 %v22664_v32, %v22589_v21 }
0x2ecf   :  { %v28946_v24 = vpop.f32.mrf.mxu0 }
0x2ed0   :  { %v22740_v63 = vadd.f32 %v22739_v14, %v22665_v30 }
0x2ed1   :  { %v22816_v8 = vpop.f32.mrf.mxu0 }
0x2ed2   :  { %v22817_v15 = vadd.f32 %v22816_v8, %v22740_v63 }
0x2ed3   :  { %v28960_v31 = vpop.f32.mrf.mxu0 }
0x2ed4   :  { %v22890_v3 = vadd.f32 %v22889_v13, %v22817_v15 }
0x2ed6   :  { %v22893_v1 = vmul.f32 %v22890_v3, %v22890_v3 }
0x2ed8   :  { %v22894_v43 = vsel %vm6280_vm9, %v22893_v1, 0.0 }
0x2ed9   :  { %22895 = vadd.xlane.f32.xlu0 %v22894_v43 }
0x2f62   :  { %v22896_v9 = vpop.xlane.xlu0 %22895 }
0x2f63   :  { %v22902_v39 = vsub.f32 1.0, %v22896_v9  ;;  %v22907_v57 = vsel %vm1011_vm6, %v22896_v9, %v35109_v53 }
0x2f64   :  { %v22908_v26 = vsel %vm1014_vm7, %v22907_v57, 0.0 }
0x2f65   :  { %v22903_v38 = vmul.f32 9.431125e-05, %v22902_v39  ;;  %v22921_v7 = vrot.slane %v22908_v26, 2  ;;  %v22909_v13 = vmul.f32 3.6e-07, %v22902_v39 }
0x2f67   :  { %v22904_v14 = vadd.f32 %v22903_v38, %v17369_v25  ;;  %v22928_v50 = vsel %vm22927_vm13, %v22926_v46, %v22921_v7 }
0x2f68   :  { %22930 = vst.msk [vmem:[%s34424_s8] sm:$0xff] %vm22929_vm14, %v22928_v50 }
0x2f69   :  { %v22906_v36 = vadd.f32 %v22905_v18, %v22904_v14 }
0x2f6b   :  { %v22910_v27 = vadd.f32 %v22909_v13, %v22906_v36 }
0x2f6d   :  { %v22911_v11 = vsel %vm72_vm2, %v34369_v51, %v22910_v27 }
0x2f6e   :  { %v22913_v21 = vsel %vm22912_vm15, %v22911_v11, 0.0 }
0x2f6f   :  { %22932 = vst.msk [vmem:[%s34424_s8 + $0x8] sm:$0x3] %vm22931_vm0, %v22913_v21 }
0x2f70   :  { %22937 = vsyncpa [#allocation3], 1 }
0x2f71   :  { %22938 = vsyncpa [#allocation5], 1 }

</bundles_post_ra>
